<compile_context>
chip_gen: v7x
topology: tpu7x:2x2x1
jax: 0.10.0
libtpu: 0.0.40
codegen_flags: <defaults>
</compile_context>

<pallas_src>
import functools
import math

import jax
import jax.numpy as jnp
import numpy as np
from jax import lax
from jax.experimental import pallas as pl
from jax.experimental.pallas import tpu as pltpu


def _round_up(x, m):
    return ((x + m - 1) // m) * m


def _pick_row_block(OH, OW, max_rows):
    """Largest ROWB dividing OH with ROWB*OW <= max_rows and ROWB*OW % 8 == 0."""
    best = None
    for r in range(1, OH + 1):
        if OH % r:
            continue
        tm = r * OW
        if tm > max_rows:
            break
        if tm % 8 == 0 or r == OH:
            best = r
    if best is None:
        # Whole image in H: output block then equals the full (OH*OW) dim and is exempt
        # from the (8,128) divisibility rule.
        best = OH
    return best


def _superconv_im2col_kernel(x_ref, w_ref, b_ref, o_ref, *,
                             K, stride, dilation, ROWB, OW, Cin):
    # x_ref: (1, Hp, Wp, Cin)      bf16 padded input image (resident across row tiles)
    # w_ref: (K*K*Cin, Cout_p)     bf16 pre-masked weight, im2col order (kh, kw, cin)
    # b_ref: (1, Cout_p)           f32 bias (zero-padded channels)
    # o_ref: (1, ROWB*OW, Cout_p)  output tile (flattened spatial rows, lane-dense channels)
    t = pl.program_id(1)
    row0 = t * (ROWB * stride)                    # first padded-input row of this tile
    span_h = (ROWB - 1) * stride + 1
    span_w = (OW - 1) * stride + 1

    taps = []
    for kh in range(K):
        # Contiguous row band for tap-row kh (dynamic start, static extent).
        band = x_ref[0, pl.ds(row0 + kh * dilation, span_h), :, :]   # (span_h, Wp, Cin)
        if stride > 1:
            # TODO(synk): for stride>1 a wrapper-side stride-phase decomposition would keep
            # all in-kernel slices contiguous; strided value slices are correct but XLU-heavy.
            band = band[::stride]                                    # (ROWB, Wp, Cin)
        for kw in range(K):
            c0 = kw * dilation
            tap = band[:, c0:c0 + span_w, :]
            if stride > 1:
                tap = tap[:, ::stride, :]
            taps.append(tap.reshape(ROWB * OW, Cin))                 # (TM, Cin)

    patch = jnp.concatenate(taps, axis=-1)                           # (TM, K*K*Cin) bf16
    acc = jnp.dot(patch, w_ref[...], preferred_element_type=jnp.float32)  # (TM, Cout_p) f32
    acc = acc + b_ref[...]                                           # bias broadcast
    o_ref[0] = acc.astype(o_ref.dtype)


def superconv2d_pallas(x_nchw, w_oihw, mask_hw_c, bias, *,
                       padding, stride, dilation, max_tile_rows=512):
    """x_nchw: (N,Cin,H,W); w_oihw: (Cout,Cin,K,K); mask_hw_c: (K,K,Cout); bias: (Cout,)."""
    N, Cin, H, W = x_nchw.shape
    Cout, _, K, _ = w_oihw.shape

    # ---- hoisted supernet masking + im2col weight layout (plain JAX, runs once) ----
    w_masked = w_oihw * jnp.transpose(mask_hw_c, (2, 0, 1))[:, None, :, :]   # (Cout,Cin,K,K)
    w_hwio = jnp.transpose(w_masked, (2, 3, 1, 0))                           # (K,K,Cin,Cout)
    Kc = K * K * Cin
    Cout_p = _round_up(Cout, 128)                                            # lane-dense out
    w_mat = jnp.pad(w_hwio.reshape(Kc, Cout), ((0, 0), (0, Cout_p - Cout)))
    w_mat = w_mat.astype(jnp.bfloat16)
    b_pad = jnp.pad(bias.astype(jnp.float32), (0, Cout_p - Cout)).reshape(1, Cout_p)

    # ---- activation layout: NCHW -> NHWC, zero pad, cast to bf16 ----
    x = jnp.transpose(x_nchw, (0, 2, 3, 1))
    x = jnp.pad(x, ((0, 0), (padding, padding), (padding, padding), (0, 0)))
    x = x.astype(jnp.bfloat16)
    Hp, Wp = H + 2 * padding, W + 2 * padding
    OH = (Hp - dilation * (K - 1) - 1) // stride + 1
    OW = (Wp - dilation * (K - 1) - 1) // stride + 1

    ROWB = _pick_row_block(OH, OW, max_tile_rows)
    TM = ROWB * OW
    T = OH // ROWB

    kernel = functools.partial(_superconv_im2col_kernel, K=K, stride=stride,
                               dilation=dilation, ROWB=ROWB, OW=OW, Cin=Cin)

    out_flat = pl.pallas_call(
        kernel,
        out_shape=jax.ShapeDtypeStruct((N, OH * OW, Cout_p), x_nchw.dtype),
        grid_spec=pltpu.PrefetchScalarGridSpec(
            num_scalar_prefetch=0,
            grid=(N, T),
            in_specs=[
                # Whole padded image per batch element; block index is constant across the
                # row-tile axis so it is not re-fetched between consecutive row tiles.
                pl.BlockSpec((1, Hp, Wp, Cin), lambda n, t: (n, 0, 0, 0)),
                # Grid-invariant (pre-masked) weight and bias.
                pl.BlockSpec((Kc, Cout_p), lambda n, t: (0, 0)),
                pl.BlockSpec((1, Cout_p), lambda n, t: (0, 0)),
            ],
            out_specs=pl.BlockSpec((1, TM, Cout_p), lambda n, t: (n, t, 0)),
        ),
        compiler_params=pltpu.CompilerParams(
            dimension_semantics=("parallel", "parallel"),   # batch + row tiles (v7x 2-TC)
            vmem_limit_bytes=48 * 1024 * 1024,              # explicit, fits v7x's 64 MiB
        ),
    )(x, w_mat, b_pad)

    out = out_flat.reshape(N, OH, OW, Cout_p)[..., :Cout]
    return jnp.transpose(out, (0, 3, 1, 2))                 # back to NCHW


class SuperConv2d:
    """JAX/Pallas port of the PyTorch SuperConv2d supernet conv."""

    def __init__(self, in_channels, out_channels=None, kernel_size=None, stride=1,
                 padding=None, out_channels_list=(), kernel_size_list=(),
                 dilation=1, groups=1, bias=True, key=None):
        assert groups == 1, "groups > 1 not implemented"  # TODO(synk): grouped conv path
        self.in_channels = in_channels
        self.stride = stride
        self.dilation = dilation
        self.groups = groups

        max_out_channels = max(out_channels_list) if out_channels_list else out_channels
        max_kernel_size = (max(k for k in kernel_size_list[:-1])
                           if kernel_size_list else kernel_size)
        self.max_out_channels = max_out_channels
        self.max_kernel_size = max_kernel_size
        self.padding = padding if padding is not None else max_kernel_size // 2

        # channel masks: (n_choices, max_out)
        if out_channels_list:
            cm = []
            for oc in out_channels_list:
                cm.append(np.concatenate([np.ones(oc, np.float32),
                                          np.zeros(max_out_channels - oc, np.float32)]))
            self.channel_masks = jnp.asarray(np.stack(cm, 0))
            self.channel_scores = jnp.zeros((len(out_channels_list),), jnp.float32)
        else:
            self.channel_masks = None
            self.channel_scores = None

        # kernel masks: (n_choices, K, K)
        if kernel_size_list:
            km = []
            for ks in kernel_size_list:
                if ks == 'dilated':
                    m = np.zeros((max_kernel_size, max_kernel_size), np.float32)
                    m[0::2, 0::2] = 1.0
                else:
                    m = np.ones((max_kernel_size, max_kernel_size), np.float32)
                    p = (max_kernel_size - ks) // 2
                    inner = np.pad(np.ones((ks, ks), np.float32), ((p, p), (p, p)))
                    m = m * inner
                km.append(m)
            self.kernel_masks = jnp.asarray(np.stack(km, 0))
            self.kernel_scores = jnp.zeros((len(kernel_size_list),), jnp.float32)
        else:
            self.kernel_masks = None
            self.kernel_scores = None

        # weight: (max_out, Cin // groups, K, K), kaiming_normal(mode='fan_out')
        fan_out = max_out_channels * max_kernel_size * max_kernel_size
        std = math.sqrt(2.0) / math.sqrt(fan_out)
        wkey = key if key is not None else jax.random.PRNGKey(0)
        self.weight = std * jax.random.normal(
            wkey, (max_out_channels, in_channels // groups,
                   max_kernel_size, max_kernel_size), jnp.float32)
        self.bias = jnp.zeros((max_out_channels,), jnp.float32) if bias else None

    def _build_mask(self, gumbel_key):
        K = self.max_kernel_size
        Cout = self.max_out_channels
        # channel mask via hard gumbel-softmax (straight-through; forward value is one-hot)
        if self.channel_masks is not None:
            u = jax.random.uniform(gumbel_key, self.channel_scores.shape,
                                   minval=1e-20, maxval=1.0)
            g = -jnp.log(-jnp.log(u))
            y = jax.nn.softmax((self.channel_scores + g) / 0.1)
            hard = jax.nn.one_hot(jnp.argmax(y), y.shape[0], dtype=y.dtype)
            scores = hard - lax.stop_gradient(y) + y
            ch_mask = jnp.sum(self.channel_masks * scores[:, None], axis=0)   # (Cout,)
        else:
            ch_mask = jnp.ones((Cout,), jnp.float32)
        # kernel-shape mask via sigmoid-weighted sum
        if self.kernel_masks is not None:
            ks = jax.nn.sigmoid(self.kernel_scores)
            k_mask = jnp.sum(self.kernel_masks * ks[:, None, None], axis=0)   # (K, K)
        else:
            k_mask = jnp.ones((K, K), jnp.float32)
        return k_mask[:, :, None] * ch_mask[None, None, :]                    # (K, K, Cout)

    def forward(self, x_nchw, gumbel_key):
        mask = self._build_mask(gumbel_key)
        bias = self.bias if self.bias is not None else jnp.zeros(
            (self.max_out_channels,), jnp.float32)
        return superconv2d_pallas(x_nchw, self.weight, mask, bias,
                                  padding=self.padding, stride=self.stride,
                                  dilation=self.dilation)

    # pure-JAX reference (for correctness checking only)
    def forward_ref(self, x_nchw, gumbel_key):
        mask = self._build_mask(gumbel_key)                                   # (K, K, Cout)
        w = self.weight * jnp.transpose(mask, (2, 0, 1))[:, None, :, :]       # (Cout,Cin,K,K)
        out = lax.conv_general_dilated(
            x_nchw, w, window_strides=(self.stride, self.stride),
            padding=[(self.padding, self.padding)] * 2,
            rhs_dilation=(self.dilation, self.dilation),
            dimension_numbers=('NCHW', 'OIHW', 'NCHW'))
        if self.bias is not None:
            out = out + self.bias[None, :, None, None]
        return out


if __name__ == "__main__":
    key = jax.random.PRNGKey(0)
    k_w, k_x, k_g = jax.random.split(key, 3)

    # small shapes consistent with the module
    N, Cin, H, W = 2, 4, 16, 16
    mod = SuperConv2d(
        in_channels=Cin,
        out_channels_list=[8, 16],
        kernel_size_list=[3, 5, 'dilated'],
        stride=1, dilation=1, groups=1, bias=True,
        key=k_w,
    )

    x = jax.random.normal(k_x, (N, Cin, H, W), jnp.float32)

    out = jax.block_until_ready(mod.forward(x, k_g))
    ref = jax.block_until_ready(mod.forward_ref(x, k_g))
    assert out.shape == ref.shape == (N, mod.max_out_channels, H, W)
    # bf16 inputs / f32 accumulation in the Pallas path -> loosened tolerance vs f32 ref.
    np.testing.assert_allclose(np.asarray(out), np.asarray(ref), atol=3e-2, rtol=3e-2)

    # Also exercise the multi-row-tile path (grid T > 1) with smaller spatial tiles.
    mask = mod._build_mask(k_g)
    out2 = jax.block_until_ready(superconv2d_pallas(
        x, mod.weight, mask, mod.bias, padding=mod.padding,
        stride=mod.stride, dilation=mod.dilation, max_tile_rows=128))
    np.testing.assert_allclose(np.asarray(out2), np.asarray(ref), atol=3e-2, rtol=3e-2)

    print("KERNEL_OK")
</pallas_src>

<mosaic_0001>
module attributes {stable_mosaic.version = 11 : i64} {
  func.func @_superconv_im2col_kernel(%arg0: i32, %arg1: i32, %arg2: memref<1x20x20x4xbf16, #tpu.memory_space<vmem>>, %arg3: memref<100x128xbf16, #tpu.memory_space<vmem>>, %arg4: memref<1x128xf32, #tpu.memory_space<vmem>>, %arg5: memref<1x256x128xf32, #tpu.memory_space<vmem>>) attributes {dimension_semantics = [#tpu.dimension_semantics<parallel>, #tpu.dimension_semantics<parallel>], iteration_bounds = array<i64: 2, 1>, scalar_prefetch = 0 : i64, scratch_operands = 0 : i64, tpu.core_type = #tpu.core_type<tc>, window_params = [{transform_indices = @transform_0, window_bounds = array<i64: 1, 20, 20, 4>}, {pipeline_mode = #tpu.pipeline_mode<synchronous>, transform_indices = @transform_1, window_bounds = array<i64: 100, 128>}, {pipeline_mode = #tpu.pipeline_mode<synchronous>, transform_indices = @transform_2, window_bounds = array<i64: 1, 128>}, {transform_indices = @transform_3, window_bounds = array<i64: 1, 256, 128>}]} {
    %c16_i32 = arith.constant 16 : i32
    %0 = arith.muli %arg1, %c16_i32 : i32
    %c0_i32 = arith.constant 0 : i32
    %1 = arith.addi %0, %c0_i32 : i32
    %c0 = arith.constant 0 : index
    %2 = arith.index_cast %1 : i32 to index
    %c0_0 = arith.constant 0 : index
    %c0_1 = arith.constant 0 : index
    %3 = vector.load %arg2[%c0, %2, %c0_0, %c0_1] : memref<1x20x20x4xbf16, #tpu.memory_space<vmem>>, vector<1x16x20x4xbf16>
    %4 = vector.shape_cast %3 : vector<1x16x20x4xbf16> to vector<16x20x4xbf16>
    %5 = vector.extract_strided_slice %4 {offsets = [0, 0, 0], sizes = [16, 16, 4], strides = [1, 1, 1]} : vector<16x20x4xbf16> to vector<16x16x4xbf16>
    %6 = vector.shape_cast %5 : vector<16x16x4xbf16> to vector<256x4xbf16>
    %7 = vector.extract_strided_slice %4 {offsets = [0, 1, 0], sizes = [16, 16, 4], strides = [1, 1, 1]} : vector<16x20x4xbf16> to vector<16x16x4xbf16>
    %8 = vector.shape_cast %7 : vector<16x16x4xbf16> to vector<256x4xbf16>
    %9 = vector.extract_strided_slice %4 {offsets = [0, 2, 0], sizes = [16, 16, 4], strides = [1, 1, 1]} : vector<16x20x4xbf16> to vector<16x16x4xbf16>
    %10 = vector.shape_cast %9 : vector<16x16x4xbf16> to vector<256x4xbf16>
    %11 = vector.extract_strided_slice %4 {offsets = [0, 3, 0], sizes = [16, 16, 4], strides = [1, 1, 1]} : vector<16x20x4xbf16> to vector<16x16x4xbf16>
    %12 = vector.shape_cast %11 : vector<16x16x4xbf16> to vector<256x4xbf16>
    %13 = vector.extract_strided_slice %4 {offsets = [0, 4, 0], sizes = [16, 16, 4], strides = [1, 1, 1]} : vector<16x20x4xbf16> to vector<16x16x4xbf16>
    %14 = vector.shape_cast %13 : vector<16x16x4xbf16> to vector<256x4xbf16>
    %c1_i32 = arith.constant 1 : i32
    %15 = arith.addi %0, %c1_i32 : i32
    %c0_2 = arith.constant 0 : index
    %16 = arith.index_cast %15 : i32 to index
    %c0_3 = arith.constant 0 : index
    %c0_4 = arith.constant 0 : index
    %17 = vector.load %arg2[%c0_2, %16, %c0_3, %c0_4] : memref<1x20x20x4xbf16, #tpu.memory_space<vmem>>, vector<1x16x20x4xbf16>
    %18 = vector.shape_cast %17 : vector<1x16x20x4xbf16> to vector<16x20x4xbf16>
    %19 = vector.extract_strided_slice %18 {offsets = [0, 0, 0], sizes = [16, 16, 4], strides = [1, 1, 1]} : vector<16x20x4xbf16> to vector<16x16x4xbf16>
    %20 = vector.shape_cast %19 : vector<16x16x4xbf16> to vector<256x4xbf16>
    %21 = vector.extract_strided_slice %18 {offsets = [0, 1, 0], sizes = [16, 16, 4], strides = [1, 1, 1]} : vector<16x20x4xbf16> to vector<16x16x4xbf16>
    %22 = vector.shape_cast %21 : vector<16x16x4xbf16> to vector<256x4xbf16>
    %23 = vector.extract_strided_slice %18 {offsets = [0, 2, 0], sizes = [16, 16, 4], strides = [1, 1, 1]} : vector<16x20x4xbf16> to vector<16x16x4xbf16>
    %24 = vector.shape_cast %23 : vector<16x16x4xbf16> to vector<256x4xbf16>
    %25 = vector.extract_strided_slice %18 {offsets = [0, 3, 0], sizes = [16, 16, 4], strides = [1, 1, 1]} : vector<16x20x4xbf16> to vector<16x16x4xbf16>
    %26 = vector.shape_cast %25 : vector<16x16x4xbf16> to vector<256x4xbf16>
    %27 = vector.extract_strided_slice %18 {offsets = [0, 4, 0], sizes = [16, 16, 4], strides = [1, 1, 1]} : vector<16x20x4xbf16> to vector<16x16x4xbf16>
    %28 = vector.shape_cast %27 : vector<16x16x4xbf16> to vector<256x4xbf16>
    %c2_i32 = arith.constant 2 : i32
    %29 = arith.addi %0, %c2_i32 : i32
    %c0_5 = arith.constant 0 : index
    %30 = arith.index_cast %29 : i32 to index
    %c0_6 = arith.constant 0 : index
    %c0_7 = arith.constant 0 : index
    %31 = vector.load %arg2[%c0_5, %30, %c0_6, %c0_7] : memref<1x20x20x4xbf16, #tpu.memory_space<vmem>>, vector<1x16x20x4xbf16>
    %32 = vector.shape_cast %31 : vector<1x16x20x4xbf16> to vector<16x20x4xbf16>
    %33 = vector.extract_strided_slice %32 {offsets = [0, 0, 0], sizes = [16, 16, 4], strides = [1, 1, 1]} : vector<16x20x4xbf16> to vector<16x16x4xbf16>
    %34 = vector.shape_cast %33 : vector<16x16x4xbf16> to vector<256x4xbf16>
    %35 = vector.extract_strided_slice %32 {offsets = [0, 1, 0], sizes = [16, 16, 4], strides = [1, 1, 1]} : vector<16x20x4xbf16> to vector<16x16x4xbf16>
    %36 = vector.shape_cast %35 : vector<16x16x4xbf16> to vector<256x4xbf16>
    %37 = vector.extract_strided_slice %32 {offsets = [0, 2, 0], sizes = [16, 16, 4], strides = [1, 1, 1]} : vector<16x20x4xbf16> to vector<16x16x4xbf16>
    %38 = vector.shape_cast %37 : vector<16x16x4xbf16> to vector<256x4xbf16>
    %39 = vector.extract_strided_slice %32 {offsets = [0, 3, 0], sizes = [16, 16, 4], strides = [1, 1, 1]} : vector<16x20x4xbf16> to vector<16x16x4xbf16>
    %40 = vector.shape_cast %39 : vector<16x16x4xbf16> to vector<256x4xbf16>
    %41 = vector.extract_strided_slice %32 {offsets = [0, 4, 0], sizes = [16, 16, 4], strides = [1, 1, 1]} : vector<16x20x4xbf16> to vector<16x16x4xbf16>
    %42 = vector.shape_cast %41 : vector<16x16x4xbf16> to vector<256x4xbf16>
    %c3_i32 = arith.constant 3 : i32
    %43 = arith.addi %0, %c3_i32 : i32
    %c0_8 = arith.constant 0 : index
    %44 = arith.index_cast %43 : i32 to index
    %c0_9 = arith.constant 0 : index
    %c0_10 = arith.constant 0 : index
    %45 = vector.load %arg2[%c0_8, %44, %c0_9, %c0_10] : memref<1x20x20x4xbf16, #tpu.memory_space<vmem>>, vector<1x16x20x4xbf16>
    %46 = vector.shape_cast %45 : vector<1x16x20x4xbf16> to vector<16x20x4xbf16>
    %47 = vector.extract_strided_slice %46 {offsets = [0, 0, 0], sizes = [16, 16, 4], strides = [1, 1, 1]} : vector<16x20x4xbf16> to vector<16x16x4xbf16>
    %48 = vector.shape_cast %47 : vector<16x16x4xbf16> to vector<256x4xbf16>
    %49 = vector.extract_strided_slice %46 {offsets = [0, 1, 0], sizes = [16, 16, 4], strides = [1, 1, 1]} : vector<16x20x4xbf16> to vector<16x16x4xbf16>
    %50 = vector.shape_cast %49 : vector<16x16x4xbf16> to vector<256x4xbf16>
    %51 = vector.extract_strided_slice %46 {offsets = [0, 2, 0], sizes = [16, 16, 4], strides = [1, 1, 1]} : vector<16x20x4xbf16> to vector<16x16x4xbf16>
    %52 = vector.shape_cast %51 : vector<16x16x4xbf16> to vector<256x4xbf16>
    %53 = vector.extract_strided_slice %46 {offsets = [0, 3, 0], sizes = [16, 16, 4], strides = [1, 1, 1]} : vector<16x20x4xbf16> to vector<16x16x4xbf16>
    %54 = vector.shape_cast %53 : vector<16x16x4xbf16> to vector<256x4xbf16>
    %55 = vector.extract_strided_slice %46 {offsets = [0, 4, 0], sizes = [16, 16, 4], strides = [1, 1, 1]} : vector<16x20x4xbf16> to vector<16x16x4xbf16>
    %56 = vector.shape_cast %55 : vector<16x16x4xbf16> to vector<256x4xbf16>
    %c4_i32 = arith.constant 4 : i32
    %57 = arith.addi %0, %c4_i32 : i32
    %c0_11 = arith.constant 0 : index
    %58 = arith.index_cast %57 : i32 to index
    %c0_12 = arith.constant 0 : index
    %c0_13 = arith.constant 0 : index
    %59 = vector.load %arg2[%c0_11, %58, %c0_12, %c0_13] : memref<1x20x20x4xbf16, #tpu.memory_space<vmem>>, vector<1x16x20x4xbf16>
    %60 = vector.shape_cast %59 : vector<1x16x20x4xbf16> to vector<16x20x4xbf16>
    %61 = vector.extract_strided_slice %60 {offsets = [0, 0, 0], sizes = [16, 16, 4], strides = [1, 1, 1]} : vector<16x20x4xbf16> to vector<16x16x4xbf16>
    %62 = vector.shape_cast %61 : vector<16x16x4xbf16> to vector<256x4xbf16>
    %63 = vector.extract_strided_slice %60 {offsets = [0, 1, 0], sizes = [16, 16, 4], strides = [1, 1, 1]} : vector<16x20x4xbf16> to vector<16x16x4xbf16>
    %64 = vector.shape_cast %63 : vector<16x16x4xbf16> to vector<256x4xbf16>
    %65 = vector.extract_strided_slice %60 {offsets = [0, 2, 0], sizes = [16, 16, 4], strides = [1, 1, 1]} : vector<16x20x4xbf16> to vector<16x16x4xbf16>
    %66 = vector.shape_cast %65 : vector<16x16x4xbf16> to vector<256x4xbf16>
    %67 = vector.extract_strided_slice %60 {offsets = [0, 3, 0], sizes = [16, 16, 4], strides = [1, 1, 1]} : vector<16x20x4xbf16> to vector<16x16x4xbf16>
    %68 = vector.shape_cast %67 : vector<16x16x4xbf16> to vector<256x4xbf16>
    %69 = vector.extract_strided_slice %60 {offsets = [0, 4, 0], sizes = [16, 16, 4], strides = [1, 1, 1]} : vector<16x20x4xbf16> to vector<16x16x4xbf16>
    %70 = vector.shape_cast %69 : vector<16x16x4xbf16> to vector<256x4xbf16>
    %71 = tpu.concatenate %6, %8, %10, %12, %14, %20, %22, %24, %26, %28, %34, %36, %38, %40, %42, %48 in 1 : vector<256x4xbf16>, vector<256x4xbf16>, vector<256x4xbf16>, vector<256x4xbf16>, vector<256x4xbf16>, vector<256x4xbf16>, vector<256x4xbf16>, vector<256x4xbf16>, vector<256x4xbf16>, vector<256x4xbf16>, vector<256x4xbf16>, vector<256x4xbf16>, vector<256x4xbf16>, vector<256x4xbf16>, vector<256x4xbf16>, vector<256x4xbf16> -> vector<256x64xbf16>
    %72 = tpu.concatenate %50, %52, %54, %56, %62, %64, %66, %68, %70 in 1 : vector<256x4xbf16>, vector<256x4xbf16>, vector<256x4xbf16>, vector<256x4xbf16>, vector<256x4xbf16>, vector<256x4xbf16>, vector<256x4xbf16>, vector<256x4xbf16>, vector<256x4xbf16> -> vector<256x36xbf16>
    %73 = tpu.concatenate %71, %72 in 1 : vector<256x64xbf16>, vector<256x36xbf16> -> vector<256x100xbf16>
    %c0_14 = arith.constant 0 : index
    %c0_15 = arith.constant 0 : index
    %74 = vector.load %arg3[%c0_14, %c0_15] : memref<100x128xbf16, #tpu.memory_space<vmem>>, vector<100x128xbf16>
    %cst = arith.constant dense<0.000000e+00> : vector<256x128xf32>
    %75 = tpu.matmul %73, %74, %cst {dimension_numbers = #tpu.dot_dimension_numbers<[1], [0], [0], [1], [0, 0, 1, 1], [], []>} : vector<256x100xbf16>, vector<100x128xbf16>, vector<256x128xf32> -> vector<256x128xf32>
    %c0_16 = arith.constant 0 : index
    %c0_17 = arith.constant 0 : index
    %76 = vector.load %arg4[%c0_16, %c0_17] : memref<1x128xf32, #tpu.memory_space<vmem>>, vector<1x128xf32>
    %77 = vector.broadcast %76 : vector<1x128xf32> to vector<256x128xf32>
    %78 = arith.addf %75, %77 : vector<256x128xf32>
    %c0_18 = arith.constant 0 : index
    %c0_19 = arith.constant 0 : index
    %c0_20 = arith.constant 0 : index
    %79 = vector.load %arg5[%c0_18, %c0_19, %c0_20] : memref<1x256x128xf32, #tpu.memory_space<vmem>>, vector<1x256x128xf32>
    %80 = vector.shape_cast %79 : vector<1x256x128xf32> to vector<256x128xf32>
    %81 = vector.shape_cast %78 : vector<256x128xf32> to vector<1x256x128xf32>
    tpu.vector_store %arg5[%c0_18, %c0_19, %c0_20], %81 {strides = array<i32>} : memref<1x256x128xf32, #tpu.memory_space<vmem>>, vector<1x256x128xf32>,
    return
  }
  func.func @transform_0(%arg0: i32, %arg1: i32) -> (i32, i32, i32, i32) {
    %c0_i32 = arith.constant 0 : i32
    %c0_i32_0 = arith.constant 0 : i32
    %c0_i32_1 = arith.constant 0 : i32
    %c0_i32_2 = arith.constant 0 : i32
    return %arg0, %c0_i32, %c0_i32_0, %c0_i32_1 : i32, i32, i32, i32
  }
  func.func @transform_1(%arg0: i32, %arg1: i32) -> (i32, i32) {
    %c0_i32 = arith.constant 0 : i32
    %c0_i32_0 = arith.constant 0 : i32
    %c0_i32_1 = arith.constant 0 : i32
    return %c0_i32, %c0_i32_0 : i32, i32
  }
  func.func @transform_2(%arg0: i32, %arg1: i32) -> (i32, i32) {
    %c0_i32 = arith.constant 0 : i32
    %c0_i32_0 = arith.constant 0 : i32
    %c0_i32_1 = arith.constant 0 : i32
    return %c0_i32, %c0_i32_0 : i32, i32
  }
  func.func @transform_3(%arg0: i32, %arg1: i32) -> (i32, i32, i32) {
    %c0_i32 = arith.constant 0 : i32
    %c0_i32_0 = arith.constant 0 : i32
    return %arg0, %arg1, %c0_i32 : i32, i32, i32
  }
}

</mosaic_0001>

<bundles_post_ra>
// kernel: tpu_custom_call.1
= control target key start
LH: loop header
LB: loop body
LE: loop exit
PB: predicated region body
PF: predicated region fallthrough
CT: control target
= control target key end

     0   :  { %8 = vsyncpa [#allocation3], 0  ;;  %s16751_s0 = inlined_call_operand.vmem [shape: bf16[2,20,20,4], index: 0, kind: input, shape index: {}]   ;;  %s16752_s1 = inlined_call_operand.vmem [shape: bf16[100,128], index: 1, kind: input, shape index: {}]   ;;  %s16753_s2 = inlined_call_operand.vmem [shape: f32[1,128], index: 2, kind: input, shape index: {}]   ;;  %s16754_s3 = inlined_call_operand.hbm [shape: f32[2,256,128], index: 3, kind: output, shape index: {}]  }
   0x1   :  { %10 = vsyncpa [#allocation3 + $0x1], 0  ;;  %s9499_s12 = smov 0   ;;  %s9501_s13 = smov 0  }
   0x2   :  { %s9503_s14 = smov 0   ;;  %s9505_s15 = smov 0  }
   0x3   :  { %s9507_s16 = smov 0   ;;  %s9509_s17 = smov 0  }
   0x4 LB: > { %s8133_s18 = sadd.s32 4294967295, %s9459_s17   ;;  %s8134_s19 = sadd.s32 4294967294, %s9459_s17   ;;  %s9459_s17 = sphi %s9509_s17, %s16_s17   ;;  %s9455_s16 = sphi %s9507_s16, %s18529_s16   ;;  %s9451_s15 = sphi %s9505_s15, %s18528_s15   ;;  %s9447_s14 = sphi %s9503_s14, %s18527_s14   ;;  %s9443_s13 = sphi %s9501_s13, %s18526_s13   ;;  %s9439_s12 = sphi %s9499_s12, %s18525_s12  }
   0x5   : > { %s28_s20 = sadd.s32 1, %s9455_s16  ;;  %s105_s21 = sadd.s32 1, %s9447_s14 }
   0x6   : > { %p30_p0 = scmp.ge.s32.totalorder %s28_s20, 2  ;;  %p115_p1 = scmp.ne.s32.totalorder %s9447_s14, %s9443_s13 }
   0x7   : > { %p116_p2 = scmp.eq.s32.totalorder %s8133_s18, 1  ;;  %p121_p3 = scmp.ne.s32.totalorder %s9443_s13, %s9439_s12 }
   0x8   : > { %s18531_s20 = smov (%p30_p0, %s28_s20), 0  ;;  %p122_p5 = scmp.eq.s32.totalorder %s8134_s19, 1 }
   0x9   : > { %p9539_p4 = por %p116_p2, %p115_p1  ;;  %s100_s23 = ssub.s32 %s9455_s16, %s18531_s20 }
   0xa   : > { %p8137_p6 = scmp.ge.s32.totalorder %s9459_s17, 1  ;;  %p103_p7 = scmp.eq.s32.totalorder %s100_s23, 0 }
   0xb   : > { %p9546_p8 = por %p122_p5, %p121_p3  ;;  %p154_p9 = scmp.lt.s32.totalorder %s9459_s17, 3 }
   0xc   : > { %s9552_s25 = scalar_select %p103_p7, %s9447_s14, %s105_s21  }
   0xd   : > { %p155_p10 = pnand %p8137_p6, %p154_p9 }
   0xf   : > { %158 = sbr.rel (%p155_p10) target bundleno = 1499 (0x5db), region = 32 }
  0x16   : > { %p178_p11 = scmp.lt.s32.totalorder %s9451_s15, 1  ;;  %vm237_vm0 = vsmask.f32 3328  ;;  %vm238_vm1 = vsmask.f32 7440  ;;  %v17299_v25 = vmov 0 }
  0x17   : > { %vm9604_vm2 = vmor %vm237_vm0, %vm238_vm1  ;;  %s9461_s4 = smov 4   ;;  %vm672_vm3 = vcmask 1042432   ;;  %vm673_vm4 = vcmask 1046532   ;;  %s9462_s5 = smov 8   ;;  %vm787_vm6 = vsmask.f32 2304 }
  0x18   : > { %s179_s26 = scalar_select %p178_p11, %s9451_s15, 1  ;;  %v17300_v25 = vsel %vm9604_vm2, 4294967295, %v17299_v25  ;;  %vm10020_vm5 = vmor %vm672_vm3, %vm673_vm4  ;;  %vm788_vm7 = vsmask.f32 6416  ;;  %vm1030_vm9 = vcmask 1041408   ;;  %vm1031_vm10 = vcmask 1045508  }
  0x19   : > { %17301 = vst [vmem:[#allocation8_spill] sm:$0xff] %v17300_v25  ;;  %vm10174_vm8 = vmor %vm787_vm6, %vm788_vm7  ;;  %s9463_s6 = smov 12   ;;  %s9464_s7 = smov 16   ;;  %vm6185_vm12 = vcmask 31744   ;;  %vm6234_vm13 = vcmask 64512   ;;  %vm6267_vm14 = vcmask 97280  }
  0x1a   : > { %s9007_s27 = smul.u32 240, %s179_s26  ;;  %vm10433_vm11 = vmor %vm1030_vm9, %vm1031_vm10  ;;  %s9465_s8 = smov 20   ;;  %vm17293_vm15 = vcmask 130048   ;;  %vm6333_vm0 = vcmask 162816   ;;  %vm6366_vm1 = vcmask 195584   ;;  %vm17292_vm3 = vcmask 228352  }
  0x1b   : > { %s9466_s9 = smov 24   ;;  %s9467_s10 = smov 28   ;;  %vm17291_vm4 = vcmask 261120   ;;  %vm6465_vm6 = vcmask 293888   ;;  %vm6498_vm7 = vcmask 326656   ;;  %vm17121_vm10 = vcmask 359424  }
  0x1c   : > { %s9559_s30 = scalar_lea.vmem %s16751_s0, %s9007_s27  ;;  %s9468_s11 = smov 32  }
  0x1d   : > { %v9562_v0 = vld [vmem:[%s9559_s30 + $0x18] sm:$0xf]  ;;  %v9565_v1 = vld [vmem:[%s9559_s30 + $0x1c] sm:$0xf]  ;;  %v9568_v2 = vld [vmem:[%s9559_s30 + $0x20] sm:$0x3] }
  0x1e   : > { %v16772_v3 = vshrl.u32 %v9562_v0, 16  ;;  %v16771_v4 = vshll.u32 %v9562_v0, 16  ;;  %v298_v5 = vshll.u32 %v9565_v1, 16  ;;  %v16770_v6 = vshrl.u32 %v9565_v1, 16  ;;  %v9575_v7 = vld [vmem:[%s9559_s30] sm:$0xf] }
  0x1f   : > { %17296 = vst [vmem:[#allocation5_spill] sm:$0xff] %v9575_v7  ;;  %v308_v8 = vshll.u32 %v9568_v2, 16  ;;  %v9579_v9 = vld [vmem:[%s9559_s30 + $0x4] sm:$0xf]  ;;  %v9582_v10 = vld [vmem:[%s9559_s30 + $0x8] sm:$0x3] }
  0x20   : > { %v16797_v11 = vshrl.u32 %v9575_v7, 16  ;;  %v291_v12 = vrot.slane %v16772_v3, 4  ;;  %v294_v13 = vrot.slane %v16771_v4, 5  ;;  %v300_v14 = vrot.slane %v298_v5, 5  ;;  %v9592_v16 = vld [vmem:[%s9559_s30 + $0x24] sm:$0xf] }
  0x21   : > { %v304_v15 = vrot.slane %v16770_v6, 4  ;;  %v310_v17 = vrot.slane %v308_v8, 5  ;;  %v9594_v18 = vrot.slane %v298_v5, 6  ;;  %v9596_v19 = vrot.slane %v308_v8, 6  ;;  %v9611_v28 = vld [vmem:[%s9559_s30 + $0x28] sm:$0xf] }
  0x22   : > { %v243_v20 = vrot.slane %v16797_v11, 4  ;;  %v295_v21 = vor.u32 %v294_v13, %v291_v12  ;;  %v16796_v23 = vshll.u32 %v9575_v7, 16  ;;  %v250_v24 = vshll.u32 %v9579_v9, 16  ;;  %v9618_v35 = vld [vmem:[%s9559_s30 + $0x2c] sm:$0x3]  ;;  %s9469_s18 = smov 36  }
  0x23   : > { %17297 = vst [vmem:[#allocation6_spill] sm:$0xff] %v9594_v18  ;;  %17298 = vst [vmem:[#allocation7_spill] sm:$0xff] %v9596_v19  ;;  %v305_v22 = vor.u32 %v304_v15, %v300_v14  ;;  %v16792_v26 = vshrl.u32 %v9579_v9, 16  ;;  %v260_v27 = vshll.u32 %v9582_v10, 16  ;;  %v16788_v29 = vshrl.u32 %v9592_v16, 16  ;;  %s9470_s19 = smov 40  }
  0x24   : > { %v16786_v30 = vshll.u32 %v9592_v16, 16  ;;  %v296_v31 = vrot.slane %v295_v21, 4  ;;  %v246_v33 = vrot.slane %v16796_v23, 5  ;;  %v252_v34 = vrot.slane %v250_v24, 5  ;;  %v9627_v40 = vld [vmem:[%s9559_s30 + $0xc] sm:$0xf] }
  0x25   : > { %v306_v32 = vrot.slane %v305_v22, 4  ;;  %v256_v36 = vrot.slane %v16792_v26, 4  ;;  %v262_v37 = vrot.slane %v260_v27, 5  ;;  %v9622_v38 = vrot.slane %v250_v24, 6  ;;  %17304 = vst [vmem:[#allocation11_spill] sm:$0xff] %v9627_v40  ;;  %s9471_s21 = smov 44  }
  0x26   : > { %v9624_v39 = vrot.slane %v260_v27, 6  ;;  %v301_v41 = vsel %vm9604_vm2, %v296_v31, %v300_v14  ;;  %v247_v43 = vor.u32 %v246_v33, %v243_v20  ;;  %v315_v44 = vrot.slane %v16788_v29, 4  ;;  %v9641_v52 = vld [vmem:[%s9559_s30 + $0x10] sm:$0xf]  ;;  %v9648_v57 = vld [vmem:[%s9559_s30 + $0x14] sm:$0x3] }
  0x27   : > { %17302 = vst [vmem:[#allocation9_spill] sm:$0xff] %v9622_v38  ;;  %v311_v42 = vsel %vm9604_vm2, %v306_v32, %v310_v17  ;;  %v257_v46 = vor.u32 %v256_v36, %v252_v34  ;;  %v318_v47 = vrot.slane %v16786_v30, 5  ;;  %v16778_v48 = vshll.u32 %v9611_v28, 16  ;;  %v9660_v63 = vld [vmem:[%s9559_s30 + $0x3c] sm:$0xf]  ;;  %s9472_s23 = smov 48  }
  0x28   : > { %17303 = vst [vmem:[#allocation10_spill] sm:$0xff] %v9624_v39  ;;  %v8510_v45 = vcombine.low %v301_v41, %v311_v42  ;;  %v248_v49 = vrot.slane %v247_v43, 4  ;;  %v16784_v50 = vshrl.u32 %v9611_v28, 16  ;;  %v16776_v51 = vshll.u32 %v9618_v35, 16  ;;  %v9670_v21 = vld [vmem:[%s9559_s30 + $0x40] sm:$0xf] }
  0x29   : > { %v16811_v53 = vshrl.u32 %v9627_v40, 16  ;;  %v258_v54 = vrot.slane %v257_v46, 4  ;;  %v319_v55 = vor.u32 %v318_v47, %v315_v44  ;;  %v324_v56 = vrot.slane %v16778_v48, 5  ;;  %v9677_v31 = vld [vmem:[%s9559_s30 + $0x44] sm:$0x3]  ;;  %s9473_s26 = smov 52  }
  0x2a   : > { %5037 = vrot.lane.b32.xlu1 %v8510_v45, %s9461_s4  ;;  %v16809_v58 = vshll.u32 %v9627_v40, 16  ;;  %v253_v59 = vsel %vm9604_vm2, %v248_v49, %v252_v34  ;;  %v328_v60 = vrot.slane %v16784_v50, 4  ;;  %v334_v61 = vrot.slane %v16776_v51, 5  ;;  %v9691_v45 = vld [vmem:[%s9559_s30 + $0x30] sm:$0xf]  ;;  %s9475_s28 = smov 60  }
  0x2b   : > { %v267_v62 = vrot.slane %v16811_v53, 4  ;;  %v263_v5 = vsel %vm9604_vm2, %v258_v54, %v262_v37  ;;  %v320_v8 = vrot.slane %v319_v55, 4  ;;  %v16804_v13 = vshll.u32 %v9641_v52, 16  ;;  %v9699_v55 = vld [vmem:[%s9559_s30 + $0x34] sm:$0xf]  ;;  %s9476_s29 = smov 64  }
  0x2c   : > { %v270_v12 = vrot.slane %v16809_v58, 5  ;;  %v8508_v14 = vcombine.low %v253_v59, %v263_v5  ;;  %v329_v15 = vor.u32 %v328_v60, %v324_v56  ;;  %v16805_v17 = vshrl.u32 %v9641_v52, 16  ;;  %v9790_v4 = vld [vmem:[%s9559_s30 + $0x74] sm:$0x3]  ;;  %v9793_v3 = vld [vmem:[%s9559_s30 + $0x60] sm:$0xf] }
  0x2d   : > { %v16798_v20 = vshll.u32 %v9648_v57, 16  ;;  %v325_v22 = vsel %vm9604_vm2, %v320_v8, %v324_v56  ;;  %v276_v27 = vrot.slane %v16804_v13, 5  ;;  %v16768_v32 = vshrl.u32 %v9660_v63, 16  ;;  %v9845_v50 = vld [vmem:[%s9559_s30 + $0x88] sm:$0xf] }
  0x2e   : > { %v271_v24 = vor.u32 %v270_v12, %v267_v62  ;;  %5033 = vrot.lane.b32.xlu0 %v8508_v14, %s9461_s4  ;;  %v330_v33 = vrot.slane %v329_v15, 4  ;;  %v280_v34 = vrot.slane %v16805_v17, 4  ;;  %v16767_v37 = vshll.u32 %v9660_v63, 16  ;;  %v9919_v17 = vld [vmem:[%s9559_s30 + $0x90] sm:$0xf] }
  0x2f   : > { %v286_v36 = vrot.slane %v16798_v20, 5  ;;  %v363_v42 = vrot.slane %v16768_v32, 4  ;;  %v16761_v43 = vshll.u32 %v9670_v21, 16  ;;  %v16762_v44 = vshrl.u32 %v9670_v21, 16  ;;  %v9882_v20 = vld [vmem:[%s9559_s30 + $0x80] sm:$0x3] }
  0x30   : > { %v272_v41 = vrot.slane %v271_v24, 4  ;;  %v335_v46 = vsel %vm9604_vm2, %v330_v33, %v334_v61  ;;  %v281_v47 = vor.u32 %v280_v34, %v276_v27  ;;  %v366_v49 = vrot.slane %v16767_v37, 5  ;;  %v9708_v61 = vld [vmem:[%s9559_s30 + $0x38] sm:$0x3]  ;;  %v9718_v33 = vld [vmem:[%s9559_s30 + $0x54] sm:$0xf] }
  0x31   : > { %v16755_v54 = vshll.u32 %v9677_v31, 16  ;;  %v8511_v56 = vcombine.low %v325_v22, %v335_v46  ;;  %v372_v60 = vrot.slane %v16761_v43, 5  ;;  %v376_v62 = vrot.slane %v16762_v44, 4  ;;  %17305 = vst [vmem:[#allocation12_spill] sm:$0xff] %v9919_v17  ;;  %v9930_v58 = vld [vmem:[%s9559_s30 + $0x94] sm:$0xf] }
  0x32   : > { %v277_v59 = vsel %vm9604_vm2, %v272_v41, %v276_v27  ;;  %v282_v5 = vrot.slane %v281_v47, 4  ;;  %v367_v8 = vor.u32 %v366_v49, %v363_v42  ;;  %v16756_v14 = vshrl.u32 %v9691_v45, 16  ;;  %v9726_v47 = vld [vmem:[%s9559_s30 + $0x58] sm:$0xf]  ;;  %17306 = vst [vmem:[#allocation13_spill] sm:$0xff] %v9930_v58 }
  0x33   : > { %v382_v12 = vrot.slane %v16755_v54, 5  ;;  %5039 = vrot.lane.b32.xlu1 %v8511_v56, %s9461_s4  ;;  %v377_v15 = vor.u32 %v376_v62, %v372_v60  ;;  %v16759_v22 = vshll.u32 %v9691_v45, 16  ;;  %v16757_v24 = vshll.u32 %v9699_v55, 16 }
  0x34   : > { %v16758_v27 = vshrl.u32 %v9699_v55, 16  ;;  %v287_v34 = vsel %vm9604_vm2, %v282_v5, %v286_v36  ;;  %v368_v41 = vrot.slane %v367_v8, 4  ;;  %v339_v42 = vrot.slane %v16756_v14, 4  ;;  %v9739_v14 = vld [vmem:[%s9559_s30 + $0x5c] sm:$0x3] }
  0x35   : > { %v16760_v46 = vshll.u32 %v9708_v61, 16  ;;  %v8509_v49 = vcombine.low %v277_v59, %v287_v34  ;;  %v378_v56 = vrot.slane %v377_v15, 4  ;;  %v342_v62 = vrot.slane %v16759_v22, 5 }
  0x36   : > { %v348_v54 = vrot.slane %v16757_v24, 5  ;;  %v373_v36 = vsel %vm9604_vm2, %v368_v41, %v372_v60  ;;  %v352_v5 = vrot.slane %v16758_v27, 4  ;;  %v16765_v59 = vshrl.u32 %v9718_v33, 16  ;;  %v9748_v41 = vld [vmem:[%s9559_s30 + $0x48] sm:$0xf] }
  0x37   : > { %v358_v8 = vrot.slane %v16760_v46, 5  ;;  %5035 = vrot.lane.b32.xlu0 %v8509_v49, %s9461_s4  ;;  %v383_v15 = vsel %vm9604_vm2, %v378_v56, %v382_v12  ;;  %v343_v34 = vor.u32 %v342_v62, %v339_v42  ;;  %v16763_v24 = vshll.u32 %v9718_v33, 16  ;;  %v9754_v49 = vld [vmem:[%s9559_s30 + $0x4c] sm:$0xf] }
  0x38   : > { %v16764_v60 = vshll.u32 %v9726_v47, 16  ;;  %v8513_v27 = vcombine.low %v373_v36, %v383_v15  ;;  %v353_v22 = vor.u32 %v352_v5, %v348_v54  ;;  %v411_v46 = vrot.slane %v16765_v59, 4  ;;  %v9771_v59 = vld [vmem:[%s9559_s30 + $0x50] sm:$0x3] }
  0x39   : > { %v16766_v43 = vshrl.u32 %v9726_v47, 16  ;;  %v344_v44 = vrot.slane %v343_v34, 4  ;;  %v414_v12 = vrot.slane %v16763_v24, 5  ;;  %v16769_v56 = vshll.u32 %v9739_v14, 16 }
  0x3a   : > { %v420_v42 = vrot.slane %v16764_v60, 5  ;;  %5043 = vrot.lane.b32.xlu1 %v8513_v27, %s9461_s4  ;;  %v354_v62 = vrot.slane %v353_v22, 4  ;;  %v16773_v5 = vshrl.u32 %v9748_v41, 16  ;;  %v16774_v15 = vshll.u32 %v9748_v41, 16  ;;  %v9775_v27 = vld [vmem:[%s9559_s30 + $0x6c] sm:$0xf] }
  0x3b   : > { %v424_v36 = vrot.slane %v16766_v43, 4  ;;  %v349_v34 = vsel %vm9604_vm2, %v344_v44, %v348_v54  ;;  %v415_v24 = vor.u32 %v414_v12, %v411_v46  ;;  %v430_v60 = vrot.slane %v16769_v56, 5  ;;  %v9784_v54 = vld [vmem:[%s9559_s30 + $0x70] sm:$0xf] }
  0x3c   : > { %v16775_v22 = vshll.u32 %v9754_v49, 16  ;;  %v359_v43 = vsel %vm9604_vm2, %v354_v62, %v358_v8  ;;  %v387_v32 = vrot.slane %v16773_v5, 4  ;;  %v390_v44 = vrot.slane %v16774_v15, 5  ;;  %v9798_v15 = vld [vmem:[%s9559_s30 + $0x64] sm:$0xf] }
  0x3d   : > { %v425_v37 = vor.u32 %v424_v36, %v420_v42  ;;  %v8512_v46 = vcombine.low %v349_v34, %v359_v43  ;;  %v416_v12 = vrot.slane %v415_v24, 4  ;;  %v16777_v6 = vshrl.u32 %v9754_v49, 16 }
  0x3e   : > { %v396_v56 = vrot.slane %v16775_v22, 5  ;;  %v391_v62 = vor.u32 %v390_v44, %v387_v32  ;;  %v16782_v36 = vshll.u32 %v9771_v59, 16  ;;  %v16781_v5 = vshrl.u32 %v9775_v27, 16 }
  0x3f   : > { %v426_v8 = vrot.slane %v425_v37, 4  ;;  %5041 = vrot.lane.b32.xlu0 %v8512_v46, %s9461_s4  ;;  %v421_v43 = vsel %vm9604_vm2, %v416_v12, %v420_v42  ;;  %v400_v24 = vrot.slane %v16777_v6, 4  ;;  %v16779_v34 = vshll.u32 %v9775_v27, 16 }
  0x40   : > { %v16780_v22 = vshll.u32 %v9784_v54, 16  ;;  %v392_v37 = vrot.slane %v391_v62, 4  ;;  %v406_v44 = vrot.slane %v16782_v36, 5  ;;  %v459_v46 = vrot.slane %v16781_v5, 4 }
  0x41   : > { %v431_v32 = vsel %vm9604_vm2, %v426_v8, %v430_v60  ;;  %v401_v42 = vor.u32 %v400_v24, %v396_v56  ;;  %v462_v12 = vrot.slane %v16779_v34, 5  ;;  %v16783_v60 = vshrl.u32 %v9784_v54, 16 }
  0x42   : > { %v8515_v51 = vcombine.low %v421_v43, %v431_v32  ;;  %v468_v6 = vrot.slane %v16780_v22, 5  ;;  %v397_v48 = vsel %vm9604_vm2, %v392_v37, %v396_v56  ;;  %v16785_v8 = vshll.u32 %v9790_v4, 16  ;;  %v9824_v32 = vld [vmem:[%s9559_s30 + $0x68] sm:$0x3] }
  0x43   : > { %v16787_v62 = vshrl.u32 %v9793_v3, 16  ;;  %v402_v43 = vrot.slane %v401_v42, 4  ;;  %v463_v24 = vor.u32 %v462_v12, %v459_v46  ;;  %v16789_v34 = vshll.u32 %v9793_v3, 16  ;;  %v9836_v42 = vld [vmem:[%s9559_s30 + $0x84] sm:$0xf] }
  0x44   : > { %5047 = vrot.lane.b32.xlu1 %v8515_v51, %s9461_s4  ;;  %v16790_v22 = vshll.u32 %v9798_v15, 16  ;;  %v472_v56 = vrot.slane %v16783_v60, 4  ;;  %v478_v37 = vrot.slane %v16785_v8, 5  ;;  %v16791_v51 = vshrl.u32 %v9798_v15, 16 }
  0x45   : > { %v435_v5 = vrot.slane %v16787_v62, 4  ;;  %v407_v46 = vsel %vm9604_vm2, %v402_v43, %v406_v44  ;;  %v464_v12 = vrot.slane %v463_v24, 4  ;;  %v438_v36 = vrot.slane %v16789_v34, 5  ;;  %v9853_v24 = vld [vmem:[%s9559_s30 + $0x8c] sm:$0x3] }
  0x46   : > { %v444_v60 = vrot.slane %v16790_v22, 5  ;;  %v8514_v8 = vcombine.low %v397_v48, %v407_v46  ;;  %v473_v30 = vor.u32 %v472_v56, %v468_v6  ;;  %v448_v62 = vrot.slane %v16791_v51, 4 }
  0x47   : > { %v16793_v29 = vshll.u32 %v9824_v32, 16  ;;  %v469_v44 = vsel %vm9604_vm2, %v464_v12, %v468_v6  ;;  %v439_v43 = vor.u32 %v438_v36, %v435_v5  ;;  %v16794_v34 = vshrl.u32 %v9836_v42, 16  ;;  %v9867_v12 = vld [vmem:[%s9559_s30 + $0x78] sm:$0xf] }
  0x48   : > { %v16795_v22 = vshll.u32 %v9836_v42, 16  ;;  %5045 = vrot.lane.b32.xlu0 %v8514_v8, %s9461_s4  ;;  %v474_v48 = vrot.slane %v473_v30, 4  ;;  %v449_v56 = vor.u32 %v448_v62, %v444_v60  ;;  %v16800_v51 = vshll.u32 %v9845_v50, 16 }
  0x49   : > { %v454_v46 = vrot.slane %v16793_v29, 5  ;;  %v440_v26 = vrot.slane %v439_v43, 4  ;;  %v507_v6 = vrot.slane %v16794_v34, 4  ;;  %v16801_v36 = vshrl.u32 %v9845_v50, 16  ;;  %v9875_v29 = vld [vmem:[%s9559_s30 + $0x7c] sm:$0xf] }
  0x4a   : > { %v510_v5 = vrot.slane %v16795_v22, 5  ;;  %v479_v30 = vsel %vm9604_vm2, %v474_v48, %v478_v37  ;;  %v450_v8 = vrot.slane %v449_v56, 4  ;;  %v516_v62 = vrot.slane %v16800_v51, 5 }
  0x4b   : > { %v16799_v43 = vshll.u32 %v9853_v24, 16  ;;  %v8517_v34 = vcombine.low %v469_v44, %v479_v30  ;;  %v445_v22 = vsel %vm9604_vm2, %v440_v26, %v444_v60  ;;  %v520_v11 = vrot.slane %v16801_v36, 4  ;;  %v9891_v30 = vld [vmem:[%s9559_s30 + $0x9c] sm:$0xf]  ;;  %v9902_v36 = vld [vmem:[%s9559_s30 + $0xa0] sm:$0xf] }
  0x4c   : > { %v511_v23 = vor.u32 %v510_v5, %v507_v6  ;;  %v455_v37 = vsel %vm9604_vm2, %v450_v8, %v454_v46  ;;  %v16803_v56 = vshrl.u32 %v9867_v12, 16  ;;  %v16802_v44 = vshll.u32 %v9867_v12, 16 }
  0x4d   : > { %v526_v48 = vrot.slane %v16799_v43, 5  ;;  %5051 = vrot.lane.b32.xlu1 %v8517_v34, %s9461_s4  ;;  %v8516_v26 = vcombine.low %v445_v22, %v455_v37  ;;  %v521_v6 = vor.u32 %v520_v11, %v516_v62  ;;  %v16806_v5 = vshll.u32 %v9875_v29, 16  ;;  %v9910_v34 = vld [vmem:[%s9559_s30 + $0xa4] sm:$0x3] }
  0x4e   : > { %v512_v60 = vrot.slane %v511_v23, 4  ;;  %v483_v46 = vrot.slane %v16803_v56, 4  ;;  %v486_v8 = vrot.slane %v16802_v44, 5  ;;  %v16807_v43 = vshrl.u32 %v9875_v29, 16 }
  0x4f   : > { %v16808_v51 = vshll.u32 %v9882_v20, 16  ;;  %5049 = vrot.lane.b32.xlu0 %v8516_v26, %s9461_s4  ;;  %v522_v23 = vrot.slane %v521_v6, 4  ;;  %v492_v22 = vrot.slane %v16806_v5, 5  ;;  %v16810_v37 = vshrl.u32 %v9891_v30, 16 }
  0x50   : > { %v517_v11 = vsel %vm9604_vm2, %v512_v60, %v516_v62  ;;  %v487_v44 = vor.u32 %v486_v8, %v483_v46  ;;  %v496_v56 = vrot.slane %v16807_v43, 4  ;;  %v16812_v26 = vshll.u32 %v9891_v30, 16 }
  0x51   : > { %v502_v13 = vrot.slane %v16808_v51, 5  ;;  %v527_v62 = vsel %vm9604_vm2, %v522_v23, %v526_v48  ;;  %v555_v60 = vrot.slane %v16810_v37, 4  ;;  %v16813_v6 = vshll.u32 %v9902_v36, 16 }
  0x52   : > { %v16814_v46 = vshrl.u32 %v9902_v36, 16  ;;  %v8519_v8 = vcombine.low %v517_v11, %v527_v62  ;;  %v488_v5 = vrot.slane %v487_v44, 4  ;;  %v497_v43 = vor.u32 %v496_v56, %v492_v22  ;;  %v9942_v62 = vld [vmem:[%s9559_s30 + $0x98] sm:$0x3] }
  0x53   : > { %v558_v51 = vrot.slane %v16812_v26, 5  ;;  %v564_v48 = vrot.slane %v16813_v6, 5  ;;  %v16816_v37 = vshll.u32 %v9910_v34, 16  ;;  %v16815_v53 = vshrl.u32 %v9919_v17, 16  ;;  %17307 = vst [vmem:[#allocation14_spill] sm:$0xff] %v9942_v62 }
  0x54   : > { %v568_v23 = vrot.slane %v16814_v46, 4  ;;  %5055 = vrot.lane.b32.xlu1 %v8519_v8, %s9461_s4  ;;  %v493_v56 = vsel %vm9604_vm2, %v488_v5, %v492_v22  ;;  %v498_v44 = vrot.slane %v497_v43, 4  ;;  %v16817_v26 = vshll.u32 %v9919_v17, 16  ;;  %v9951_v8 = vld [vmem:[%s9559_s30 + $0xb4] sm:$0xf] }
  0x55   : > { %v559_v11 = vor.u32 %v558_v51, %v555_v60  ;;  %v574_v46 = vrot.slane %v16816_v37, 5  ;;  %v531_v19 = vrot.slane %v16815_v53, 4  ;;  %v16818_v18 = vshll.u32 %v9930_v58, 16  ;;  %17308 = vst [vmem:[#allocation15_spill] sm:$0xff] %v9951_v8  ;;  %v9959_v60 = vld [vmem:[%s9559_s30 + $0xb8] sm:$0xf] }
  0x56   : > { %v569_v6 = vor.u32 %v568_v23, %v564_v48  ;;  %v503_v51 = vsel %vm9604_vm2, %v498_v44, %v502_v13  ;;  %v534_v5 = vrot.slane %v16817_v26, 5  ;;  %v16819_v22 = vshrl.u32 %v9930_v58, 16  ;;  %17309 = vst [vmem:[#allocation16_spill] sm:$0xff] %v9959_v60  ;;  %v9969_v26 = vld [vmem:[%s9559_s30 + $0xbc] sm:$0x3] }
  0x57   : > { %v560_v43 = vrot.slane %v559_v11, 4  ;;  %v8518_v23 = vcombine.low %v493_v56, %v503_v51  ;;  %v540_v37 = vrot.slane %v16818_v18, 5  ;;  %v16820_v39 = vshll.u32 %v9942_v62, 16  ;;  %17310 = vst [vmem:[#allocation17_spill] sm:$0xff] %v9969_v26 }
  0x58   : > { %v570_v53 = vrot.slane %v569_v6, 4  ;;  %v535_v44 = vor.u32 %v534_v5, %v531_v19  ;;  %v544_v11 = vrot.slane %v16819_v22, 4  ;;  %v16823_v38 = vshrl.u32 %v9951_v8, 16  ;;  %v9980_v19 = vld [vmem:[%s9559_s30 + $0xa8] sm:$0xf] }
  0x59   : > { %v565_v13 = vsel %vm9604_vm2, %v560_v43, %v564_v48  ;;  %5053 = vrot.lane.b32.xlu0 %v8518_v23, %s9461_s4  ;;  %v550_v56 = vrot.slane %v16820_v39, 5  ;;  %v16824_v51 = vshll.u32 %v9951_v8, 16  ;;  %v16825_v48 = vshll.u32 %v9959_v60, 16  ;;  %17311 = vst [vmem:[#allocation18_spill] sm:$0xff] %v9980_v19  ;;  %v9985_v23 = vld [vmem:[%s9559_s30 + $0xac] sm:$0xf] }
  0x5a   : > { %v575_v6 = vsel %vm9604_vm2, %v570_v53, %v574_v46  ;;  %v536_v5 = vrot.slane %v535_v44, 4  ;;  %v545_v18 = vor.u32 %v544_v11, %v540_v37  ;;  %v603_v22 = vrot.slane %v16823_v38, 4  ;;  %17312 = vst [vmem:[#allocation19_spill] sm:$0xff] %v9985_v23  ;;  %v10003_v8 = vld [vmem:[%s9559_s30 + $0xb0] sm:$0x3] }
  0x5b   : > { %v8521_v43 = vcombine.low %v565_v13, %v575_v6  ;;  %v606_v53 = vrot.slane %v16824_v51, 5  ;;  %v612_v46 = vrot.slane %v16825_v48, 5  ;;  %v16830_v39 = vshrl.u32 %v9959_v60, 16  ;;  %17313 = vst [vmem:[#allocation20_spill] sm:$0xff] %v10003_v8 }
  0x5c   : > { %v16831_v62 = vshll.u32 %v9969_v26, 16  ;;  %v541_v13 = vsel %vm9604_vm2, %v536_v5, %v540_v37  ;;  %v546_v44 = vrot.slane %v545_v18, 4  ;;  %v16839_v11 = vshrl.u32 %v9980_v19, 16 }
  0x5d   : > { %5059 = vrot.lane.b32.xlu1 %v8521_v43, %s9461_s4  ;;  %v16836_v6 = vshll.u32 %v9980_v19, 16  ;;  %v607_v38 = vor.u32 %v606_v53, %v603_v22  ;;  %v616_v51 = vrot.slane %v16830_v39, 4  ;;  %v16837_v58 = vshll.u32 %v9985_v23, 16 }
  0x5e   : > { %v622_v48 = vrot.slane %v16831_v62, 5  ;;  %v551_v43 = vsel %vm9604_vm2, %v546_v44, %v550_v56  ;;  %v579_v18 = vrot.slane %v16839_v11, 4  ;;  %v16838_v22 = vshrl.u32 %v9985_v23, 16 }
  0x5f   : > { %v582_v37 = vrot.slane %v16836_v6, 5  ;;  %v8520_v5 = vcombine.low %v541_v13, %v551_v43  ;;  %v608_v53 = vrot.slane %v607_v38, 4  ;;  %v617_v39 = vor.u32 %v616_v51, %v612_v46 }
  0x60   : > { %v588_v62 = vrot.slane %v16837_v58, 5  ;;  %v592_v60 = vrot.slane %v16838_v22, 4  ;;  %v16842_v56 = vshll.u32 %v10003_v8, 16  ;;  %v17314_v44 = vmov 0 }
  0x61   : > { %v583_v26 = vor.u32 %v582_v37, %v579_v18  ;;  %v17315_v44 = vsel %vm10020_vm5, 4294967295, %v17314_v44  ;;  %v8141_v6 = vrot.slane %v9627_v40, 9  ;;  %5057 = vrot.lane.b32.xlu0 %v8520_v5, %s9461_s4  ;;  %v613_v38 = vsel %vm9604_vm2, %v608_v53, %v612_v46 }
  0x62   : > { %17316 = vst [vmem:[#allocation21_spill] sm:$0xff] %v17315_v44  ;;  %v618_v51 = vrot.slane %v617_v39, 4  ;;  %v684_v13 = vrot.slane %v9641_v52, 5  ;;  %v687_v43 = vrot.slane %v9648_v57, 5  ;;  %v593_v37 = vor.u32 %v592_v60, %v588_v62 }
  0x63   : > { %v584_v18 = vrot.slane %v583_v26, 4  ;;  %v598_v58 = vrot.slane %v16842_v56, 5  ;;  %v8140_v22 = vrot.slane %v9575_v7, 9  ;;  %v677_v39 = vrot.slane %v9579_v9, 5 }
  0x64   : > { %v623_v11 = vsel %vm9604_vm2, %v618_v51, %v622_v48  ;;  %v685_v5 = vsel %vm10020_vm5, %v8141_v6, %v684_v13  ;;  %v686_v40 = vrot.slane %v684_v13, 4  ;;  %v594_v26 = vrot.slane %v593_v37, 4 }
  0x65   : > { %v8523_v46 = vcombine.low %v613_v38, %v623_v11  ;;  %v589_v53 = vsel %vm9604_vm2, %v584_v18, %v588_v62  ;;  %v680_v60 = vrot.slane %v9582_v10, 5  ;;  %v678_v7 = vsel %vm10020_vm5, %v8140_v22, %v677_v39 }
  0x66   : > { %v688_v56 = vsel %vm10020_vm5, %v686_v40, %v687_v43  ;;  %v679_v48 = vrot.slane %v677_v39, 4  ;;  %v8143_v51 = vrot.slane %v9592_v16, 9  ;;  %v599_v11 = vsel %vm9604_vm2, %v594_v26, %v598_v58 }
  0x67   : > { %5063 = vrot.lane.b32.xlu1 %v8523_v46, %s9461_s4  ;;  %v8525_v6 = vcombine.low %v685_v5, %v688_v56  ;;  %v698_v62 = vrot.slane %v9611_v28, 5  ;;  %v701_v38 = vrot.slane %v9618_v35, 5  ;;  %v8522_v13 = vcombine.low %v589_v53, %v599_v11 }
  0x68   : > { %v681_v40 = vsel %vm10020_vm5, %v679_v48, %v680_v60  ;;  %v8142_v43 = vrot.slane %v9562_v0, 9  ;;  %v691_v22 = vrot.slane %v9565_v1, 5  ;;  %v694_v58 = vrot.slane %v9568_v2, 5 }
  0x69   : > { %v8524_v18 = vcombine.low %v678_v7, %v681_v40  ;;  %v699_v37 = vsel %vm10020_vm5, %v8143_v51, %v698_v62  ;;  %v700_v39 = vrot.slane %v698_v62, 4  ;;  %5061 = vrot.lane.b32.xlu0 %v8522_v13, %s9461_s4  ;;  %v8145_v46 = vrot.slane %v9660_v63, 9 }
  0x6a   : > { %v692_v56 = vsel %vm10020_vm5, %v8142_v43, %v691_v22  ;;  %v693_v5 = vrot.slane %v691_v22, 4  ;;  %v712_v53 = vrot.slane %v9670_v21, 5  ;;  %v715_v26 = vrot.slane %v9677_v31, 5 }
  0x6b   : > { %5115 = vrot.lane.b32.xlu1 %v8525_v6, %s9462_s5  ;;  %v702_v7 = vsel %vm10020_vm5, %v700_v39, %v701_v38  ;;  %v8144_v2 = vrot.slane %v9691_v45, 9  ;;  %v705_v60 = vrot.slane %v9699_v55, 5  ;;  %v708_v38 = vrot.slane %v9708_v61, 5 }
  0x6c   : > { %v8527_v48 = vcombine.low %v699_v37, %v702_v7  ;;  %v695_v51 = vsel %vm10020_vm5, %v693_v5, %v694_v58  ;;  %v713_v11 = vsel %vm10020_vm5, %v8145_v46, %v712_v53  ;;  %v714_v62 = vrot.slane %v712_v53, 4 }
  0x6d   : > { %v8526_v13 = vcombine.low %v692_v56, %v695_v51  ;;  %v706_v6 = vsel %vm10020_vm5, %v8144_v2, %v705_v60  ;;  %v707_v40 = vrot.slane %v705_v60, 4  ;;  %5113 = vrot.lane.b32.xlu0 %v8524_v18, %s9462_s5  ;;  %v8147_v22 = vrot.slane %v9718_v33, 9 }
  0x6e   : > { %v716_v43 = vsel %vm10020_vm5, %v714_v62, %v715_v26  ;;  %v726_v37 = vrot.slane %v9726_v47, 5  ;;  %v729_v39 = vrot.slane %v9739_v14, 5  ;;  %v8146_v5 = vrot.slane %v9748_v41, 9 }
  0x6f   : > { %5119 = vrot.lane.b32.xlu1 %v8527_v48, %s9462_s5  ;;  %v8529_v58 = vcombine.low %v713_v11, %v716_v43  ;;  %v709_v56 = vsel %vm10020_vm5, %v707_v40, %v708_v38  ;;  %v719_v46 = vrot.slane %v9754_v49, 5  ;;  %v722_v26 = vrot.slane %v9771_v59, 5 }
  0x70   : > { %v8528_v18 = vcombine.low %v706_v6, %v709_v56  ;;  %v727_v53 = vsel %vm10020_vm5, %v8147_v22, %v726_v37  ;;  %v728_v7 = vrot.slane %v726_v37, 4  ;;  %v8149_v48 = vrot.slane %v9775_v27, 9 }
  0x71   : > { %v720_v2 = vsel %vm10020_vm5, %v8146_v5, %v719_v46  ;;  %v721_v60 = vrot.slane %v719_v46, 4  ;;  %v740_v51 = vrot.slane %v9784_v54, 5  ;;  %5117 = vrot.lane.b32.xlu0 %v8526_v13, %s9462_s5  ;;  %v743_v62 = vrot.slane %v9790_v4, 5 }
  0x72   : > { %v730_v11 = vsel %vm10020_vm5, %v728_v7, %v729_v39  ;;  %v8148_v6 = vrot.slane %v9793_v3, 9  ;;  %v733_v40 = vrot.slane %v9798_v15, 5  ;;  %v736_v5 = vrot.slane %v9824_v32, 5 }
  0x73   : > { %5123 = vrot.lane.b32.xlu1 %v8529_v58, %s9462_s5  ;;  %v8531_v38 = vcombine.low %v727_v53, %v730_v11  ;;  %v723_v43 = vsel %vm10020_vm5, %v721_v60, %v722_v26  ;;  %v741_v22 = vsel %vm10020_vm5, %v8149_v48, %v740_v51  ;;  %v742_v37 = vrot.slane %v740_v51, 4 }
  0x74   : > { %v8530_v13 = vcombine.low %v720_v2, %v723_v43  ;;  %v734_v39 = vsel %vm10020_vm5, %v8148_v6, %v733_v40  ;;  %v735_v56 = vrot.slane %v733_v40, 4  ;;  %v8151_v58 = vrot.slane %v9836_v42, 9 }
  0x75   : > { %v744_v46 = vsel %vm10020_vm5, %v742_v37, %v743_v62  ;;  %v754_v53 = vrot.slane %v9845_v50, 5  ;;  %v757_v7 = vrot.slane %v9853_v24, 5  ;;  %5121 = vrot.lane.b32.xlu0 %v8528_v18, %s9462_s5  ;;  %v8150_v60 = vrot.slane %v9867_v12, 9 }
  0x76   : > { %v8533_v26 = vcombine.low %v741_v22, %v744_v46  ;;  %v737_v2 = vsel %vm10020_vm5, %v735_v56, %v736_v5  ;;  %v747_v48 = vrot.slane %v9875_v29, 5  ;;  %v750_v6 = vrot.slane %v9882_v20, 5  ;;  %v17317_v56 = vld [vmem:[#allocation13_spill] sm:$0xff] }
  0x77   : > { %5127 = vrot.lane.b32.xlu1 %v8531_v38, %s9462_s5  ;;  %v8532_v51 = vcombine.low %v734_v39, %v737_v2  ;;  %v755_v11 = vsel %vm10020_vm5, %v8151_v58, %v754_v53  ;;  %v756_v62 = vrot.slane %v754_v53, 4  ;;  %v8153_v43 = vrot.slane %v9891_v30, 9 }
  0x78   : > { %v748_v18 = vsel %vm10020_vm5, %v8150_v60, %v747_v48  ;;  %v749_v40 = vrot.slane %v747_v48, 4  ;;  %v768_v22 = vrot.slane %v9902_v36, 5  ;;  %v771_v37 = vrot.slane %v9910_v34, 5 }
  0x79   : > { %v758_v38 = vsel %vm10020_vm5, %v756_v62, %v757_v7  ;;  %v8152_v39 = vrot.slane %v9919_v17, 9  ;;  %v761_v5 = vrot.slane %v17317_v56, 5  ;;  %5125 = vrot.lane.b32.xlu0 %v8530_v13, %s9462_s5  ;;  %v17318_v62 = vld [vmem:[#allocation14_spill] sm:$0xff]  ;;  %v17320_v56 = vld [vmem:[#allocation16_spill] sm:$0xff] }
  0x7a   : > { %v8535_v46 = vcombine.low %v755_v11, %v758_v38  ;;  %v751_v58 = vsel %vm10020_vm5, %v749_v40, %v750_v6  ;;  %v769_v53 = vsel %vm10020_vm5, %v8153_v43, %v768_v22  ;;  %v770_v2 = vrot.slane %v768_v22, 4  ;;  %v17319_v11 = vld [vmem:[#allocation15_spill] sm:$0xff]  ;;  %v17321_v40 = vld [vmem:[#allocation17_spill] sm:$0xff] }
  0x7b   : > { %5131 = vrot.lane.b32.xlu1 %v8533_v26, %s9462_s5  ;;  %v8534_v60 = vcombine.low %v748_v18, %v751_v58  ;;  %v762_v7 = vsel %vm10020_vm5, %v8152_v39, %v761_v5  ;;  %v763_v48 = vrot.slane %v761_v5, 4  ;;  %v764_v25 = vrot.slane %v17318_v62, 5 }
  0x7c   : > { %v772_v13 = vsel %vm10020_vm5, %v770_v2, %v771_v37  ;;  %v8155_v38 = vrot.slane %v17319_v11, 9  ;;  %v782_v6 = vrot.slane %v17320_v56, 5  ;;  %v785_v17 = vrot.slane %v17321_v40, 5 }
  0x7d   : > { %v8537_v43 = vcombine.low %v769_v53, %v772_v13  ;;  %v765_v26 = vsel %vm10020_vm5, %v763_v48, %v764_v25  ;;  %v8154_v18 = vrot.slane %v9980_v19, 9  ;;  %v775_v22 = vrot.slane %v9985_v23, 5  ;;  %5129 = vrot.lane.b32.xlu0 %v8532_v51, %s9462_s5  ;;  %v17322_v25 = vld [vmem:[#allocation11_spill] sm:$0xff] }
  0x7e   : > { %v8536_v39 = vcombine.low %v762_v7, %v765_v26  ;;  %v783_v37 = vsel %vm10020_vm5, %v8155_v38, %v782_v6  ;;  %v784_v5 = vrot.slane %v782_v6, 4  ;;  %v778_v58 = vrot.slane %v10003_v8, 5 }
  0x7f   : > { %5135 = vrot.lane.b32.xlu1 %v8535_v46, %s9462_s5  ;;  %v776_v53 = vsel %vm10020_vm5, %v8154_v18, %v775_v22  ;;  %v777_v2 = vrot.slane %v775_v22, 4  ;;  %v17323_v48 = vshrl.u32 %v17322_v25, 16  ;;  %v17324_v23 = vshll.u32 %v17322_v25, 16 }
  0x80   : > { %v786_v51 = vsel %vm10020_vm5, %v784_v5, %v785_v17  ;;  %v17325_v7 = vshrl.u32 %v9641_v52, 16  ;;  %v17326_v6 = vshll.u32 %v9641_v52, 16  ;;  %v814_v46 = vshrl.u32 %v9648_v57, 16 }
  0x81   : > { %v805_v13 = vrot.slane %v17323_v48, 5  ;;  %v806_v19 = vrot.slane %v17324_v23, 6  ;;  %v8539_v8 = vcombine.low %v783_v37, %v786_v51  ;;  %v779_v18 = vsel %vm10020_vm5, %v777_v2, %v778_v58  ;;  %5133 = vrot.lane.b32.xlu0 %v8534_v60, %s9462_s5 }
  0x82   : > { %v809_v38 = vrot.slane %v17325_v7, 5  ;;  %v810_v26 = vrot.slane %v17326_v6, 6  ;;  %v17327_v48 = vshll.u32 %v9648_v57, 16  ;;  %v8538_v23 = vcombine.low %v776_v53, %v779_v18  ;;  %v17331_v7 = vld [vmem:[#allocation5_spill] sm:$0xff] }
  0x83   : > { %v807_v22 = vor.u32 %v806_v19, %v805_v13  ;;  %v17328_v17 = vmov 0  ;;  %v816_v5 = vrot.slane %v814_v46, 5  ;;  %v17332_v37 = vshrl.u32 %v17331_v7, 16  ;;  %5139 = vrot.lane.b32.xlu1 %v8537_v43, %s9462_s5 }
  0x84   : > { %v817_v25 = vrot.slane %v17327_v48, 6  ;;  %v17329_v17 = vsel %vm10174_vm8, 4294967295, %v17328_v17  ;;  %v811_v52 = vor.u32 %v810_v26, %v809_v38  ;;  %v17333_v57 = vshll.u32 %v17331_v7, 16  ;;  %v17337_v48 = vld [vmem:[#allocation9_spill] sm:$0xff] }
  0x85   : > { %17330 = vst [vmem:[#allocation14_spill] sm:$0xff] %v17329_v17  ;;  %v790_v51 = vrot.slane %v17332_v37, 5  ;;  %v808_v19 = vrot.slane %v807_v22, 4  ;;  %v17334_v60 = vshrl.u32 %v9579_v9, 16  ;;  %v799_v2 = vshrl.u32 %v9582_v10, 16  ;;  %5137 = vrot.lane.b32.xlu0 %v8536_v39, %s9462_s5 }
  0x86   : > { %v791_v58 = vrot.slane %v17333_v57, 6  ;;  %v813_v13 = vrot.slane %v811_v52, 4  ;;  %v818_v6 = vor.u32 %v817_v25, %v816_v5  ;;  %v17335_v18 = vshrl.u32 %v9592_v16, 16  ;;  %v10845_v17 = vld [vmem:[%s9559_s30 + $0x50] sm:$0x3] }
  0x87   : > { %v794_v53 = vrot.slane %v17334_v60, 5  ;;  %v17336_v26 = vshll.u32 %v9592_v16, 16  ;;  %v812_v43 = vsel %vm10174_vm8, %v808_v19, %v811_v52  ;;  %v801_v37 = vrot.slane %v799_v2, 5  ;;  %5143 = vrot.lane.b32.xlu1 %v8539_v8, %s9462_s5  ;;  %v17340_v19 = vld [vmem:[#allocation10_spill] sm:$0xff] }
  0x88   : > { %v835_v38 = vrot.slane %v17335_v18, 5  ;;  %v792_v22 = vor.u32 %v791_v58, %v790_v51  ;;  %v819_v9 = vsel %vm10174_vm8, %v813_v13, %v818_v6  ;;  %v17338_v25 = vshrl.u32 %v9611_v28, 16 }
  0x89   : > { %v836_v46 = vrot.slane %v17336_v26, 6  ;;  %v796_v7 = vor.u32 %v17337_v48, %v794_v53  ;;  %v17339_v57 = vshll.u32 %v9611_v28, 16  ;;  %v8541_v60 = vcombine.low %v812_v43, %v819_v9  ;;  %5141 = vrot.lane.b32.xlu0 %v8538_v23, %s9462_s5 }
  0x8a   : > { %v839_v5 = vrot.slane %v17338_v25, 5  ;;  %v793_v52 = vrot.slane %v792_v22, 4  ;;  %v803_v58 = vor.u32 %v17340_v19, %v801_v37  ;;  %v844_v39 = vshrl.u32 %v9618_v35, 16 }
  0x8b   : > { %v837_v10 = vor.u32 %v836_v46, %v835_v38  ;;  %v840_v16 = vrot.slane %v17339_v57, 6  ;;  %v798_v51 = vrot.slane %v796_v7, 4  ;;  %v17341_v13 = vshll.u32 %v9618_v35, 16  ;;  %5195 = vrot.lane.b32.xlu1 %v8541_v60, %s9463_s6 }
  0x8c   : > { %v797_v18 = vsel %vm10174_vm8, %v793_v52, %v796_v7  ;;  %v17342_v8 = vshrl.u32 %v9562_v0, 16  ;;  %v17343_v26 = vshll.u32 %v9562_v0, 16  ;;  %v846_v48 = vrot.slane %v844_v39, 5 }
  0x8d   : > { %v838_v53 = vrot.slane %v837_v10, 4  ;;  %v841_v2 = vor.u32 %v840_v16, %v839_v5  ;;  %v847_v6 = vrot.slane %v17341_v13, 6  ;;  %v804_v28 = vsel %vm10174_vm8, %v798_v51, %v803_v58  ;;  %v10220_v10 = vld [vmem:[%s9559_s30 + $0x20] sm:$0x3] }
  0x8e   : > { %v820_v38 = vrot.slane %v17342_v8, 5  ;;  %v821_v46 = vrot.slane %v17343_v26, 6  ;;  %v8540_v43 = vcombine.low %v797_v18, %v804_v28  ;;  %v17344_v37 = vshrl.u32 %v9565_v1, 16  ;;  %v17349_v1 = vld [vmem:[#allocation6_spill] sm:$0xff]  ;;  %v17351_v26 = vld [vmem:[#allocation7_spill] sm:$0xff] }
  0x8f   : > { %v842_v22 = vsel %vm10174_vm8, %v838_v53, %v841_v2  ;;  %v843_v35 = vrot.slane %v841_v2, 4  ;;  %v829_v0 = vshrl.u32 %v10220_v10, 16  ;;  %v17345_v25 = vshrl.u32 %v9660_v63, 16 }
  0x90   : > { %v822_v7 = vor.u32 %v821_v46, %v820_v38  ;;  %v824_v9 = vrot.slane %v17344_v37, 5  ;;  %v848_v5 = vor.u32 %v847_v6, %v846_v48  ;;  %v17346_v57 = vshll.u32 %v9660_v63, 16  ;;  %5193 = vrot.lane.b32.xlu0 %v8540_v43, %s9463_s6 }
  0x91   : > { %v865_v23 = vrot.slane %v17345_v25, 5  ;;  %v17347_v52 = vshrl.u32 %v9670_v21, 16  ;;  %v17348_v60 = vshll.u32 %v9670_v21, 16  ;;  %v831_v2 = vrot.slane %v829_v0, 5 }
  0x92   : > { %v866_v16 = vrot.slane %v17346_v57, 6  ;;  %v823_v58 = vrot.slane %v822_v7, 4  ;;  %v826_v53 = vor.u32 %v17349_v1, %v824_v9  ;;  %v874_v39 = vshrl.u32 %v9677_v31, 16 }
  0x93   : > { %v869_v51 = vrot.slane %v17347_v52, 5  ;;  %v870_v19 = vrot.slane %v17348_v60, 6  ;;  %v849_v13 = vsel %vm10174_vm8, %v843_v35, %v848_v5  ;;  %v17350_v18 = vshll.u32 %v9677_v31, 16 }
  0x94   : > { %v867_v6 = vor.u32 %v866_v16, %v865_v23  ;;  %v8543_v8 = vcombine.low %v842_v22, %v849_v13  ;;  %v827_v21 = vsel %vm10174_vm8, %v823_v58, %v826_v53  ;;  %v828_v38 = vrot.slane %v826_v53, 4 }
  0x95   : > { %v871_v63 = vor.u32 %v870_v19, %v869_v51  ;;  %v877_v28 = vrot.slane %v17350_v18, 6  ;;  %v833_v46 = vor.u32 %v17351_v26, %v831_v2  ;;  %v876_v37 = vrot.slane %v874_v39, 5 }
  0x96   : > { %v868_v48 = vrot.slane %v867_v6, 4  ;;  %v17352_v43 = vshrl.u32 %v9691_v45, 16  ;;  %5199 = vrot.lane.b32.xlu1 %v8543_v8, %s9463_s6  ;;  %v17353_v31 = vshll.u32 %v9691_v45, 16  ;;  %v17354_v0 = vshrl.u32 %v9699_v55, 16 }
  0x97   : > { %v873_v7 = vrot.slane %v871_v63, 4  ;;  %v834_v35 = vsel %vm10174_vm8, %v828_v38, %v833_v46  ;;  %v17355_v23 = vshll.u32 %v9699_v55, 16  ;;  %v878_v52 = vor.u32 %v877_v28, %v876_v37 }
  0x98   : > { %v850_v9 = vrot.slane %v17352_v43, 5  ;;  %v851_v22 = vrot.slane %v17353_v31, 6  ;;  %v854_v25 = vrot.slane %v17354_v0, 5  ;;  %v8542_v57 = vcombine.low %v827_v21, %v834_v35 }
  0x99   : > { %v855_v5 = vrot.slane %v17355_v23, 6  ;;  %v872_v16 = vsel %vm10174_vm8, %v868_v48, %v871_v63  ;;  %v859_v51 = vshrl.u32 %v9708_v61, 16  ;;  %v17356_v58 = vshll.u32 %v9708_v61, 16 }
  0x9a   : > { %v852_v60 = vor.u32 %v851_v22, %v850_v9  ;;  %v17357_v45 = vshrl.u32 %v9718_v33, 16  ;;  %5197 = vrot.lane.b32.xlu0 %v8542_v57, %s9463_s6  ;;  %v879_v55 = vsel %vm10174_vm8, %v873_v7, %v878_v52  ;;  %v17358_v39 = vshll.u32 %v9718_v33, 16 }
  0x9b   : > { %v856_v19 = vor.u32 %v855_v5, %v854_v25  ;;  %v862_v1 = vrot.slane %v17356_v58, 6  ;;  %v861_v2 = vrot.slane %v859_v51, 5  ;;  %v17359_v6 = vshrl.u32 %v9726_v47, 16 }
  0x9c   : > { %v895_v53 = vrot.slane %v17357_v45, 5  ;;  %v896_v13 = vrot.slane %v17358_v39, 6  ;;  %v8545_v18 = vcombine.low %v872_v16, %v879_v55  ;;  %v853_v28 = vrot.slane %v852_v60, 4 }
  0x9d   : > { %v899_v63 = vrot.slane %v17359_v6, 5  ;;  %v858_v8 = vrot.slane %v856_v19, 4  ;;  %v17360_v61 = vshll.u32 %v9726_v47, 16  ;;  %v863_v38 = vor.u32 %v862_v1, %v861_v2 }
  0x9e   : > { %v897_v26 = vor.u32 %v896_v13, %v895_v53  ;;  %v904_v46 = vshrl.u32 %v9739_v14, 16  ;;  %v17361_v48 = vshll.u32 %v9739_v14, 16  ;;  %5203 = vrot.lane.b32.xlu1 %v8545_v18, %s9463_s6  ;;  %v857_v33 = vsel %vm10174_vm8, %v853_v28, %v856_v19 }
  0x9f   : > { %v900_v21 = vrot.slane %v17360_v61, 6  ;;  %v17362_v43 = vshrl.u32 %v9748_v41, 16  ;;  %v17363_v35 = vshll.u32 %v9748_v41, 16  ;;  %v864_v31 = vsel %vm10174_vm8, %v858_v8, %v863_v38 }
  0xa0   : > { %v907_v7 = vrot.slane %v17361_v48, 6  ;;  %v898_v22 = vrot.slane %v897_v26, 4  ;;  %v906_v0 = vrot.slane %v904_v46, 5  ;;  %v17364_v14 = vshrl.u32 %v9754_v49, 16 }
  0xa1   : > { %v901_v37 = vor.u32 %v900_v21, %v899_v63  ;;  %v880_v9 = vrot.slane %v17362_v43, 5  ;;  %v881_v47 = vrot.slane %v17363_v35, 6  ;;  %v8544_v23 = vcombine.low %v857_v33, %v864_v31 }
  0xa2   : > { %v884_v25 = vrot.slane %v17364_v14, 5  ;;  %v17365_v16 = vshll.u32 %v9754_v49, 16  ;;  %v908_v60 = vor.u32 %v907_v7, %v906_v0  ;;  %v889_v41 = vshrl.u32 %v9771_v59, 16 }
  0xa3   : > { %v903_v5 = vrot.slane %v901_v37, 4  ;;  %v882_v57 = vor.u32 %v881_v47, %v880_v9  ;;  %v902_v51 = vsel %vm10174_vm8, %v898_v22, %v901_v37  ;;  %v17366_v19 = vshll.u32 %v9771_v59, 16  ;;  %5201 = vrot.lane.b32.xlu0 %v8544_v23, %s9463_s6 }
  0xa4   : > { %v885_v52 = vrot.slane %v17365_v16, 6  ;;  %v17367_v53 = vshrl.u32 %v9775_v27, 16  ;;  %v17368_v2 = vshll.u32 %v9775_v27, 16  ;;  %v891_v13 = vrot.slane %v889_v41, 5 }
  0xa5   : > { %v892_v58 = vrot.slane %v17366_v19, 6  ;;  %v883_v1 = vrot.slane %v882_v57, 4  ;;  %v909_v39 = vsel %vm10174_vm8, %v903_v5, %v908_v60  ;;  %v17369_v6 = vshrl.u32 %v9784_v54, 16 }
  0xa6   : > { %v886_v45 = vor.u32 %v885_v52, %v884_v25  ;;  %v925_v55 = vrot.slane %v17367_v53, 5  ;;  %v926_v49 = vrot.slane %v17368_v2, 6  ;;  %v17370_v59 = vshll.u32 %v9784_v54, 16 }
  0xa7   : > { %v929_v63 = vrot.slane %v17369_v6, 5  ;;  %v8547_v28 = vcombine.low %v902_v51, %v909_v39  ;;  %v893_v38 = vor.u32 %v892_v58, %v891_v13  ;;  %v934_v27 = vshrl.u32 %v9790_v4, 16 }
  0xa8   : > { %v930_v18 = vrot.slane %v17370_v59, 6  ;;  %v887_v8 = vsel %vm10174_vm8, %v883_v1, %v886_v45  ;;  %v888_v61 = vrot.slane %v886_v45, 4  ;;  %v927_v21 = vor.u32 %v926_v49, %v925_v55 }
  0xa9   : > { %v17371_v46 = vshll.u32 %v9790_v4, 16  ;;  %5207 = vrot.lane.b32.xlu1 %v8547_v28, %s9463_s6  ;;  %v17372_v33 = vshrl.u32 %v9793_v3, 16  ;;  %v17373_v37 = vshll.u32 %v9793_v3, 16  ;;  %v17374_v9 = vshrl.u32 %v9798_v15, 16 }
  0xaa   : > { %v931_v26 = vor.u32 %v930_v18, %v929_v63  ;;  %v928_v7 = vrot.slane %v927_v21, 4  ;;  %v894_v47 = vsel %vm10174_vm8, %v888_v61, %v893_v38  ;;  %v936_v22 = vrot.slane %v934_v27, 5 }
  0xab   : > { %v937_v48 = vrot.slane %v17371_v46, 6  ;;  %v910_v54 = vrot.slane %v17372_v33, 5  ;;  %v911_v43 = vrot.slane %v17373_v37, 6  ;;  %v914_v35 = vrot.slane %v17374_v9, 5 }
  0xac   : > { %v933_v31 = vrot.slane %v931_v26, 4  ;;  %v17375_v4 = vshll.u32 %v9798_v15, 16  ;;  %v8546_v14 = vcombine.low %v887_v8, %v894_v47  ;;  %v932_v25 = vsel %vm10174_vm8, %v928_v7, %v931_v26 }
  0xad   : > { %v912_v23 = vor.u32 %v911_v43, %v910_v54  ;;  %v919_v5 = vshrl.u32 %v9824_v32, 16  ;;  %v938_v3 = vor.u32 %v937_v48, %v936_v22  ;;  %v17376_v16 = vshll.u32 %v9824_v32, 16 }
  0xae   : > { %v915_v0 = vrot.slane %v17375_v4, 6  ;;  %v17377_v51 = vshrl.u32 %v9836_v42, 16  ;;  %5205 = vrot.lane.b32.xlu0 %v8546_v14, %s9463_s6  ;;  %v17378_v19 = vshll.u32 %v9836_v42, 16  ;;  %v17379_v1 = vshrl.u32 %v9845_v50, 16 }
  0xaf   : > { %v922_v52 = vrot.slane %v17376_v16, 6  ;;  %v913_v41 = vrot.slane %v912_v23, 4  ;;  %v921_v15 = vrot.slane %v919_v5, 5  ;;  %v939_v53 = vsel %vm10174_vm8, %v933_v31, %v938_v3 }
  0xb0   : > { %v916_v57 = vor.u32 %v915_v0, %v914_v35  ;;  %v955_v60 = vrot.slane %v17377_v51, 5  ;;  %v956_v58 = vrot.slane %v17378_v19, 6  ;;  %v959_v45 = vrot.slane %v17379_v1, 5  ;;  %v17392_v19 = vld [vmem:[#allocation12_spill] sm:$0xff] }
  0xb1   : > { %v17380_v32 = vshll.u32 %v9845_v50, 16  ;;  %v964_v49 = vshrl.u32 %v9853_v24, 16  ;;  %v8549_v39 = vcombine.low %v932_v25, %v939_v53  ;;  %v923_v6 = vor.u32 %v922_v52, %v921_v15 }
  0xb2   : > { %v918_v55 = vrot.slane %v916_v57, 4  ;;  %v917_v13 = vsel %vm10174_vm8, %v913_v41, %v916_v57  ;;  %v957_v63 = vor.u32 %v956_v58, %v955_v60  ;;  %v17381_v18 = vshll.u32 %v9853_v24, 16 }
  0xb3   : > { %v960_v2 = vrot.slane %v17380_v32, 6  ;;  %v966_v59 = vrot.slane %v964_v49, 5  ;;  %v17382_v8 = vshrl.u32 %v9867_v12, 16  ;;  %5211 = vrot.lane.b32.xlu1 %v8549_v39, %s9463_s6  ;;  %v17383_v38 = vshll.u32 %v9867_v12, 16  ;;  %v17395_v49 = vld [vmem:[#allocation13_spill] sm:$0xff] }
  0xb4   : > { %v967_v28 = vrot.slane %v17381_v18, 6  ;;  %v924_v50 = vsel %vm10174_vm8, %v918_v55, %v923_v6  ;;  %v958_v21 = vrot.slane %v957_v63, 4  ;;  %v17384_v27 = vshrl.u32 %v9875_v29, 16 }
  0xb5   : > { %v961_v42 = vor.u32 %v960_v2, %v959_v45  ;;  %v940_v61 = vrot.slane %v17382_v8, 5  ;;  %v941_v26 = vrot.slane %v17383_v38, 6  ;;  %v8548_v48 = vcombine.low %v917_v13, %v924_v50 }
  0xb6   : > { %v944_v46 = vrot.slane %v17384_v27, 5  ;;  %v968_v33 = vor.u32 %v967_v28, %v966_v59  ;;  %v17385_v24 = vshll.u32 %v9875_v29, 16  ;;  %v949_v9 = vshrl.u32 %v9882_v20, 16 }
  0xb7   : > { %v963_v7 = vrot.slane %v961_v42, 4  ;;  %v962_v37 = vsel %vm10174_vm8, %v958_v21, %v961_v42  ;;  %v942_v43 = vor.u32 %v941_v26, %v940_v61  ;;  %v17386_v35 = vshll.u32 %v9882_v20, 16  ;;  %5209 = vrot.lane.b32.xlu0 %v8548_v48, %s9463_s6  ;;  %v10381_v42 = vpop.permute.xlu1 %5037 }
  0xb8   : > { %v945_v54 = vrot.slane %v17385_v24, 6  ;;  %v17387_v22 = vshrl.u32 %v9891_v30, 16  ;;  %v17388_v29 = vshll.u32 %v9891_v30, 16  ;;  %v951_v23 = vrot.slane %v949_v9, 5  ;;  %17398 = vst [vmem:[#allocation15_spill] sm:$0xff] %v10381_v42 }
  0xb9   : > { %v952_v47 = vrot.slane %v17386_v35, 6  ;;  %v969_v12 = vsel %vm10174_vm8, %v963_v7, %v968_v33  ;;  %v943_v25 = vrot.slane %v942_v43, 4  ;;  %v17389_v5 = vshrl.u32 %v9902_v36, 16 }
  0xba   : > { %v946_v31 = vor.u32 %v945_v54, %v944_v46  ;;  %v985_v4 = vrot.slane %v17387_v22, 5  ;;  %v986_v0 = vrot.slane %v17388_v29, 6  ;;  %v8551_v14 = vcombine.low %v962_v37, %v969_v12  ;;  %v10396_v37 = vpop.permute.xlu0 %5033 }
  0xbb   : > { %v989_v3 = vrot.slane %v17389_v5, 5  ;;  %v17390_v16 = vshll.u32 %v9902_v36, 16  ;;  %v994_v51 = vshrl.u32 %v9910_v34, 16  ;;  %v953_v30 = vor.u32 %v952_v47, %v951_v23  ;;  %17403 = vst [vmem:[#allocation16_spill] sm:$0xff] %v10396_v37 }
  0xbc   : > { %v948_v20 = vrot.slane %v946_v31, 4  ;;  %v987_v57 = vor.u32 %v986_v0, %v985_v4  ;;  %5215 = vrot.lane.b32.xlu1 %v8551_v14, %s9463_s6  ;;  %v947_v60 = vsel %vm10174_vm8, %v943_v25, %v946_v31  ;;  %v17391_v41 = vshll.u32 %v9910_v34, 16  ;;  %v17406_v14 = vld [vmem:[#allocation18_spill] sm:$0xff] }
  0xbd   : > { %v990_v52 = vrot.slane %v17390_v16, 6  ;;  %v17393_v58 = vshrl.u32 %v17392_v19, 16  ;;  %v996_v55 = vrot.slane %v994_v51, 5  ;;  %v17394_v36 = vshll.u32 %v17392_v19, 16  ;;  %v17410_v51 = vld [vmem:[#allocation19_spill] sm:$0xff]  ;;  %v17413_v19 = vld [vmem:[#allocation20_spill] sm:$0xff] }
  0xbe   : > { %v997_v15 = vrot.slane %v17391_v41, 6  ;;  %v988_v45 = vrot.slane %v987_v57, 4  ;;  %v954_v2 = vsel %vm10174_vm8, %v948_v20, %v953_v30  ;;  %v17396_v39 = vshrl.u32 %v17395_v49, 16 }
  0xbf   : > { %v970_v1 = vrot.slane %v17393_v58, 5  ;;  %v991_v53 = vor.u32 %v990_v52, %v989_v3  ;;  %v971_v32 = vrot.slane %v17394_v36, 6  ;;  %v17397_v6 = vshll.u32 %v17395_v49, 16  ;;  %v10412_v3 = vpop.permute.xlu1 %5039 }
  0xc0   : > { %v974_v13 = vrot.slane %v17396_v39, 5  ;;  %v979_v34 = vshrl.u32 %v17318_v62, 16  ;;  %v8550_v59 = vcombine.low %v947_v60, %v954_v2  ;;  %v998_v8 = vor.u32 %v997_v15, %v996_v55  ;;  %17409 = vst [vmem:[#allocation17_spill] sm:$0xff] %v10412_v3 }
  0xc1   : > { %v975_v63 = vrot.slane %v17397_v6, 6  ;;  %v992_v18 = vsel %vm10174_vm8, %v988_v45, %v991_v53  ;;  %v993_v28 = vrot.slane %v991_v53, 4  ;;  %v972_v61 = vor.u32 %v971_v32, %v970_v1  ;;  %v10424_v32 = vpop.permute.xlu0 %5035  ;;  %v9168_v6 = vld [vmem:[%s9559_s30 + $0xc] sm:$0xf] }
  0xc2   : > { %v981_v21 = vrot.slane %v979_v34, 5  ;;  %v17399_v38 = vshll.u32 %v17318_v62, 16  ;;  %5213 = vrot.lane.b32.xlu0 %v8550_v59, %s9463_s6  ;;  %v17400_v46 = vshrl.u32 %v17319_v11, 16  ;;  %v17401_v7 = vshll.u32 %v17319_v11, 16  ;;  %17415 = vst [vmem:[#allocation11_spill] sm:$0xff] %v10424_v32 }
  0xc3   : > { %v976_v50 = vor.u32 %v975_v63, %v974_v13  ;;  %v999_v27 = vsel %vm10174_vm8, %v993_v28, %v998_v8  ;;  %v17402_v24 = vshrl.u32 %v17320_v56, 16  ;;  %v973_v9 = vrot.slane %v972_v61, 4  ;;  %v9169_v34 = vld [vmem:[%s9559_s30 + $0x10] sm:$0xf] }
  0xc4   : > { %v982_v26 = vrot.slane %v17399_v38, 6  ;;  %v1015_v48 = vrot.slane %v17400_v46, 5  ;;  %v1016_v33 = vrot.slane %v17401_v7, 6  ;;  %v8553_v43 = vcombine.low %v992_v18, %v999_v27  ;;  %v9170_v27 = vld [vmem:[%s9559_s30 + $0x14] sm:$0x3] }
  0xc5   : > { %v1019_v54 = vrot.slane %v17402_v24, 5  ;;  %v978_v62 = vrot.slane %v976_v50, 4  ;;  %v17404_v12 = vshll.u32 %v17320_v56, 16  ;;  %v1024_v22 = vshrl.u32 %v17321_v40, 16  ;;  %v9172_v24 = vld [vmem:[%s9559_s30 + $0x4] sm:$0xf] }
  0xc6   : > { %v983_v35 = vor.u32 %v982_v26, %v981_v21  ;;  %v1017_v47 = vor.u32 %v1016_v33, %v1015_v48  ;;  %v17405_v4 = vshll.u32 %v17321_v40, 16  ;;  %5219 = vrot.lane.b32.xlu1 %v8553_v43, %s9463_s6  ;;  %v977_v11 = vsel %vm10174_vm8, %v973_v9, %v976_v50  ;;  %v10437_v21 = vpop.permute.xlu1 %5043  ;;  %v9171_v48 = vld [vmem:[%s9559_s30] sm:$0xf]  ;;  %v9173_v43 = vld [vmem:[%s9559_s30 + $0x8] sm:$0x3] }
  0xc7   : > { %v1020_v31 = vrot.slane %v17404_v12, 6  ;;  %v17407_v25 = vshrl.u32 %v17406_v14, 16  ;;  %v17408_v5 = vshll.u32 %v17406_v14, 16  ;;  %v1026_v16 = vrot.slane %v1024_v22, 5  ;;  %17419 = vst [vmem:[#allocation9_spill] sm:$0xff] %v10437_v21 }
  0xc8   : > { %v1027_v29 = vrot.slane %v17405_v4, 6  ;;  %v984_v0 = vsel %vm10174_vm8, %v978_v62, %v983_v35  ;;  %v1018_v57 = vrot.slane %v1017_v47, 4  ;;  %v17411_v60 = vshrl.u32 %v17410_v51, 16  ;;  %v9174_v62 = vld [vmem:[%s9559_s30 + $0x24] sm:$0xf] }
  0xc9   : > { %v1000_v23 = vrot.slane %v17407_v25, 5  ;;  %v1001_v56 = vrot.slane %v17408_v5, 6  ;;  %v8552_v20 = vcombine.low %v977_v11, %v984_v0  ;;  %v1021_v40 = vor.u32 %v1020_v31, %v1019_v54  ;;  %v9175_v31 = vld [vmem:[%s9559_s30 + $0x28] sm:$0xf]  ;;  %v9176_v4 = vld [vmem:[%s9559_s30 + $0x2c] sm:$0x3]  ;;  %v10453_v11 = vpop.permute.xlu0 %5041 }
  0xca   : > { %v1004_v30 = vrot.slane %v17411_v60, 5  ;;  %v17412_v41 = vshll.u32 %v17410_v51, 16  ;;  %v1009_v58 = vshrl.u32 %v17413_v19, 16  ;;  %v1028_v53 = vor.u32 %v1027_v29, %v1026_v16  ;;  %17420 = vst [vmem:[#allocation10_spill] sm:$0xff] %v10453_v11  ;;  %v9179_v51 = vld [vmem:[%s9559_s30 + $0x3c] sm:$0xf] }
  0xcb   : > { %v1002_v52 = vor.u32 %v1001_v56, %v1000_v23  ;;  %5217 = vrot.lane.b32.xlu0 %v8552_v20, %s9463_s6  ;;  %v1022_v1 = vsel %vm10174_vm8, %v1018_v57, %v1021_v40  ;;  %v1023_v45 = vrot.slane %v1021_v40, 4  ;;  %v17414_v55 = vshll.u32 %v17413_v19, 16  ;;  %v9177_v23 = vld [vmem:[%s9559_s30 + $0x18] sm:$0xf]  ;;  %v9178_v57 = vld [vmem:[%s9559_s30 + $0x1c] sm:$0xf] }
  0xcc   : > { %v1005_v15 = vrot.slane %v17412_v41, 6  ;;  %v1011_v39 = vrot.slane %v1009_v58, 5  ;;  %v8157_v63 = vrot.slane %v9168_v6, 10  ;;  %v1042_v59 = vrot.slane %v9169_v34, 6  ;;  %v10469_v58 = vpop.permute.xlu1 %5047  ;;  %v9183_v6 = vld [vmem:[%s9559_s30 + $0x34] sm:$0xf] }
  0xcd   : > { %v1012_v36 = vrot.slane %v17414_v55, 6  ;;  %v1003_v2 = vrot.slane %v1002_v52, 4  ;;  %v1029_v13 = vsel %vm10174_vm8, %v1023_v45, %v1028_v53  ;;  %v17416_v50 = vmov 0  ;;  %17421 = vst [vmem:[#allocation6_spill] sm:$0xff] %v10469_v58  ;;  %v9184_v34 = vld [vmem:[%s9559_s30 + $0x38] sm:$0x3] }
  0xce   : > { %v1006_v49 = vor.u32 %v1005_v15, %v1004_v30  ;;  %v8555_v18 = vcombine.low %v1022_v1, %v1029_v13  ;;  %v17417_v50 = vsel %vm10433_vm11, 4294967295, %v17416_v50  ;;  %v1043_v38 = vsel %vm10433_vm11, %v8157_v63, %v1042_v59  ;;  %v9180_v30 = vld [vmem:[%s9559_s30 + $0x40] sm:$0xf]  ;;  %v9181_v15 = vld [vmem:[%s9559_s30 + $0x44] sm:$0x3] }
  0xcf   : > { %v1013_v61 = vor.u32 %v1012_v36, %v1011_v39  ;;  %17418 = vst [vmem:[#allocation5_spill] sm:$0xff] %v17417_v50  ;;  %v1044_v26 = vrot.slane %v1042_v59, 4  ;;  %v1045_v46 = vrot.slane %v9170_v27, 6  ;;  %v8156_v7 = vrot.slane %v9171_v48, 10  ;;  %v10746_v21 = vld [vmem:[%s9559_s30 + $0xa0] sm:$0xf] }
  0xd0   : > { %v1007_v28 = vsel %vm10174_vm8, %v1003_v2, %v1006_v49  ;;  %v1008_v8 = vrot.slane %v1006_v49, 4  ;;  %5223 = vrot.lane.b32.xlu1 %v8555_v18, %s9463_s6  ;;  %v1035_v54 = vrot.slane %v9172_v24, 6  ;;  %v1038_v9 = vrot.slane %v9173_v43, 6  ;;  %v9182_v49 = vld [vmem:[%s9559_s30 + $0x30] sm:$0xf]  ;;  %17454 = vst [vmem:[#allocation48_spill] sm:$0xff] %v10746_v21 }
  0xd1   : > { %v8159_v35 = vrot.slane %v9174_v62, 10  ;;  %v1046_v12 = vsel %vm10433_vm11, %v1044_v26, %v1045_v46  ;;  %v1056_v22 = vrot.slane %v9175_v31, 6  ;;  %v1059_v29 = vrot.slane %v9176_v4, 6  ;;  %v9185_v18 = vld [vmem:[%s9559_s30 + $0x54] sm:$0xf] }
  0xd2   : > { %v1014_v33 = vsel %vm10174_vm8, %v1008_v8, %v1013_v61  ;;  %v8557_v0 = vcombine.low %v1043_v38, %v1046_v12  ;;  %v1036_v14 = vsel %vm10433_vm11, %v8156_v7, %v1035_v54  ;;  %v1037_v25 = vrot.slane %v1035_v54, 4  ;;  %v10484_v8 = vpop.permute.xlu0 %5045  ;;  %v9186_v26 = vld [vmem:[%s9559_s30 + $0x58] sm:$0xf]  ;;  %v9187_v46 = vld [vmem:[%s9559_s30 + $0x5c] sm:$0x3] }
  0xd3   : > { %v8554_v47 = vcombine.low %v1007_v28, %v1014_v33  ;;  %v8158_v5 = vrot.slane %v9177_v23, 10  ;;  %v1057_v56 = vsel %vm10433_vm11, %v8159_v35, %v1056_v22  ;;  %v1058_v20 = vrot.slane %v1056_v22, 4  ;;  %17422 = vst [vmem:[#allocation7_spill] sm:$0xff] %v10484_v8  ;;  %v9188_v54 = vld [vmem:[%s9559_s30 + $0x48] sm:$0xf]  ;;  %v10498_v22 = vpop.permute.xlu1 %5051 }
  0xd4   : > { %v1049_v40 = vrot.slane %v9178_v57, 6  ;;  %v1052_v16 = vrot.slane %v10220_v10, 6  ;;  %5275 = vrot.lane.b32.xlu1 %v8557_v0, %s9464_s7  ;;  %v1039_v52 = vsel %vm10433_vm11, %v1037_v25, %v1038_v9  ;;  %v8161_v60 = vrot.slane %v9179_v51, 10  ;;  %v9189_v35 = vld [vmem:[%s9559_s30 + $0x4c] sm:$0xf]  ;;  %17423 = vst [vmem:[#allocation12_spill] sm:$0xff] %v10498_v22 }
  0xd5   : > { %5221 = vrot.lane.b32.xlu0 %v8554_v47, %s9463_s6  ;;  %v1070_v41 = vrot.slane %v9180_v30, 6  ;;  %v1073_v19 = vrot.slane %v9181_v15, 6  ;;  %v8556_v1 = vcombine.low %v1036_v14, %v1039_v52  ;;  %v1060_v10 = vsel %vm10433_vm11, %v1058_v20, %v1059_v29  ;;  %v9190_v12 = vld [vmem:[%s9559_s30 + $0x50] sm:$0x3]  ;;  %v9191_v29 = vld [vmem:[%s9559_s30 + $0x6c] sm:$0xf] }
  0xd6   : > { %v1050_v45 = vsel %vm10433_vm11, %v8158_v5, %v1049_v40  ;;  %v1051_v53 = vrot.slane %v1049_v40, 4  ;;  %v8559_v55 = vcombine.low %v1057_v56, %v1060_v10  ;;  %v8160_v39 = vrot.slane %v9182_v49, 10  ;;  %v9192_v14 = vld [vmem:[%s9559_s30 + $0x70] sm:$0xf]  ;;  %v9193_v23 = vld [vmem:[%s9559_s30 + $0x74] sm:$0x3] }
  0xd7   : > { %v1071_v36 = vsel %vm10433_vm11, %v8161_v60, %v1070_v41  ;;  %v1072_v2 = vrot.slane %v1070_v41, 4  ;;  %v1063_v63 = vrot.slane %v9183_v6, 6  ;;  %v1066_v59 = vrot.slane %v9184_v34, 6  ;;  %v9194_v60 = vld [vmem:[%s9559_s30 + $0x60] sm:$0xf]  ;;  %v10514_v41 = vpop.permute.xlu0 %5049 }
  0xd8   : > { %v1053_v13 = vsel %vm10433_vm11, %v1051_v53, %v1052_v16  ;;  %v8163_v28 = vrot.slane %v9185_v18, 10  ;;  %5279 = vrot.lane.b32.xlu1 %v8559_v55, %s9464_s7  ;;  %v1084_v27 = vrot.slane %v9186_v26, 6  ;;  %v1087_v48 = vrot.slane %v9187_v46, 6  ;;  %17424 = vst [vmem:[#allocation13_spill] sm:$0xff] %v10514_v41  ;;  %v9196_v10 = vld [vmem:[%s9559_s30 + $0x68] sm:$0x3] }
  0xd9   : > { %5273 = vrot.lane.b32.xlu0 %v8556_v1, %s9464_s7  ;;  %v8558_v61 = vcombine.low %v1050_v45, %v1053_v13  ;;  %v1074_v38 = vsel %vm10433_vm11, %v1072_v2, %v1073_v19  ;;  %v1064_v33 = vsel %vm10433_vm11, %v8160_v39, %v1063_v63  ;;  %v1065_v24 = vrot.slane %v1063_v63, 4  ;;  %v9195_v19 = vld [vmem:[%s9559_s30 + $0x64] sm:$0xf]  ;;  %v10526_v39 = vpop.permute.xlu1 %5055  ;;  %v9198_v63 = vld [vmem:[%s9559_s30 + $0x88] sm:$0xf] }
  0xda   : > { %v8561_v7 = vcombine.low %v1071_v36, %v1074_v38  ;;  %v8162_v43 = vrot.slane %v9188_v54, 10  ;;  %v1085_v9 = vsel %vm10433_vm11, %v8163_v28, %v1084_v27  ;;  %v1086_v62 = vrot.slane %v1084_v27, 4  ;;  %17425 = vst [vmem:[#allocation18_spill] sm:$0xff] %v10526_v39  ;;  %v9197_v13 = vld [vmem:[%s9559_s30 + $0x84] sm:$0xf] }
  0xdb   : > { %v1077_v47 = vrot.slane %v9189_v35, 6  ;;  %v1080_v31 = vrot.slane %v9190_v12, 6  ;;  %v1067_v4 = vsel %vm10433_vm11, %v1065_v24, %v1066_v59  ;;  %v8165_v0 = vrot.slane %v9191_v29, 10  ;;  %v9199_v59 = vld [vmem:[%s9559_s30 + $0x8c] sm:$0x3]  ;;  %v10539_v54 = vpop.permute.xlu0 %5053 }
  0xdc   : > { %v1098_v25 = vrot.slane %v9192_v14, 6  ;;  %v1101_v5 = vrot.slane %v9193_v23, 6  ;;  %5283 = vrot.lane.b32.xlu1 %v8561_v7, %s9464_s7  ;;  %v8560_v56 = vcombine.low %v1064_v33, %v1067_v4  ;;  %v1088_v20 = vsel %vm10433_vm11, %v1086_v62, %v1087_v48  ;;  %v9201_v26 = vld [vmem:[%s9559_s30 + $0x7c] sm:$0xf]  ;;  %v9202_v46 = vld [vmem:[%s9559_s30 + $0x80] sm:$0x3] }
  0xdd   : > { %5277 = vrot.lane.b32.xlu0 %v8558_v61, %s9464_s7  ;;  %v1078_v57 = vsel %vm10433_vm11, %v8162_v43, %v1077_v47  ;;  %v1079_v40 = vrot.slane %v1077_v47, 4  ;;  %v8563_v16 = vcombine.low %v1085_v9, %v1088_v20  ;;  %v8164_v30 = vrot.slane %v9194_v60, 10  ;;  %v9200_v61 = vld [vmem:[%s9559_s30 + $0x78] sm:$0xf]  ;;  %17426 = vst [vmem:[#allocation19_spill] sm:$0xff] %v10539_v54 }
  0xde   : > { %v1099_v52 = vsel %vm10433_vm11, %v8165_v0, %v1098_v25  ;;  %v1100_v51 = vrot.slane %v1098_v25, 4  ;;  %v1091_v1 = vrot.slane %v9195_v19, 6  ;;  %v1094_v45 = vrot.slane %v9196_v10, 6  ;;  %v9203_v62 = vld [vmem:[%s9559_s30 + $0x9c] sm:$0xf] }
  0xdf   : > { %v1081_v15 = vsel %vm10433_vm11, %v1079_v40, %v1080_v31  ;;  %v8167_v6 = vrot.slane %v9197_v13, 10  ;;  %v1112_v34 = vrot.slane %v9198_v63, 6  ;;  %v1115_v18 = vrot.slane %v9199_v59, 6  ;;  %v9204_v12 = vld [vmem:[%s9559_s30 + $0xa0] sm:$0xf] }
  0xe0   : > { %v8562_v53 = vcombine.low %v1078_v57, %v1081_v15  ;;  %v1102_v55 = vsel %vm10433_vm11, %v1100_v51, %v1101_v5  ;;  %5287 = vrot.lane.b32.xlu1 %v8563_v16, %s9464_s7  ;;  %v1092_v2 = vsel %vm10433_vm11, %v8164_v30, %v1091_v1  ;;  %v1093_v49 = vrot.slane %v1091_v1, 4  ;;  %v9205_v4 = vld [vmem:[%s9559_s30 + $0xa4] sm:$0x3]  ;;  %v9206_v25 = vld [vmem:[%s9559_s30 + $0x90] sm:$0xf]  ;;  %v10552_v5 = vpop.permute.xlu1 %5059 }
  0xe1   : > { %5281 = vrot.lane.b32.xlu0 %v8560_v56, %s9464_s7  ;;  %v8565_v36 = vcombine.low %v1099_v52, %v1102_v55  ;;  %v8166_v38 = vrot.slane %v9200_v61, 10  ;;  %v1105_v27 = vrot.slane %v9201_v26, 6  ;;  %v1108_v48 = vrot.slane %v9202_v46, 6  ;;  %17427 = vst [vmem:[#allocation20_spill] sm:$0xff] %v10552_v5  ;;  %v9207_v40 = vld [vmem:[%s9559_s30 + $0x94] sm:$0xf] }
  0xe2   : > { %v1095_v28 = vsel %vm10433_vm11, %v1093_v49, %v1094_v45  ;;  %v1113_v33 = vsel %vm10433_vm11, %v8167_v6, %v1112_v34  ;;  %v1114_v24 = vrot.slane %v1112_v34, 4  ;;  %v8169_v35 = vrot.slane %v9203_v62, 10  ;;  %v9208_v52 = vld [vmem:[%s9559_s30 + $0x98] sm:$0x3]  ;;  %v9209_v60 = vld [vmem:[%s9559_s30 + $0xb4] sm:$0xf] }
  0xe3   : > { %v8564_v7 = vcombine.low %v1092_v2, %v1095_v28  ;;  %v1106_v43 = vsel %vm10433_vm11, %v8166_v38, %v1105_v27  ;;  %v1107_v9 = vrot.slane %v1105_v27, 4  ;;  %v1126_v31 = vrot.slane %v9204_v12, 6  ;;  %v9210_v10 = vld [vmem:[%s9559_s30 + $0xb8] sm:$0xf]  ;;  %v9212_v63 = vld [vmem:[%s9559_s30 + $0xa8] sm:$0xf] }
  0xe4   : > { %5291 = vrot.lane.b32.xlu1 %v8565_v36, %s9464_s7  ;;  %v1116_v47 = vsel %vm10433_vm11, %v1114_v24, %v1115_v18  ;;  %v1129_v29 = vrot.slane %v9205_v4, 6  ;;  %v8168_v23 = vrot.slane %v9206_v25, 10  ;;  %v1119_v16 = vrot.slane %v9207_v40, 6  ;;  %v9211_v36 = vld [vmem:[%s9559_s30 + $0xbc] sm:$0x3]  ;;  %v10578_v26 = vpop.permute.xlu1 %5063 }
  0xe5   : > { %5285 = vrot.lane.b32.xlu0 %v8562_v53, %s9464_s7  ;;  %v8567_v0 = vcombine.low %v1113_v33, %v1116_v47  ;;  %v1109_v14 = vsel %vm10433_vm11, %v1107_v9, %v1108_v48  ;;  %v1127_v20 = vsel %vm10433_vm11, %v8169_v35, %v1126_v31  ;;  %v1128_v57 = vrot.slane %v1126_v31, 4  ;;  %v10566_v53 = vpop.permute.xlu0 %5057  ;;  %v9213_v18 = vld [vmem:[%s9559_s30 + $0xac] sm:$0xf]  ;;  %v9214_v61 = vld [vmem:[%s9559_s30 + $0xb0] sm:$0x3]  ;;  %17429 = vst [vmem:[#allocation23_spill] sm:$0xff] %v10578_v26 }
  0xe6   : > { %v8566_v56 = vcombine.low %v1106_v43, %v1109_v14  ;;  %v1122_v51 = vrot.slane %v9208_v52, 6  ;;  %v8171_v30 = vrot.slane %v9209_v60, 10  ;;  %v1120_v19 = vsel %vm10433_vm11, %v8168_v23, %v1119_v16  ;;  %17428 = vst [vmem:[#allocation22_spill] sm:$0xff] %v10566_v53  ;;  %v10583_v46 = vld [vmem:[%s9559_s30 + $0x18] sm:$0xf] }
  0xe7   : > { %v1130_v15 = vsel %vm10433_vm11, %v1128_v57, %v1129_v29  ;;  %v1121_v1 = vrot.slane %v1119_v16, 4  ;;  %v1140_v45 = vrot.slane %v9210_v10, 6  ;;  %v1143_v2 = vrot.slane %v9211_v36, 6  ;;  %v10586_v48 = vld [vmem:[%s9559_s30 + $0x1c] sm:$0xf] }
  0xe8   : > { %5295 = vrot.lane.b32.xlu1 %v8567_v0, %s9464_s7  ;;  %v8569_v55 = vcombine.low %v1127_v20, %v1130_v15  ;;  %v8170_v34 = vrot.slane %v9212_v63, 10  ;;  %v1133_v28 = vrot.slane %v9213_v18, 6  ;;  %v1136_v38 = vrot.slane %v9214_v61, 6  ;;  %v10599_v35 = vld [vmem:[%s9559_s30 + $0xc] sm:$0xf]  ;;  %v10604_v12 = vpop.permute.xlu1 %5115 }
  0xe9   : > { %5289 = vrot.lane.b32.xlu0 %v8564_v7, %s9464_s7  ;;  %v1123_v49 = vsel %vm10433_vm11, %v1121_v1, %v1122_v51  ;;  %v1141_v13 = vsel %vm10433_vm11, %v8171_v30, %v1140_v45  ;;  %v1142_v6 = vrot.slane %v1140_v45, 4  ;;  %v10591_v43 = vpop.permute.xlu0 %5061  ;;  %v8573_v62 = vcombine.low %v10583_v46, %v10586_v48  ;;  %17431 = vst [vmem:[#allocation25_spill] sm:$0xff] %v10599_v35  ;;  %v10602_v47 = vld [vmem:[%s9559_s30 + $0x10] sm:$0xf]  ;;  %v10610_v29 = vld [vmem:[%s9559_s30 + $0x34] sm:$0xf] }
  0xea   : > { %v8568_v59 = vcombine.low %v1120_v19, %v1123_v49  ;;  %v1134_v33 = vsel %vm10433_vm11, %v8170_v34, %v1133_v28  ;;  %v1135_v24 = vrot.slane %v1133_v28, 4  ;;  %17430 = vst [vmem:[#allocation24_spill] sm:$0xff] %v10591_v43  ;;  %17432 = vst [vmem:[#allocation26_spill] sm:$0xff] %v10604_v12  ;;  %v10607_v4 = vld [vmem:[%s9559_s30 + $0x30] sm:$0xf]  ;;  %v8572_v0 = vcombine.low %v10599_v35, %v10602_v47 }
  0xeb   : > { %v1144_v27 = vsel %vm10433_vm11, %v1142_v6, %v1143_v2  ;;  %17433 = vst [vmem:[#allocation27_spill] sm:$0xff] %v10610_v29  ;;  %v8575_v25 = vcombine.low %v10607_v4, %v10610_v29  ;;  %v10621_v23 = vld [vmem:[%s9559_s30 + $0x24] sm:$0xf]  ;;  %v10629_v57 = vld [vmem:[%s9559_s30 + $0x48] sm:$0xf]  ;;  %v16857_v1 = vshrl.u32 %v10583_v46, 16 }
  0xec   : > { %5299 = vrot.lane.b32.xlu1 %v8569_v55, %s9464_s7  ;;  %v8571_v7 = vcombine.low %v1141_v13, %v1144_v27  ;;  %v1137_v9 = vsel %vm10433_vm11, %v1135_v24, %v1136_v38  ;;  %17435 = vst [vmem:[#allocation29_spill] sm:$0xff] %v10621_v23  ;;  %v10626_v20 = vpop.permute.xlu1 %5119  ;;  %17438 = vst [vmem:[#allocation32_spill] sm:$0xff] %v10629_v57  ;;  %v10632_v40 = vld [vmem:[%s9559_s30 + $0x4c] sm:$0xf]  ;;  %v10638_v52 = vld [vmem:[%s9559_s30 + $0x3c] sm:$0xf] }
  0xed   : > { %5293 = vrot.lane.b32.xlu0 %v8566_v56, %s9464_s7  ;;  %v8570_v31 = vcombine.low %v1134_v33, %v1137_v9  ;;  %v10615_v14 = vpop.permute.xlu0 %5113  ;;  %v10624_v56 = vld [vmem:[%s9559_s30 + $0x28] sm:$0xf]  ;;  %17437 = vst [vmem:[#allocation31_spill] sm:$0xff] %v10626_v20  ;;  %17439 = vst [vmem:[#allocation33_spill] sm:$0xff] %v10638_v52  ;;  %v8577_v60 = vcombine.low %v10629_v57, %v10632_v40  ;;  %v10646_v30 = vld [vmem:[%s9559_s30 + $0x40] sm:$0xf] }
  0xee   : > { %17434 = vst [vmem:[#allocation28_spill] sm:$0xff] %v10615_v14  ;;  %17436 = vst [vmem:[#allocation30_spill] sm:$0xff] %v10624_v56  ;;  %v8574_v16 = vcombine.low %v10621_v23, %v10624_v56  ;;  %v10649_v15 = vld [vmem:[%s9559_s30 + $0x60] sm:$0xf]  ;;  %v16856_v10 = vshll.u32 %v10583_v46, 16  ;;  %v16858_v36 = vshll.u32 %v10586_v48, 16  ;;  %v8576_v18 = vcombine.low %v10638_v52, %v10646_v30 }
  0xef   : > { %17441 = vst [vmem:[#allocation35_spill] sm:$0xff] %v10649_v15  ;;  %v10656_v45 = vld [vmem:[%s9559_s30 + $0x64] sm:$0xf]  ;;  %v10659_v55 = vld [vmem:[%s9559_s30 + $0x20] sm:$0x3]  ;;  %v16855_v2 = vshrl.u32 %v10586_v48, 16 }
  0xf0   : > { %5303 = vrot.lane.b32.xlu1 %v8571_v7, %s9464_s7  ;;  %v10651_v19 = vpop.permute.xlu1 %5123  ;;  %v10664_v49 = vld [vmem:[%s9559_s30 + $0x54] sm:$0xf]  ;;  %v10667_v13 = vld [vmem:[%s9559_s30 + $0x58] sm:$0xf]  ;;  %v1224_v6 = vrot.slane %v16857_v1, 4  ;;  %v1227_v63 = vrot.slane %v16856_v10, 5  ;;  %v8579_v33 = vcombine.low %v10649_v15, %v10656_v45 }
  0xf1   : > { %5297 = vrot.lane.b32.xlu0 %v8568_v59, %s9464_s7  ;;  %v10640_v51 = vpop.permute.xlu0 %5117  ;;  %17442 = vst [vmem:[#allocation36_spill] sm:$0xff] %v10651_v19  ;;  %17443 = vst [vmem:[#allocation37_spill] sm:$0xff] %v10664_v49  ;;  %v16859_v34 = vshrl.u32 %v10599_v35, 16  ;;  %v16860_v59 = vshll.u32 %v10599_v35, 16  ;;  %v10679_v28 = vld [vmem:[%s9559_s30 + $0x78] sm:$0xf] }
  0xf2   : > { %17440 = vst [vmem:[#allocation34_spill] sm:$0xff] %v10640_v51  ;;  %17444 = vst [vmem:[#allocation38_spill] sm:$0xff] %v10679_v28  ;;  %v10682_v61 = vld [vmem:[%s9559_s30 + $0x7c] sm:$0xf]  ;;  %v10688_v27 = vrot.slane %v16858_v36, 5  ;;  %v1237_v7 = vrot.slane %v16855_v2, 4 }
  0xf3   : > { %v10696_v24 = vld [vmem:[%s9559_s30 + $0x6c] sm:$0xf]  ;;  %v10699_v9 = vld [vmem:[%s9559_s30 + $0x70] sm:$0xf]  ;;  %v1200_v2 = vrot.slane %v16859_v34, 4  ;;  %v1203_v10 = vrot.slane %v16860_v59, 5  ;;  %v8581_v36 = vcombine.low %v10679_v28, %v10682_v61 }
  0xf4   : > { %5355 = vrot.lane.b32.xlu1 %v8573_v62, %s9465_s8  ;;  %17446 = vst [vmem:[#allocation40_spill] sm:$0xff] %v10696_v24  ;;  %v10701_v62 = vpop.permute.xlu1 %5127  ;;  %v10728_v34 = vld [vmem:[%s9559_s30 + $0xa8] sm:$0xf]  ;;  %v10740_v1 = vld [vmem:[%s9559_s30 + $0xac] sm:$0xf]  ;;  %v17456_v11 = vshll.u32 %v10659_v55, 16 }
  0xf5   : > { %5301 = vrot.lane.b32.xlu0 %v8570_v31, %s9464_s7  ;;  %v10684_v38 = vpop.permute.xlu0 %5121  ;;  %17447 = vst [vmem:[#allocation41_spill] sm:$0xff] %v10701_v62  ;;  %17450 = vst [vmem:[#allocation44_spill] sm:$0xff] %v10728_v34  ;;  %v10743_v19 = vld [vmem:[%s9559_s30 + $0x9c] sm:$0xf]  ;;  %v10753_v20 = vld [vmem:[%s9559_s30 + $0x14] sm:$0x3]  ;;  %v1204_v3 = vor.u32 %v1203_v10, %v1200_v2  ;;  %v8585_v10 = vcombine.low %v10728_v34, %v10740_v1 }
  0xf6   : > { %17445 = vst [vmem:[#allocation39_spill] sm:$0xff] %v10684_v38  ;;  %17452 = vst [vmem:[#allocation46_spill] sm:$0xff] %v10740_v1  ;;  %v1243_v53 = vrot.slane %v17456_v11, 5  ;;  %v17457_v39 = vshll.u32 %v10602_v47, 16  ;;  %v17458_v42 = vshrl.u32 %v10602_v47, 16  ;;  %v17459_v14 = vshrl.u32 %v10607_v4, 16 }
  0xf7   : > { %17453 = vst [vmem:[#allocation47_spill] sm:$0xff] %v10743_v19  ;;  %v10770_v2 = vld [vmem:[%s9559_s30 + $0xc0] sm:$0xf]  ;;  %v10786_v12 = vld [vmem:[%s9559_s30 + $0xb4] sm:$0xf]  ;;  %v17464_v32 = vshll.u32 %v10607_v4, 16 }
  0xf8   : > { %5359 = vrot.lane.b32.xlu1 %v8575_v25, %s9465_s8  ;;  %v10708_v25 = vld [vmem:[%s9559_s30 + $0x94] sm:$0xf]  ;;  %v10748_v5 = vpop.permute.xlu1 %5131  ;;  %v10757_v51 = vrot.slane %v17457_v39, 5  ;;  %v1213_v54 = vrot.slane %v17458_v42, 4  ;;  %17460 = vst [vmem:[#allocation50_spill] sm:$0xff] %v10770_v2  ;;  %17463 = vst [vmem:[#allocation53_spill] sm:$0xff] %v10786_v12 }
  0xf9   : > { %5353 = vrot.lane.b32.xlu0 %v8572_v0, %s9465_s8  ;;  %v10705_v0 = vld [vmem:[%s9559_s30 + $0x90] sm:$0xf]  ;;  %v10730_v59 = vpop.permute.xlu0 %5125  ;;  %17455 = vst [vmem:[#allocation49_spill] sm:$0xff] %v10748_v5  ;;  %v1272_v5 = vrot.slane %v17459_v14, 4  ;;  %v10773_v39 = vld [vmem:[%s9559_s30 + $0xc4] sm:$0xf] }
  0xfa   : > { %17448 = vst [vmem:[#allocation42_spill] sm:$0xff] %v10705_v0  ;;  %17451 = vst [vmem:[#allocation45_spill] sm:$0xff] %v10730_v59  ;;  %v8583_v31 = vcombine.low %v10705_v0, %v10708_v25  ;;  %v1275_v37 = vrot.slane %v17464_v32, 5  ;;  %v10793_v41 = vld [vmem:[%s9559_s30 + $0xb8] sm:$0xf]  ;;  %v17467_v59 = vshll.u32 %v10610_v29, 16 }
  0xfb   : > { %17461 = vst [vmem:[#allocation51_spill] sm:$0xff] %v10773_v39  ;;  %17465 = vst [vmem:[#allocation54_spill] sm:$0xff] %v10793_v41  ;;  %v17468_v22 = vshrl.u32 %v10610_v29, 16  ;;  %v10807_v26 = vld [vmem:[%s9559_s30 + $0x2c] sm:$0x3]  ;;  %v10809_v32 = vrot.slane %v1204_v3, 4 }
  0xfc   : > { %5363 = vrot.lane.b32.xlu1 %v8577_v60, %s9465_s8  ;;  %v1238_v60 = vor.u32 %v1237_v7, %v10688_v27  ;;  %v10725_v7 = vld [vmem:[%s9559_s30 + $0x88] sm:$0xf]  ;;  %v10802_v62 = vrot.slane %v17467_v59, 5  ;;  %v1276_v8 = vor.u32 %v1275_v37, %v1272_v5  ;;  %v17470_v59 = vshrl.u32 %v10621_v23, 16 }
  0xfd   : > { %5357 = vrot.lane.b32.xlu0 %v8574_v16, %s9465_s8  ;;  %v1228_v16 = vor.u32 %v1227_v63, %v1224_v6  ;;  %v8578_v6 = vcombine.low %v10664_v49, %v10667_v13  ;;  %v10722_v63 = vld [vmem:[%s9559_s30 + $0x84] sm:$0xf]  ;;  %v10775_v42 = vpop.permute.xlu0 %5129  ;;  %v1285_v43 = vrot.slane %v17468_v22, 4  ;;  %v16865_v22 = vshll.u32 %v10621_v23, 16 }
  0xfe   : > { %17449 = vst [vmem:[#allocation43_spill] sm:$0xff] %v10722_v63  ;;  %v1239_v38 = vrot.slane %v1238_v60, 4  ;;  %v8582_v11 = vcombine.low %v10722_v63, %v10725_v7  ;;  %17462 = vst [vmem:[#allocation52_spill] sm:$0xff] %v10775_v42  ;;  %v10778_v60 = vld [vmem:[%s9559_s30 + $0x38] sm:$0x3]  ;;  %v1214_v42 = vor.u32 %v1213_v54, %v10757_v51  ;;  %v16866_v3 = vshll.u32 %v10624_v56, 16 }
  0xff   : > { %v8587_v37 = vcombine.low %v10770_v2, %v10773_v39  ;;  %v8586_v54 = vcombine.low %v10786_v12, %v10793_v41  ;;  %v1251_v58 = vrot.slane %v16865_v22, 5  ;;  %v1210_v50 = vsel %vm9604_vm2, %v10809_v32, %v10757_v51 }
 0x100   : > { %5367 = vrot.lane.b32.xlu1 %v8579_v33, %s9465_s8  ;;  %v1229_v33 = vrot.slane %v1228_v16, 4  ;;  %v1215_v5 = vrot.slane %v1214_v42, 4  ;;  %v1277_v22 = vrot.slane %v1276_v8, 4  ;;  %v17475_v51 = vshll.u32 %v10807_v26, 16 }
 0x101   : > { %5361 = vrot.lane.b32.xlu0 %v8576_v18, %s9465_s8  ;;  %v8580_v18 = vcombine.low %v10696_v24, %v10699_v9  ;;  %v16874_v32 = vshll.u32 %v10629_v57, 16 }
 0x102   : > { %v1234_v16 = vsel %vm9604_vm2, %v1229_v33, %v10688_v27  ;;  %v10813_v27 = vpop.permute.xlu1 %5135  ;;  %v17471_v33 = vshll.u32 %v10753_v20, 16  ;;  %v1267_v42 = vrot.slane %v17475_v51, 5 }
 0x103   : > { %17469 = vst [vmem:[#allocation55_spill] sm:$0xff] %v10813_v27  ;;  %v10834_v27 = vpop.permute.xlu0 %5133 }
 0x104   : > { %5371 = vrot.lane.b32.xlu1 %v8581_v36, %s9465_s8  ;;  %v1244_v36 = vsel %vm9604_vm2, %v1239_v38, %v1243_v53  ;;  %v1286_v53 = vor.u32 %v1285_v43, %v10802_v62  ;;  %v1248_v38 = vrot.slane %v17470_v59, 4  ;;  %v1219_v59 = vrot.slane %v17471_v33, 5  ;;  %17472 = vst [vmem:[#allocation56_spill] sm:$0xff] %v10834_v27 }
 0x105   : > { %5365 = vrot.lane.b32.xlu0 %v8578_v6, %s9465_s8  ;;  %v8584_v6 = vcombine.low %v10743_v19, %v10746_v21  ;;  %v17473_v43 = vshll.u32 %v10778_v60, 16  ;;  %v16873_v27 = vshrl.u32 %v10629_v57, 16 }
 0x106   : > { %v1252_v23 = vor.u32 %v1251_v58, %v1248_v38  ;;  %v16875_v58 = vshrl.u32 %v10632_v40, 16  ;;  %v1323_v38 = vrot.slane %v16874_v32, 5 }
 0x107   : > { %v1320_v8 = vrot.slane %v16873_v27, 4 }
 0x108   : > { %5375 = vrot.lane.b32.xlu1 %v8583_v31, %s9465_s8  ;;  %v1257_v31 = vrot.slane %v16866_v3, 5  ;;  %v1287_v3 = vrot.slane %v1286_v53, 4 }
 0x109   : > { %5369 = vrot.lane.b32.xlu0 %v8580_v18, %s9465_s8  ;;  %v8589_v18 = vcombine.low %v1234_v16, %v1244_v36  ;;  %v1291_v16 = vrot.slane %v17473_v43, 5  ;;  %v17474_v36 = vshrl.u32 %v10624_v56, 16  ;;  %v16879_v43 = vshll.u32 %v10632_v40, 16 }
 0x10a   : > { %v1253_v56 = vrot.slane %v1252_v23, 4  ;;  %v1282_v23 = vsel %vm9604_vm2, %v1277_v22, %v10802_v62  ;;  %v16877_v62 = vshrl.u32 %v10638_v52, 16  ;;  %v16878_v22 = vshll.u32 %v10638_v52, 16 }
 0x10b   : > { %v1261_v33 = vrot.slane %v17474_v36, 4  ;;  %v10854_v36 = vpop.permute.xlu1 %5139  ;;  %v1292_v51 = vsel %vm9604_vm2, %v1287_v3, %v1291_v16  ;;  %v16881_v16 = vshrl.u32 %v10646_v30, 16 }
 0x10c   : > { %5379 = vrot.lane.b32.xlu1 %v8585_v10, %s9465_s8  ;;  %17476 = vst [vmem:[#allocation57_spill] sm:$0xff] %v10854_v36  ;;  %v1220_v10 = vsel %vm9604_vm2, %v1215_v5, %v1219_v59  ;;  %v1258_v27 = vsel %vm9604_vm2, %v1253_v56, %v1257_v31  ;;  %v10877_v5 = vld [vmem:[%s9559_s30 + $0x44] sm:$0x3]  ;;  %v10879_v59 = vpop.permute.xlu0 %5137 }
 0x10d   : > { %5373 = vrot.lane.b32.xlu0 %v8582_v11, %s9465_s8  ;;  %v1262_v29 = vor.u32 %v1261_v33, %v1257_v31  ;;  %v16876_v11 = vshll.u32 %v10845_v17, 16  ;;  %v1329_v33 = vrot.slane %v16879_v43, 5  ;;  %17477 = vst [vmem:[#allocation58_spill] sm:$0xff] %v10879_v59  ;;  %v16880_v31 = vshll.u32 %v10646_v30, 16 }
 0x10f   : > { %v1263_v53 = vrot.slane %v1262_v29, 4  ;;  %v1333_v29 = vrot.slane %v16875_v58, 4  ;;  %v1339_v32 = vrot.slane %v16876_v11, 5  ;;  %v10895_v11 = vpop.permute.xlu1 %5143 }
 0x110   : > { %5383 = vrot.lane.b32.xlu1 %v8587_v37, %s9465_s8  ;;  %v1296_v37 = vrot.slane %v16877_v62, 4  ;;  %17478 = vst [vmem:[#allocation59_spill] sm:$0xff] %v10895_v11  ;;  %v8591_v62 = vcombine.low %v1282_v23, %v1292_v51  ;;  %v16921_v11 = vshll.u32 %v10746_v21, 16 }
 0x111   : > { %5377 = vrot.lane.b32.xlu0 %v8584_v6, %s9465_s8  ;;  %v1324_v6 = vor.u32 %v1323_v38, %v1320_v8  ;;  %v1268_v56 = vsel %vm9604_vm2, %v1263_v53, %v1267_v42  ;;  %v1334_v3 = vor.u32 %v1333_v29, %v1329_v33  ;;  %v1299_v8 = vrot.slane %v16878_v22, 5  ;;  %v10906_v38 = vld [vmem:[%s9559_s30 + $0x68] sm:$0x3] }
 0x112   : > { %v8588_v42 = vcombine.low %v1210_v50, %v1220_v10  ;;  %v1305_v29 = vrot.slane %v16880_v31, 5  ;;  %v8590_v36 = vcombine.low %v1258_v27, %v1268_v56  ;;  %v17479_v10 = vshll.u32 %v10877_v5, 16  ;;  %v10912_v31 = vpop.permute.xlu0 %5141 }
 0x113   : > { %v1325_v58 = vrot.slane %v1324_v6, 4  ;;  %v1335_v53 = vrot.slane %v1334_v3, 4  ;;  %v1309_v6 = vrot.slane %v16881_v16, 4  ;;  %v1300_v43 = vor.u32 %v1299_v8, %v1296_v37  ;;  %17480 = vst [vmem:[#allocation60_spill] sm:$0xff] %v10912_v31  ;;  %v10928_v37 = vpop.permute.xlu1 %5195 }
 0x114   : > { %5435 = vrot.lane.b32.xlu1 %v8589_v18, %s9466_s9  ;;  %v1315_v3 = vrot.slane %v17479_v10, 5  ;;  %v16886_v18 = vshrl.u32 %v10649_v15, 16  ;;  %v16890_v27 = vshll.u32 %v10656_v45, 16  ;;  %v16889_v23 = vshll.u32 %v10906_v38, 16  ;;  %17481 = vst [vmem:[#allocation61_spill] sm:$0xff] %v10928_v37 }
 0x115   : > { %5381 = vrot.lane.b32.xlu0 %v8586_v54, %s9465_s8  ;;  %v1330_v22 = vsel %vm9604_vm2, %v1325_v58, %v1329_v33  ;;  %v1340_v50 = vsel %vm9604_vm2, %v1335_v53, %v1339_v32  ;;  %v1310_v54 = vor.u32 %v1309_v6, %v1305_v29  ;;  %v1301_v59 = vrot.slane %v1300_v43, 4 }
 0x116   : > { %v8593_v16 = vcombine.low %v1330_v22, %v1340_v50  ;;  %v16884_v58 = vshll.u32 %v10649_v15, 16  ;;  %v16883_v32 = vshrl.u32 %v10656_v45, 16  ;;  %v1368_v43 = vrot.slane %v16886_v18, 4 }
 0x117   : > { %v1311_v33 = vrot.slane %v1310_v54, 4  ;;  %v1306_v51 = vsel %vm9604_vm2, %v1301_v59, %v1305_v29  ;;  %v16882_v56 = vshrl.u32 %v10664_v49, 16  ;;  %v10937_v59 = vld [vmem:[%s9559_s30 + $0x5c] sm:$0x3]  ;;  %v1387_v6 = vrot.slane %v16889_v23, 5 }
 0x118   : > { %5439 = vrot.lane.b32.xlu1 %v8591_v62, %s9466_s9  ;;  %v1371_v22 = vrot.slane %v16884_v58, 5  ;;  %v1381_v62 = vrot.slane %v16883_v32, 4  ;;  %v16885_v10 = vshll.u32 %v10664_v49, 16  ;;  %v10960_v58 = vld [vmem:[%s9559_s30 + $0x80] sm:$0x3]  ;;  %v16891_v18 = vshrl.u32 %v10679_v28, 16 }
 0x119   : > { %5433 = vrot.lane.b32.xlu0 %v8588_v42, %s9466_s9  ;;  %v1316_v8 = vsel %vm9604_vm2, %v1311_v33, %v1315_v3  ;;  %v1377_v42 = vrot.slane %v16890_v27, 5  ;;  %v1344_v54 = vrot.slane %v16882_v56, 4  ;;  %v16887_v3 = vshll.u32 %v10667_v13, 16  ;;  %v10946_v33 = vpop.permute.xlu0 %5193 }
 0x11a   : > { %v8592_v53 = vcombine.low %v1306_v51, %v1316_v8  ;;  %v1372_v29 = vor.u32 %v1371_v22, %v1368_v43  ;;  %17482 = vst [vmem:[#allocation62_spill] sm:$0xff] %v10946_v33  ;;  %v16888_v43 = vshrl.u32 %v10667_v13, 16  ;;  %v16893_v22 = vshll.u32 %v10937_v59, 16 }
 0x11b   : > { %v1382_v50 = vor.u32 %v1381_v62, %v1377_v42  ;;  %v1353_v62 = vrot.slane %v16887_v3, 5  ;;  %v16895_v27 = vshrl.u32 %v10682_v61, 16 }
 0x11c   : > { %5443 = vrot.lane.b32.xlu1 %v8593_v16, %s9466_s9  ;;  %v1373_v51 = vrot.slane %v1372_v29, 4  ;;  %v1357_v32 = vrot.slane %v16888_v43, 4  ;;  %v10962_v16 = vpop.permute.xlu1 %5199  ;;  %v16894_v43 = vshll.u32 %v10682_v61, 16 }
 0x11d   : > { %5437 = vrot.lane.b32.xlu0 %v8590_v36, %s9466_s9  ;;  %v1383_v8 = vrot.slane %v1382_v50, 4  ;;  %v1347_v36 = vrot.slane %v16885_v10, 5  ;;  %17483 = vst [vmem:[#allocation63_spill] sm:$0xff] %v10962_v16  ;;  %v1363_v10 = vrot.slane %v16893_v22, 5  ;;  %v16897_v22 = vshll.u32 %v10696_v24, 16 }
 0x11e   : > { %v1378_v56 = vsel %vm9604_vm2, %v1373_v51, %v1377_v42  ;;  %v1358_v42 = vor.u32 %v1357_v32, %v1353_v62  ;;  %v16892_v51 = vshll.u32 %v10679_v28, 16 }
 0x11f   : > { %v1388_v29 = vsel %vm9604_vm2, %v1383_v8, %v1387_v6  ;;  %v1348_v50 = vor.u32 %v1347_v36, %v1344_v54  ;;  %v16896_v6 = vshll.u32 %v10960_v58, 16  ;;  %v10976_v54 = vpop.permute.xlu0 %5197 }
 0x120   : > { %v8595_v3 = vcombine.low %v1378_v56, %v1388_v29  ;;  %17484 = vst [vmem:[#allocation64_spill] sm:$0xff] %v10976_v54  ;;  %v1359_v8 = vrot.slane %v1358_v42, 4  ;;  %v1419_v32 = vrot.slane %v16892_v51, 5  ;;  %v1425_v56 = vrot.slane %v16894_v43, 5  ;;  %v10996_v43 = vpop.permute.xlu1 %5203 }
 0x121   : > { %5441 = vrot.lane.b32.xlu0 %v8592_v53, %s9466_s9  ;;  %v1349_v23 = vrot.slane %v1348_v50, 4  ;;  %v1416_v53 = vrot.slane %v16891_v18, 4  ;;  %v1429_v29 = vrot.slane %v16895_v27, 4  ;;  %v1435_v50 = vrot.slane %v16896_v6, 5  ;;  %v10990_v18 = vld [vmem:[%s9559_s30 + $0x74] sm:$0x3] }
 0x122   : > { %5447 = vrot.lane.b32.xlu1 %v8595_v3, %s9466_s9  ;;  %v1364_v3 = vsel %vm9604_vm2, %v1359_v8, %v1363_v10  ;;  %v16898_v51 = vshrl.u32 %v10696_v24, 16  ;;  %17485 = vst [vmem:[#allocation65_spill] sm:$0xff] %v10996_v43  ;;  %v16900_v27 = vshrl.u32 %v10699_v9, 16  ;;  %v1395_v10 = vrot.slane %v16897_v22, 5 }
 0x123   : > { %v1354_v36 = vsel %vm9604_vm2, %v1349_v23, %v1353_v62  ;;  %v1420_v42 = vor.u32 %v1419_v32, %v1416_v53  ;;  %v1430_v23 = vor.u32 %v1429_v29, %v1425_v56  ;;  %v16899_v62 = vshll.u32 %v10699_v9, 16  ;;  %v11010_v29 = vpop.permute.xlu0 %5201 }
 0x124   : > { %v8594_v16 = vcombine.low %v1354_v36, %v1364_v3  ;;  %v1392_v54 = vrot.slane %v16898_v51, 4  ;;  %v16902_v53 = vshll.u32 %v10990_v18, 16  ;;  %v1405_v36 = vrot.slane %v16900_v27, 4  ;;  %17486 = vst [vmem:[#allocation66_spill] sm:$0xff] %v11010_v29  ;;  %v11022_v33 = vpop.permute.xlu1 %5207 }
 0x125   : > { %v1421_v6 = vrot.slane %v1420_v42, 4  ;;  %v1431_v8 = vrot.slane %v1430_v23, 4  ;;  %v1401_v32 = vrot.slane %v16899_v62, 5  ;;  %v11019_v23 = vld [vmem:[%s9559_s30 + $0x98] sm:$0x3]  ;;  %v16901_v62 = vshrl.u32 %v10705_v0, 16 }
 0x126   : > { %5445 = vrot.lane.b32.xlu0 %v8594_v16, %s9466_s9  ;;  %v1396_v42 = vor.u32 %v1395_v10, %v1392_v54  ;;  %v1411_v16 = vrot.slane %v16902_v53, 5  ;;  %17487 = vst [vmem:[#allocation67_spill] sm:$0xff] %v11019_v23  ;;  %17488 = vst [vmem:[#allocation68_spill] sm:$0xff] %v11022_v33  ;;  %v16903_v54 = vshll.u32 %v10705_v0, 16  ;;  %v16905_v10 = vshrl.u32 %v10708_v25, 16 }
 0x127   : > { %v1426_v3 = vsel %vm9604_vm2, %v1421_v6, %v1425_v56  ;;  %v1436_v22 = vsel %vm9604_vm2, %v1431_v8, %v1435_v50  ;;  %v1406_v51 = vor.u32 %v1405_v36, %v1401_v32  ;;  %v1464_v6 = vrot.slane %v16901_v62, 4  ;;  %v11069_v33 = vld [vmem:[%s9559_s30 + $0xb0] sm:$0x3] }
 0x128   : > { %v8597_v43 = vcombine.low %v1426_v3, %v1436_v22  ;;  %v1397_v27 = vrot.slane %v1396_v42, 4  ;;  %v16904_v56 = vshll.u32 %v10708_v25, 16  ;;  %v16907_v22 = vshll.u32 %v11019_v23, 16  ;;  %v11041_v42 = vld [vmem:[%s9559_s30 + $0x8c] sm:$0x3]  ;;  %17492 = vst [vmem:[#allocation72_spill] sm:$0xff] %v11069_v33 }
 0x129   : > { %v1407_v29 = vrot.slane %v1406_v51, 4  ;;  %v16906_v8 = vshrl.u32 %v10722_v63, 16  ;;  %v1467_v36 = vrot.slane %v16903_v54, 5  ;;  %17489 = vst [vmem:[#allocation69_spill] sm:$0xff] %v11041_v42 }
 0x12a   : > { %5451 = vrot.lane.b32.xlu1 %v8597_v43, %s9466_s9  ;;  %v1402_v50 = vsel %vm9604_vm2, %v1397_v27, %v1401_v32  ;;  %v1473_v3 = vrot.slane %v16904_v56, 5  ;;  %v11043_v43 = vpop.permute.xlu0 %5205  ;;  %v1477_v32 = vrot.slane %v16905_v10, 4  ;;  %v1483_v56 = vrot.slane %v16907_v22, 5  ;;  %v11056_v10 = vpop.permute.xlu1 %5211 }
 0x12b   : > { %v1412_v51 = vsel %vm9604_vm2, %v1407_v29, %v1411_v16  ;;  %17490 = vst [vmem:[#allocation70_spill] sm:$0xff] %v11043_v43  ;;  %v1468_v62 = vor.u32 %v1467_v36, %v1464_v6  ;;  %v1440_v53 = vrot.slane %v16906_v8, 4  ;;  %v16908_v29 = vshll.u32 %v10722_v63, 16  ;;  %17491 = vst [vmem:[#allocation71_spill] sm:$0xff] %v11056_v10 }
 0x12c   : > { %v8596_v27 = vcombine.low %v1402_v50, %v1412_v51  ;;  %v16910_v16 = vshll.u32 %v10725_v7, 16  ;;  %v1478_v54 = vor.u32 %v1477_v32, %v1473_v3  ;;  %v16909_v50 = vshrl.u32 %v10725_v7, 16 }
 0x12d   : > { %v16911_v51 = vshll.u32 %v11041_v42, 16  ;;  %v1469_v6 = vrot.slane %v1468_v62, 4  ;;  %v1443_v36 = vrot.slane %v16908_v29, 5  ;;  %v16913_v62 = vshrl.u32 %v10728_v34, 16 }
 0x12e   : > { %5449 = vrot.lane.b32.xlu0 %v8596_v27, %s9466_s9  ;;  %v1449_v8 = vrot.slane %v16910_v16, 5  ;;  %v1479_v37 = vrot.slane %v1478_v54, 4  ;;  %v1453_v27 = vrot.slane %v16909_v50, 4  ;;  %v11072_v10 = vpop.permute.xlu0 %5209  ;;  %v16912_v50 = vshll.u32 %v10728_v34, 16 }
 0x12f   : > { %v1474_v32 = vsel %vm9604_vm2, %v1469_v6, %v1473_v3  ;;  %v1444_v22 = vor.u32 %v1443_v36, %v1440_v53  ;;  %v1459_v43 = vrot.slane %v16911_v51, 5  ;;  %17493 = vst [vmem:[#allocation73_spill] sm:$0xff] %v11072_v10  ;;  %v16914_v16 = vshll.u32 %v10740_v1, 16 }
 0x130   : > { %v1484_v29 = vsel %vm9604_vm2, %v1479_v37, %v1483_v56  ;;  %v1454_v54 = vor.u32 %v1453_v27, %v1449_v8  ;;  %v1512_v6 = vrot.slane %v16913_v62, 4  ;;  %v16915_v36 = vshrl.u32 %v10740_v1, 16  ;;  %v11086_v27 = vpop.permute.xlu1 %5215 }
 0x131   : > { %v8599_v3 = vcombine.low %v1474_v32, %v1484_v29  ;;  %v1445_v53 = vrot.slane %v1444_v22, 4  ;;  %v1515_v10 = vrot.slane %v16912_v50, 5  ;;  %v1521_v37 = vrot.slane %v16914_v16, 5  ;;  %17494 = vst [vmem:[#allocation74_spill] sm:$0xff] %v11086_v27  ;;  %v11094_v32 = vld [vmem:[%s9559_s30 + $0xa4] sm:$0x3] }
 0x132   : > { %v1455_v51 = vrot.slane %v1454_v54, 4  ;;  %v16920_v56 = vshll.u32 %v11069_v33, 16  ;;  %v1525_v29 = vrot.slane %v16915_v36, 4  ;;  %v16919_v54 = vshrl.u32 %v10743_v19, 16 }
 0x133   : > { %5455 = vrot.lane.b32.xlu1 %v8599_v3, %s9466_s9  ;;  %v1450_v22 = vsel %vm9604_vm2, %v1445_v53, %v1449_v8  ;;  %v1516_v62 = vor.u32 %v1515_v10, %v1512_v6  ;;  %v16918_v53 = vshll.u32 %v10743_v19, 16  ;;  %v16922_v1 = vshrl.u32 %v10746_v21, 16 }
 0x134   : > { %v1460_v50 = vsel %vm9604_vm2, %v1455_v51, %v1459_v43  ;;  %v1531_v16 = vrot.slane %v16920_v56, 5  ;;  %v1526_v3 = vor.u32 %v1525_v29, %v1521_v37  ;;  %v1488_v8 = vrot.slane %v16919_v54, 4  ;;  %v11104_v36 = vpop.permute.xlu0 %5213 }
 0x135   : > { %v8598_v27 = vcombine.low %v1450_v22, %v1460_v50  ;;  %17495 = vst [vmem:[#allocation75_spill] sm:$0xff] %v11104_v36  ;;  %v1517_v31 = vrot.slane %v1516_v62, 4  ;;  %v16927_v10 = vshll.u32 %v11094_v32, 16  ;;  %v1491_v50 = vrot.slane %v16918_v53, 5  ;;  %v11119_v22 = vld [vmem:[%s9559_s30 + $0xc8] sm:$0x3] }
 0x136   : > { %v1527_v43 = vrot.slane %v1526_v3, 4  ;;  %v1497_v6 = vrot.slane %v16921_v11, 5  ;;  %v1501_v62 = vrot.slane %v16922_v1, 4  ;;  %17496 = vst [vmem:[#allocation76_spill] sm:$0xff] %v11119_v22  ;;  %v16928_v1 = vshll.u32 %v10773_v39, 16 }
 0x137   : > { %5453 = vrot.lane.b32.xlu0 %v8598_v27, %s9466_s9  ;;  %v1522_v51 = vsel %vm9604_vm2, %v1517_v31, %v1521_v37  ;;  %v1492_v3 = vor.u32 %v1491_v50, %v1488_v8  ;;  %v1507_v53 = vrot.slane %v16927_v10, 5  ;;  %v16926_v31 = vshrl.u32 %v10770_v2, 16 }
 0x138   : > { %v11121_v29 = vpop.permute.xlu1 %5219  ;;  %v1532_v27 = vsel %vm9604_vm2, %v1527_v43, %v1531_v16  ;;  %v1502_v56 = vor.u32 %v1501_v62, %v1497_v6  ;;  %v16925_v37 = vshll.u32 %v10770_v2, 16  ;;  %v16929_v36 = vshrl.u32 %v10773_v39, 16 }
 0x139   : > { %17497 = vst [vmem:[#allocation77_spill] sm:$0xff] %v11121_v29  ;;  %v8601_v54 = vcombine.low %v1522_v51, %v1532_v27  ;;  %v1493_v11 = vrot.slane %v1492_v3, 4  ;;  %v16933_v29 = vshll.u32 %v11119_v22, 16  ;;  %v1560_v8 = vrot.slane %v16926_v31, 4  ;;  %v11147_v3 = vld [vmem:[%s9559_s30 + $0xbc] sm:$0x3] }
 0x13a   : > { %v1503_v16 = vrot.slane %v1502_v56, 4  ;;  %v1563_v43 = vrot.slane %v16925_v37, 5  ;;  %v1569_v62 = vrot.slane %v16928_v1, 5  ;;  %v1573_v27 = vrot.slane %v16929_v36, 4  ;;  %17499 = vst [vmem:[#allocation79_spill] sm:$0xff] %v11147_v3 }
 0x13b   : > { %5459 = vrot.lane.b32.xlu1 %v8601_v54, %s9466_s9  ;;  %v1498_v51 = vsel %vm9604_vm2, %v1493_v11, %v1497_v6  ;;  %v1579_v37 = vrot.slane %v16933_v29, 5  ;;  %v17501_v11 = vshrl.u32 %v10786_v12, 16  ;;  %v16932_v1 = vshll.u32 %v10786_v12, 16 }
 0x13c   : > { %v1508_v56 = vsel %vm9604_vm2, %v1503_v16, %v1507_v53  ;;  %v1564_v54 = vor.u32 %v1563_v43, %v1560_v8  ;;  %v1574_v50 = vor.u32 %v1573_v27, %v1569_v62  ;;  %v16934_v36 = vshll.u32 %v10793_v41, 16 }
 0x13d   : > { %v11132_v21 = vpop.permute.xlu0 %5217  ;;  %v8600_v10 = vcombine.low %v1498_v51, %v1508_v56  ;;  %v1536_v6 = vrot.slane %v17501_v11, 4  ;;  %v16935_v39 = vshrl.u32 %v10793_v41, 16  ;;  %v16936_v53 = vshll.u32 %v11147_v3, 16 }
 0x13e   : > { %17498 = vst [vmem:[#allocation78_spill] sm:$0xff] %v11132_v21  ;;  %v1565_v21 = vrot.slane %v1564_v54, 4  ;;  %v1575_v16 = vrot.slane %v1574_v50, 4  ;;  %v1539_v8 = vrot.slane %v16932_v1, 5  ;;  %v1545_v27 = vrot.slane %v16934_v36, 5 }
 0x13f   : > { %5457 = vrot.lane.b32.xlu0 %v8600_v10, %s9466_s9  ;;  %v1549_v56 = vrot.slane %v16935_v39, 4  ;;  %v1555_v11 = vrot.slane %v16936_v53, 5  ;;  %v1641_v36 = vrot.slane %v10659_v55, 5  ;;  %v8220_v39 = vrot.slane %v10599_v35, 9 }
 0x140   : > { %v1570_v51 = vsel %vm9604_vm2, %v1565_v21, %v1569_v62  ;;  %v1580_v10 = vsel %vm9604_vm2, %v1575_v16, %v1579_v37  ;;  %v1540_v50 = vor.u32 %v1539_v8, %v1536_v6  ;;  %v1638_v21 = vrot.slane %v10586_v48, 5 }
 0x141   : > { %v8603_v1 = vcombine.low %v1570_v51, %v1580_v10  ;;  %v1550_v29 = vor.u32 %v1549_v56, %v1545_v27  ;;  %v1634_v8 = vrot.slane %v10753_v20, 5  ;;  %v17506_v56 = vshll.u32 %v10586_v48, 16 }
 0x142   : > { %v11153_v31 = vpop.permute.xlu1 %5223  ;;  %v1541_v62 = vrot.slane %v1540_v50, 4  ;;  %v1640_v16 = vrot.slane %v1638_v21, 4 }
 0x143   : > { %17500 = vst [vmem:[#allocation80_spill] sm:$0xff] %v11153_v31  ;;  %5463 = vrot.lane.b32.xlu1 %v8603_v1, %s9466_s9  ;;  %v1551_v37 = vrot.slane %v1550_v29, 4  ;;  %v11193_v10 = vrot.slane %v17506_v56, 6 }
 0x144   : > { %v1546_v50 = vsel %vm9604_vm2, %v1541_v62, %v1545_v27  ;;  %v1642_v29 = vsel %vm10020_vm5, %v1640_v16, %v1641_v36  ;;  %v17510_v62 = vshll.u32 %v10659_v55, 16  ;;  %v1655_v36 = vrot.slane %v10778_v60, 5 }
 0x145   : > { %17507 = vst [vmem:[#allocation85_spill] sm:$0xff] %v11193_v10  ;;  %v1556_v1 = vsel %vm9604_vm2, %v1551_v37, %v1555_v11  ;;  %v17508_v10 = vld [vmem:[#allocation27_spill] sm:$0xff]  ;;  %v17511_v37 = vld [vmem:[#allocation29_spill] sm:$0xff] }
 0x146   : > { %v11172_v54 = vpop.permute.xlu1 %5275  ;;  %v1652_v35 = vrot.slane %v17508_v10, 5  ;;  %v11211_v11 = vrot.slane %v17510_v62, 6  ;;  %v8222_v16 = vrot.slane %v17511_v37, 9 }
 0x147   : > { %v11164_v43 = vpop.permute.xlu0 %5221  ;;  %17503 = vst [vmem:[#allocation82_spill] sm:$0xff] %v11172_v54  ;;  %v1631_v54 = vrot.slane %v10602_v47, 5 }
 0x148   : > { %17502 = vst [vmem:[#allocation81_spill] sm:$0xff] %v11164_v43  ;;  %v8221_v43 = vrot.slane %v10583_v46, 9  ;;  %v1654_v55 = vrot.slane %v1652_v35, 4 }
 0x149   : > { %v1633_v53 = vrot.slane %v1631_v54, 4 }
 0x14a   : > { %v1639_v6 = vsel %vm10020_vm5, %v8221_v43, %v1638_v21  ;;  %v11189_v51 = vpop.permute.xlu1 %5279  ;;  %v1632_v43 = vsel %vm10020_vm5, %v8220_v39, %v1631_v54  ;;  %v8223_v21 = vrot.slane %v10607_v4, 9  ;;  %v17512_v39 = vld [vmem:[#allocation30_spill] sm:$0xff] }
 0x14b   : > { %v11183_v31 = vpop.permute.xlu0 %5273  ;;  %17505 = vst [vmem:[#allocation84_spill] sm:$0xff] %v11189_v51  ;;  %v8602_v51 = vcombine.low %v1546_v50, %v1556_v1  ;;  %v1635_v56 = vsel %vm10020_vm5, %v1633_v53, %v1634_v8  ;;  %v1645_v54 = vrot.slane %v17512_v39, 5  ;;  %v1648_v8 = vrot.slane %v10807_v26, 5 }
 0x14c   : > { %17504 = vst [vmem:[#allocation83_spill] sm:$0xff] %v11183_v31  ;;  %v8605_v31 = vcombine.low %v1639_v6, %v1642_v29  ;;  %v8604_v53 = vcombine.low %v1632_v43, %v1635_v56  ;;  %v1653_v6 = vsel %vm10020_vm5, %v8223_v21, %v1652_v35  ;;  %v17514_v50 = vshll.u32 %v10602_v47, 16 }
 0x14d   : > { %5461 = vrot.lane.b32.xlu0 %v8602_v51, %s9466_s9  ;;  %v1646_v29 = vsel %vm10020_vm5, %v8222_v16, %v1645_v54  ;;  %v1647_v62 = vrot.slane %v1645_v54, 4  ;;  %v8225_v51 = vrot.slane %v10629_v57, 9  ;;  %v1666_v43 = vrot.slane %v10632_v40, 5 }
 0x14e   : > { %v11216_v14 = vpop.permute.xlu1 %5283  ;;  %5515 = vrot.lane.b32.xlu1 %v8605_v31, %s9467_s10  ;;  %v11225_v1 = vrot.slane %v17514_v50, 6  ;;  %v1656_v31 = vsel %vm10020_vm5, %v1654_v55, %v1655_v36  ;;  %v1669_v21 = vrot.slane %v10845_v17, 5  ;;  %v8224_v35 = vrot.slane %v10638_v52, 9 }
 0x14f   : > { %v11207_v27 = vpop.permute.xlu0 %5277  ;;  %17513 = vst [vmem:[#allocation29_spill] sm:$0xff] %v11216_v14  ;;  %v8607_v14 = vcombine.low %v1653_v6, %v1656_v31  ;;  %v1649_v50 = vsel %vm10020_vm5, %v1647_v62, %v1648_v8  ;;  %v1659_v16 = vrot.slane %v10646_v30, 5  ;;  %v1662_v54 = vrot.slane %v10877_v5, 5 }
 0x150   : > { %17509 = vst [vmem:[#allocation27_spill] sm:$0xff] %v11207_v27  ;;  %v17517_v36 = vshll.u32 %v10753_v20, 16  ;;  %v8606_v57 = vcombine.low %v1646_v29, %v1649_v50  ;;  %v1668_v6 = vrot.slane %v1666_v43, 4  ;;  %v17518_v31 = vshll.u32 %v17508_v10, 16 }
 0x151   : > { %5513 = vrot.lane.b32.xlu0 %v8604_v53, %s9467_s10  ;;  %v1660_v62 = vsel %vm10020_vm5, %v8224_v35, %v1659_v16  ;;  %v1680_v29 = vrot.slane %v10656_v45, 5  ;;  %v1673_v35 = vrot.slane %v10667_v13, 5 }
 0x152   : > { %v11241_v27 = vpop.permute.xlu1 %5287  ;;  %v11245_v55 = vrot.slane %v17517_v36, 6  ;;  %v11252_v8 = vrot.slane %v17518_v31, 6  ;;  %5519 = vrot.lane.b32.xlu1 %v8607_v14, %s9467_s10  ;;  %v8227_v36 = vrot.slane %v10649_v15, 9  ;;  %v1670_v53 = vsel %vm10020_vm5, %v1668_v6, %v1669_v21 }
 0x153   : > { %v11235_v56 = vpop.permute.xlu0 %5281  ;;  %17516 = vst [vmem:[#allocation86_spill] sm:$0xff] %v11241_v27  ;;  %v1661_v27 = vrot.slane %v1659_v16, 4  ;;  %v1676_v16 = vrot.slane %v10937_v59, 5  ;;  %v17521_v21 = vshll.u32 %v10778_v60, 16 }
 0x154   : > { %17515 = vst [vmem:[#allocation30_spill] sm:$0xff] %v11235_v56  ;;  %v1667_v56 = vsel %vm10020_vm5, %v8225_v51, %v1666_v43  ;;  %v1683_v51 = vrot.slane %v10906_v38, 5  ;;  %v8226_v43 = vrot.slane %v10664_v49, 9 }
 0x155   : > { %v8609_v31 = vcombine.low %v1667_v56, %v1670_v53  ;;  %v1663_v14 = vsel %vm10020_vm5, %v1661_v27, %v1662_v54  ;;  %v11273_v6 = vrot.slane %v17521_v21, 6  ;;  %5517 = vrot.lane.b32.xlu0 %v8606_v57, %s9467_s10  ;;  %v1682_v56 = vrot.slane %v1680_v29, 4 }
 0x156   : > { %v11269_v15 = vpop.permute.xlu1 %5291  ;;  %v8608_v52 = vcombine.low %v1660_v62, %v1663_v14  ;;  %v17522_v53 = vshll.u32 %v17512_v39, 16  ;;  %v1674_v54 = vsel %vm10020_vm5, %v8226_v43, %v1673_v35  ;;  %v8229_v21 = vrot.slane %v10679_v28, 9 }
 0x157   : > { %v11263_v50 = vpop.permute.xlu0 %5285  ;;  %17520 = vst [vmem:[#allocation88_spill] sm:$0xff] %v11269_v15  ;;  %5523 = vrot.lane.b32.xlu1 %v8609_v31, %s9467_s10  ;;  %v1675_v15 = vrot.slane %v1673_v35, 4  ;;  %v1684_v57 = vsel %vm10020_vm5, %v1682_v56, %v1683_v51  ;;  %v1694_v62 = vrot.slane %v10682_v61, 5  ;;  %v1687_v43 = vrot.slane %v10699_v9, 5 }
 0x158   : > { %17519 = vst [vmem:[#allocation87_spill] sm:$0xff] %v11263_v50  ;;  %v1681_v50 = vsel %vm10020_vm5, %v8227_v36, %v1680_v29  ;;  %v11280_v27 = vrot.slane %v17522_v53, 6  ;;  %v1697_v36 = vrot.slane %v10960_v58, 5  ;;  %v8228_v29 = vrot.slane %v10696_v24, 9 }
 0x159   : > { %v8611_v53 = vcombine.low %v1681_v50, %v1684_v57  ;;  %v1677_v31 = vsel %vm10020_vm5, %v1675_v15, %v1676_v16  ;;  %v1690_v35 = vrot.slane %v10990_v18, 5  ;;  %v17525_v51 = vshll.u32 %v10807_v26, 16  ;;  %5521 = vrot.lane.b32.xlu0 %v8608_v52, %s9467_s10 }
 0x15a   : > { %v11297_v28 = vpop.permute.xlu1 %5295  ;;  %v8610_v49 = vcombine.low %v1674_v54, %v1677_v31  ;;  %v1696_v50 = vrot.slane %v1694_v62, 4  ;;  %v17526_v57 = vshll.u32 %v10632_v40, 16  ;;  %v17527_v16 = vshll.u32 %v10845_v17, 16 }
 0x15b   : > { %v11291_v14 = vpop.permute.xlu0 %5289  ;;  %17524 = vst [vmem:[#allocation90_spill] sm:$0xff] %v11297_v28  ;;  %v11301_v56 = vrot.slane %v17525_v51, 6  ;;  %5527 = vrot.lane.b32.xlu1 %v8611_v53, %s9467_s10  ;;  %v1688_v51 = vsel %vm10020_vm5, %v8228_v29, %v1687_v43  ;;  %v1689_v28 = vrot.slane %v1687_v43, 4  ;;  %v8231_v54 = vrot.slane %v10705_v0, 9 }
 0x15c   : > { %17523 = vst [vmem:[#allocation89_spill] sm:$0xff] %v11291_v14  ;;  %v1695_v14 = vsel %vm10020_vm5, %v8229_v21, %v1694_v62  ;;  %v11308_v15 = vrot.slane %v17526_v57, 6  ;;  %v11312_v24 = vrot.slane %v17527_v16, 6  ;;  %v1698_v52 = vsel %vm10020_vm5, %v1696_v50, %v1697_v36 }
 0x15d   : > { %v1708_v21 = vrot.slane %v10708_v25, 5  ;;  %v1711_v62 = vrot.slane %v11019_v23, 5  ;;  %v8613_v57 = vcombine.low %v1695_v14, %v1698_v52  ;;  %v1691_v16 = vsel %vm10020_vm5, %v1689_v28, %v1690_v35  ;;  %5525 = vrot.lane.b32.xlu0 %v8610_v49, %s9467_s10 }
 0x15e   : > { %v8230_v53 = vrot.slane %v10722_v63, 9  ;;  %v1701_v29 = vrot.slane %v10725_v7, 5  ;;  %v11328_v43 = vpop.permute.xlu1 %5299  ;;  %v8612_v36 = vcombine.low %v1688_v51, %v1691_v16  ;;  %v1704_v23 = vrot.slane %v11041_v42, 5  ;;  %v17532_v16 = vld [vmem:[#allocation46_spill] sm:$0xff]  ;;  %v17534_v42 = vld [vmem:[#allocation48_spill] sm:$0xff] }
 0x15f   : > { %v11322_v31 = vpop.permute.xlu0 %5293  ;;  %17529 = vst [vmem:[#allocation92_spill] sm:$0xff] %v11328_v43  ;;  %v1709_v50 = vsel %vm10020_vm5, %v8231_v54, %v1708_v21  ;;  %v1710_v0 = vrot.slane %v1708_v21, 4  ;;  %v17530_v14 = vshll.u32 %v10646_v30, 16  ;;  %v17531_v28 = vshll.u32 %v10877_v5, 16  ;;  %5531 = vrot.lane.b32.xlu1 %v8613_v57, %s9467_s10 }
 0x160   : > { %17528 = vst [vmem:[#allocation91_spill] sm:$0xff] %v11322_v31  ;;  %v1702_v49 = vsel %vm10020_vm5, %v8230_v53, %v1701_v29  ;;  %v1703_v51 = vrot.slane %v1701_v29, 4  ;;  %v8233_v21 = vrot.slane %v10728_v34, 9  ;;  %v1722_v43 = vrot.slane %v17532_v16, 5 }
 0x161   : > { %v11336_v52 = vrot.slane %v17530_v14, 6  ;;  %v11340_v35 = vrot.slane %v17531_v28, 6  ;;  %v1712_v54 = vsel %vm10020_vm5, %v1710_v0, %v1711_v62  ;;  %v1725_v14 = vrot.slane %v11069_v33, 5  ;;  %5529 = vrot.lane.b32.xlu0 %v8612_v36, %s9467_s10 }
 0x162   : > { %v8615_v63 = vcombine.low %v1709_v50, %v1712_v54  ;;  %v1705_v28 = vsel %vm10020_vm5, %v1703_v51, %v1704_v23  ;;  %v8232_v57 = vrot.slane %v10743_v19, 9  ;;  %v1715_v53 = vrot.slane %v17534_v42, 5  ;;  %v11356_v29 = vpop.permute.xlu1 %5303 }
 0x163   : > { %v11350_v31 = vpop.permute.xlu0 %5297  ;;  %17535 = vst [vmem:[#allocation48_spill] sm:$0xff] %v11356_v29  ;;  %v8614_v0 = vcombine.low %v1702_v49, %v1705_v28  ;;  %v1723_v62 = vsel %vm10020_vm5, %v8233_v21, %v1722_v43  ;;  %v1724_v34 = vrot.slane %v1722_v43, 4  ;;  %v1718_v33 = vrot.slane %v11094_v32, 5  ;;  %v17538_v28 = vld [vmem:[#allocation51_spill] sm:$0xff] }
 0x164   : > { %17533 = vst [vmem:[#allocation46_spill] sm:$0xff] %v11350_v31  ;;  %v17536_v50 = vshll.u32 %v10656_v45, 16  ;;  %v17537_v23 = vshll.u32 %v10906_v38, 16  ;;  %5535 = vrot.lane.b32.xlu1 %v8615_v63, %s9467_s10  ;;  %v1716_v36 = vsel %vm10020_vm5, %v8232_v57, %v1715_v53  ;;  %v1717_v49 = vrot.slane %v1715_v53, 4 }
 0x165   : > { %v1726_v21 = vsel %vm10020_vm5, %v1724_v34, %v1725_v14  ;;  %v8235_v43 = vrot.slane %v10770_v2, 9  ;;  %v1736_v31 = vrot.slane %v17538_v28, 5  ;;  %v8234_v63 = vrot.slane %v10786_v12, 9  ;;  %5533 = vrot.lane.b32.xlu0 %v8614_v0, %s9467_s10 }
 0x166   : > { %v11364_v54 = vrot.slane %v17536_v50, 6  ;;  %v11368_v51 = vrot.slane %v17537_v23, 6  ;;  %v1739_v50 = vrot.slane %v11119_v22, 5  ;;  %v8617_v19 = vcombine.low %v1723_v62, %v1726_v21  ;;  %v11384_v53 = vpop.permute.xlu1 %5355 }
 0x167   : > { %v11378_v29 = vpop.permute.xlu0 %5301  ;;  %v1719_v23 = vsel %vm10020_vm5, %v1717_v49, %v1718_v33  ;;  %v1729_v57 = vrot.slane %v10793_v41, 5  ;;  %17540 = vst [vmem:[#allocation93_spill] sm:$0xff] %v11384_v53  ;;  %v1737_v14 = vsel %vm10020_vm5, %v8235_v43, %v1736_v31  ;;  %v1738_v2 = vrot.slane %v1736_v31, 4 }
 0x168   : > { %17539 = vst [vmem:[#allocation51_spill] sm:$0xff] %v11378_v29  ;;  %v8616_v34 = vcombine.low %v1716_v36, %v1719_v23  ;;  %v1732_v29 = vrot.slane %v11147_v3, 5  ;;  %v17541_v62 = vshll.u32 %v10667_v13, 16  ;;  %v17542_v33 = vshll.u32 %v10937_v59, 16  ;;  %5539 = vrot.lane.b32.xlu1 %v8617_v19, %s9467_s10 }
 0x169   : > { %v1730_v0 = vsel %vm10020_vm5, %v8234_v63, %v1729_v57  ;;  %v1731_v36 = vrot.slane %v1729_v57, 4  ;;  %v1740_v43 = vsel %vm10020_vm5, %v1738_v2, %v1739_v50  ;;  %v17543_v31 = vshrl.u32 %v10583_v46, 16  ;;  %v11414_v63 = vld [vmem:[%s9559_s30 + $0x20] sm:$0x3] }
 0x16a   : > { %v11392_v21 = vrot.slane %v17541_v62, 6  ;;  %v11396_v49 = vrot.slane %v17542_v33, 6  ;;  %v17544_v53 = vshll.u32 %v10583_v46, 16  ;;  %v17545_v3 = vshrl.u32 %v10586_v48, 16  ;;  %v17547_v2 = vld [vmem:[#allocation25_spill] sm:$0xff]  ;;  %5537 = vrot.lane.b32.xlu0 %v8616_v34, %s9467_s10 }
 0x16b   : > { %v1756_v23 = vrot.slane %v17543_v31, 5  ;;  %v11409_v33 = vpop.permute.xlu0 %5353  ;;  %v8619_v41 = vcombine.low %v1737_v14, %v1740_v43  ;;  %v1733_v19 = vsel %vm10020_vm5, %v1731_v36, %v1732_v29  ;;  %v1765_v57 = vshrl.u32 %v11414_v63, 16  ;;  %v11419_v31 = vpop.permute.xlu1 %5359 }
 0x16c   : > { %v1757_v62 = vrot.slane %v17544_v53, 6  ;;  %v1760_v12 = vrot.slane %v17545_v3, 5  ;;  %17546 = vst [vmem:[#allocation94_spill] sm:$0xff] %v11409_v33  ;;  %v17548_v50 = vshrl.u32 %v17547_v2, 16  ;;  %17549 = vst [vmem:[#allocation25_spill] sm:$0xff] %v11419_v31  ;;  %v8618_v46 = vcombine.low %v1730_v0, %v1733_v19  ;;  %v17550_v3 = vld [vmem:[#allocation85_spill] sm:$0xff] }
 0x16d   : > { %v17551_v14 = vshll.u32 %v17547_v2, 16  ;;  %v17552_v29 = vshll.u32 %v10682_v61, 16  ;;  %5543 = vrot.lane.b32.xlu1 %v8619_v41, %s9467_s10  ;;  %v1767_v33 = vrot.slane %v1765_v57, 5  ;;  %v1750_v31 = vshrl.u32 %v10753_v20, 16 }
 0x16e   : > { %v1741_v22 = vrot.slane %v17548_v50, 5  ;;  %v1758_v48 = vor.u32 %v1757_v62, %v1756_v23  ;;  %v1762_v53 = vor.u32 %v17550_v3, %v1760_v12  ;;  %v17553_v50 = vshrl.u32 %v10602_v47, 16  ;;  %5541 = vrot.lane.b32.xlu0 %v8618_v46, %s9467_s10 }
 0x16f   : > { %v1742_v43 = vrot.slane %v17551_v14, 6  ;;  %v11427_v36 = vrot.slane %v17552_v29, 6  ;;  %v17554_v34 = vshll.u32 %v10960_v58, 16  ;;  %v11437_v19 = vpop.permute.xlu0 %5357  ;;  %v1769_v2 = vor.u32 %v11211_v11, %v1767_v33  ;;  %v11443_v14 = vpop.permute.xlu1 %5363 }
 0x170   : > { %v1745_v44 = vrot.slane %v17553_v50, 5  ;;  %v1759_v12 = vrot.slane %v1758_v48, 4  ;;  %v1764_v23 = vrot.slane %v1762_v53, 4  ;;  %17555 = vst [vmem:[#allocation85_spill] sm:$0xff] %v11437_v19  ;;  %v1752_v41 = vrot.slane %v1750_v31, 5  ;;  %17557 = vst [vmem:[#allocation95_spill] sm:$0xff] %v11443_v14 }
 0x171   : > { %v11435_v0 = vrot.slane %v17554_v34, 6  ;;  %v1743_v62 = vor.u32 %v1742_v43, %v1741_v22  ;;  %v17556_v57 = vshrl.u32 %v10607_v4, 16  ;;  %v17559_v22 = vshll.u32 %v10607_v4, 16  ;;  %v11966_v14 = vld [vmem:[%s9559_s30 + $0x90] sm:$0xf] }
 0x172   : > { %v1747_v3 = vor.u32 %v11225_v1, %v1745_v44  ;;  %v1763_v29 = vsel %vm10174_vm8, %v1759_v12, %v1762_v53  ;;  %v17560_v50 = vshrl.u32 %v17508_v10, 16  ;;  %v1770_v44 = vsel %vm10174_vm8, %v1764_v23, %v1769_v2  ;;  %17674 = vst [vmem:[#allocation119_spill] sm:$0xff] %v11966_v14  ;;  %v12012_v19 = vld [vmem:[%s9559_s30 + $0xac] sm:$0xf] }
 0x173   : > { %v1786_v47 = vrot.slane %v17556_v57, 5  ;;  %v1744_v48 = vrot.slane %v1743_v62, 4  ;;  %v1787_v43 = vrot.slane %v17559_v22, 6  ;;  %v1754_v33 = vor.u32 %v11245_v55, %v1752_v41  ;;  %17684 = vst [vmem:[#allocation125_spill] sm:$0xff] %v12012_v19 }
 0x174   : > { %v1790_v11 = vrot.slane %v17560_v50, 5  ;;  %v1749_v1 = vrot.slane %v1747_v3, 4  ;;  %v1795_v31 = vshrl.u32 %v10778_v60, 16  ;;  %v8621_v34 = vcombine.low %v1763_v29, %v1770_v44  ;;  %v11476_v50 = vpop.permute.xlu1 %5367 }
 0x175   : > { %v1748_v46 = vsel %vm10174_vm8, %v1744_v48, %v1747_v3  ;;  %v1788_v53 = vor.u32 %v1787_v43, %v1786_v47  ;;  %v17561_v62 = vshrl.u32 %v17511_v37, 16  ;;  %v17562_v23 = vshll.u32 %v17511_v37, 16  ;;  %17566 = vst [vmem:[#allocation97_spill] sm:$0xff] %v11476_v50 }
 0x176   : > { %v1792_v12 = vor.u32 %v11252_v8, %v1790_v11  ;;  %v1755_v4 = vsel %vm10174_vm8, %v1749_v1, %v1754_v33  ;;  %v1797_v10 = vrot.slane %v1795_v31, 5  ;;  %5595 = vrot.lane.b32.xlu1 %v8621_v34, %s9468_s11  ;;  %v17563_v3 = vshrl.u32 %v17512_v39, 16  ;;  %v11468_v8 = vpop.permute.xlu0 %5361  ;;  %v17568_v33 = vld [vmem:[#allocation32_spill] sm:$0xff] }
 0x177   : > { %v1771_v57 = vrot.slane %v17561_v62, 5  ;;  %v1772_v2 = vrot.slane %v17562_v23, 6  ;;  %v8620_v60 = vcombine.low %v1748_v46, %v1755_v4  ;;  %v1789_v55 = vrot.slane %v1788_v53, 4  ;;  %17564 = vst [vmem:[#allocation96_spill] sm:$0xff] %v11468_v8  ;;  %v11979_v8 = vld [vmem:[%s9559_s30 + $0xb4] sm:$0xf] }
 0x178   : > { %v1794_v41 = vrot.slane %v1792_v12, 4  ;;  %v1775_v47 = vrot.slane %v17563_v3, 5  ;;  %v17565_v29 = vshll.u32 %v10699_v9, 16  ;;  %v1799_v22 = vor.u32 %v11273_v6, %v1797_v10  ;;  %17678 = vst [vmem:[#allocation121_spill] sm:$0xff] %v11979_v8 }
 0x179   : > { %v1773_v43 = vor.u32 %v1772_v2, %v1771_v57  ;;  %v1780_v37 = vshrl.u32 %v10807_v26, 16  ;;  %v17567_v11 = vshll.u32 %v10990_v18, 16  ;;  %5593 = vrot.lane.b32.xlu0 %v8620_v60, %s9468_s11  ;;  %v1793_v39 = vsel %vm10174_vm8, %v1789_v55, %v1792_v12  ;;  %v17572_v55 = vld [vmem:[#allocation33_spill] sm:$0xff] }
 0x17a   : > { %v11472_v48 = vrot.slane %v17565_v29, 6  ;;  %v1777_v1 = vor.u32 %v11280_v27, %v1775_v47  ;;  %v17569_v31 = vshrl.u32 %v17568_v33, 16  ;;  %v1800_v6 = vsel %vm10174_vm8, %v1794_v41, %v1799_v22 }
 0x17b   : > { %v11480_v44 = vrot.slane %v17567_v11, 6  ;;  %v1774_v26 = vrot.slane %v1773_v43, 4  ;;  %v1782_v46 = vrot.slane %v1780_v37, 5  ;;  %v17570_v53 = vshll.u32 %v17568_v33, 16  ;;  %v11506_v37 = vpop.permute.xlu0 %5365 }
 0x17c   : > { %v1816_v34 = vrot.slane %v17569_v31, 5  ;;  %v8623_v10 = vcombine.low %v1793_v39, %v1800_v6  ;;  %v1779_v62 = vrot.slane %v1777_v1, 4  ;;  %v17571_v57 = vshrl.u32 %v10632_v40, 16  ;;  %17576 = vst [vmem:[#allocation32_spill] sm:$0xff] %v11506_v37 }
 0x17d   : > { %v1817_v4 = vrot.slane %v17570_v53, 6  ;;  %v1825_v12 = vshrl.u32 %v10845_v17, 16  ;;  %v1778_v27 = vsel %vm10174_vm8, %v1774_v26, %v1777_v1  ;;  %v1784_v2 = vor.u32 %v11301_v56, %v1782_v46  ;;  %v17579_v26 = vld [vmem:[#allocation67_spill] sm:$0xff] }
 0x17e   : > { %v1820_v23 = vrot.slane %v17571_v57, 5  ;;  %v17573_v41 = vshrl.u32 %v17572_v55, 16  ;;  %5599 = vrot.lane.b32.xlu1 %v8623_v10, %s9468_s11  ;;  %v17574_v22 = vshll.u32 %v17572_v55, 16  ;;  %v17575_v43 = vshrl.u32 %v10646_v30, 16 }
 0x17f   : > { %v1818_v60 = vor.u32 %v1817_v4, %v1816_v34  ;;  %v1827_v29 = vrot.slane %v1825_v12, 5  ;;  %v17577_v11 = vshll.u32 %v10708_v25, 16  ;;  %v1785_v39 = vsel %vm10174_vm8, %v1779_v62, %v1784_v2 }
 0x180   : > { %v1801_v3 = vrot.slane %v17573_v41, 5  ;;  %v1822_v47 = vor.u32 %v11308_v15, %v1820_v23  ;;  %v1802_v40 = vrot.slane %v17574_v22, 6  ;;  %v1805_v17 = vrot.slane %v17575_v43, 5  ;;  %v11515_v15 = vpop.permute.xlu1 %5371  ;;  %v17581_v23 = vld [vmem:[#allocation35_spill] sm:$0xff] }
 0x181   : > { %v11510_v56 = vrot.slane %v17577_v11, 6  ;;  %v1819_v1 = vrot.slane %v1818_v60, 4  ;;  %v1810_v33 = vshrl.u32 %v10877_v5, 16  ;;  %17578 = vst [vmem:[#allocation33_spill] sm:$0xff] %v11515_v15  ;;  %v8622_v31 = vcombine.low %v1778_v27, %v1785_v39  ;;  %v11540_v11 = vpop.permute.xlu0 %5369 }
 0x182   : > { %v1824_v34 = vrot.slane %v1822_v47, 4  ;;  %v1829_v6 = vor.u32 %v11312_v24, %v1827_v29  ;;  %v1803_v30 = vor.u32 %v1802_v40, %v1801_v3  ;;  %v17580_v46 = vshll.u32 %v17579_v26, 16  ;;  %v17585_v40 = vld [vmem:[#allocation37_spill] sm:$0xff]  ;;  %17587 = vst [vmem:[#allocation67_spill] sm:$0xff] %v11540_v11 }
 0x183   : > { %v1823_v4 = vsel %vm10174_vm8, %v1819_v1, %v1822_v47  ;;  %v1807_v10 = vor.u32 %v11336_v52, %v1805_v17  ;;  %v1812_v62 = vrot.slane %v1810_v33, 5  ;;  %5597 = vrot.lane.b32.xlu0 %v8622_v31, %s9468_s11  ;;  %v17582_v12 = vshrl.u32 %v17581_v23, 16 }
 0x184   : > { %v11520_v53 = vrot.slane %v17580_v46, 6  ;;  %v1830_v5 = vsel %vm10174_vm8, %v1824_v34, %v1829_v6  ;;  %v1804_v57 = vrot.slane %v1803_v30, 4  ;;  %v17583_v27 = vshll.u32 %v17581_v23, 16  ;;  %v11550_v34 = vpop.permute.xlu1 %5375 }
 0x185   : > { %v1846_v24 = vrot.slane %v17582_v12, 5  ;;  %v8625_v60 = vcombine.low %v1823_v4, %v1830_v5  ;;  %v1809_v55 = vrot.slane %v1807_v10, 4  ;;  %v1814_v41 = vor.u32 %v11340_v35, %v1812_v62  ;;  %17590 = vst [vmem:[#allocation35_spill] sm:$0xff] %v11550_v34 }
 0x186   : > { %v1847_v2 = vrot.slane %v17583_v27, 6  ;;  %v17584_v3 = vshrl.u32 %v10656_v45, 16  ;;  %v1808_v47 = vsel %vm10174_vm8, %v1804_v57, %v1807_v10  ;;  %v1855_v22 = vshrl.u32 %v10906_v38, 16  ;;  %v17592_v57 = vld [vmem:[#allocation69_spill] sm:$0xff] }
 0x187   : > { %v17586_v43 = vshrl.u32 %v17585_v40, 16  ;;  %5603 = vrot.lane.b32.xlu1 %v8625_v60, %s9468_s11  ;;  %v1815_v39 = vsel %vm10174_vm8, %v1809_v55, %v1814_v41  ;;  %v17588_v45 = vshll.u32 %v17585_v40, 16  ;;  %v17589_v33 = vshrl.u32 %v10667_v13, 16  ;;  %v17594_v60 = vld [vmem:[#allocation38_spill] sm:$0xff] }
 0x188   : > { %v1850_v52 = vrot.slane %v17584_v3, 5  ;;  %v1848_v29 = vor.u32 %v1847_v2, %v1846_v24  ;;  %v8624_v38 = vcombine.low %v1808_v47, %v1815_v39  ;;  %v1857_v30 = vrot.slane %v1855_v22, 5 }
 0x189   : > { %v1831_v17 = vrot.slane %v17586_v43, 5  ;;  %v1832_v1 = vrot.slane %v17588_v45, 6  ;;  %v1835_v31 = vrot.slane %v17589_v33, 5  ;;  %v1840_v46 = vshrl.u32 %v10937_v59, 16  ;;  %v11582_v33 = vpop.permute.xlu1 %5379 }
 0x18a   : > { %v1852_v35 = vor.u32 %v11364_v54, %v1850_v52  ;;  %v1849_v6 = vrot.slane %v1848_v29, 4  ;;  %v17591_v4 = vshll.u32 %v10725_v7, 16  ;;  %v17593_v23 = vshll.u32 %v17592_v57, 16  ;;  %5601 = vrot.lane.b32.xlu0 %v8624_v38, %s9468_s11  ;;  %17601 = vst [vmem:[#allocation69_spill] sm:$0xff] %v11582_v33 }
 0x18b   : > { %v1833_v5 = vor.u32 %v1832_v1, %v1831_v17  ;;  %v1837_v54 = vor.u32 %v11392_v21, %v1835_v31  ;;  %v1859_v24 = vor.u32 %v11368_v51, %v1857_v30  ;;  %v1842_v59 = vrot.slane %v1840_v46, 5  ;;  %v11576_v51 = vpop.permute.xlu0 %5373 }
 0x18c   : > { %v11555_v10 = vrot.slane %v17591_v4, 6  ;;  %v1854_v62 = vrot.slane %v1852_v35, 4  ;;  %v11560_v12 = vrot.slane %v17593_v23, 6  ;;  %v1853_v13 = vsel %vm10174_vm8, %v1849_v6, %v1852_v35  ;;  %17598 = vst [vmem:[#allocation37_spill] sm:$0xff] %v11576_v51  ;;  %v17599_v35 = vld [vmem:[#allocation40_spill] sm:$0xff] }
 0x18d   : > { %v1834_v27 = vrot.slane %v1833_v5, 4  ;;  %v1839_v2 = vrot.slane %v1837_v54, 4  ;;  %v17595_v55 = vshrl.u32 %v17594_v60, 16  ;;  %v17596_v3 = vshll.u32 %v17594_v60, 16 }
 0x18e   : > { %v1860_v52 = vsel %vm10174_vm8, %v1854_v62, %v1859_v24  ;;  %v1844_v47 = vor.u32 %v11396_v49, %v1842_v59  ;;  %v17597_v29 = vshrl.u32 %v10682_v61, 16  ;;  %v1885_v40 = vshrl.u32 %v10960_v58, 16  ;;  %v17605_v24 = vld [vmem:[#allocation72_spill] sm:$0xff] }
 0x18f   : > { %v1876_v41 = vrot.slane %v17595_v55, 5  ;;  %v1877_v21 = vrot.slane %v17596_v3, 6  ;;  %v8627_v43 = vcombine.low %v1853_v13, %v1860_v52  ;;  %v1838_v17 = vsel %vm10174_vm8, %v1834_v27, %v1837_v54  ;;  %v17608_v3 = vld [vmem:[#allocation42_spill] sm:$0xff] }
 0x190   : > { %v1880_v22 = vrot.slane %v17597_v29, 5  ;;  %v17600_v45 = vshrl.u32 %v17599_v35, 16  ;;  %v1845_v49 = vsel %vm10174_vm8, %v1839_v2, %v1844_v47  ;;  %v1887_v31 = vrot.slane %v1885_v40, 5  ;;  %v11612_v47 = vpop.permute.xlu0 %5377 }
 0x191   : > { %v1878_v39 = vor.u32 %v1877_v21, %v1876_v41  ;;  %v17602_v58 = vshll.u32 %v17599_v35, 16  ;;  %5607 = vrot.lane.b32.xlu1 %v8627_v43, %s9468_s11  ;;  %v8626_v6 = vcombine.low %v1838_v17, %v1845_v49  ;;  %v17603_v46 = vshrl.u32 %v10699_v9, 16  ;;  %17610 = vst [vmem:[#allocation38_spill] sm:$0xff] %v11612_v47  ;;  %v11617_v17 = vpop.permute.xlu1 %5383  ;;  %v17614_v49 = vld [vmem:[#allocation43_spill] sm:$0xff] }
 0x192   : > { %v1861_v1 = vrot.slane %v17600_v45, 5  ;;  %v1882_v61 = vor.u32 %v11427_v36, %v1880_v22  ;;  %v1870_v62 = vshrl.u32 %v10990_v18, 16  ;;  %v17604_v5 = vshll.u32 %v17532_v16, 16  ;;  %17612 = vst [vmem:[#allocation40_spill] sm:$0xff] %v11617_v17 }
 0x193   : > { %v1862_v38 = vrot.slane %v17602_v58, 6  ;;  %v1879_v30 = vrot.slane %v1878_v39, 4  ;;  %v1865_v4 = vrot.slane %v17603_v46, 5  ;;  %v1889_v13 = vor.u32 %v11435_v0, %v1887_v31  ;;  %5605 = vrot.lane.b32.xlu0 %v8626_v6, %s9468_s11 }
 0x194   : > { %v1941_v54 = vrot.slane %v17604_v5, 6  ;;  %v1884_v23 = vrot.slane %v1882_v61, 4  ;;  %v17606_v59 = vshll.u32 %v17605_v24, 16  ;;  %v1872_v60 = vrot.slane %v1870_v62, 5 }
 0x195   : > { %v1863_v36 = vor.u32 %v1862_v38, %v1861_v1  ;;  %v1883_v2 = vsel %vm10174_vm8, %v1879_v30, %v1882_v61  ;;  %v1867_v9 = vor.u32 %v11472_v48, %v1865_v4  ;;  %v17607_v18 = vshll.u32 %v17534_v42, 16 }
 0x196   : > { %v11598_v27 = vrot.slane %v17606_v59, 6  ;;  %v1890_v0 = vsel %vm10174_vm8, %v1884_v23, %v1889_v13  ;;  %v17609_v21 = vshrl.u32 %v17608_v3, 16  ;;  %v1874_v40 = vor.u32 %v11480_v44, %v1872_v60 }
 0x197   : > { %v11606_v55 = vrot.slane %v17607_v18, 6  ;;  %v1864_v41 = vrot.slane %v1863_v36, 4  ;;  %v8629_v29 = vcombine.low %v1883_v2, %v1890_v0  ;;  %v1869_v22 = vrot.slane %v1867_v9, 4 }
 0x198   : > { %v1906_v52 = vrot.slane %v17609_v21, 5  ;;  %v17611_v48 = vshll.u32 %v17608_v3, 16  ;;  %v17613_v35 = vshrl.u32 %v10708_v25, 16  ;;  %v1915_v1 = vshrl.u32 %v17579_v26, 16  ;;  %v17621_v3 = vld [vmem:[#allocation44_spill] sm:$0xff] }
 0x199   : > { %v1868_v39 = vsel %vm10174_vm8, %v1864_v41, %v1867_v9  ;;  %v17615_v61 = vshrl.u32 %v17614_v49, 16  ;;  %5611 = vrot.lane.b32.xlu1 %v8629_v29, %s9468_s11  ;;  %v1875_v44 = vsel %vm10174_vm8, %v1869_v22, %v1874_v40  ;;  %v17616_v38 = vshll.u32 %v17614_v49, 16 }
 0x19a   : > { %v1907_v43 = vrot.slane %v17611_v48, 6  ;;  %v1910_v45 = vrot.slane %v17613_v35, 5  ;;  %v17617_v30 = vshrl.u32 %v10725_v7, 16  ;;  %v8628_v4 = vcombine.low %v1868_v39, %v1875_v44 }
 0x19b   : > { %v1891_v31 = vrot.slane %v17615_v61, 5  ;;  %v1892_v6 = vrot.slane %v17616_v38, 6  ;;  %v1917_v62 = vrot.slane %v1915_v1, 5  ;;  %v1900_v26 = vshrl.u32 %v17592_v57, 16  ;;  %v17626_v1 = vld [vmem:[#allocation47_spill] sm:$0xff] }
 0x19c   : > { %v1908_v58 = vor.u32 %v1907_v43, %v1906_v52  ;;  %v1895_v46 = vrot.slane %v17617_v30, 5  ;;  %v1912_v25 = vor.u32 %v11510_v56, %v1910_v45  ;;  %v17618_v5 = vshll.u32 %v11094_v32, 16  ;;  %5609 = vrot.lane.b32.xlu0 %v8628_v4, %s9468_s11  ;;  %v11642_v56 = vpop.permute.xlu0 %5381  ;;  %v17630_v4 = vld [vmem:[#allocation76_spill] sm:$0xff] }
 0x19d   : > { %v1893_v36 = vor.u32 %v1892_v6, %v1891_v31  ;;  %v17619_v2 = vshll.u32 %v17538_v28, 16  ;;  %v1919_v60 = vor.u32 %v11520_v53, %v1917_v62  ;;  %v1902_v18 = vrot.slane %v1900_v26, 5  ;;  %17620 = vst [vmem:[#allocation72_spill] sm:$0xff] %v11642_v56 }
 0x19e   : > { %v1933_v23 = vrot.slane %v17618_v5, 6  ;;  %v1909_v13 = vrot.slane %v1908_v58, 4  ;;  %v1897_v59 = vor.u32 %v11555_v10, %v1895_v46  ;;  %v1914_v7 = vrot.slane %v1912_v25, 4  ;;  %v11648_v10 = vpop.permute.xlu1 %5435 }
 0x19f   : > { %v1971_v9 = vrot.slane %v17619_v2, 6  ;;  %v1894_v0 = vrot.slane %v1893_v36, 4  ;;  %v17622_v21 = vshrl.u32 %v17621_v3, 16  ;;  %17623 = vst [vmem:[#allocation42_spill] sm:$0xff] %v11648_v10  ;;  %v1904_v22 = vor.u32 %v11560_v12, %v1902_v18 }
 0x1a0   : > { %v1913_v57 = vsel %vm10174_vm8, %v1909_v13, %v1912_v25  ;;  %v1899_v41 = vrot.slane %v1897_v59, 4  ;;  %v1920_v29 = vsel %vm10174_vm8, %v1914_v7, %v1919_v60  ;;  %v17624_v53 = vshll.u32 %v17621_v3, 16  ;;  %v11672_v36 = vpop.permute.xlu0 %5433 }
 0x1a1   : > { %v1936_v52 = vrot.slane %v17622_v21, 5  ;;  %v17625_v48 = vshrl.u32 %v17532_v16, 16  ;;  %v8631_v39 = vcombine.low %v1913_v57, %v1920_v29  ;;  %v1898_v35 = vsel %vm10174_vm8, %v1894_v0, %v1897_v59  ;;  %17632 = vst [vmem:[#allocation43_spill] sm:$0xff] %v11672_v36  ;;  %v17636_v0 = vld [vmem:[#allocation50_spill] sm:$0xff] }
 0x1a2   : > { %v1937_v40 = vrot.slane %v17624_v53, 6  ;;  %v1945_v45 = vshrl.u32 %v17605_v24, 16  ;;  %v17627_v49 = vshrl.u32 %v17626_v1, 16  ;;  %v1905_v31 = vsel %vm10174_vm8, %v1899_v41, %v1904_v22  ;;  %v11679_v18 = vpop.permute.xlu1 %5439  ;;  %v12034_v36 = vld [vmem:[%s9559_s30 + $0xcc] sm:$0xf] }
 0x1a3   : > { %v1940_v43 = vrot.slane %v17625_v48, 5  ;;  %v17628_v58 = vshll.u32 %v17626_v1, 16  ;;  %5615 = vrot.lane.b32.xlu1 %v8631_v39, %s9468_s11  ;;  %v8630_v16 = vcombine.low %v1898_v35, %v1905_v31  ;;  %v17629_v30 = vshrl.u32 %v17534_v42, 16  ;;  %17635 = vst [vmem:[#allocation44_spill] sm:$0xff] %v11679_v18  ;;  %v17640_v1 = vld [vmem:[#allocation53_spill] sm:$0xff]  ;;  %17690 = vst [vmem:[#allocation127_spill] sm:$0xff] %v12034_v36 }
 0x1a4   : > { %v1921_v61 = vrot.slane %v17627_v49, 5  ;;  %v1938_v44 = vor.u32 %v1937_v40, %v1936_v52  ;;  %v1947_v6 = vrot.slane %v1945_v45, 5  ;;  %v1930_v24 = vshrl.u32 %v11094_v32, 16 }
 0x1a5   : > { %v1942_v12 = vor.u32 %v1941_v54, %v1940_v43  ;;  %v1922_v38 = vrot.slane %v17628_v58, 6  ;;  %v1925_v46 = vrot.slane %v17629_v30, 5  ;;  %v17631_v25 = vshll.u32 %v17630_v4, 16  ;;  %v17633_v54 = vld [vmem:[#allocation54_spill] sm:$0xff]  ;;  %5613 = vrot.lane.b32.xlu0 %v8630_v16, %s9468_s11  ;;  %v11703_v16 = vpop.permute.xlu0 %5437 }
 0x1a6   : > { %v1939_v26 = vrot.slane %v1938_v44, 4  ;;  %v17634_v59 = vshll.u32 %v17633_v54, 16  ;;  %v1949_v7 = vor.u32 %v11598_v27, %v1947_v6  ;;  %v1932_v60 = vrot.slane %v1930_v24, 5  ;;  %17644 = vst [vmem:[#allocation47_spill] sm:$0xff] %v11703_v16  ;;  %v17645_v6 = vld [vmem:[#allocation79_spill] sm:$0xff] }
 0x1a7   : > { %v1978_v62 = vrot.slane %v17631_v25, 6  ;;  %v1944_v5 = vrot.slane %v1942_v12, 4  ;;  %v1923_v13 = vor.u32 %v1922_v38, %v1921_v61  ;;  %v1927_v42 = vor.u32 %v11606_v55, %v1925_v46  ;;  %v11708_v25 = vpop.permute.xlu1 %5443  ;;  %v12002_v16 = vld [vmem:[%s9559_s30 + $0x20] sm:$0x3] }
 0x1a8   : > { %v1956_v2 = vrot.slane %v17634_v59, 6  ;;  %v1943_v32 = vsel %vm10174_vm8, %v1939_v26, %v1942_v12  ;;  %v17637_v41 = vshrl.u32 %v17636_v0, 16  ;;  %v17638_v21 = vshll.u32 %v17636_v0, 16  ;;  %17647 = vst [vmem:[#allocation76_spill] sm:$0xff] %v11708_v25  ;;  %v11963_v25 = vld [vmem:[%s9559_s30 + $0xa0] sm:$0xf] }
 0x1a9   : > { %v1924_v57 = vrot.slane %v1923_v13, 4  ;;  %v1950_v29 = vsel %vm10174_vm8, %v1944_v5, %v1949_v7  ;;  %v1929_v22 = vrot.slane %v1927_v42, 4  ;;  %v1934_v27 = vor.u32 %v1933_v23, %v1932_v60  ;;  %v9216_v7 = vld [vmem:[%s9559_s30 + $0x18] sm:$0xf]  ;;  %v9217_v60 = vld [vmem:[%s9559_s30 + $0x1c] sm:$0xf] }
 0x1aa   : > { %v1966_v3 = vrot.slane %v17637_v41, 5  ;;  %v1967_v52 = vrot.slane %v17638_v21, 6  ;;  %v17639_v55 = vshrl.u32 %v17538_v28, 16  ;;  %v8633_v40 = vcombine.low %v1943_v32, %v1950_v29  ;;  %17673 = vst [vmem:[#allocation118_spill] sm:$0xff] %v11963_v25 }
 0x1ab   : > { %v1928_v48 = vsel %vm10174_vm8, %v1924_v57, %v1927_v42  ;;  %v1975_v39 = vshrl.u32 %v17630_v4, 16  ;;  %v1935_v35 = vsel %vm10174_vm8, %v1929_v22, %v1934_v27  ;;  %v17641_v49 = vshrl.u32 %v17640_v1, 16 }
 0x1ac   : > { %v1970_v53 = vrot.slane %v17639_v55, 5  ;;  %v1968_v43 = vor.u32 %v1967_v52, %v1966_v3  ;;  %v17642_v31 = vshll.u32 %v17640_v1, 16  ;;  %5619 = vrot.lane.b32.xlu1 %v8633_v40, %s9468_s11  ;;  %v8632_v28 = vcombine.low %v1928_v48, %v1935_v35  ;;  %v9218_v3 = vld [vmem:[%s9559_s30 + $0xc] sm:$0xf]  ;;  %v9219_v55 = vld [vmem:[%s9559_s30 + $0x10] sm:$0xf] }
 0x1ad   : > { %v1951_v61 = vrot.slane %v17641_v49, 5  ;;  %v1977_v12 = vrot.slane %v1975_v39, 5  ;;  %v17643_v58 = vshrl.u32 %v17633_v54, 16  ;;  %v1960_v4 = vshrl.u32 %v17645_v6, 16  ;;  %v9220_v40 = vld [vmem:[%s9559_s30 + $0x14] sm:$0x3]  ;;  %v11732_v49 = vpop.permute.xlu1 %5447 }
 0x1ae   : > { %v1972_v45 = vor.u32 %v1971_v9, %v1970_v53  ;;  %v1952_v23 = vrot.slane %v17642_v31, 6  ;;  %v1969_v44 = vrot.slane %v1968_v43, 4  ;;  %v17646_v9 = vshll.u32 %v17645_v6, 16  ;;  %5617 = vrot.lane.b32.xlu0 %v8632_v28, %s9468_s11  ;;  %v11725_v43 = vpop.permute.xlu0 %5441  ;;  %v9221_v39 = vld [vmem:[%s9559_s30 + $0x30] sm:$0xf]  ;;  %17650 = vst [vmem:[#allocation50_spill] sm:$0xff] %v11732_v49 }
 0x1af   : > { %v1955_v38 = vrot.slane %v17643_v58, 5  ;;  %v1979_v5 = vor.u32 %v1978_v62, %v1977_v12  ;;  %v1962_v59 = vrot.slane %v1960_v4, 5  ;;  %v8237_v42 = vrot.slane %v9216_v7, 10  ;;  %17649 = vst [vmem:[#allocation54_spill] sm:$0xff] %v11725_v43 }
 0x1b0   : > { %v1963_v30 = vrot.slane %v17646_v9, 6  ;;  %v1974_v46 = vrot.slane %v1972_v45, 4  ;;  %v1953_v24 = vor.u32 %v1952_v23, %v1951_v61  ;;  %v1973_v26 = vsel %vm10174_vm8, %v1969_v44, %v1972_v45  ;;  %v9222_v45 = vld [vmem:[%s9559_s30 + $0x34] sm:$0xf] }
 0x1b1   : > { %v1957_v13 = vor.u32 %v1956_v2, %v1955_v38  ;;  %v1990_v32 = vrot.slane %v9217_v60, 6  ;;  %v1993_v41 = vrot.slane %v11414_v63, 6  ;;  %v8236_v21 = vrot.slane %v9218_v3, 10  ;;  %v9223_v38 = vld [vmem:[%s9559_s30 + $0x38] sm:$0x3] }
 0x1b2   : > { %v1954_v54 = vrot.slane %v1953_v24, 4  ;;  %v1980_v57 = vsel %vm10174_vm8, %v1974_v46, %v1979_v5  ;;  %v1964_v52 = vor.u32 %v1963_v30, %v1962_v59  ;;  %v1983_v53 = vrot.slane %v9219_v55, 6  ;;  %v9224_v30 = vld [vmem:[%s9559_s30 + $0x24] sm:$0xf]  ;;  %v9225_v24 = vld [vmem:[%s9559_s30 + $0x28] sm:$0xf] }
 0x1b3   : > { %v1959_v0 = vrot.slane %v1957_v13, 4  ;;  %v8635_v62 = vcombine.low %v1973_v26, %v1980_v57  ;;  %v1991_v22 = vsel %vm10433_vm11, %v8237_v42, %v1990_v32  ;;  %v1992_v27 = vrot.slane %v1990_v32, 4  ;;  %v9226_v26 = vld [vmem:[%s9559_s30 + $0x2c] sm:$0x3]  ;;  %v9227_v60 = vld [vmem:[%s9559_s30 + $0x48] sm:$0xf]  ;;  %v11753_v57 = vpop.permute.xlu0 %5445 }
 0x1b4   : > { %v1958_v2 = vsel %vm10174_vm8, %v1954_v54, %v1957_v13  ;;  %v1986_v48 = vrot.slane %v9220_v40, 6  ;;  %v8239_v35 = vrot.slane %v9221_v39, 10  ;;  %v2004_v1 = vrot.slane %v9222_v45, 6  ;;  %17651 = vst [vmem:[#allocation53_spill] sm:$0xff] %v11753_v57  ;;  %v9229_v3 = vld [vmem:[%s9559_s30 + $0x50] sm:$0x3] }
 0x1b5   : > { %5623 = vrot.lane.b32.xlu1 %v8635_v62, %s9468_s11  ;;  %v1965_v63 = vsel %vm10174_vm8, %v1959_v0, %v1964_v52  ;;  %v1994_v31 = vsel %vm10433_vm11, %v1992_v27, %v1993_v41  ;;  %v1984_v23 = vsel %vm10433_vm11, %v8236_v21, %v1983_v53  ;;  %v1985_v28 = vrot.slane %v1983_v53, 4  ;;  %v9228_v0 = vld [vmem:[%s9559_s30 + $0x4c] sm:$0xf]  ;;  %v9230_v62 = vld [vmem:[%s9559_s30 + $0x3c] sm:$0xf]  ;;  %v11759_v27 = vpop.permute.xlu1 %5451 }
 0x1b6   : > { %v8634_v61 = vcombine.low %v1958_v2, %v1965_v63  ;;  %v8637_v44 = vcombine.low %v1991_v22, %v1994_v31  ;;  %v2005_v12 = vsel %vm10433_vm11, %v8239_v35, %v2004_v1  ;;  %v2006_v58 = vrot.slane %v2004_v1, 4  ;;  %v9231_v52 = vld [vmem:[%s9559_s30 + $0x40] sm:$0xf]  ;;  %17652 = vst [vmem:[#allocation79_spill] sm:$0xff] %v11759_v27  ;;  %v9232_v53 = vld [vmem:[%s9559_s30 + $0x44] sm:$0x3] }
 0x1b7   : > { %v2007_v6 = vrot.slane %v9223_v38, 6  ;;  %v1987_v9 = vsel %vm10433_vm11, %v1985_v28, %v1986_v48  ;;  %v8238_v46 = vrot.slane %v9224_v30, 10  ;;  %v1997_v4 = vrot.slane %v9225_v24, 6  ;;  %v9233_v1 = vld [vmem:[%s9559_s30 + $0x60] sm:$0xf] }
 0x1b8   : > { %5621 = vrot.lane.b32.xlu0 %v8634_v61, %s9468_s11  ;;  %v2000_v5 = vrot.slane %v9226_v26, 6  ;;  %v8636_v13 = vcombine.low %v1984_v23, %v1987_v9  ;;  %v8241_v32 = vrot.slane %v9227_v60, 10  ;;  %v2018_v41 = vrot.slane %v9228_v0, 6  ;;  %v9234_v31 = vld [vmem:[%s9559_s30 + $0x64] sm:$0xf] }
 0x1b9   : > { %5675 = vrot.lane.b32.xlu1 %v8637_v44, %s9469_s18  ;;  %v2008_v54 = vsel %vm10433_vm11, %v2006_v58, %v2007_v6  ;;  %v1998_v7 = vsel %vm10433_vm11, %v8238_v46, %v1997_v4  ;;  %v1999_v42 = vrot.slane %v1997_v4, 4  ;;  %v2021_v21 = vrot.slane %v9229_v3, 6  ;;  %v9235_v28 = vld [vmem:[%s9559_s30 + $0x68] sm:$0x3]  ;;  %v9236_v58 = vld [vmem:[%s9559_s30 + $0x54] sm:$0xf] }
 0x1ba   : > { %v8639_v59 = vcombine.low %v2005_v12, %v2008_v54  ;;  %v8240_v2 = vrot.slane %v9230_v62, 10  ;;  %v2011_v22 = vrot.slane %v9231_v52, 6  ;;  %v2014_v40 = vrot.slane %v9232_v53, 6  ;;  %v9237_v6 = vld [vmem:[%s9559_s30 + $0x58] sm:$0xf] }
 0x1bb   : > { %v2001_v55 = vsel %vm10433_vm11, %v1999_v42, %v2000_v5  ;;  %v2019_v63 = vsel %vm10433_vm11, %v8241_v32, %v2018_v41  ;;  %v2020_v39 = vrot.slane %v2018_v41, 4  ;;  %v8243_v61 = vrot.slane %v9233_v1, 10  ;;  %v9238_v30 = vld [vmem:[%s9559_s30 + $0x5c] sm:$0x3]  ;;  %v11787_v42 = vpop.permute.xlu1 %5455  ;;  %v9239_v32 = vld [vmem:[%s9559_s30 + $0x78] sm:$0xf] }
 0x1bc   : > { %5673 = vrot.lane.b32.xlu0 %v8636_v13, %s9469_s18  ;;  %v8638_v48 = vcombine.low %v1998_v7, %v2001_v55  ;;  %v2012_v35 = vsel %vm10433_vm11, %v8240_v2, %v2011_v22  ;;  %v2013_v45 = vrot.slane %v2011_v22, 4  ;;  %v2032_v23 = vrot.slane %v9234_v31, 6  ;;  %v11783_v13 = vpop.permute.xlu0 %5449  ;;  %17654 = vst [vmem:[#allocation99_spill] sm:$0xff] %v11787_v42  ;;  %v9240_v41 = vld [vmem:[%s9559_s30 + $0x7c] sm:$0xf] }
 0x1bd   : > { %5679 = vrot.lane.b32.xlu1 %v8639_v59, %s9469_s18  ;;  %v2035_v44 = vrot.slane %v9235_v28, 6  ;;  %v2022_v12 = vsel %vm10433_vm11, %v2020_v39, %v2021_v21  ;;  %v8242_v38 = vrot.slane %v9236_v58, 10  ;;  %v2025_v9 = vrot.slane %v9237_v6, 6  ;;  %17653 = vst [vmem:[#allocation98_spill] sm:$0xff] %v11783_v13  ;;  %v9241_v2 = vld [vmem:[%s9559_s30 + $0x80] sm:$0x3] }
 0x1be   : > { %v2028_v46 = vrot.slane %v9238_v30, 6  ;;  %v8641_v24 = vcombine.low %v2019_v63, %v2022_v12  ;;  %v2015_v4 = vsel %vm10433_vm11, %v2013_v45, %v2014_v40  ;;  %v2033_v26 = vsel %vm10433_vm11, %v8243_v61, %v2032_v23  ;;  %v9242_v22 = vld [vmem:[%s9559_s30 + $0x6c] sm:$0xf]  ;;  %v9243_v63 = vld [vmem:[%s9559_s30 + $0x70] sm:$0xf] }
 0x1bf   : > { %v2034_v5 = vrot.slane %v2032_v23, 4  ;;  %v8640_v54 = vcombine.low %v2012_v35, %v2015_v4  ;;  %v2026_v59 = vsel %vm10433_vm11, %v8242_v38, %v2025_v9  ;;  %v2027_v7 = vrot.slane %v2025_v9, 4  ;;  %v9244_v35 = vld [vmem:[%s9559_s30 + $0x74] sm:$0x3]  ;;  %v9245_v1 = vld [vmem:[%s9559_s30 + $0x90] sm:$0xf]  ;;  %v11814_v30 = vpop.permute.xlu1 %5459 }
 0x1c0   : > { %5677 = vrot.lane.b32.xlu0 %v8638_v48, %s9469_s18  ;;  %v8245_v0 = vrot.slane %v9239_v32, 10  ;;  %v2046_v3 = vrot.slane %v9240_v41, 6  ;;  %v2049_v52 = vrot.slane %v9241_v2, 6  ;;  %v8244_v55 = vrot.slane %v9242_v22, 10  ;;  %v9246_v31 = vld [vmem:[%s9559_s30 + $0x94] sm:$0xf]  ;;  %v11810_v58 = vpop.permute.xlu0 %5453 }
 0x1c1   : > { %5683 = vrot.lane.b32.xlu1 %v8641_v24, %s9469_s18  ;;  %v2036_v60 = vsel %vm10433_vm11, %v2034_v5, %v2035_v44  ;;  %v2029_v62 = vsel %vm10433_vm11, %v2027_v7, %v2028_v46  ;;  %v2039_v39 = vrot.slane %v9243_v63, 6  ;;  %v2042_v45 = vrot.slane %v9244_v35, 6  ;;  %17655 = vst [vmem:[#allocation100_spill] sm:$0xff] %v11810_v58  ;;  %17656 = vst [vmem:[#allocation101_spill] sm:$0xff] %v11814_v30  ;;  %v9247_v24 = vld [vmem:[%s9559_s30 + $0x98] sm:$0x3] }
 0x1c2   : > { %v8643_v21 = vcombine.low %v2033_v26, %v2036_v60  ;;  %v8642_v53 = vcombine.low %v2026_v59, %v2029_v62  ;;  %v2047_v40 = vsel %vm10433_vm11, %v8245_v0, %v2046_v3  ;;  %v2048_v48 = vrot.slane %v2046_v3, 4  ;;  %v9248_v26 = vld [vmem:[%s9559_s30 + $0x84] sm:$0xf]  ;;  %v9250_v60 = vld [vmem:[%s9559_s30 + $0x8c] sm:$0x3] }
 0x1c3   : > { %v8247_v61 = vrot.slane %v9245_v1, 10  ;;  %v2060_v23 = vrot.slane %v9246_v31, 6  ;;  %v2040_v44 = vsel %vm10433_vm11, %v8244_v55, %v2039_v39  ;;  %v2041_v12 = vrot.slane %v2039_v39, 4  ;;  %v9253_v55 = vld [vmem:[%s9559_s30 + $0xb0] sm:$0x3] }
 0x1c4   : > { %5681 = vrot.lane.b32.xlu0 %v8640_v54, %s9469_s18  ;;  %v2050_v28 = vsel %vm10433_vm11, %v2048_v48, %v2049_v52  ;;  %v2063_v4 = vrot.slane %v9247_v24, 6  ;;  %v8246_v5 = vrot.slane %v9248_v26, 10  ;;  %v9249_v54 = vld [vmem:[%s9559_s30 + $0x88] sm:$0xf]  ;;  %v2056_v32 = vrot.slane %v9250_v60, 6 }
 0x1c5   : > { %5687 = vrot.lane.b32.xlu1 %v8643_v21, %s9469_s18  ;;  %v8645_v38 = vcombine.low %v2047_v40, %v2050_v28  ;;  %v2061_v6 = vsel %vm10433_vm11, %v8247_v61, %v2060_v23  ;;  %v2062_v9 = vrot.slane %v2060_v23, 4  ;;  %v2043_v46 = vsel %vm10433_vm11, %v2041_v12, %v2042_v45  ;;  %v9251_v21 = vld [vmem:[%s9559_s30 + $0xa8] sm:$0xf]  ;;  %v9252_v52 = vld [vmem:[%s9559_s30 + $0xac] sm:$0xf]  ;;  %v11837_v61 = vpop.permute.xlu0 %5457 }
 0x1c6   : > { %v2053_v59 = vrot.slane %v9249_v54, 6  ;;  %v8644_v7 = vcombine.low %v2040_v44, %v2043_v46  ;;  %v8249_v62 = vrot.slane %v9251_v21, 10  ;;  %v2074_v22 = vrot.slane %v9252_v52, 6  ;;  %v9254_v40 = vld [vmem:[%s9559_s30 + $0x9c] sm:$0xf]  ;;  %17657 = vst [vmem:[#allocation102_spill] sm:$0xff] %v11837_v61  ;;  %v11841_v44 = vpop.permute.xlu1 %5463 }
 0x1c7   : > { %v2064_v0 = vsel %vm10433_vm11, %v2062_v9, %v2063_v4  ;;  %v8248_v48 = vrot.slane %v9254_v40, 10  ;;  %v9255_v39 = vld [vmem:[%s9559_s30 + $0xa0] sm:$0xf]  ;;  %v9256_v45 = vld [vmem:[%s9559_s30 + $0xa4] sm:$0x3]  ;;  %17658 = vst [vmem:[#allocation103_spill] sm:$0xff] %v11841_v44 }
 0x1c8   : > { %5685 = vrot.lane.b32.xlu0 %v8642_v53, %s9469_s18  ;;  %v2054_v41 = vsel %vm10433_vm11, %v8246_v5, %v2053_v59  ;;  %v2055_v3 = vrot.slane %v2053_v59, 4  ;;  %v8647_v2 = vcombine.low %v2061_v6, %v2064_v0  ;;  %v2077_v53 = vrot.slane %v9253_v55, 6  ;;  %v9257_v6 = vld [vmem:[%s9559_s30 + $0xc0] sm:$0xf]  ;;  %v9258_v46 = vld [vmem:[%s9559_s30 + $0xc4] sm:$0xf] }
 0x1c9   : > { %5691 = vrot.lane.b32.xlu1 %v8645_v38, %s9469_s18  ;;  %v2067_v35 = vrot.slane %v9255_v39, 6  ;;  %v2070_v1 = vrot.slane %v9256_v45, 6  ;;  %v2075_v23 = vsel %vm10433_vm11, %v8249_v62, %v2074_v22  ;;  %v2076_v28 = vrot.slane %v2074_v22, 4  ;;  %v9259_v26 = vld [vmem:[%s9559_s30 + $0xc8] sm:$0x3] }
 0x1ca   : > { %v2057_v63 = vsel %vm10433_vm11, %v2055_v3, %v2056_v32  ;;  %v8251_v9 = vrot.slane %v9257_v6, 10  ;;  %v2088_v24 = vrot.slane %v9258_v46, 6  ;;  %v2091_v5 = vrot.slane %v9259_v26, 6  ;;  %v9260_v54 = vld [vmem:[%s9559_s30 + $0xb4] sm:$0xf]  ;;  %v11866_v40 = vpop.permute.xlu1 %5515 }
 0x1cb   : > { %v8646_v31 = vcombine.low %v2054_v41, %v2057_v63  ;;  %v2068_v12 = vsel %vm10433_vm11, %v8248_v48, %v2067_v35  ;;  %v2069_v38 = vrot.slane %v2067_v35, 4  ;;  %v2078_v4 = vsel %vm10433_vm11, %v2076_v28, %v2077_v53  ;;  %v9262_v52 = vld [vmem:[%s9559_s30 + $0xbc] sm:$0x3]  ;;  %v11864_v53 = vpop.permute.xlu0 %5461  ;;  %17660 = vst [vmem:[#allocation105_spill] sm:$0xff] %v11866_v40  ;;  %v11871_v39 = vld [vmem:[%s9559_s30 + $0x24] sm:$0xf] }
 0x1cc   : > { %5689 = vrot.lane.b32.xlu0 %v8644_v7, %s9469_s18  ;;  %v8250_v59 = vrot.slane %v9260_v54, 10  ;;  %v9261_v7 = vld [vmem:[%s9559_s30 + $0xb8] sm:$0xf]  ;;  %v8649_v32 = vcombine.low %v2075_v23, %v2078_v4  ;;  %v2089_v41 = vsel %vm10433_vm11, %v8251_v9, %v2088_v24  ;;  %v2090_v3 = vrot.slane %v2088_v24, 4  ;;  %17659 = vst [vmem:[#allocation104_spill] sm:$0xff] %v11864_v53 }
 0x1cd   : > { %5695 = vrot.lane.b32.xlu1 %v8647_v2, %s9469_s18  ;;  %v2081_v60 = vrot.slane %v9261_v7, 6  ;;  %v2071_v0 = vsel %vm10433_vm11, %v2069_v38, %v2070_v1  ;;  %v2084_v22 = vrot.slane %v9262_v52, 6  ;;  %v11874_v35 = vld [vmem:[%s9559_s30 + $0x28] sm:$0xf]  ;;  %v11878_v1 = vld [vmem:[%s9559_s30 + $0x18] sm:$0xf] }
 0x1ce   : > { %v8648_v21 = vcombine.low %v2068_v12, %v2071_v0  ;;  %v2092_v55 = vsel %vm10433_vm11, %v2090_v3, %v2091_v5  ;;  %v8653_v23 = vcombine.low %v11871_v39, %v11874_v35  ;;  %v11887_v28 = vld [vmem:[%s9559_s30 + $0x3c] sm:$0xf]  ;;  %v11890_v12 = vld [vmem:[%s9559_s30 + $0x40] sm:$0xf]  ;;  %v11893_v38 = vld [vmem:[%s9559_s30 + $0x30] sm:$0xf]  ;;  %v11906_v4 = vpop.permute.xlu1 %5519 }
 0x1cf   : > { %v2082_v62 = vsel %vm10433_vm11, %v8250_v59, %v2081_v60  ;;  %v2083_v2 = vrot.slane %v2081_v60, 4  ;;  %v8651_v48 = vcombine.low %v2089_v41, %v2092_v55  ;;  %v11895_v6 = vpop.permute.xlu0 %5513  ;;  %v11898_v9 = vld [vmem:[%s9559_s30 + $0x34] sm:$0xf]  ;;  %v11904_v24 = vld [vmem:[%s9559_s30 + $0x58] sm:$0xf]  ;;  %17663 = vst [vmem:[#allocation108_spill] sm:$0xff] %v11906_v4  ;;  %v8655_v0 = vcombine.low %v11887_v28, %v11890_v12 }
 0x1d0   : > { %5693 = vrot.lane.b32.xlu0 %v8646_v31, %s9469_s18  ;;  %v11881_v31 = vld [vmem:[%s9559_s30 + $0x1c] sm:$0xf]  ;;  %17662 = vst [vmem:[#allocation107_spill] sm:$0xff] %v11895_v6  ;;  %v11901_v46 = vld [vmem:[%s9559_s30 + $0x54] sm:$0xf]  ;;  %v8654_v52 = vcombine.low %v11893_v38, %v11898_v9  ;;  %v17679_v47 = vshll.u32 %v11874_v35, 16 }
 0x1d1   : > { %5699 = vrot.lane.b32.xlu1 %v8649_v32, %s9469_s18  ;;  %v2085_v63 = vsel %vm10433_vm11, %v2083_v2, %v2084_v22  ;;  %17661 = vst [vmem:[#allocation106_spill] sm:$0xff] %v11881_v31  ;;  %v8652_v26 = vcombine.low %v11878_v1, %v11881_v31  ;;  %v11912_v5 = vld [vmem:[%s9559_s30 + $0x48] sm:$0xf]  ;;  %v11915_v54 = vld [vmem:[%s9559_s30 + $0x4c] sm:$0xf]  ;;  %v8657_v22 = vcombine.low %v11901_v46, %v11904_v24  ;;  %v17687_v6 = vshll.u32 %v11878_v1, 16 }
 0x1d2   : > { %v8650_v45 = vcombine.low %v2082_v62, %v2085_v63  ;;  %17664 = vst [vmem:[#allocation109_spill] sm:$0xff] %v11912_v5  ;;  %v11918_v59 = vld [vmem:[%s9559_s30 + $0x6c] sm:$0xf]  ;;  %v11921_v7 = vld [vmem:[%s9559_s30 + $0x70] sm:$0xf]  ;;  %v11952_v63 = vpop.permute.xlu1 %5523  ;;  %v8656_v2 = vcombine.low %v11912_v5, %v11915_v54  ;;  %v11986_v4 = vrot.slane %v17679_v47, 5 }
 0x1d3   : > { %v11924_v60 = vld [vmem:[%s9559_s30 + $0x60] sm:$0xf]  ;;  %v11927_v32 = vld [vmem:[%s9559_s30 + $0x64] sm:$0xf]  ;;  %v11936_v3 = vld [vmem:[%s9559_s30 + $0x88] sm:$0xf]  ;;  %v8659_v43 = vcombine.low %v11918_v59, %v11921_v7 }
 0x1d4   : > { %5697 = vrot.lane.b32.xlu0 %v8648_v21, %s9469_s18  ;;  %17665 = vst [vmem:[#allocation110_spill] sm:$0xff] %v11924_v60  ;;  %v11933_v41 = vld [vmem:[%s9559_s30 + $0x84] sm:$0xf]  ;;  %17667 = vst [vmem:[#allocation112_spill] sm:$0xff] %v11936_v3  ;;  %v11938_v21 = vpop.permute.xlu0 %5517  ;;  %v11947_v55 = vld [vmem:[%s9559_s30 + $0x78] sm:$0xf] }
 0x1d5   : > { %5703 = vrot.lane.b32.xlu1 %v8651_v48, %s9469_s18  ;;  %17666 = vst [vmem:[#allocation111_spill] sm:$0xff] %v11933_v41  ;;  %17668 = vst [vmem:[#allocation113_spill] sm:$0xff] %v11938_v21  ;;  %v11950_v48 = vld [vmem:[%s9559_s30 + $0x7c] sm:$0xf]  ;;  %v11969_v30 = vld [vmem:[%s9559_s30 + $0x94] sm:$0xf] }
 0x1d6   : > { %17669 = vst [vmem:[#allocation114_spill] sm:$0xff] %v11947_v55  ;;  %17670 = vst [vmem:[#allocation115_spill] sm:$0xff] %v11950_v48  ;;  %v11960_v62 = vld [vmem:[%s9559_s30 + $0x9c] sm:$0xf]  ;;  %v11982_v61 = vld [vmem:[%s9559_s30 + $0x2c] sm:$0x3]  ;;  %v12014_v42 = vpop.permute.xlu1 %5527 }
 0x1d7   : > { %17671 = vst [vmem:[#allocation116_spill] sm:$0xff] %v11952_v63  ;;  %17672 = vst [vmem:[#allocation117_spill] sm:$0xff] %v11960_v62  ;;  %v17676_v63 = vshrl.u32 %v11871_v39, 16  ;;  %v11997_v21 = vld [vmem:[%s9559_s30 + $0xb8] sm:$0xf]  ;;  %v2151_v47 = vrot.slane %v17687_v6, 5 }
 0x1d8   : > { %5701 = vrot.lane.b32.xlu0 %v8650_v45, %s9469_s18  ;;  %17675 = vst [vmem:[#allocation120_spill] sm:$0xff] %v11969_v30  ;;  %17681 = vst [vmem:[#allocation122_spill] sm:$0xff] %v11997_v21  ;;  %v11999_v34 = vpop.permute.xlu0 %5521  ;;  %v17688_v40 = vshll.u32 %v11881_v31, 16  ;;  %v12050_v6 = vld [vmem:[%s9559_s30 + $0xc4] sm:$0xf]  ;;  %v16979_v15 = vshll.u32 %v11887_v28, 16 }
 0x1d9   : > { %5755 = vrot.lane.b32.xlu1 %v8653_v23, %s9470_s19  ;;  %v2172_v45 = vrot.slane %v17676_v63, 4  ;;  %v17677_v23 = vshll.u32 %v11871_v39, 16  ;;  %v17680_v63 = vshrl.u32 %v11874_v35, 16  ;;  %17682 = vst [vmem:[#allocation123_spill] sm:$0xff] %v11999_v34  ;;  %17685 = vst [vmem:[#allocation126_spill] sm:$0xff] %v12014_v42  ;;  %v17686_v34 = vshrl.u32 %v11878_v1, 16 }
 0x1da   : > { %v12025_v27 = vrot.slane %v17688_v40, 5  ;;  %17693 = vst [vmem:[#allocation130_spill] sm:$0xff] %v12050_v6  ;;  %v12060_v40 = vld [vmem:[%s9559_s30 + $0x44] sm:$0x3]  ;;  %v17699_v53 = vshll.u32 %v11890_v12, 16  ;;  %v16980_v29 = vshrl.u32 %v11890_v12, 16 }
 0x1db   : > { %v2175_v33 = vrot.slane %v17677_v23, 5  ;;  %v2185_v18 = vrot.slane %v17680_v63, 4  ;;  %v12009_v23 = vld [vmem:[%s9559_s30 + $0xa8] sm:$0xf]  ;;  %v2148_v51 = vrot.slane %v17686_v34, 4  ;;  %v17710_v17 = vshrl.u32 %v11904_v24, 16 }
 0x1dc   : > { %5753 = vrot.lane.b32.xlu0 %v8652_v26, %s9470_s19  ;;  %v8658_v26 = vcombine.low %v11924_v60, %v11927_v32  ;;  %17683 = vst [vmem:[#allocation124_spill] sm:$0xff] %v12009_v23  ;;  %v12047_v34 = vld [vmem:[%s9559_s30 + $0xc0] sm:$0xf]  ;;  %v12052_v10 = vpop.permute.xlu0 %5525  ;;  %v2233_v49 = vrot.slane %v16980_v29, 4  ;;  %s9474_s18 = smov 56  }
 0x1dd   : > { %5759 = vrot.lane.b32.xlu1 %v8655_v0, %s9470_s19  ;;  %v2176_v58 = vor.u32 %v2175_v33, %v2172_v45  ;;  %v2186_v63 = vor.u32 %v2185_v18, %v11986_v4  ;;  %v17689_v33 = vshrl.u32 %v11881_v31, 16  ;;  %17692 = vst [vmem:[#allocation129_spill] sm:$0xff] %v12047_v34  ;;  %17694 = vst [vmem:[#allocation131_spill] sm:$0xff] %v12052_v10  ;;  %v17696_v18 = vshll.u32 %v11982_v61, 16  ;;  %v12091_v10 = vld [vmem:[%s9559_s30 + $0x38] sm:$0x3] }
 0x1de   : > { %v2152_v0 = vor.u32 %v2151_v47, %v2148_v51  ;;  %v2223_v51 = vrot.slane %v16979_v15, 5  ;;  %v16984_v15 = vshll.u32 %v12060_v40, 16  ;;  %v16981_v47 = vshrl.u32 %v11893_v38, 16 }
 0x1df   : > { %v2161_v45 = vrot.slane %v17689_v33, 4  ;;  %v12056_v13 = vrot.slane %v2176_v58, 4  ;;  %v17695_v33 = vshrl.u32 %v11887_v28, 16  ;;  %v12067_v44 = vrot.slane %v2186_v63, 4 }
 0x1e0   : > { %5757 = vrot.lane.b32.xlu0 %v8654_v52, %s9470_s19  ;;  %v12037_v52 = vld [vmem:[%s9559_s30 + $0xd0] sm:$0xf]  ;;  %v12071_v58 = vrot.slane %v17696_v18, 5  ;;  %v12085_v63 = vrot.slane %v17699_v53, 5  ;;  %v2153_v53 = vrot.slane %v2152_v0, 4 }
 0x1e1   : > { %17691 = vst [vmem:[#allocation128_spill] sm:$0xff] %v12037_v52  ;;  %5763 = vrot.lane.b32.xlu1 %v8657_v22, %s9470_s19  ;;  %v2162_v22 = vor.u32 %v2161_v45, %v12025_v27  ;;  %v2220_v11 = vrot.slane %v17695_v33, 4  ;;  %v17697_v45 = vshll.u32 %v12002_v16, 16  ;;  %v2182_v42 = vsel %vm9604_vm2, %v12056_v13, %v11986_v4 }
 0x1e2   : > { %v16983_v4 = vshll.u32 %v11898_v9, 16 }
 0x1e3   : > { %v12079_v33 = vrot.slane %v17697_v45, 5  ;;  %v2224_v18 = vor.u32 %v2223_v51, %v2220_v11  ;;  %v16982_v45 = vshll.u32 %v11893_v38, 16  ;;  %v2163_v57 = vrot.slane %v2162_v22, 4 }
 0x1e4   : > { %5761 = vrot.lane.b32.xlu0 %v8656_v2, %s9470_s19  ;;  %v12081_v2 = vpop.permute.xlu1 %5531  ;;  %v2192_v11 = vsel %vm9604_vm2, %v12067_v44, %v12071_v58  ;;  %v2196_v51 = vrot.slane %v16981_v47, 4  ;;  %v2234_v22 = vor.u32 %v2233_v49, %v12085_v63  ;;  %v17702_v44 = vcombine.low %v11933_v41, %v11936_v3 }
 0x1e5   : > { %17698 = vst [vmem:[#allocation132_spill] sm:$0xff] %v12081_v2  ;;  %5767 = vrot.lane.b32.xlu1 %v8659_v43, %s9470_s19  ;;  %v12106_v43 = vpop.permute.xlu0 %5529  ;;  %v2199_v13 = vrot.slane %v16982_v45, 5  ;;  %v2225_v0 = vrot.slane %v2224_v18, 4  ;;  %v2239_v58 = vrot.slane %v16984_v15, 5  ;;  %v2205_v45 = vrot.slane %v16983_v4, 5 }
 0x1e6   : > { %17701 = vst [vmem:[#allocation133_spill] sm:$0xff] %v12106_v43  ;;  %v16985_v18 = vshrl.u32 %v11901_v46, 16  ;;  %v2158_v49 = vsel %vm9604_vm2, %v2153_v53, %v12025_v27  ;;  %v2168_v29 = vsel %vm9604_vm2, %v2163_v57, %v12079_v33  ;;  %v16986_v57 = vshll.u32 %v11901_v46, 16 }
 0x1e7   : > { %v2200_v47 = vor.u32 %v2199_v13, %v2196_v51  ;;  %v12136_v51 = vld [vmem:[%s9559_s30 + $0x5c] sm:$0x3]  ;;  %v17705_v13 = vcombine.low %v11947_v55, %v11950_v48  ;;  %v2230_v53 = vsel %vm9604_vm2, %v2225_v0, %v12085_v63  ;;  %v17709_v63 = vshll.u32 %v11904_v24, 16 }
 0x1e8   : > { %5765 = vrot.lane.b32.xlu0 %v8658_v26, %s9470_s19  ;;  %v2235_v26 = vrot.slane %v2234_v22, 4  ;;  %v12133_v56 = vpop.permute.xlu1 %5535  ;;  %v2268_v27 = vrot.slane %v16985_v18, 4  ;;  %v2271_v33 = vrot.slane %v16986_v57, 5  ;;  %v17711_v57 = vcombine.low %v11966_v14, %v11969_v30 }
 0x1e9   : > { %5771 = vrot.lane.b32.xlu1 %v17702_v44, %s9470_s19  ;;  %v17703_v44 = vshrl.u32 %v11898_v9, 16  ;;  %17704 = vst [vmem:[#allocation134_spill] sm:$0xff] %v12133_v56  ;;  %v2201_v4 = vrot.slane %v2200_v47, 4  ;;  %v17707_v47 = vcombine.low %v11960_v62, %v11963_v25  ;;  %v12158_v18 = vpop.permute.xlu0 %5533  ;;  %v16992_v0 = vshll.u32 %v11915_v54, 16 }
 0x1ea   : > { %17708 = vst [vmem:[#allocation135_spill] sm:$0xff] %v12158_v18  ;;  %v16989_v18 = vshll.u32 %v11912_v5, 16 }
 0x1eb   : > { %v2209_v43 = vrot.slane %v17703_v44, 4  ;;  %v17706_v44 = vshll.u32 %v12091_v10, 16  ;;  %v2206_v56 = vsel %vm9604_vm2, %v2201_v4, %v2205_v45 }
 0x1ec   : > { %5769 = vrot.lane.b32.xlu0 %v17705_v13, %s9470_s19  ;;  %v2240_v13 = vsel %vm9604_vm2, %v2235_v26, %v2239_v58  ;;  %v2281_v26 = vrot.slane %v17710_v17, 4  ;;  %v16988_v58 = vshrl.u32 %v11912_v5, 16  ;;  %v12188_v20 = vpop.permute.xlu1 %5539  ;;  %v12209_v5 = vld [vmem:[%s9559_s30 + $0x74] sm:$0x3] }
 0x1ed   : > { %v2210_v22 = vor.u32 %v2209_v43, %v2205_v45  ;;  %v2215_v15 = vrot.slane %v17706_v44, 5  ;;  %5775 = vrot.lane.b32.xlu1 %v17707_v47, %s9470_s19  ;;  %v12164_v43 = vrot.slane %v17709_v63, 5  ;;  %v12168_v44 = vld [vmem:[%s9559_s30 + $0x50] sm:$0x3]  ;;  %v2272_v63 = vor.u32 %v2271_v33, %v2268_v27  ;;  %17712 = vst [vmem:[#allocation136_spill] sm:$0xff] %v12188_v20  ;;  %17718 = vst [vmem:[#allocation138_spill] sm:$0xff] %v12209_v5 }
 0x1ee   : > { %v2244_v17 = vrot.slane %v16988_v58, 4  ;;  %v17713_v27 = vcombine.low %v11979_v8, %v11997_v21  ;;  %v8671_v58 = vcombine.low %v2230_v53, %v2240_v13  ;;  %v17715_v20 = vshrl.u32 %v11915_v54, 16 }
 0x1ef   : > { %v2211_v47 = vrot.slane %v2210_v22, 4  ;;  %v2282_v4 = vor.u32 %v2281_v26, %v12164_v43  ;;  %v2273_v33 = vrot.slane %v2272_v63, 4  ;;  %v8668_v26 = vcombine.low %v2158_v49, %v2168_v29 }
 0x1f0   : > { %5773 = vrot.lane.b32.xlu0 %v17711_v57, %s9470_s19  ;;  %v8669_v57 = vcombine.low %v2182_v42, %v2192_v11  ;;  %v17714_v22 = vshll.u32 %v12136_v51, 16  ;;  %v2257_v50 = vrot.slane %v17715_v20, 4  ;;  %v16995_v29 = vshrl.u32 %v11918_v59, 16 }
 0x1f1   : > { %v2216_v45 = vsel %vm9604_vm2, %v2211_v47, %v2215_v15  ;;  %5779 = vrot.lane.b32.xlu1 %v17713_v27, %s9470_s19  ;;  %v2247_v15 = vrot.slane %v16989_v18, 5  ;;  %v2253_v47 = vrot.slane %v16992_v0, 5  ;;  %v17716_v27 = vcombine.low %v12009_v23, %v12012_v19  ;;  %v12206_v18 = vpop.permute.xlu0 %5537 }
 0x1f2   : > { %v2287_v37 = vrot.slane %v17714_v22, 5  ;;  %v8670_v42 = vcombine.low %v2206_v56, %v2216_v45  ;;  %v2283_v11 = vrot.slane %v2282_v4, 4  ;;  %17717 = vst [vmem:[#allocation137_spill] sm:$0xff] %v12206_v18  ;;  %v17719_v53 = vshll.u32 %v12168_v44, 16 }
 0x1f3   : > { %v2248_v63 = vor.u32 %v2247_v15, %v2244_v17  ;;  %v2258_v49 = vor.u32 %v2257_v50, %v2253_v47  ;;  %v16993_v20 = vshll.u32 %v11918_v59, 16  ;;  %v16994_v22 = vshll.u32 %v11921_v7, 16 }
 0x1f4   : > { %5777 = vrot.lane.b32.xlu0 %v17716_v27, %s9470_s19  ;;  %v2263_v13 = vrot.slane %v17719_v53, 5  ;;  %v17720_v56 = vcombine.low %v12034_v36, %v12037_v52  ;;  %v2278_v45 = vsel %vm9604_vm2, %v2273_v33, %v12164_v43  ;;  %v2316_v50 = vrot.slane %v16995_v29, 4 }
 0x1f5   : > { %v2249_v4 = vrot.slane %v2248_v63, 4  ;;  %v16996_v17 = vshrl.u32 %v11921_v7, 16  ;;  %v2259_v15 = vrot.slane %v2258_v49, 4  ;;  %v2319_v27 = vrot.slane %v16993_v20, 5  ;;  %v12242_v49 = vld [vmem:[%s9559_s30 + $0x68] sm:$0x3] }
 0x1f6   : > { %5783 = vrot.lane.b32.xlu1 %v17720_v56, %s9470_s19  ;;  %v2325_v53 = vrot.slane %v16994_v22, 5  ;;  %v12231_v56 = vpop.permute.xlu1 %5543  ;;  %v17722_v43 = vcombine.low %v12047_v34, %v12050_v6  ;;  %v2288_v33 = vsel %vm9604_vm2, %v2283_v11, %v2287_v37  ;;  %v16999_v20 = vshrl.u32 %v11924_v60, 16 }
 0x1f7   : > { %17721 = vst [vmem:[#allocation139_spill] sm:$0xff] %v12231_v56  ;;  %v2329_v63 = vrot.slane %v16996_v17, 4  ;;  %v2254_v29 = vsel %vm9604_vm2, %v2249_v4, %v2253_v47  ;;  %v2264_v0 = vsel %vm9604_vm2, %v2259_v15, %v2263_v13  ;;  %v2320_v18 = vor.u32 %v2319_v27, %v2316_v50  ;;  %v12258_v4 = vpop.permute.xlu0 %5541 }
 0x1f8   : > { %5781 = vrot.lane.b32.xlu0 %v17722_v43, %s9470_s19  ;;  %v17000_v43 = vshll.u32 %v11927_v32, 16  ;;  %v17723_v11 = vshll.u32 %v12209_v5, 16  ;;  %v2292_v22 = vrot.slane %v16999_v20, 4  ;;  %v17724_v56 = vshll.u32 %v11924_v60, 16  ;;  %17725 = vst [vmem:[#allocation140_spill] sm:$0xff] %v12258_v4 }
 0x1f9   : > { %v2330_v37 = vor.u32 %v2329_v63, %v2325_v53  ;;  %v2321_v13 = vrot.slane %v2320_v18, 4  ;;  %v17010_v15 = vshrl.u32 %v11927_v32, 16  ;;  %v8673_v27 = vcombine.low %v2278_v45, %v2288_v33 }
 0x1fa   : > { %5835 = vrot.lane.b32.xlu1 %v8669_v57, %s9471_s21  ;;  %v2335_v17 = vrot.slane %v17723_v11, 5  ;;  %v2295_v47 = vrot.slane %v17724_v56, 5  ;;  %v2301_v50 = vrot.slane %v17000_v43, 5  ;;  %v17008_v57 = vshll.u32 %v12242_v49, 16  ;;  %v12272_v43 = vld [vmem:[%s9559_s30 + $0x8c] sm:$0x3]  ;;  %v12275_v60 = vpop.permute.xlu1 %5595 }
 0x1fb   : > { %v8672_v63 = vcombine.low %v2254_v29, %v2264_v0  ;;  %v2331_v11 = vrot.slane %v2330_v37, 4  ;;  %v2326_v20 = vsel %vm9604_vm2, %v2321_v13, %v2325_v53  ;;  %v2305_v56 = vrot.slane %v17010_v15, 4  ;;  %17726 = vst [vmem:[#allocation141_spill] sm:$0xff] %v12272_v43  ;;  %17727 = vst [vmem:[#allocation142_spill] sm:$0xff] %v12275_v60  ;;  %v9263_v15 = vld [vmem:[%s9559_s30 + $0x54] sm:$0xf] }
 0x1fc   : > { %5833 = vrot.lane.b32.xlu0 %v8668_v26, %s9471_s21  ;;  %v2296_v5 = vor.u32 %v2295_v47, %v2292_v22  ;;  %v2311_v18 = vrot.slane %v17008_v57, 5  ;;  %v17006_v4 = vshrl.u32 %v11933_v41, 16  ;;  %v17005_v29 = vshll.u32 %v11933_v41, 16  ;;  %v12293_v47 = vpop.permute.xlu0 %5593 }
 0x1fd   : > { %v2336_v0 = vsel %vm9604_vm2, %v2331_v11, %v2335_v17  ;;  %v17003_v22 = vshll.u32 %v11936_v3, 16  ;;  %v2306_v53 = vor.u32 %v2305_v56, %v2301_v50  ;;  %v17004_v37 = vshrl.u32 %v11936_v3, 16  ;;  %17728 = vst [vmem:[#allocation143_spill] sm:$0xff] %v12293_v47 }
 0x1fe   : > { %5839 = vrot.lane.b32.xlu1 %v8671_v58, %s9471_s21  ;;  %v2297_v26 = vrot.slane %v2296_v5, 4  ;;  %v8675_v45 = vcombine.low %v2326_v20, %v2336_v0  ;;  %v2364_v33 = vrot.slane %v17006_v4, 4  ;;  %v2367_v5 = vrot.slane %v17005_v29, 5 }
 0x1ff   : > { %v2373_v17 = vrot.slane %v17003_v22, 5  ;;  %v17007_v20 = vshll.u32 %v12272_v43, 16  ;;  %v2307_v13 = vrot.slane %v2306_v53, 4  ;;  %v2377_v11 = vrot.slane %v17004_v37, 4 }
 0x200   : > { %5837 = vrot.lane.b32.xlu0 %v8670_v42, %s9471_s21  ;;  %v2302_v58 = vsel %vm9604_vm2, %v2297_v26, %v2301_v50  ;;  %v17009_v56 = vshrl.u32 %v11947_v55, 16  ;;  %v17011_v42 = vshll.u32 %v11947_v55, 16  ;;  %v2368_v50 = vor.u32 %v2367_v5, %v2364_v33  ;;  %v12303_v26 = vld [vmem:[%s9559_s30 + $0x80] sm:$0x3]  ;;  %v12313_v33 = vpop.permute.xlu1 %5599 }
 0x201   : > { %v2383_v0 = vrot.slane %v17007_v20, 5  ;;  %17729 = vst [vmem:[#allocation144_spill] sm:$0xff] %v12303_v26  ;;  %v17014_v22 = vshll.u32 %v11950_v48, 16  ;;  %v17015_v53 = vshrl.u32 %v11950_v48, 16  ;;  %v2312_v37 = vsel %vm9604_vm2, %v2307_v13, %v2311_v18  ;;  %17730 = vst [vmem:[#allocation145_spill] sm:$0xff] %v12313_v33 }
 0x202   : > { %5843 = vrot.lane.b32.xlu1 %v8673_v27, %s9471_s21  ;;  %v2378_v29 = vor.u32 %v2377_v11, %v2373_v17  ;;  %v2340_v4 = vrot.slane %v17009_v56, 4  ;;  %v2343_v27 = vrot.slane %v17011_v42, 5  ;;  %v8674_v5 = vcombine.low %v2302_v58, %v2312_v37  ;;  %v9264_v42 = vld [vmem:[%s9559_s30 + $0x58] sm:$0xf]  ;;  %v12327_v58 = vld [vmem:[%s9559_s30 + $0xa4] sm:$0x3] }
 0x203   : > { %v2369_v20 = vrot.slane %v2368_v50, 4  ;;  %v2349_v57 = vrot.slane %v17014_v22, 5  ;;  %v2353_v18 = vrot.slane %v17015_v53, 4  ;;  %v17012_v56 = vshll.u32 %v12303_v26, 16  ;;  %17731 = vst [vmem:[#allocation146_spill] sm:$0xff] %v12327_v58  ;;  %v12329_v50 = vpop.permute.xlu0 %5597 }
 0x204   : > { %5841 = vrot.lane.b32.xlu0 %v8672_v63, %s9471_s21  ;;  %v2379_v13 = vrot.slane %v2378_v29, 4  ;;  %v2344_v11 = vor.u32 %v2343_v27, %v2340_v4  ;;  %v8499_v47 = vcombine.low %v9263_v15, %v9264_v42  ;;  %17732 = vst [vmem:[#allocation147_spill] sm:$0xff] %v12329_v50  ;;  %v17013_v15 = vshrl.u32 %v11960_v62, 16 }
 0x205   : > { %v2374_v63 = vsel %vm9604_vm2, %v2369_v20, %v2373_v17  ;;  %v2354_v37 = vor.u32 %v2353_v18, %v2349_v57  ;;  %v2359_v27 = vrot.slane %v17012_v56, 5  ;;  %v17016_v20 = vshll.u32 %v11960_v62, 16  ;;  %v12345_v56 = vpop.permute.xlu1 %5603 }
 0x206   : > { %5847 = vrot.lane.b32.xlu1 %v8675_v45, %s9471_s21  ;;  %v2384_v29 = vsel %vm9604_vm2, %v2379_v13, %v2383_v0  ;;  %v2345_v4 = vrot.slane %v2344_v11, 4  ;;  %v17017_v42 = vshll.u32 %v11963_v25, 16  ;;  %v2412_v18 = vrot.slane %v17013_v15, 4  ;;  %17733 = vst [vmem:[#allocation148_spill] sm:$0xff] %v12345_v56  ;;  %v9266_v15 = vld [vmem:[%s9559_s30 + $0x4c] sm:$0xf] }
 0x207   : > { %v8677_v45 = vcombine.low %v2374_v63, %v2384_v29  ;;  %v2355_v17 = vrot.slane %v2354_v37, 4  ;;  %v17019_v13 = vshrl.u32 %v11963_v25, 16  ;;  %v2415_v63 = vrot.slane %v17016_v20, 5  ;;  %v12355_v37 = vld [vmem:[%s9559_s30 + $0x98] sm:$0x3]  ;;  %v12367_v56 = vpop.permute.xlu0 %5601 }
 0x208   : > { %5845 = vrot.lane.b32.xlu0 %v8674_v5, %s9471_s21  ;;  %v2350_v0 = vsel %vm9604_vm2, %v2345_v4, %v2349_v57  ;;  %v2421_v57 = vrot.slane %v17017_v42, 5  ;;  %17734 = vst [vmem:[#allocation149_spill] sm:$0xff] %v12355_v37  ;;  %v17018_v29 = vshrl.u32 %v11966_v14, 16  ;;  %v9265_v4 = vld [vmem:[%s9559_s30 + $0x48] sm:$0xf]  ;;  %v17020_v11 = vshll.u32 %v11966_v14, 16 }
 0x209   : > { %v2360_v5 = vsel %vm9604_vm2, %v2355_v17, %v2359_v27  ;;  %v8498_v22 = vcombine.low %v9265_v4, %v9266_v15  ;;  %v2416_v27 = vor.u32 %v2415_v63, %v2412_v18  ;;  %v17021_v20 = vshll.u32 %v11969_v30, 16  ;;  %17735 = vst [vmem:[#allocation150_spill] sm:$0xff] %v12367_v56  ;;  %v17737_v63 = vld [vmem:[#allocation6_spill] sm:$0xff]  ;;  %v12386_v50 = vpop.permute.xlu1 %5607 }
 0x20a   : > { %5851 = vrot.lane.b32.xlu1 %v8677_v45, %s9471_s21  ;;  %v8676_v53 = vcombine.low %v2350_v0, %v2360_v5  ;;  %v2425_v45 = vrot.slane %v17019_v13, 4  ;;  %v2388_v17 = vrot.slane %v17018_v29, 4  ;;  %v17736_v0 = vshll.u32 %v12327_v58, 16  ;;  %17739 = vst [vmem:[#allocation6_spill] sm:$0xff] %v12386_v50 }
 0x20b   : > { %v2391_v4 = vrot.slane %v17020_v11, 5  ;;  %v17022_v18 = vshll.u32 %v12355_v37, 16  ;;  %v12377_v29 = vsel %vm6185_vm12, %v8499_v47, %v17737_v63  ;;  %v2417_v13 = vrot.slane %v2416_v27, 4  ;;  %v12391_v27 = vld [vmem:[%s9559_s30 + $0xbc] sm:$0x3] }
 0x20c   : > { %5849 = vrot.lane.b32.xlu0 %v8676_v53, %s9471_s21  ;;  %v2426_v15 = vor.u32 %v2425_v45, %v2421_v57  ;;  %v2431_v5 = vrot.slane %v17736_v0, 5  ;;  %v2397_v42 = vrot.slane %v17021_v20, 5  ;;  %v17738_v53 = vshrl.u32 %v11969_v30, 16  ;;  %17740 = vst [vmem:[#allocation151_spill] sm:$0xff] %v12391_v27 }
 0x20d   : > { %v2392_v33 = vor.u32 %v2391_v4, %v2388_v17  ;;  %v2407_v0 = vrot.slane %v17022_v18, 5  ;;  %v17023_v11 = vshrl.u32 %v11979_v8, 16  ;;  %v2422_v47 = vsel %vm9604_vm2, %v2417_v13, %v2421_v57  ;;  %v12404_v57 = vpop.permute.xlu0 %5605 }
 0x20e   : > { %v2401_v56 = vrot.slane %v17738_v53, 4  ;;  %v2427_v45 = vrot.slane %v2426_v15, 4  ;;  %v17026_v20 = vshll.u32 %v11979_v8, 16  ;;  %v17024_v60 = vshll.u32 %v11997_v21, 16  ;;  %17741 = vst [vmem:[#allocation152_spill] sm:$0xff] %v12404_v57  ;;  %v12424_v57 = vpop.permute.xlu1 %5611 }
 0x20f   : > { %v2393_v15 = vrot.slane %v2392_v33, 4  ;;  %v2460_v4 = vrot.slane %v17023_v11, 4  ;;  %v17025_v53 = vshrl.u32 %v11997_v21, 16  ;;  %v17030_v11 = vshrl.u32 %v12009_v23, 16  ;;  %17743 = vst [vmem:[#allocation154_spill] sm:$0xff] %v12424_v57 }
 0x210   : > { %v2402_v63 = vor.u32 %v2401_v56, %v2397_v42  ;;  %v2432_v17 = vsel %vm9604_vm2, %v2427_v45, %v2431_v5  ;;  %v2463_v56 = vrot.slane %v17026_v20, 5  ;;  %v2469_v13 = vrot.slane %v17024_v60, 5 }
 0x211   : > { %v8679_v18 = vcombine.low %v2422_v47, %v2432_v17  ;;  %v2398_v5 = vsel %vm9604_vm2, %v2393_v15, %v2397_v42  ;;  %v2473_v33 = vrot.slane %v17025_v53, 4  ;;  %v17027_v45 = vshll.u32 %v12391_v27, 16  ;;  %v12416_v17 = vld [vmem:[%s9559_s30 + $0xb0] sm:$0x3] }
 0x212   : > { %v2403_v50 = vrot.slane %v2402_v63, 4  ;;  %v2464_v63 = vor.u32 %v2463_v56, %v2460_v4  ;;  %17742 = vst [vmem:[#allocation153_spill] sm:$0xff] %v12416_v17  ;;  %v17031_v60 = vshll.u32 %v12009_v23, 16  ;;  %v17032_v42 = vshll.u32 %v12012_v19, 16  ;;  %v12444_v23 = vld [vmem:[%s9559_s30 + $0xd4] sm:$0x3] }
 0x213   : > { %5855 = vrot.lane.b32.xlu1 %v8679_v18, %s9471_s21  ;;  %v2474_v53 = vor.u32 %v2473_v33, %v2469_v13  ;;  %v2479_v20 = vrot.slane %v17027_v45, 5  ;;  %v2436_v18 = vrot.slane %v17030_v11, 4  ;;  %v17035_v56 = vshrl.u32 %v12012_v19, 16  ;;  %v9268_v45 = vld [vmem:[%s9559_s30 + $0xb8] sm:$0xf] }
 0x214   : > { %v2408_v47 = vsel %vm9604_vm2, %v2403_v50, %v2407_v0  ;;  %v2465_v50 = vrot.slane %v2464_v63, 4  ;;  %v2439_v0 = vrot.slane %v17031_v60, 5  ;;  %v2445_v4 = vrot.slane %v17032_v42, 5 }
 0x215   : > { %v8678_v15 = vcombine.low %v2398_v5, %v2408_v47  ;;  %v17744_v5 = vld [vmem:[#allocation7_spill] sm:$0xff]  ;;  %v2475_v11 = vrot.slane %v2474_v53, 4  ;;  %v17036_v63 = vshll.u32 %v12416_v17, 16  ;;  %v2449_v42 = vrot.slane %v17035_v56, 4  ;;  %v9270_v17 = vld [vmem:[%s9559_s30 + $0xac] sm:$0xf] }
 0x216   : > { %v12433_v33 = vsel %vm6185_vm12, %v8498_v22, %v17744_v5  ;;  %v9267_v47 = vld [vmem:[%s9559_s30 + $0xb4] sm:$0xf]  ;;  %v2470_v60 = vsel %vm9604_vm2, %v2465_v50, %v2469_v13  ;;  %v2440_v57 = vor.u32 %v2439_v0, %v2436_v18  ;;  %17745 = vst [vmem:[#allocation7_spill] sm:$0xff] %v12444_v23  ;;  %v17039_v22 = vshrl.u32 %v12034_v36, 16  ;;  %v12447_v5 = vpop.permute.xlu0 %5609 }
 0x217   : > { %v8507_v27 = vcombine.low %v9267_v47, %v9268_v45  ;;  %5853 = vrot.lane.b32.xlu0 %v8678_v15, %s9471_s21  ;;  %17746 = vst [vmem:[#allocation155_spill] sm:$0xff] %v12447_v5  ;;  %v2480_v45 = vsel %vm9604_vm2, %v2475_v11, %v2479_v20  ;;  %v2455_v53 = vrot.slane %v17036_v63, 5  ;;  %v17037_v15 = vshll.u32 %v12034_v36, 16  ;;  %v12463_v5 = vpop.permute.xlu1 %5615  ;;  %v9269_v36 = vld [vmem:[%s9559_s30 + $0xa8] sm:$0xf] }
 0x218   : > { %v17038_v13 = vshll.u32 %v12037_v52, 16  ;;  %v8681_v18 = vcombine.low %v2470_v60, %v2480_v45  ;;  %v2441_v50 = vrot.slane %v2440_v57, 4  ;;  %v2450_v0 = vor.u32 %v2449_v42, %v2445_v4  ;;  %17747 = vst [vmem:[#allocation156_spill] sm:$0xff] %v12463_v5  ;;  %v12475_v5 = vld [vmem:[%s9559_s30 + $0xc8] sm:$0x3] }
 0x219   : > { %v2508_v47 = vrot.slane %v17039_v22, 4  ;;  %v2511_v56 = vrot.slane %v17037_v15, 5  ;;  %v17040_v11 = vshrl.u32 %v12037_v52, 16  ;;  %v17043_v63 = vshll.u32 %v12444_v23, 16  ;;  %17748 = vst [vmem:[#allocation157_spill] sm:$0xff] %v12475_v5 }
 0x21a   : > { %v2517_v20 = vrot.slane %v17038_v13, 5  ;;  %5859 = vrot.lane.b32.xlu1 %v8681_v18, %s9471_s21  ;;  %v2446_v60 = vsel %vm9604_vm2, %v2441_v50, %v2445_v4  ;;  %v2451_v57 = vrot.slane %v2450_v0, 4  ;;  %v17052_v42 = vshrl.u32 %v12047_v34, 16 }
 0x21b   : > { %v17053_v45 = vshll.u32 %v12047_v34, 16  ;;  %v2512_v15 = vor.u32 %v2511_v56, %v2508_v47  ;;  %v2521_v13 = vrot.slane %v17040_v11, 4  ;;  %v2527_v22 = vrot.slane %v17043_v63, 5  ;;  %v12485_v47 = vpop.permute.xlu0 %5613 }
 0x21c   : > { %v17056_v18 = vshll.u32 %v12050_v6, 16  ;;  %v2456_v4 = vsel %vm9604_vm2, %v2451_v57, %v2455_v53  ;;  %v2484_v50 = vrot.slane %v17052_v42, 4  ;;  %v17058_v56 = vshrl.u32 %v12050_v6, 16  ;;  %17749 = vst [vmem:[#allocation158_spill] sm:$0xff] %v12485_v47  ;;  %v17754_v47 = vld [vmem:[#allocation24_spill] sm:$0xff] }
 0x21d   : > { %v2487_v0 = vrot.slane %v17053_v45, 5  ;;  %v8680_v11 = vcombine.low %v2446_v60, %v2456_v4  ;;  %v2513_v23 = vrot.slane %v2512_v15, 4  ;;  %v2522_v63 = vor.u32 %v2521_v13, %v2517_v20  ;;  %v17750_v45 = vld [vmem:[#allocation23_spill] sm:$0xff] }
 0x21e   : > { %v2493_v52 = vrot.slane %v17056_v18, 5  ;;  %v8506_v19 = vcombine.low %v9269_v36, %v9270_v17  ;;  %v2497_v57 = vrot.slane %v17058_v56, 4  ;;  %v17057_v42 = vshll.u32 %v12475_v5, 16  ;;  %v12500_v4 = vpop.permute.xlu1 %5619 }
 0x21f   : > { %v2488_v53 = vor.u32 %v2487_v0, %v2484_v50  ;;  %v6233_v34 = vsel %vm6185_vm12, %v8507_v27, %v17750_v45  ;;  %5857 = vrot.lane.b32.xlu0 %v8680_v11, %s9471_s21  ;;  %v2518_v15 = vsel %vm9604_vm2, %v2513_v23, %v2517_v20  ;;  %v2523_v13 = vrot.slane %v2522_v63, 4  ;;  %17751 = vst [vmem:[#allocation23_spill] sm:$0xff] %v12500_v4 }
 0x220   : > { %v8301_v60 = vrot.slane %v11871_v39, 9  ;;  %v2498_v17 = vor.u32 %v2497_v57, %v2493_v52  ;;  %v2503_v50 = vrot.slane %v17057_v42, 5  ;;  %v2586_v0 = vrot.slane %v11874_v35, 5  ;;  %v12514_v42 = vpop.permute.xlu0 %5617 }
 0x221   : > { %v2489_v36 = vrot.slane %v2488_v53, 4  ;;  %v2528_v27 = vsel %vm9604_vm2, %v2523_v13, %v2527_v22  ;;  %v2589_v11 = vrot.slane %v11982_v61, 5  ;;  %v8300_v45 = vrot.slane %v11878_v1, 9  ;;  %17753 = vst [vmem:[#allocation21_spill] sm:$0xff] %v12514_v42  ;;  %v17761_v42 = vld [vmem:[#allocation59_spill] sm:$0xff] }
 0x222   : > { %v2579_v23 = vrot.slane %v11881_v31, 5  ;;  %v8683_v63 = vcombine.low %v2518_v15, %v2528_v27  ;;  %v2499_v53 = vrot.slane %v2498_v17, 4  ;;  %v2587_v18 = vsel %vm10020_vm5, %v8301_v60, %v2586_v0 }
 0x223   : > { %v2494_v20 = vsel %vm9604_vm2, %v2489_v36, %v2493_v52  ;;  %v2588_v56 = vrot.slane %v2586_v0, 4  ;;  %v2582_v4 = vrot.slane %v12002_v16, 5  ;;  %v6230_v31 = vsel %vm6185_vm12, %v8506_v19, %v17754_v47 }
 0x224   : > { %v2580_v22 = vsel %vm10020_vm5, %v8300_v45, %v2579_v23  ;;  %v2581_v13 = vrot.slane %v2579_v23, 4  ;;  %5863 = vrot.lane.b32.xlu1 %v8683_v63, %s9471_s21  ;;  %v2504_v52 = vsel %vm9604_vm2, %v2499_v53, %v2503_v50  ;;  %v8303_v15 = vrot.slane %v11887_v28, 9 }
 0x225   : > { %v8682_v60 = vcombine.low %v2494_v20, %v2504_v52  ;;  %v2590_v36 = vsel %vm10020_vm5, %v2588_v56, %v2589_v11  ;;  %v2600_v0 = vrot.slane %v11890_v12, 5  ;;  %v2603_v45 = vrot.slane %v12060_v40, 5  ;;  %v17756_v11 = vld [vmem:[#allocation41_spill] sm:$0xff] }
 0x226   : > { %v2583_v17 = vsel %vm10020_vm5, %v2581_v13, %v2582_v4  ;;  %v8685_v19 = vcombine.low %v2587_v18, %v2590_v36  ;;  %v8302_v23 = vrot.slane %v11893_v38, 9  ;;  %v2593_v56 = vrot.slane %v11898_v9, 5  ;;  %v17757_v18 = vld [vmem:[#allocation45_spill] sm:$0xff] }
 0x227   : > { %v12530_v27 = vpop.permute.xlu1 %5623  ;;  %v8684_v47 = vcombine.low %v2580_v22, %v2583_v17  ;;  %5861 = vrot.lane.b32.xlu0 %v8682_v60, %s9471_s21  ;;  %v2601_v50 = vsel %vm10020_vm5, %v8303_v15, %v2600_v0  ;;  %v2602_v63 = vrot.slane %v2600_v0, 4  ;;  %v2596_v4 = vrot.slane %v12091_v10, 5  ;;  %s9477_s21 = smov [#allocation2]  }
 0x228   : > { %17755 = vst [vmem:[#allocation24_spill] sm:$0xff] %v12530_v27  ;;  %v6250_v20 = vsel %vm6234_vm13, %v12377_v29, %v17756_v11  ;;  %v6248_v53 = vsel %vm6234_vm13, %v12433_v33, %v17757_v18  ;;  %5915 = vrot.lane.b32.xlu1 %v8685_v19, %s9472_s23  ;;  %v8305_v22 = vrot.slane %v11901_v46, 9  ;;  %v2614_v13 = vrot.slane %v11904_v24, 5  ;;  %v17760_v11 = vld [vmem:[#allocation109_spill] sm:$0xff] }
 0x229   : > { %v2604_v15 = vsel %vm10020_vm5, %v2602_v63, %v2603_v45  ;;  %v2594_v60 = vsel %vm10020_vm5, %v8302_v23, %v2593_v56  ;;  %v2595_v29 = vrot.slane %v2593_v56, 4  ;;  %v2617_v36 = vrot.slane %v12136_v51, 5  ;;  %v17762_v56 = vld [vmem:[#allocation60_spill] sm:$0xff] }
 0x22a   : > { %v12548_v52 = vpop.permute.xlu0 %5621  ;;  %v8687_v33 = vcombine.low %v2601_v50, %v2604_v15  ;;  %v2615_v0 = vsel %vm10020_vm5, %v8305_v22, %v2614_v13  ;;  %v2616_v19 = vrot.slane %v2614_v13, 4  ;;  %v8304_v18 = vrot.slane %v17760_v11, 9 }
 0x22b   : > { %17758 = vst [vmem:[#allocation41_spill] sm:$0xff] %v12548_v52  ;;  %v12555_v17 = vpop.permute.xlu1 %5675  ;;  %v6266_v2 = vsel %vm6234_vm13, %v6233_v34, %v17761_v42  ;;  %5913 = vrot.lane.b32.xlu0 %v8684_v47, %s9472_s23  ;;  %v2597_v45 = vsel %vm10020_vm5, %v2595_v29, %v2596_v4  ;;  %v2607_v23 = vrot.slane %v11915_v54, 5  ;;  %v2610_v63 = vrot.slane %v12168_v44, 5 }
 0x22c   : > { %17759 = vst [vmem:[#allocation45_spill] sm:$0xff] %v12555_v17  ;;  %v6264_v50 = vsel %vm6234_vm13, %v6230_v31, %v17762_v56  ;;  %5919 = vrot.lane.b32.xlu1 %v8687_v33, %s9472_s23  ;;  %v8686_v22 = vcombine.low %v2594_v60, %v2597_v45  ;;  %v2618_v13 = vsel %vm10020_vm5, %v2616_v19, %v2617_v36  ;;  %v8307_v34 = vrot.slane %v11918_v59, 9  ;;  %v17765_v31 = vld [vmem:[#allocation138_spill] sm:$0xff] }
 0x22d   : > { %v8689_v47 = vcombine.low %v2615_v0, %v2618_v13  ;;  %v2608_v4 = vsel %vm10020_vm5, %v8304_v18, %v2607_v23  ;;  %v2609_v15 = vrot.slane %v2607_v23, 4  ;;  %v2628_v29 = vrot.slane %v11921_v7, 5  ;;  %v17766_v33 = vld [vmem:[#allocation110_spill] sm:$0xff]  ;;  %v17767_v23 = vld [vmem:[#allocation68_spill] sm:$0xff] }
 0x22e   : > { %v12573_v42 = vpop.permute.xlu0 %5673  ;;  %v2631_v56 = vrot.slane %v17765_v31, 5  ;;  %v8306_v60 = vrot.slane %v17766_v33, 9  ;;  %v2621_v45 = vrot.slane %v11927_v32, 5  ;;  %v2624_v36 = vrot.slane %v12242_v49, 5 }
 0x22f   : > { %17763 = vst [vmem:[#allocation109_spill] sm:$0xff] %v12573_v42  ;;  %v12578_v17 = vpop.permute.xlu1 %5679  ;;  %5917 = vrot.lane.b32.xlu0 %v8686_v22, %s9472_s23  ;;  %v2611_v0 = vsel %vm10020_vm5, %v2609_v15, %v2610_v63  ;;  %v2629_v19 = vsel %vm10020_vm5, %v8307_v34, %v2628_v29  ;;  %v2630_v18 = vrot.slane %v2628_v29, 4  ;;  %v6283_v13 = vsel %vm6267_vm14, %v6250_v20, %v17767_v23  ;;  %v17770_v23 = vld [vmem:[#allocation70_spill] sm:$0xff] }
 0x230   : > { %17764 = vst [vmem:[#allocation59_spill] sm:$0xff] %v12578_v17  ;;  %5923 = vrot.lane.b32.xlu1 %v8689_v47, %s9472_s23  ;;  %v8688_v17 = vcombine.low %v2608_v4, %v2611_v0  ;;  %v2622_v42 = vsel %vm10020_vm5, %v8306_v60, %v2621_v45  ;;  %v2623_v52 = vrot.slane %v2621_v45, 4  ;;  %v8309_v63 = vrot.slane %v11933_v41, 9 }
 0x231   : > { %v2632_v22 = vsel %vm10020_vm5, %v2630_v18, %v2631_v56  ;;  %v2642_v34 = vrot.slane %v11936_v3, 5  ;;  %v2645_v15 = vrot.slane %v12272_v43, 5  ;;  %v8308_v47 = vrot.slane %v11947_v55, 9 }
 0x232   : > { %v12594_v27 = vpop.permute.xlu0 %5677  ;;  %v8691_v29 = vcombine.low %v2629_v19, %v2632_v22  ;;  %v2625_v20 = vsel %vm10020_vm5, %v2623_v52, %v2624_v36  ;;  %v2635_v4 = vrot.slane %v11950_v48, 5  ;;  %v2638_v18 = vrot.slane %v12303_v26, 5 }
 0x233   : > { %17768 = vst [vmem:[#allocation60_spill] sm:$0xff] %v12594_v27  ;;  %v12605_v60 = vpop.permute.xlu1 %5683  ;;  %5921 = vrot.lane.b32.xlu0 %v8688_v17, %s9472_s23  ;;  %v8690_v45 = vcombine.low %v2622_v42, %v2625_v20  ;;  %v2643_v56 = vsel %vm10020_vm5, %v8309_v63, %v2642_v34  ;;  %v2644_v0 = vrot.slane %v2642_v34, 4  ;;  %v6281_v19 = vsel %vm6267_vm14, %v6248_v53, %v17770_v23  ;;  %v17772_v17 = vld [vmem:[#allocation80_spill] sm:$0xff]  ;;  %v17777_v27 = vld [vmem:[#allocation125_spill] sm:$0xff] }
 0x234   : > { %17769 = vst [vmem:[#allocation138_spill] sm:$0xff] %v12605_v60  ;;  %5927 = vrot.lane.b32.xlu1 %v8691_v29, %s9472_s23  ;;  %v2636_v52 = vsel %vm10020_vm5, %v8308_v47, %v2635_v4  ;;  %v2637_v36 = vrot.slane %v2635_v4, 4  ;;  %v8311_v22 = vrot.slane %v11960_v62, 9  ;;  %v6299_v42 = vsel %vm6267_vm14, %v6266_v2, %v17772_v17 }
 0x235   : > { %v2646_v63 = vsel %vm10020_vm5, %v2644_v0, %v2645_v15  ;;  %v2656_v34 = vrot.slane %v11963_v25, 5  ;;  %v2659_v20 = vrot.slane %v12327_v58, 5  ;;  %v8310_v47 = vrot.slane %v11966_v14, 9  ;;  %v17773_v0 = vld [vmem:[#allocation81_spill] sm:$0xff] }
 0x236   : > { %v12617_v60 = vpop.permute.xlu0 %5681  ;;  %v8693_v53 = vcombine.low %v2643_v56, %v2646_v63  ;;  %v2639_v29 = vsel %vm10020_vm5, %v2637_v36, %v2638_v18  ;;  %v2649_v15 = vrot.slane %v11969_v30, 5  ;;  %v6297_v56 = vsel %vm6267_vm14, %v6264_v50, %v17773_v0  ;;  %v17774_v63 = vld [vmem:[#allocation86_spill] sm:$0xff] }
 0x237   : > { %17771 = vst [vmem:[#allocation110_spill] sm:$0xff] %v12617_v60  ;;  %v12628_v4 = vpop.permute.xlu1 %5687  ;;  %5925 = vrot.lane.b32.xlu0 %v8690_v45, %s9472_s23  ;;  %v8692_v23 = vcombine.low %v2636_v52, %v2639_v29  ;;  %v2657_v2 = vsel %vm10020_vm5, %v8311_v22, %v2656_v34  ;;  %v2658_v17 = vrot.slane %v2656_v34, 4  ;;  %v12638_v18 = vsel %vm17293_vm15, %v6283_v13, %v17774_v63  ;;  %v17775_v13 = vld [vmem:[#allocation151_spill] sm:$0xff]  ;;  %v17776_v60 = vld [vmem:[#allocation124_spill] sm:$0xff] }
 0x238   : > { %5931 = vrot.lane.b32.xlu1 %v8693_v53, %s9472_s23  ;;  %v2652_v36 = vrot.slane %v12355_v37, 5  ;;  %v8313_v45 = vrot.slane %v11979_v8, 9  ;;  %v2650_v34 = vsel %vm10020_vm5, %v8310_v47, %v2649_v15  ;;  %v2651_v29 = vrot.slane %v2649_v15, 4  ;;  %v17779_v15 = vld [vmem:[#allocation153_spill] sm:$0xff] }
 0x239   : > { %v2660_v22 = vsel %vm10020_vm5, %v2658_v17, %v2659_v20  ;;  %v2670_v50 = vrot.slane %v11997_v21, 5  ;;  %v2673_v63 = vrot.slane %v17775_v13, 5  ;;  %v8312_v53 = vrot.slane %v17776_v60, 9 }
 0x23a   : > { %v12643_v52 = vpop.permute.xlu0 %5685  ;;  %v8695_v0 = vcombine.low %v2657_v2, %v2660_v22  ;;  %v2663_v37 = vrot.slane %v17777_v27, 5  ;;  %v2653_v20 = vsel %vm10020_vm5, %v2651_v29, %v2652_v36  ;;  %v2666_v21 = vrot.slane %v17779_v15, 5  ;;  %v17780_v2 = vld [vmem:[#allocation87_spill] sm:$0xff]  ;;  %v17782_v36 = vld [vmem:[#allocation48_spill] sm:$0xff] }
 0x23b   : > { %v12653_v58 = vpop.permute.xlu1 %5691  ;;  %5929 = vrot.lane.b32.xlu0 %v8692_v23, %s9472_s23  ;;  %v2671_v47 = vsel %vm10020_vm5, %v8313_v45, %v2670_v50  ;;  %v2672_v17 = vrot.slane %v2670_v50, 4  ;;  %v12663_v22 = vsel %vm17293_vm15, %v6281_v19, %v17780_v2  ;;  %v8694_v27 = vcombine.low %v2650_v34, %v2653_v20  ;;  %v17783_v50 = vld [vmem:[#allocation127_spill] sm:$0xff]  ;;  %v17784_v19 = vld [vmem:[#allocation128_spill] sm:$0xff] }
 0x23c   : > { %17778 = vst [vmem:[#allocation68_spill] sm:$0xff] %v12653_v58  ;;  %5935 = vrot.lane.b32.xlu1 %v8695_v0, %s9472_s23  ;;  %v2664_v58 = vsel %vm10020_vm5, %v8312_v53, %v2663_v37  ;;  %v2665_v23 = vrot.slane %v2663_v37, 4  ;;  %v12672_v29 = vsel %vm17293_vm15, %v6299_v42, %v17782_v36  ;;  %v8315_v15 = vrot.slane %v17783_v50, 9  ;;  %v17785_v0 = vld [vmem:[#allocation7_spill] sm:$0xff]  ;;  %v17786_v37 = vld [vmem:[#allocation129_spill] sm:$0xff] }
 0x23d   : > { %v2674_v45 = vsel %vm10020_vm5, %v2672_v17, %v2673_v63  ;;  %v2684_v2 = vrot.slane %v17784_v19, 5  ;;  %v2687_v53 = vrot.slane %v17785_v0, 5  ;;  %v8314_v20 = vrot.slane %v17786_v37, 9 }
 0x23e   : > { %v12668_v60 = vpop.permute.xlu0 %5689  ;;  %v8697_v13 = vcombine.low %v2671_v47, %v2674_v45  ;;  %v2667_v34 = vsel %vm10020_vm5, %v2665_v23, %v2666_v21  ;;  %v2677_v36 = vrot.slane %v12050_v6, 5  ;;  %v17788_v47 = vld [vmem:[#allocation51_spill] sm:$0xff]  ;;  %v2680_v21 = vrot.slane %v12475_v5, 5 }
 0x23f   : > { %17781 = vst [vmem:[#allocation70_spill] sm:$0xff] %v12668_v60  ;;  %v12682_v60 = vpop.permute.xlu1 %5695  ;;  %5933 = vrot.lane.b32.xlu0 %v8694_v27, %s9472_s23  ;;  %v8696_v42 = vcombine.low %v2664_v58, %v2667_v34  ;;  %v2685_v63 = vsel %vm10020_vm5, %v8315_v15, %v2684_v2  ;;  %v2686_v17 = vrot.slane %v2684_v2, 4  ;;  %v12690_v45 = vsel %vm17293_vm15, %v6297_v56, %v17788_v47 }
 0x240   : > { %17787 = vst [vmem:[#allocation80_spill] sm:$0xff] %v12682_v60  ;;  %5939 = vrot.lane.b32.xlu1 %v8697_v13, %s9472_s23  ;;  %v17789_v23 = vshrl.u32 %v11871_v39, 16  ;;  %v2678_v2 = vsel %vm10020_vm5, %v8314_v20, %v2677_v36  ;;  %v2679_v34 = vrot.slane %v2677_v36, 4  ;;  %v17791_v56 = vshll.u32 %v11871_v39, 16 }
 0x241   : > { %v2688_v15 = vsel %vm10020_vm5, %v2686_v17, %v2687_v53  ;;  %v17792_v13 = vshrl.u32 %v11874_v35, 16  ;;  %v17793_v5 = vshll.u32 %v11874_v35, 16  ;;  %v17795_v39 = vshll.u32 %v11982_v61, 16 }
 0x242   : > { %v2704_v27 = vrot.slane %v17789_v23, 5  ;;  %v12696_v58 = vpop.permute.xlu0 %5693  ;;  %v2705_v47 = vrot.slane %v17791_v56, 6  ;;  %v8699_v60 = vcombine.low %v2685_v63, %v2688_v15  ;;  %v9271_v23 = vld [vmem:[%s9559_s30 + $0x2c] sm:$0x3]  ;;  %v2681_v53 = vsel %vm10020_vm5, %v2679_v34, %v2680_v21 }
 0x243   : > { %17790 = vst [vmem:[#allocation81_spill] sm:$0xff] %v12696_v58  ;;  %v2708_v0 = vrot.slane %v17792_v13, 5  ;;  %v2709_v6 = vrot.slane %v17793_v5, 6  ;;  %v2713_v37 = vshrl.u32 %v9271_v23, 16  ;;  %v12709_v58 = vpop.permute.xlu1 %5699  ;;  %5937 = vrot.lane.b32.xlu0 %v8696_v42, %s9472_s23  ;;  %v2716_v63 = vrot.slane %v17795_v39, 6 }
 0x244   : > { %17794 = vst [vmem:[#allocation86_spill] sm:$0xff] %v12709_v58  ;;  %v2706_v20 = vor.u32 %v2705_v47, %v2704_v27  ;;  %v17796_v17 = vshrl.u32 %v11878_v1, 16  ;;  %5943 = vrot.lane.b32.xlu1 %v8699_v60, %s9472_s23  ;;  %v8698_v35 = vcombine.low %v2678_v2, %v2681_v53  ;;  %v17797_v56 = vshll.u32 %v11878_v1, 16  ;;  %v17799_v58 = vld [vmem:[#allocation106_spill] sm:$0xff]  ;;  %v9272_v47 = vld [vmem:[%s9559_s30 + $0x20] sm:$0x3] }
 0x245   : > { %v2710_v5 = vor.u32 %v2709_v6, %v2708_v0  ;;  %v2715_v15 = vrot.slane %v2713_v37, 5  ;;  %v17800_v21 = vshrl.u32 %v17799_v58, 16  ;;  %v17801_v61 = vshll.u32 %v17799_v58, 16  ;;  %v17803_v1 = vld [vmem:[#allocation97_spill] sm:$0xff] }
 0x246   : > { %v2689_v36 = vrot.slane %v17796_v17, 5  ;;  %v2690_v13 = vrot.slane %v17797_v56, 6  ;;  %v12721_v23 = vpop.permute.xlu0 %5697  ;;  %v2707_v42 = vrot.slane %v2706_v20, 4  ;;  %v2698_v39 = vshrl.u32 %v9272_v47, 16 }
 0x247   : > { %17798 = vst [vmem:[#allocation87_spill] sm:$0xff] %v12721_v23  ;;  %v2693_v27 = vrot.slane %v17800_v21, 5  ;;  %v2694_v34 = vrot.slane %v17801_v61, 6  ;;  %v2712_v17 = vrot.slane %v2710_v5, 4  ;;  %v2717_v19 = vor.u32 %v2716_v63, %v2715_v15  ;;  %v12730_v37 = vpop.permute.xlu1 %5703  ;;  %5941 = vrot.lane.b32.xlu0 %v8698_v35, %s9472_s23  ;;  %v17805_v63 = vld [vmem:[#allocation32_spill] sm:$0xff]  ;;  %s9385_s23 = sshll.u32 %s9477_s21, 4  ;;  %s9386_s23 = int_to_ptr.vmem [resolvable:$false] %s9385_s23 }
 0x248   : > { %v2691_v60 = vor.u32 %v2690_v13, %v2689_v36  ;;  %v17802_v6 = vshll.u32 %v12002_v16, 16  ;;  %v12735_v2 = vsel %vm6333_vm0, %v12638_v18, %v17803_v1  ;;  %v2711_v58 = vsel %vm10174_vm8, %v2707_v42, %v2710_v5  ;;  %s9387_s27 = scalar_lea.vmem %s9386_s23, 8192 }
 0x249   : > { %v2695_v20 = vor.u32 %v2694_v34, %v2693_v27  ;;  %v2700_v56 = vrot.slane %v2698_v39, 5  ;;  %v12743_v16 = vsel %vm6333_vm0, %v12663_v22, %v17805_v63  ;;  %v2718_v36 = vsel %vm10174_vm8, %v2712_v17, %v2717_v19  ;;  %v9273_v17 = vld [vmem:[%s9559_s30 + $0x44] sm:$0x3] }
 0x24a   : > { %v2701_v0 = vrot.slane %v17802_v6, 6  ;;  %v2692_v15 = vrot.slane %v2691_v60, 4  ;;  %v17806_v18 = vshrl.u32 %v11887_v28, 16  ;;  %v12749_v21 = vpop.permute.xlu0 %5701  ;;  %v8701_v35 = vcombine.low %v2711_v58, %v2718_v36 }
 0x24b   : > { %v2697_v61 = vrot.slane %v2695_v20, 4  ;;  %v17807_v5 = vshll.u32 %v11887_v28, 16  ;;  %v17808_v22 = vshrl.u32 %v11890_v12, 16  ;;  %v17809_v19 = vshll.u32 %v11890_v12, 16  ;;  %v12760_v6 = vpop.permute.xlu1 %5755 }
 0x24c   : > { %v2734_v13 = vrot.slane %v17806_v18, 5  ;;  %v2702_v47 = vor.u32 %v2701_v0, %v2700_v56  ;;  %v2696_v27 = vsel %vm10174_vm8, %v2692_v15, %v2695_v20  ;;  %v2743_v60 = vshrl.u32 %v9273_v17, 16  ;;  %17810 = vst [vmem:[#allocation48_spill] sm:$0xff] %v12760_v6  ;;  %5995 = vrot.lane.b32.xlu1 %v8701_v35, %s9473_s26 }
 0x24d   : > { %v2735_v42 = vrot.slane %v17807_v5, 6  ;;  %v2738_v34 = vrot.slane %v17808_v22, 5  ;;  %v2739_v39 = vrot.slane %v17809_v19, 6  ;;  %v17811_v1 = vshll.u32 %v12060_v40, 16  ;;  %v9274_v40 = vld [vmem:[%s9559_s30 + $0x38] sm:$0x3] }
 0x24e   : > { %v2703_v28 = vsel %vm10174_vm8, %v2697_v61, %v2702_v47  ;;  %v17812_v20 = vshrl.u32 %v11893_v38, 16  ;;  %v2745_v36 = vrot.slane %v2743_v60, 5  ;;  %v17813_v15 = vshll.u32 %v11893_v38, 16  ;;  %v12771_v5 = vpop.permute.xlu0 %5753  ;;  %v17819_v60 = vld [vmem:[#allocation40_spill] sm:$0xff] }
 0x24f   : > { %v2736_v0 = vor.u32 %v2735_v42, %v2734_v13  ;;  %v2746_v58 = vrot.slane %v17811_v1, 6  ;;  %v8700_v12 = vcombine.low %v2696_v27, %v2703_v28  ;;  %v2740_v63 = vor.u32 %v2739_v39, %v2738_v34  ;;  %17814 = vst [vmem:[#allocation51_spill] sm:$0xff] %v12771_v5  ;;  %v12781_v17 = vpop.permute.xlu1 %5759 }
 0x250   : > { %v2719_v56 = vrot.slane %v17812_v20, 5  ;;  %v2720_v18 = vrot.slane %v17813_v15, 6  ;;  %v17815_v35 = vshrl.u32 %v11898_v9, 16  ;;  %v17816_v13 = vshll.u32 %v11898_v9, 16  ;;  %17818 = vst [vmem:[#allocation106_spill] sm:$0xff] %v12781_v17  ;;  %v17820_v20 = vld [vmem:[#allocation72_spill] sm:$0xff] }
 0x251   : > { %v2737_v22 = vrot.slane %v2736_v0, 4  ;;  %v2728_v47 = vshrl.u32 %v9274_v40, 16  ;;  %5993 = vrot.lane.b32.xlu0 %v8700_v12, %s9473_s26  ;;  %v2742_v42 = vrot.slane %v2740_v63, 4  ;;  %v2747_v27 = vor.u32 %v2746_v58, %v2745_v36 }
 0x252   : > { %v2723_v19 = vrot.slane %v17815_v35, 5  ;;  %v2724_v61 = vrot.slane %v17816_v13, 6  ;;  %v2721_v34 = vor.u32 %v2720_v18, %v2719_v56  ;;  %v17817_v39 = vshll.u32 %v12091_v10, 16 }
 0x253   : > { %v12786_v28 = vsel %vm6333_vm0, %v12672_v29, %v17819_v60  ;;  %v2741_v9 = vsel %vm10174_vm8, %v2737_v22, %v2740_v63  ;;  %v2730_v1 = vrot.slane %v2728_v47, 5  ;;  %v12793_v58 = vsel %vm6333_vm0, %v12690_v45, %v17820_v20  ;;  %v12799_v29 = vpop.permute.xlu0 %5757  ;;  %v9275_v47 = vld [vmem:[%s9559_s30 + $0x5c] sm:$0x3] }
 0x254   : > { %v2731_v38 = vrot.slane %v17817_v39, 6  ;;  %v2725_v0 = vor.u32 %v2724_v61, %v2723_v19  ;;  %v2748_v10 = vsel %vm10174_vm8, %v2742_v42, %v2747_v27  ;;  %v2722_v56 = vrot.slane %v2721_v34, 4  ;;  %17822 = vst [vmem:[#allocation97_spill] sm:$0xff] %v12799_v29  ;;  %v12810_v27 = vpop.permute.xlu1 %5763 }
 0x255   : > { %v17821_v12 = vshrl.u32 %v11901_v46, 16  ;;  %v8703_v15 = vcombine.low %v2741_v9, %v2748_v10  ;;  %v17823_v63 = vshll.u32 %v11901_v46, 16  ;;  %v17824_v45 = vshrl.u32 %v11904_v24, 16  ;;  %17826 = vst [vmem:[#allocation14_spill] sm:$0xff] %v12810_v27 }
 0x256   : > { %v2727_v18 = vrot.slane %v2725_v0, 4  ;;  %v2732_v35 = vor.u32 %v2731_v38, %v2730_v1  ;;  %v2726_v19 = vsel %vm10174_vm8, %v2722_v56, %v2725_v0  ;;  %v17825_v61 = vshll.u32 %v11904_v24, 16 }
 0x257   : > { %v2764_v36 = vrot.slane %v17821_v12, 5  ;;  %v2765_v22 = vrot.slane %v17823_v63, 6  ;;  %v2768_v13 = vrot.slane %v17824_v45, 5  ;;  %v2773_v42 = vshrl.u32 %v9275_v47, 16  ;;  %5999 = vrot.lane.b32.xlu1 %v8703_v15, %s9473_s26  ;;  %v12821_v56 = vpop.permute.xlu0 %5761 }
 0x258   : > { %v2769_v40 = vrot.slane %v17825_v61, 6  ;;  %v2733_v46 = vsel %vm10174_vm8, %v2727_v18, %v2732_v35  ;;  %v17827_v39 = vshll.u32 %v12136_v51, 16  ;;  %v17828_v60 = vshrl.u32 %v17760_v11, 16  ;;  %17830 = vst [vmem:[#allocation32_spill] sm:$0xff] %v12821_v56  ;;  %v9276_v51 = vld [vmem:[%s9559_s30 + $0x50] sm:$0x3]  ;;  %v12831_v61 = vpop.permute.xlu1 %5767 }
 0x259   : > { %v2766_v34 = vor.u32 %v2765_v22, %v2764_v36  ;;  %v8702_v0 = vcombine.low %v2726_v19, %v2733_v46  ;;  %v2775_v1 = vrot.slane %v2773_v42, 5  ;;  %v17829_v20 = vshll.u32 %v17760_v11, 16  ;;  %v17855_v56 = vld [vmem:[#allocation152_spill] sm:$0xff] }
 0x25a   : > { %v2776_v38 = vrot.slane %v17827_v39, 6  ;;  %v2749_v9 = vrot.slane %v17828_v60, 5  ;;  %v2770_v24 = vor.u32 %v2769_v40, %v2768_v13  ;;  %v17831_v15 = vshrl.u32 %v11915_v54, 16 }
 0x25b   : > { %v2750_v10 = vrot.slane %v17829_v20, 6  ;;  %v2767_v12 = vrot.slane %v2766_v34, 4  ;;  %v17832_v36 = vshll.u32 %v11915_v54, 16  ;;  %v2758_v35 = vshrl.u32 %v9276_v51, 16  ;;  %5997 = vrot.lane.b32.xlu0 %v8702_v0, %s9473_s26  ;;  %v17834_v54 = vld [vmem:[#allocation50_spill] sm:$0xff]  ;;  %v12844_v60 = vpop.permute.xlu0 %5765 }
 0x25c   : > { %v2753_v63 = vrot.slane %v17831_v15, 5  ;;  %v2772_v22 = vrot.slane %v2770_v24, 4  ;;  %v2777_v19 = vor.u32 %v2776_v38, %v2775_v1  ;;  %v17833_v13 = vshll.u32 %v12168_v44, 16 }
 0x25d   : > { %v2754_v18 = vrot.slane %v17832_v36, 6  ;;  %v2751_v45 = vor.u32 %v2750_v10, %v2749_v9  ;;  %v2771_v40 = vsel %vm10174_vm8, %v2767_v12, %v2770_v24  ;;  %v2760_v42 = vrot.slane %v2758_v35, 5 }
 0x25e   : > { %v2761_v11 = vrot.slane %v17833_v13, 6  ;;  %v12838_v46 = vsel %vm6366_vm1, %v12735_v2, %v17834_v54  ;;  %v2778_v34 = vsel %vm10174_vm8, %v2772_v22, %v2777_v19  ;;  %v17835_v44 = vshrl.u32 %v11918_v59, 16 }
 0x25f   : > { %v2755_v47 = vor.u32 %v2754_v18, %v2753_v63  ;;  %v2752_v39 = vrot.slane %v2751_v45, 4  ;;  %v8705_v9 = vcombine.low %v2771_v40, %v2778_v34  ;;  %v17836_v24 = vshll.u32 %v11918_v59, 16  ;;  %v12855_v18 = vpop.permute.xlu1 %5771 }
 0x260   : > { %v2794_v38 = vrot.slane %v17835_v44, 5  ;;  %v2762_v1 = vor.u32 %v2761_v11, %v2760_v42  ;;  %v17837_v2 = vshrl.u32 %v11921_v7, 16  ;;  %v17838_v15 = vshll.u32 %v11921_v7, 16  ;;  %17839 = vst [vmem:[#allocation40_spill] sm:$0xff] %v12855_v18  ;;  %v12866_v42 = vpop.permute.xlu0 %5769 }
 0x261   : > { %v2757_v0 = vrot.slane %v2755_v47, 4  ;;  %v2795_v20 = vrot.slane %v17836_v24, 6  ;;  %v2756_v10 = vsel %vm10174_vm8, %v2752_v39, %v2755_v47  ;;  %v2803_v36 = vshrl.u32 %v17765_v31, 16  ;;  %6003 = vrot.lane.b32.xlu1 %v8705_v9, %s9473_s26  ;;  %17843 = vst [vmem:[#allocation72_spill] sm:$0xff] %v12866_v42  ;;  %v12874_v9 = vld [vmem:[%s9559_s30 + $0x84] sm:$0xf] }
 0x262   : > { %v2798_v12 = vrot.slane %v17837_v2, 5  ;;  %v2799_v63 = vrot.slane %v17838_v15, 6  ;;  %v17840_v35 = vshll.u32 %v17765_v31, 16  ;;  %v17841_v19 = vshrl.u32 %v17766_v33, 16  ;;  %v12883_v2 = vld [vmem:[%s9559_s30 + $0x28] sm:$0xf] }
 0x263   : > { %v2763_v59 = vsel %vm10174_vm8, %v2757_v0, %v2762_v1  ;;  %v2796_v51 = vor.u32 %v2795_v20, %v2794_v38  ;;  %v2805_v11 = vrot.slane %v2803_v36, 5  ;;  %v17842_v40 = vshll.u32 %v17766_v33, 16 }
 0x264   : > { %v2806_v22 = vrot.slane %v17840_v35, 6  ;;  %v2779_v45 = vrot.slane %v17841_v19, 5  ;;  %v8704_v7 = vcombine.low %v2756_v10, %v2763_v59  ;;  %v2800_v13 = vor.u32 %v2799_v63, %v2798_v12  ;;  %v12880_v10 = vld [vmem:[%s9559_s30 + $0x88] sm:$0xf]  ;;  %v17848_v12 = vld [vmem:[#allocation53_spill] sm:$0xff] }
 0x265   : > { %v2780_v47 = vrot.slane %v17842_v40, 6  ;;  %v2797_v54 = vrot.slane %v2796_v51, 4  ;;  %v17844_v34 = vshrl.u32 %v11927_v32, 16  ;;  %v17845_v31 = vshll.u32 %v11927_v32, 16  ;;  %v12885_v32 = vpop.permute.xlu1 %5775  ;;  %v12893_v51 = vld [vmem:[%s9559_s30 + $0x8c] sm:$0x3] }
 0x266   : > { %v2788_v38 = vshrl.u32 %v12242_v49, 16  ;;  %6001 = vrot.lane.b32.xlu0 %v8704_v7, %s9473_s26  ;;  %v2802_v0 = vrot.slane %v2800_v13, 4  ;;  %v2807_v33 = vor.u32 %v2806_v22, %v2805_v11  ;;  %v17846_v24 = vshll.u32 %v12242_v49, 16  ;;  %17847 = vst [vmem:[#allocation50_spill] sm:$0xff] %v12885_v32  ;;  %v12896_v49 = vld [vmem:[%s9559_s30 + $0x24] sm:$0xf] }
 0x267   : > { %v2783_v39 = vrot.slane %v17844_v34, 5  ;;  %v2784_v44 = vrot.slane %v17845_v31, 6  ;;  %v2781_v1 = vor.u32 %v2780_v47, %v2779_v45  ;;  %v6380_v15 = vsel %vm6366_vm1, %v12743_v16, %v17848_v12  ;;  %v12902_v45 = vld [vmem:[%s9559_s30 + $0x2c] sm:$0x3]  ;;  %v12904_v16 = vpop.permute.xlu0 %5773  ;;  %v12908_v47 = vld [vmem:[%s9559_s30 + $0x94] sm:$0xf] }
 0x268   : > { %v2791_v20 = vrot.slane %v17846_v24, 6  ;;  %v2801_v63 = vsel %vm10174_vm8, %v2797_v54, %v2800_v13  ;;  %v2790_v59 = vrot.slane %v2788_v38, 5  ;;  %v2808_v35 = vsel %vm10174_vm8, %v2802_v0, %v2807_v33  ;;  %17849 = vst [vmem:[#allocation53_spill] sm:$0xff] %v12904_v16  ;;  %v12930_v12 = vld [vmem:[%s9559_s30 + $0x34] sm:$0xf]  ;;  %v17870_v16 = vld [vmem:[#allocation41_spill] sm:$0xff] }
 0x269   : > { %v2785_v36 = vor.u32 %v2784_v44, %v2783_v39  ;;  %v2782_v22 = vrot.slane %v2781_v1, 4  ;;  %v8388_v19 = vrot.slane %v12874_v9, 9  ;;  %v8707_v7 = vcombine.low %v2801_v63, %v2808_v35  ;;  %v12916_v44 = vld [vmem:[%s9559_s30 + $0x90] sm:$0xf]  ;;  %v12918_v38 = vpop.permute.xlu1 %5779  ;;  %v17851_v63 = vld [vmem:[#allocation126_spill] sm:$0xff] }
 0x26a   : > { %v2792_v11 = vor.u32 %v2791_v20, %v2790_v59  ;;  %v3583_v40 = vrot.slane %v12880_v10, 5  ;;  %v3586_v34 = vrot.slane %v12893_v51, 5  ;;  %v8380_v39 = vrot.slane %v12896_v49, 9  ;;  %17850 = vst [vmem:[#allocation159_spill] sm:$0xff] %v12918_v38  ;;  %v12927_v20 = vld [vmem:[%s9559_s30 + $0x98] sm:$0x3] }
 0x26b   : > { %v2787_v13 = vrot.slane %v2785_v36, 4  ;;  %v2786_v54 = vsel %vm10174_vm8, %v2782_v22, %v2785_v36  ;;  %v3527_v31 = vrot.slane %v12883_v2, 5  ;;  %6007 = vrot.lane.b32.xlu1 %v8707_v7, %s9473_s26  ;;  %v3530_v24 = vrot.slane %v12902_v45, 5  ;;  %v12938_v7 = vld [vmem:[%s9559_s30 + $0x30] sm:$0xf] }
 0x26c   : > { %v3584_v33 = vsel %vm10020_vm5, %v8388_v19, %v3583_v40  ;;  %v3585_v1 = vrot.slane %v3583_v40, 4  ;;  %v6415_v36 = vsel %vm17292_vm3, %v12838_v46, %v17851_v63  ;;  %v12943_v19 = vpop.permute.xlu0 %5777  ;;  %v8389_v46 = vrot.slane %v12916_v44, 9 }
 0x26d   : > { %v2793_v0 = vsel %vm10174_vm8, %v2787_v13, %v2792_v11  ;;  %v3528_v35 = vsel %vm10020_vm5, %v8380_v39, %v3527_v31  ;;  %v3529_v22 = vrot.slane %v3527_v31, 4  ;;  %v12941_v13 = vld [vmem:[%s9559_s30 + $0x38] sm:$0x3]  ;;  %17852 = vst [vmem:[#allocation126_spill] sm:$0xff] %v12943_v19  ;;  %v17853_v11 = vld [vmem:[#allocation131_spill] sm:$0xff]  ;;  %v3590_v31 = vrot.slane %v12908_v47, 5 }
 0x26e   : > { %v8706_v59 = vcombine.low %v2786_v54, %v2793_v0  ;;  %v6413_v40 = vsel %vm17292_vm3, %v6380_v15, %v17853_v11  ;;  %v3587_v27 = vsel %vm10020_vm5, %v3585_v1, %v3586_v34  ;;  %v3593_v0 = vrot.slane %v12927_v20, 5  ;;  %v17854_v34 = vld [vmem:[#allocation6_spill] sm:$0xff] }
 0x26f   : > { %v8772_v54 = vcombine.low %v3584_v33, %v3587_v27  ;;  %v3531_v39 = vsel %vm10020_vm5, %v3529_v22, %v3530_v24  ;;  %v8381_v38 = vrot.slane %v12938_v7, 9  ;;  %v3534_v15 = vrot.slane %v12930_v12, 5 }
 0x270   : > { %6005 = vrot.lane.b32.xlu0 %v8706_v59, %s9473_s26  ;;  %v8764_v63 = vcombine.low %v3528_v35, %v3531_v39  ;;  %v3537_v11 = vrot.slane %v12941_v13, 5  ;;  %v6448_v1 = vsel %vm17291_vm4, %v6415_v36, %v17854_v34  ;;  %v6446_v27 = vsel %vm17291_vm4, %v6413_v40, %v17855_v56  ;;  %v12965_v59 = vpop.permute.xlu1 %5783 }
 0x271   : > { %6808 = vrot.lane.b32.xlu1 %v8772_v54, %s9461_s4  ;;  %v3591_v33 = vsel %vm10020_vm5, %v8389_v46, %v3590_v31  ;;  %v3592_v24 = vrot.slane %v3590_v31, 4  ;;  %v3535_v35 = vsel %vm10020_vm5, %v8381_v38, %v3534_v15  ;;  %v3536_v22 = vrot.slane %v3534_v15, 4  ;;  %v12977_v31 = vpop.permute.xlu0 %5781 }
 0x272   : > { %v17069_v39 = vshrl.u32 %v12874_v9, 16  ;;  %v17072_v36 = vshll.u32 %v12874_v9, 16  ;;  %v17071_v40 = vshll.u32 %v12880_v10, 16  ;;  %v17070_v46 = vshrl.u32 %v12880_v10, 16 }
 0x273   : > { %v3594_v56 = vsel %vm10020_vm5, %v3592_v24, %v3593_v0  ;;  %v3538_v38 = vsel %vm10020_vm5, %v3536_v22, %v3537_v11  ;;  %v3766_v54 = vshrl.u32 %v12893_v51, 16  ;;  %v17856_v11 = vshll.u32 %v12893_v51, 16 }
 0x274   : > { %6792 = vrot.lane.b32.xlu0 %v8764_v63, %s9461_s4  ;;  %v8773_v34 = vcombine.low %v3591_v33, %v3594_v56  ;;  %v3757_v15 = vrot.slane %v17069_v39, 5  ;;  %v3758_v63 = vrot.slane %v17072_v36, 6  ;;  %v8765_v19 = vcombine.low %v3535_v35, %v3538_v38  ;;  %v12998_v36 = vpop.permute.xlu1 %5835 }
 0x275   : > { %v3761_v0 = vrot.slane %v17070_v46, 5  ;;  %v3762_v24 = vrot.slane %v17071_v40, 6  ;;  %v3769_v22 = vrot.slane %v17856_v11, 6  ;;  %v17073_v56 = vshrl.u32 %v12896_v49, 16  ;;  %17857 = vst [vmem:[#allocation131_spill] sm:$0xff] %v12998_v36 }
 0x276   : > { %6810 = vrot.lane.b32.xlu1 %v8773_v34, %s9461_s4  ;;  %v3759_v33 = vor.u32 %v3758_v63, %v3757_v15  ;;  %v17076_v39 = vshll.u32 %v12896_v49, 16  ;;  %v3768_v38 = vrot.slane %v3766_v54, 5  ;;  %v17075_v46 = vshll.u32 %v12883_v2, 16 }
 0x277   : > { %v3763_v35 = vor.u32 %v3762_v24, %v3761_v0  ;;  %v17074_v40 = vshrl.u32 %v12883_v2, 16  ;;  %v3637_v15 = vrot.slane %v17073_v56, 5  ;;  %v13009_v0 = vpop.permute.xlu0 %5833  ;;  %v3646_v34 = vshrl.u32 %v12902_v45, 16 }
 0x278   : > { %6794 = vrot.lane.b32.xlu0 %v8765_v19, %s9461_s4  ;;  %v3760_v23 = vrot.slane %v3759_v33, 4  ;;  %v3638_v63 = vrot.slane %v17076_v39, 6  ;;  %v3770_v17 = vor.u32 %v3769_v22, %v3768_v38  ;;  %v3642_v54 = vrot.slane %v17075_v46, 6  ;;  %17858 = vst [vmem:[#allocation6_spill] sm:$0xff] %v13009_v0 }
 0x279   : > { %v3765_v11 = vrot.slane %v3763_v35, 4  ;;  %v3641_v19 = vrot.slane %v17074_v40, 5  ;;  %v17859_v56 = vshll.u32 %v12902_v45, 16  ;;  %v6481_v22 = vsel %vm6465_vm6, %v6448_v1, %v12628_v4  ;;  %v13026_v1 = vpop.permute.xlu1 %5839 }
 0x27a   : > { %v3764_v24 = vsel %vm10174_vm8, %v3760_v23, %v3763_v35  ;;  %v3639_v33 = vor.u32 %v3638_v63, %v3637_v15  ;;  %v6479_v38 = vsel %vm6465_vm6, %v6446_v27, %v12643_v52  ;;  %v3648_v23 = vrot.slane %v3646_v34, 5  ;;  %17860 = vst [vmem:[#allocation152_spill] sm:$0xff] %v13026_v1 }
 0x27b   : > { %v3649_v32 = vrot.slane %v17859_v56, 6  ;;  %v3771_v40 = vsel %vm10174_vm8, %v3765_v11, %v3770_v17  ;;  %v3643_v46 = vor.u32 %v3642_v54, %v3641_v19  ;;  %v17080_v35 = vshrl.u32 %v12916_v44, 16  ;;  %v13041_v54 = vpop.permute.xlu0 %5837 }
 0x27c   : > { %v8788_v39 = vcombine.low %v3764_v24, %v3771_v40  ;;  %v3640_v29 = vrot.slane %v3639_v33, 4  ;;  %v17078_v63 = vshll.u32 %v12916_v44, 16  ;;  %v17079_v56 = vshll.u32 %v12908_v47, 16  ;;  %17861 = vst [vmem:[#allocation160_spill] sm:$0xff] %v13041_v54 }
 0x27d   : > { %v3645_v15 = vrot.slane %v3643_v46, 4  ;;  %v17077_v4 = vshrl.u32 %v12908_v47, 16  ;;  %v3650_v17 = vor.u32 %v3649_v32, %v3648_v23  ;;  %v17081_v27 = vshll.u32 %v12927_v20, 16 }
 0x27e   : > { %6888 = vrot.lane.b32.xlu1 %v8788_v39, %s9462_s5  ;;  %v3644_v52 = vsel %vm10174_vm8, %v3640_v29, %v3643_v46  ;;  %v3772_v40 = vrot.slane %v17080_v35, 5  ;;  %v3773_v34 = vrot.slane %v17078_v63, 6  ;;  %v3777_v19 = vrot.slane %v17079_v56, 6 }
 0x27f   : > { %v3776_v11 = vrot.slane %v17077_v4, 5  ;;  %v3781_v39 = vshrl.u32 %v12927_v20, 16  ;;  %v3651_v29 = vsel %vm10174_vm8, %v3645_v15, %v3650_v17  ;;  %v3784_v32 = vrot.slane %v17081_v27, 6 }
 0x280   : > { %v17085_v46 = vshrl.u32 %v12938_v7, 16  ;;  %v17084_v24 = vshll.u32 %v12938_v7, 16  ;;  %v8780_v33 = vcombine.low %v3644_v52, %v3651_v29  ;;  %v3774_v23 = vor.u32 %v3773_v34, %v3772_v40  ;;  %v13057_v40 = vpop.permute.xlu1 %5843 }
 0x281   : > { %v3778_v4 = vor.u32 %v3777_v19, %v3776_v11  ;;  %v3783_v63 = vrot.slane %v3781_v39, 5  ;;  %v17083_v56 = vshll.u32 %v12930_v12, 16  ;;  %v17082_v35 = vshrl.u32 %v12930_v12, 16  ;;  %17862 = vst [vmem:[#allocation161_spill] sm:$0xff] %v13057_v40 }
 0x282   : > { %v17086_v1 = vshll.u32 %v12941_v13, 16  ;;  %v3652_v15 = vrot.slane %v17085_v46, 5  ;;  %6872 = vrot.lane.b32.xlu0 %v8780_v33, %s9462_s5  ;;  %v3775_v17 = vrot.slane %v3774_v23, 4  ;;  %v3653_v52 = vrot.slane %v17084_v24, 6  ;;  %v13074_v23 = vpop.permute.xlu0 %5841 }
 0x283   : > { %v3780_v27 = vrot.slane %v3778_v4, 4  ;;  %v3785_v54 = vor.u32 %v3784_v32, %v3783_v63  ;;  %v3656_v34 = vrot.slane %v17082_v35, 5  ;;  %v3657_v11 = vrot.slane %v17083_v56, 6  ;;  %17863 = vst [vmem:[#allocation162_spill] sm:$0xff] %v13074_v23 }
 0x284   : > { %v3661_v19 = vshrl.u32 %v12941_v13, 16  ;;  %v3664_v39 = vrot.slane %v17086_v1, 6  ;;  %v3779_v29 = vsel %vm10174_vm8, %v3775_v17, %v3778_v4  ;;  %v3654_v32 = vor.u32 %v3653_v52, %v3652_v15 }
 0x285   : > { %v3786_v63 = vsel %vm10174_vm8, %v3780_v27, %v3785_v54  ;;  %v13072_v33 = vsel %vm6498_vm7, %v6481_v22, %v12831_v61  ;;  %v3658_v56 = vor.u32 %v3657_v11, %v3656_v34  ;;  %v13078_v46 = vsel %vm6498_vm7, %v6479_v38, %v12844_v60 }
 0x286   : > { %v8789_v35 = vcombine.low %v3779_v29, %v3786_v63  ;;  %v3663_v24 = vrot.slane %v3661_v19, 5  ;;  %v3655_v1 = vrot.slane %v3654_v32, 4  ;;  %v8404_v4 = vrot.slane %v12874_v9, 10  ;;  %v13091_v19 = vpop.permute.xlu1 %5847  ;;  %v17865_v29 = vld [vmem:[#allocation103_spill] sm:$0xff]  ;;  %v13106_v40 = vpop.permute.xlu0 %5845 }
 0x287   : > { %v3935_v17 = vrot.slane %v12880_v10, 6  ;;  %v3938_v27 = vrot.slane %v12893_v51, 6  ;;  %v3660_v61 = vrot.slane %v3658_v56, 4  ;;  %v8396_v54 = vrot.slane %v12896_v49, 10 }
 0x288   : > { %6890 = vrot.lane.b32.xlu1 %v8789_v35, %s9462_s5  ;;  %v3665_v22 = vor.u32 %v3664_v39, %v3663_v24  ;;  %v3879_v15 = vrot.slane %v12883_v2, 6  ;;  %v3659_v52 = vsel %vm10174_vm8, %v3655_v1, %v3658_v56  ;;  %v3882_v11 = vrot.slane %v12902_v45, 6  ;;  %v17866_v1 = vld [vmem:[#allocation104_spill] sm:$0xff] }
 0x289   : > { %v3936_v38 = vsel %vm10433_vm11, %v8404_v4, %v3935_v17  ;;  %v3937_v34 = vrot.slane %v3935_v17, 4  ;;  %v6398_v35 = vsel %vm6366_vm1, %v12786_v28, %v17865_v29  ;;  %v6396_v63 = vsel %vm6366_vm1, %v12793_v58, %v17866_v1  ;;  %v17867_v29 = vld [vmem:[#allocation139_spill] sm:$0xff] }
 0x28a   : > { %v3666_v24 = vsel %vm10174_vm8, %v3660_v61, %v3665_v22  ;;  %v3880_v39 = vsel %vm10433_vm11, %v8396_v54, %v3879_v15  ;;  %v3881_v56 = vrot.slane %v3879_v15, 4  ;;  %v8405_v17 = vrot.slane %v12916_v44, 10  ;;  %v13113_v15 = vld [vmem:[%s9559_s30 + $0x90] sm:$0xf] }
 0x28b   : > { %v8781_v32 = vcombine.low %v3659_v52, %v3666_v24  ;;  %v3939_v4 = vsel %vm10433_vm11, %v3937_v34, %v3938_v27  ;;  %v3942_v22 = vrot.slane %v12908_v47, 6  ;;  %v3945_v54 = vrot.slane %v12927_v20, 6  ;;  %v13120_v34 = vld [vmem:[%s9559_s30 + $0x94] sm:$0xf]  ;;  %v17868_v24 = vld [vmem:[#allocation140_spill] sm:$0xff] }
 0x28c   : > { %v8804_v28 = vcombine.low %v3936_v38, %v3939_v4  ;;  %v3883_v61 = vsel %vm10433_vm11, %v3881_v56, %v3882_v11  ;;  %v8397_v27 = vrot.slane %v12938_v7, 10  ;;  %v3886_v52 = vrot.slane %v12930_v12, 6  ;;  %v13133_v4 = vld [vmem:[%s9559_s30 + $0x34] sm:$0xf] }
 0x28d   : > { %6874 = vrot.lane.b32.xlu0 %v8781_v32, %s9462_s5  ;;  %v8796_v58 = vcombine.low %v3880_v39, %v3883_v61  ;;  %v3889_v38 = vrot.slane %v12941_v13, 6  ;;  %v6431_v11 = vsel %vm17292_vm3, %v6398_v35, %v17867_v29  ;;  %v6429_v56 = vsel %vm17292_vm3, %v6396_v63, %v17868_v24  ;;  %v13130_v32 = vld [vmem:[%s9559_s30 + $0x30] sm:$0xf]  ;;  %v17869_v61 = vld [vmem:[#allocation24_spill] sm:$0xff]  ;;  %v13141_v29 = vpop.permute.xlu1 %5851 }
 0x28e   : > { %6968 = vrot.lane.b32.xlu1 %v8804_v28, %s9463_s6  ;;  %v3943_v39 = vsel %vm10433_vm11, %v8405_v17, %v3942_v22  ;;  %v3944_v1 = vrot.slane %v3942_v22, 4  ;;  %v6464_v23 = vsel %vm17291_vm4, %v6431_v11, %v17869_v61  ;;  %v6462_v35 = vsel %vm17291_vm4, %v6429_v56, %v17870_v16  ;;  %17871 = vst [vmem:[#allocation5_spill] sm:$0xff] %v13141_v29  ;;  %v13152_v24 = vld [vmem:[%s9559_s30 + $0x98] sm:$0x3]  ;;  %v13166_v56 = vld [vmem:[%s9559_s30 + $0x9c] sm:$0xf] }
 0x28f   : > { %v3887_v63 = vsel %vm10433_vm11, %v8397_v27, %v3886_v52  ;;  %v3888_v28 = vrot.slane %v3886_v52, 4  ;;  %v6497_v17 = vsel %vm6465_vm6, %v6464_v23, %v12730_v37  ;;  %v6495_v22 = vsel %vm6465_vm6, %v6462_v35, %v12749_v21  ;;  %v13163_v23 = vpop.permute.xlu0 %5849 }
 0x290   : > { %v3946_v11 = vsel %vm10433_vm11, %v3944_v1, %v3945_v54  ;;  %v8820_v16 = vcombine.low %v13113_v15, %v13120_v34  ;;  %v8812_v37 = vcombine.low %v13130_v32, %v13133_v4  ;;  %v13161_v21 = vsel %vm6498_vm7, %v6497_v17, %v12965_v59  ;;  %17872 = vst [vmem:[#allocation103_spill] sm:$0xff] %v13163_v23  ;;  %v13169_v1 = vld [vmem:[%s9559_s30 + $0xa0] sm:$0xf]  ;;  %v13187_v17 = vld [vmem:[%s9559_s30 + $0x38] sm:$0x3] }
 0x291   : > { %6952 = vrot.lane.b32.xlu0 %v8796_v58, %s9463_s6  ;;  %v8805_v27 = vcombine.low %v3943_v39, %v3946_v11  ;;  %v3890_v52 = vsel %vm10433_vm11, %v3888_v28, %v3889_v38  ;;  %v13173_v58 = vsel %vm6498_vm7, %v6495_v22, %v12977_v31  ;;  %v17087_v38 = vshrl.u32 %v13113_v15, 16  ;;  %v13203_v22 = vpop.permute.xlu1 %5855  ;;  %v13206_v11 = vld [vmem:[%s9559_s30 + $0x40] sm:$0xf] }
 0x292   : > { %v8797_v54 = vcombine.low %v3887_v63, %v3890_v52  ;;  %v17088_v39 = vshll.u32 %v13113_v15, 16  ;;  %v17089_v59 = vshll.u32 %v13120_v34, 16  ;;  %v17090_v61 = vshrl.u32 %v13120_v34, 16  ;;  %v13195_v52 = vld [vmem:[%s9559_s30 + $0x3c] sm:$0xf]  ;;  %17873 = vst [vmem:[#allocation104_spill] sm:$0xff] %v13203_v22 }
 0x293   : > { %6970 = vrot.lane.b32.xlu1 %v8805_v27, %s9463_s6  ;;  %v17091_v63 = vshrl.u32 %v13130_v32, 16  ;;  %v4236_v28 = vrot.slane %v17087_v38, 4  ;;  %v8821_v27 = vcombine.low %v13166_v56, %v13169_v1  ;;  %v17874_v36 = vshll.u32 %v13130_v32, 16  ;;  %v13218_v23 = vpop.permute.xlu0 %5853 }
 0x294   : > { %v4239_v31 = vrot.slane %v17088_v39, 5  ;;  %v4245_v35 = vrot.slane %v17089_v59, 5  ;;  %v4249_v38 = vrot.slane %v17090_v61, 4  ;;  %v17875_v29 = vshll.u32 %v13133_v4, 16  ;;  %17877 = vst [vmem:[#allocation139_spill] sm:$0xff] %v13218_v23 }
 0x295   : > { %6954 = vrot.lane.b32.xlu0 %v8797_v54, %s9463_s6  ;;  %v4044_v39 = vrot.slane %v17091_v63, 4  ;;  %v4047_v6 = vrot.slane %v17874_v36, 5  ;;  %v17092_v59 = vshrl.u32 %v13133_v4, 16  ;;  %v17876_v0 = vshll.u32 %v13152_v24, 16 }
 0x296   : > { %v4240_v54 = vor.u32 %v4239_v31, %v4236_v28  ;;  %v4053_v18 = vrot.slane %v17875_v29, 5  ;;  %v4250_v61 = vor.u32 %v4249_v38, %v4245_v35  ;;  %v17093_v5 = vshll.u32 %v13187_v17, 16  ;;  %v13223_v29 = vld [vmem:[%s9559_s30 + $0xa4] sm:$0x3] }
 0x297   : > { %7048 = vrot.lane.b32.xlu1 %v8820_v16, %s9464_s7  ;;  %v4255_v63 = vrot.slane %v17876_v0, 5  ;;  %v17094_v22 = vshrl.u32 %v13166_v56, 16  ;;  %v4048_v31 = vor.u32 %v4047_v6, %v4044_v39  ;;  %v4057_v36 = vrot.slane %v17092_v59, 4 }
 0x298   : > { %v4241_v28 = vrot.slane %v4240_v54, 4  ;;  %v8813_v16 = vcombine.low %v13195_v52, %v13206_v11  ;;  %v4251_v38 = vrot.slane %v4250_v61, 4  ;;  %v4063_v0 = vrot.slane %v17093_v5, 5 }
 0x299   : > { %7032 = vrot.lane.b32.xlu0 %v8812_v37, %s9464_s7  ;;  %v4260_v42 = vrot.slane %v17094_v22, 4  ;;  %v4049_v39 = vrot.slane %v4048_v31, 4  ;;  %v4058_v54 = vor.u32 %v4057_v36, %v4053_v18  ;;  %v17100_v59 = vshll.u32 %v13166_v56, 16  ;;  %v13241_v22 = vpop.permute.xlu1 %5859 }
 0x29a   : > { %v4246_v6 = vsel %vm9604_vm2, %v4241_v28, %v4245_v35  ;;  %v4256_v37 = vsel %vm9604_vm2, %v4251_v38, %v4255_v63  ;;  %v17097_v61 = vshll.u32 %v13169_v1, 16  ;;  %v17098_v5 = vshrl.u32 %v13169_v1, 16  ;;  %17879 = vst [vmem:[#allocation140_spill] sm:$0xff] %v13241_v22  ;;  %v13255_v38 = vld [vmem:[%s9559_s30 + $0x44] sm:$0x3] }
 0x29b   : > { %7050 = vrot.lane.b32.xlu1 %v8821_v27, %s9464_s7  ;;  %v17099_v50 = vshll.u32 %v13223_v29, 16  ;;  %v8836_v8 = vcombine.low %v4246_v6, %v4256_v37  ;;  %v4054_v35 = vsel %vm9604_vm2, %v4049_v39, %v4053_v18  ;;  %v4059_v28 = vrot.slane %v4058_v54, 4  ;;  %v13258_v18 = vpop.permute.xlu0 %5857 }
 0x29c   : > { %v4263_v31 = vrot.slane %v17100_v59, 5  ;;  %v4269_v63 = vrot.slane %v17097_v61, 5  ;;  %v4273_v27 = vrot.slane %v17098_v5, 4  ;;  %v17104_v6 = vshrl.u32 %v13195_v52, 16  ;;  %17880 = vst [vmem:[#allocation24_spill] sm:$0xff] %v13258_v18 }
 0x29d   : > { %7034 = vrot.lane.b32.xlu0 %v8813_v16, %s9464_s7  ;;  %v4279_v36 = vrot.slane %v17099_v50, 5  ;;  %v4064_v39 = vsel %vm9604_vm2, %v4059_v28, %v4063_v0  ;;  %v17102_v16 = vshll.u32 %v13195_v52, 16  ;;  %v17101_v37 = vshll.u32 %v13206_v11, 16 }
 0x29e   : > { %v4264_v54 = vor.u32 %v4263_v31, %v4260_v42  ;;  %v8828_v61 = vcombine.low %v4054_v35, %v4064_v39  ;;  %v4274_v5 = vor.u32 %v4273_v27, %v4269_v63  ;;  %v4068_v50 = vrot.slane %v17104_v6, 4  ;;  %v13276_v35 = vpop.permute.xlu1 %5863 }
 0x29f   : > { %7128 = vrot.lane.b32.xlu1 %v8836_v8, %s9465_s8  ;;  %v17103_v59 = vshrl.u32 %v13206_v11, 16  ;;  %v4071_v18 = vrot.slane %v17102_v16, 5  ;;  %v4077_v42 = vrot.slane %v17101_v37, 5  ;;  %v17107_v0 = vshll.u32 %v13255_v38, 16 }
 0x2a0   : > { %v4265_v22 = vrot.slane %v4264_v54, 4  ;;  %v4275_v28 = vrot.slane %v4274_v5, 4  ;;  %v8468_v54 = vrot.slane %v13113_v15, 9  ;;  %v4531_v5 = vrot.slane %v13120_v34, 5 }
 0x2a1   : > { %7112 = vrot.lane.b32.xlu0 %v8828_v61, %s9465_s8  ;;  %v4081_v8 = vrot.slane %v17103_v59, 4  ;;  %v4072_v27 = vor.u32 %v4071_v18, %v4068_v50  ;;  %v4087_v39 = vrot.slane %v17107_v0, 5  ;;  %v4534_v61 = vrot.slane %v13152_v24, 5  ;;  %v13287_v59 = vpop.permute.xlu0 %5861 }
 0x2a2   : > { %v4270_v31 = vsel %vm9604_vm2, %v4265_v22, %v4269_v63  ;;  %v4280_v37 = vsel %vm9604_vm2, %v4275_v28, %v4279_v36  ;;  %v8460_v22 = vrot.slane %v13130_v32, 9  ;;  %v4475_v50 = vrot.slane %v13133_v4, 5 }
 0x2a3   : > { %v4082_v16 = vor.u32 %v4081_v8, %v4077_v42  ;;  %v8837_v6 = vcombine.low %v4270_v31, %v4280_v37  ;;  %v4073_v30 = vrot.slane %v4072_v27, 4  ;;  %v4532_v18 = vsel %vm10020_vm5, %v8468_v54, %v4531_v5  ;;  %v13304_v54 = vpop.permute.xlu1 %5915 }
 0x2a4   : > { %v4533_v0 = vrot.slane %v4531_v5, 4  ;;  %v4478_v36 = vrot.slane %v13187_v17, 5  ;;  %v4476_v37 = vsel %vm10020_vm5, %v8460_v22, %v4475_v50  ;;  %v4477_v8 = vrot.slane %v4475_v50, 4  ;;  %17881 = vst [vmem:[#allocation41_spill] sm:$0xff] %v13304_v54 }
 0x2a5   : > { %v4083_v63 = vrot.slane %v4082_v16, 4  ;;  %7130 = vrot.lane.b32.xlu1 %v8837_v6, %s9465_s8  ;;  %v4078_v28 = vsel %vm9604_vm2, %v4073_v30, %v4077_v42  ;;  %v8469_v27 = vrot.slane %v13166_v56, 9  ;;  %v4538_v42 = vrot.slane %v13169_v1, 5 }
 0x2a6   : > { %v4535_v16 = vsel %vm10020_vm5, %v4533_v0, %v4534_v61  ;;  %v4479_v30 = vsel %vm10020_vm5, %v4477_v8, %v4478_v36  ;;  %v4541_v50 = vrot.slane %v13223_v29, 5  ;;  %v8461_v14 = vrot.slane %v13195_v52, 9 }
 0x2a7   : > { %v4088_v31 = vsel %vm9604_vm2, %v4083_v63, %v4087_v39  ;;  %v8852_v6 = vcombine.low %v4532_v18, %v4535_v16  ;;  %v8844_v22 = vcombine.low %v4476_v37, %v4479_v30  ;;  %v4482_v39 = vrot.slane %v13206_v11, 5  ;;  %v13312_v63 = vpop.permute.xlu0 %5913  ;;  %v13346_v54 = vpop.permute.xlu1 %5919 }
 0x2a8   : > { %v8829_v5 = vcombine.low %v4078_v28, %v4088_v31  ;;  %17882 = vst [vmem:[#allocation8_spill] sm:$0xff] %v13312_v63  ;;  %v4539_v0 = vsel %vm10020_vm5, %v8469_v27, %v4538_v42  ;;  %v4540_v61 = vrot.slane %v4538_v42, 4  ;;  %v4485_v18 = vrot.slane %v13255_v38, 5  ;;  %17888 = vst [vmem:[#allocation163_spill] sm:$0xff] %v13346_v54 }
 0x2a9   : > { %7208 = vrot.lane.b32.xlu1 %v8852_v6, %s9466_s9  ;;  %v13322_v36 = vsel %vm17121_vm10, %v13072_v33, %v13091_v19  ;;  %v4483_v28 = vsel %vm10020_vm5, %v8461_v14, %v4482_v39  ;;  %v4484_v37 = vrot.slane %v4482_v39, 4  ;;  %v13329_v8 = vsel %vm17121_vm10, %v13078_v46, %v13106_v40 }
 0x2aa   : > { %7114 = vrot.lane.b32.xlu0 %v8829_v5, %s9465_s8  ;;  %v17883_v31 = vshrl.u32 %v13113_v15, 16  ;;  %v4542_v27 = vsel %vm10020_vm5, %v4540_v61, %v4541_v50  ;;  %v17884_v5 = vshll.u32 %v13113_v15, 16  ;;  %v17885_v33 = vshrl.u32 %v13120_v34, 16 }
 0x2ab   : > { %v17886_v14 = vshll.u32 %v13120_v34, 16  ;;  %v8853_v42 = vcombine.low %v4539_v0, %v4542_v27  ;;  %v4486_v46 = vsel %vm10020_vm5, %v4484_v37, %v4485_v18  ;;  %v4714_v40 = vshrl.u32 %v13152_v24, 16  ;;  %v13358_v25 = vpop.permute.xlu0 %5917 }
 0x2ac   : > { %v4705_v16 = vrot.slane %v17883_v31, 5  ;;  %v4706_v6 = vrot.slane %v17884_v5, 6  ;;  %v4709_v19 = vrot.slane %v17885_v33, 5  ;;  %v17887_v39 = vshll.u32 %v13152_v24, 16  ;;  %17893 = vst [vmem:[#allocation164_spill] sm:$0xff] %v13358_v25 }
 0x2ad   : > { %v4710_v30 = vrot.slane %v17886_v14, 6  ;;  %v8845_v50 = vcombine.low %v4483_v28, %v4486_v46  ;;  %v17889_v33 = vshrl.u32 %v13130_v32, 16  ;;  %7210 = vrot.lane.b32.xlu1 %v8853_v42, %s9466_s9  ;;  %v4716_v0 = vrot.slane %v4714_v40, 5 }
 0x2ae   : > { %v4717_v31 = vrot.slane %v17887_v39, 6  ;;  %7192 = vrot.lane.b32.xlu0 %v8844_v22, %s9466_s9  ;;  %v4707_v61 = vor.u32 %v4706_v6, %v4705_v16  ;;  %v17890_v18 = vshll.u32 %v13130_v32, 16  ;;  %v17891_v27 = vshrl.u32 %v13133_v4, 16 }
 0x2af   : > { %v4711_v5 = vor.u32 %v4710_v30, %v4709_v19  ;;  %v4585_v63 = vrot.slane %v17889_v33, 5  ;;  %v17892_v39 = vshll.u32 %v13133_v4, 16  ;;  %v4594_v16 = vshrl.u32 %v13187_v17, 16 }
 0x2b0   : > { %v4586_v37 = vrot.slane %v17890_v18, 6  ;;  %v4589_v14 = vrot.slane %v17891_v27, 5  ;;  %v4708_v22 = vrot.slane %v4707_v61, 4  ;;  %v17894_v6 = vshll.u32 %v13187_v17, 16 }
 0x2b1   : > { %v4590_v54 = vrot.slane %v17892_v39, 6  ;;  %v4713_v28 = vrot.slane %v4711_v5, 4  ;;  %v4718_v30 = vor.u32 %v4717_v31, %v4716_v0  ;;  %v4596_v33 = vrot.slane %v4594_v16, 5  ;;  %v13372_v31 = vpop.permute.xlu1 %5923 }
 0x2b2   : > { %v4597_v19 = vrot.slane %v17894_v6, 6  ;;  %v4587_v42 = vor.u32 %v4586_v37, %v4585_v63  ;;  %7194 = vrot.lane.b32.xlu0 %v8845_v50, %s9466_s9  ;;  %v4712_v40 = vsel %vm10174_vm8, %v4708_v22, %v4711_v5  ;;  %v17895_v18 = vshrl.u32 %v13166_v56, 16  ;;  %17897 = vst [vmem:[#allocation165_spill] sm:$0xff] %v13372_v31 }
 0x2b3   : > { %v4591_v46 = vor.u32 %v4590_v54, %v4589_v14  ;;  %v4719_v61 = vsel %vm10174_vm8, %v4713_v28, %v4718_v30  ;;  %v17896_v62 = vshll.u32 %v13166_v56, 16  ;;  %v17898_v50 = vshrl.u32 %v13169_v1, 16 }
 0x2b4   : > { %v4720_v27 = vrot.slane %v17895_v18, 5  ;;  %v4588_v39 = vrot.slane %v4587_v42, 4  ;;  %v8868_v54 = vcombine.low %v4712_v40, %v4719_v61  ;;  %v4598_v63 = vor.u32 %v4597_v19, %v4596_v33 }
 0x2b5   : > { %v4593_v25 = vrot.slane %v4591_v46, 4  ;;  %v4721_v6 = vrot.slane %v17896_v62, 6  ;;  %v4724_v0 = vrot.slane %v17898_v50, 5  ;;  %v17899_v5 = vshll.u32 %v13169_v1, 16  ;;  %v13383_v62 = vpop.permute.xlu0 %5921 }
 0x2b6   : > { %v4592_v14 = vsel %vm10174_vm8, %v4588_v39, %v4591_v46  ;;  %v4729_v28 = vshrl.u32 %v13223_v29, 16  ;;  %v17900_v16 = vshll.u32 %v13223_v29, 16  ;;  %17901 = vst [vmem:[#allocation166_spill] sm:$0xff] %v13383_v62  ;;  %7288 = vrot.lane.b32.xlu1 %v8868_v54, %s9467_s10  ;;  %v17902_v40 = vshrl.u32 %v13195_v52, 16 }
 0x2b7   : > { %v4725_v37 = vrot.slane %v17899_v5, 6  ;;  %v4722_v22 = vor.u32 %v4721_v6, %v4720_v27  ;;  %v4599_v19 = vsel %vm10174_vm8, %v4593_v25, %v4598_v63  ;;  %v17903_v18 = vshll.u32 %v13195_v52, 16 }
 0x2b8   : > { %v4732_v30 = vrot.slane %v17900_v16, 6  ;;  %v4600_v33 = vrot.slane %v17902_v40, 5  ;;  %v8860_v27 = vcombine.low %v4592_v14, %v4599_v19  ;;  %v4731_v39 = vrot.slane %v4729_v28, 5 }
 0x2b9   : > { %v4726_v42 = vor.u32 %v4725_v37, %v4724_v0  ;;  %v4601_v46 = vrot.slane %v17903_v18, 6  ;;  %v4723_v61 = vrot.slane %v4722_v22, 4  ;;  %v17904_v6 = vshrl.u32 %v13206_v11, 16  ;;  %v13402_v22 = vpop.permute.xlu1 %5927 }
 0x2ba   : > { %v17905_v54 = vshll.u32 %v13206_v11, 16  ;;  %v4609_v25 = vshrl.u32 %v13255_v38, 16  ;;  %7272 = vrot.lane.b32.xlu0 %v8860_v27, %s9467_s10  ;;  %v4733_v0 = vor.u32 %v4732_v30, %v4731_v39  ;;  %v17906_v37 = vshll.u32 %v13255_v38, 16  ;;  %v13412_v27 = vpop.permute.xlu0 %5925 }
 0x2bb   : > { %v4604_v50 = vrot.slane %v17904_v6, 5  ;;  %v4728_v5 = vrot.slane %v4726_v42, 4  ;;  %v4602_v16 = vor.u32 %v4601_v46, %v4600_v33  ;;  %v4727_v63 = vsel %vm10174_vm8, %v4723_v61, %v4726_v42  ;;  %v13410_v42 = vld [vmem:[%s9559_s30 + $0xa0] sm:$0xf] }
 0x2bc   : > { %v4605_v31 = vrot.slane %v17905_v54, 6  ;;  %v4612_v14 = vrot.slane %v17906_v37, 6  ;;  %v4611_v40 = vrot.slane %v4609_v25, 5  ;;  %v8484_v18 = vrot.slane %v13113_v15, 10  ;;  %17907 = vst [vmem:[#allocation167_spill] sm:$0xff] %v13410_v42 }
 0x2bd   : > { %v4603_v28 = vrot.slane %v4602_v16, 4  ;;  %v4734_v33 = vsel %vm10174_vm8, %v4728_v5, %v4733_v0  ;;  %v4883_v46 = vrot.slane %v13120_v34, 6  ;;  %v4886_v30 = vrot.slane %v13152_v24, 6  ;;  %v13420_v5 = vld [vmem:[%s9559_s30 + $0x40] sm:$0xf] }
 0x2be   : > { %v4606_v19 = vor.u32 %v4605_v31, %v4604_v50  ;;  %v8869_v61 = vcombine.low %v4727_v63, %v4734_v33  ;;  %v4613_v6 = vor.u32 %v4612_v14, %v4611_v40  ;;  %v13417_v50 = vld [vmem:[%s9559_s30 + $0x9c] sm:$0xf]  ;;  %17909 = vst [vmem:[#allocation169_spill] sm:$0xff] %v13420_v5  ;;  %v8476_v24 = vrot.slane %v13130_v32, 10  ;;  %v13427_v54 = vld [vmem:[%s9559_s30 + $0xa4] sm:$0x3] }
 0x2bf   : > { %17908 = vst [vmem:[#allocation168_spill] sm:$0xff] %v13417_v50  ;;  %v4884_v15 = vsel %vm10433_vm11, %v8484_v18, %v4883_v46  ;;  %v4885_v34 = vrot.slane %v4883_v46, 4  ;;  %v4827_v16 = vrot.slane %v13133_v4, 6  ;;  %17910 = vst [vmem:[#allocation170_spill] sm:$0xff] %v13427_v54  ;;  %v4830_v63 = vrot.slane %v13187_v17, 6 }
 0x2c0   : > { %v4607_v31 = vsel %vm10174_vm8, %v4603_v28, %v4606_v19  ;;  %v4608_v39 = vrot.slane %v4606_v19, 4  ;;  %7290 = vrot.lane.b32.xlu1 %v8869_v61, %s9467_s10  ;;  %v13434_v0 = vld [vmem:[%s9559_s30 + $0x3c] sm:$0xf]  ;;  %v13437_v37 = vld [vmem:[%s9559_s30 + $0x44] sm:$0x3]  ;;  %v13443_v19 = vpop.permute.xlu1 %5931  ;;  %v8390_v33 = vrot.slane %v13417_v50, 9 }
 0x2c1   : > { %17911 = vst [vmem:[#allocation171_spill] sm:$0xff] %v13434_v0  ;;  %17912 = vst [vmem:[#allocation172_spill] sm:$0xff] %v13437_v37  ;;  %v4887_v28 = vsel %vm10433_vm11, %v4885_v34, %v4886_v30  ;;  %v4828_v32 = vsel %vm10433_vm11, %v8476_v24, %v4827_v16  ;;  %v4829_v4 = vrot.slane %v4827_v16, 4  ;;  %v3597_v18 = vrot.slane %v13410_v42, 5 }
 0x2c2   : > { %v4614_v25 = vsel %vm10174_vm8, %v4608_v39, %v4613_v6  ;;  %17913 = vst [vmem:[#allocation173_spill] sm:$0xff] %v13443_v19  ;;  %v8884_v40 = vcombine.low %v4884_v15, %v4887_v28  ;;  %v3600_v17 = vrot.slane %v13427_v54, 5  ;;  %v8382_v30 = vrot.slane %v13434_v0, 9  ;;  %v13454_v39 = vpop.permute.xlu0 %5929 }
 0x2c3   : > { %v8861_v14 = vcombine.low %v4607_v31, %v4614_v25  ;;  %v4831_v46 = vsel %vm10433_vm11, %v4829_v4, %v4830_v63  ;;  %v3541_v61 = vrot.slane %v13420_v5, 5  ;;  %v3544_v31 = vrot.slane %v13437_v37, 5  ;;  %17914 = vst [vmem:[#allocation174_spill] sm:$0xff] %v13454_v39  ;;  %v13478_v4 = vld [vmem:[%s9559_s30 + $0xac] sm:$0xf] }
 0x2c4   : > { %7368 = vrot.lane.b32.xlu1 %v8884_v40, %s9468_s11  ;;  %v8876_v6 = vcombine.low %v4828_v32, %v4831_v46  ;;  %v3598_v15 = vsel %vm10020_vm5, %v8390_v33, %v3597_v18  ;;  %v3599_v34 = vrot.slane %v3597_v18, 4  ;;  %v13462_v24 = vsel %vm17121_vm10, %v13161_v21, %v13276_v35  ;;  %17915 = vst [vmem:[#allocation175_spill] sm:$0xff] %v13478_v4  ;;  %v13486_v33 = vld [vmem:[%s9559_s30 + $0xa8] sm:$0xf] }
 0x2c5   : > { %7274 = vrot.lane.b32.xlu0 %v8861_v14, %s9467_s10  ;;  %v3542_v16 = vsel %vm10020_vm5, %v8382_v30, %v3541_v61  ;;  %v3543_v25 = vrot.slane %v3541_v61, 4  ;;  %v13469_v63 = vsel %vm17121_vm10, %v13173_v58, %v13287_v59  ;;  %v8485_v14 = vrot.slane %v13166_v56, 10  ;;  %17916 = vst [vmem:[#allocation176_spill] sm:$0xff] %v13486_v33  ;;  %v13496_v46 = vld [vmem:[%s9559_s30 + $0x48] sm:$0xf] }
 0x2c6   : > { %v3601_v28 = vsel %vm10020_vm5, %v3599_v34, %v3600_v17  ;;  %v4890_v32 = vrot.slane %v13169_v1, 6  ;;  %v4893_v21 = vrot.slane %v13223_v29, 6  ;;  %v8477_v35 = vrot.slane %v13195_v52, 10  ;;  %v13489_v1 = vld [vmem:[%s9559_s30 + $0xb0] sm:$0x3]  ;;  %v13491_v29 = vpop.permute.xlu1 %5935  ;;  %17919 = vst [vmem:[#allocation179_spill] sm:$0xff] %v13496_v46 }
 0x2c7   : > { %v8774_v58 = vcombine.low %v3598_v15, %v3601_v28  ;;  %v3545_v56 = vsel %vm10020_vm5, %v3543_v25, %v3544_v31  ;;  %v4834_v59 = vrot.slane %v13206_v11, 6  ;;  %v4837_v40 = vrot.slane %v13255_v38, 6  ;;  %17917 = vst [vmem:[#allocation177_spill] sm:$0xff] %v13489_v1  ;;  %17918 = vst [vmem:[#allocation178_spill] sm:$0xff] %v13491_v29  ;;  %v13499_v30 = vld [vmem:[%s9559_s30 + $0x4c] sm:$0xf]  ;;  %v13507_v31 = vpop.permute.xlu0 %5933 }
 0x2c8   : > { %v8766_v52 = vcombine.low %v3542_v16, %v3545_v56  ;;  %v4891_v18 = vsel %vm10433_vm11, %v8485_v14, %v4890_v32  ;;  %v4892_v17 = vrot.slane %v4890_v32, 4  ;;  %17920 = vst [vmem:[#allocation180_spill] sm:$0xff] %v13499_v30  ;;  %v13505_v61 = vld [vmem:[%s9559_s30 + $0x50] sm:$0x3]  ;;  %17922 = vst [vmem:[#allocation182_spill] sm:$0xff] %v13507_v31  ;;  %v8391_v15 = vrot.slane %v13486_v33, 9 }
 0x2c9   : > { %7352 = vrot.lane.b32.xlu0 %v8876_v6, %s9468_s11  ;;  %6812 = vrot.lane.b32.xlu1 %v8774_v58, %s9461_s4  ;;  %v4835_v11 = vsel %vm10433_vm11, %v8477_v35, %v4834_v59  ;;  %v4836_v38 = vrot.slane %v4834_v59, 4  ;;  %17921 = vst [vmem:[#allocation181_spill] sm:$0xff] %v13505_v61  ;;  %v3604_v34 = vrot.slane %v13478_v4, 5  ;;  %v3607_v16 = vrot.slane %v13489_v1, 5 }
 0x2ca   : > { %v4894_v6 = vsel %vm10433_vm11, %v4892_v17, %v4893_v21  ;;  %v8383_v28 = vrot.slane %v13496_v46, 9  ;;  %v3548_v32 = vrot.slane %v13499_v30, 5  ;;  %v3551_v56 = vrot.slane %v13505_v61, 5 }
 0x2cb   : > { %v8885_v25 = vcombine.low %v4891_v18, %v4894_v6  ;;  %v4838_v14 = vsel %vm10433_vm11, %v4836_v38, %v4837_v40  ;;  %v3605_v21 = vsel %vm10020_vm5, %v8391_v15, %v3604_v34  ;;  %v3606_v58 = vrot.slane %v3604_v34, 4  ;;  %v13525_v18 = vpop.permute.xlu1 %5939 }
 0x2cc   : > { %v8877_v35 = vcombine.low %v4835_v11, %v4838_v14  ;;  %v3549_v59 = vsel %vm10020_vm5, %v8383_v28, %v3548_v32  ;;  %17923 = vst [vmem:[#allocation183_spill] sm:$0xff] %v13525_v18  ;;  %v17117_v17 = vshrl.u32 %v13417_v50, 16  ;;  %v17114_v11 = vshll.u32 %v13417_v50, 16  ;;  %v13537_v14 = vpop.permute.xlu0 %5937 }
 0x2cd   : > { %6796 = vrot.lane.b32.xlu0 %v8766_v52, %s9461_s4  ;;  %7370 = vrot.lane.b32.xlu1 %v8885_v25, %s9468_s11  ;;  %v3550_v52 = vrot.slane %v3548_v32, 4  ;;  %v3608_v40 = vsel %vm10020_vm5, %v3606_v58, %v3607_v16  ;;  %v17115_v38 = vshll.u32 %v13410_v42, 16  ;;  %v17116_v34 = vshrl.u32 %v13410_v42, 16  ;;  %17924 = vst [vmem:[#allocation184_spill] sm:$0xff] %v13537_v14 }
 0x2ce   : > { %v8775_v6 = vcombine.low %v3605_v21, %v3608_v40  ;;  %v17118_v25 = vshll.u32 %v13427_v54, 16  ;;  %v3787_v16 = vrot.slane %v17117_v17, 5  ;;  %v3788_v32 = vrot.slane %v17114_v11, 6 }
 0x2cf   : > { %v3552_v15 = vsel %vm10020_vm5, %v3550_v52, %v3551_v56  ;;  %v3791_v21 = vrot.slane %v17116_v34, 5  ;;  %v3796_v58 = vshrl.u32 %v13427_v54, 16  ;;  %v17120_v40 = vshll.u32 %v13434_v0, 16  ;;  %v13559_v18 = vpop.permute.xlu1 %5943 }
 0x2d0   : > { %v8767_v28 = vcombine.low %v3549_v59, %v3552_v15  ;;  %v3799_v56 = vrot.slane %v17118_v25, 6  ;;  %v17119_v59 = vshrl.u32 %v13434_v0, 16  ;;  %v3789_v52 = vor.u32 %v3788_v32, %v3787_v16 }
 0x2d1   : > { %7354 = vrot.lane.b32.xlu0 %v8877_v35, %s9468_s11  ;;  %v3792_v35 = vrot.slane %v17115_v38, 6  ;;  %6814 = vrot.lane.b32.xlu1 %v8775_v6, %s9461_s4  ;;  %v17123_v15 = vshll.u32 %v13420_v5, 16  ;;  %v17122_v11 = vshrl.u32 %v13420_v5, 16  ;;  %v3798_v38 = vrot.slane %v3796_v58, 5 }
 0x2d2   : > { %v17124_v34 = vshll.u32 %v13437_v37, 16  ;;  %v3667_v17 = vrot.slane %v17119_v59, 5  ;;  %v3790_v25 = vrot.slane %v3789_v52, 4  ;;  %v3668_v16 = vrot.slane %v17120_v40, 6  ;;  %v13570_v59 = vpop.permute.xlu0 %5941 }
 0x2d3   : > { %v3793_v6 = vor.u32 %v3792_v35, %v3791_v21  ;;  %v3671_v32 = vrot.slane %v17122_v11, 5  ;;  %v3672_v62 = vrot.slane %v17123_v15, 6  ;;  %v3800_v35 = vor.u32 %v3799_v56, %v3798_v38 }
 0x2d4   : > { %v3676_v21 = vshrl.u32 %v13437_v37, 16  ;;  %v3679_v58 = vrot.slane %v17124_v34, 6  ;;  %v3669_v14 = vor.u32 %v3668_v16, %v3667_v17  ;;  %vm6564_vm10 = vcmask 392192  }
 0x2d5   : > { %6798 = vrot.lane.b32.xlu0 %v8767_v28, %s9461_s4  ;;  %v3795_v28 = vrot.slane %v3793_v6, 4  ;;  %v3794_v52 = vsel %vm10174_vm8, %v3790_v25, %v3793_v6  ;;  %v3673_v40 = vor.u32 %v3672_v62, %v3671_v32  ;;  %v17135_v15 = vshrl.u32 %v13486_v33, 16  ;;  %v13581_v62 = vpop.permute.xlu1 %5995 }
 0x2d6   : > { %v3678_v29 = vrot.slane %v3676_v21, 5  ;;  %v3670_v56 = vrot.slane %v3669_v14, 4  ;;  %v17134_v19 = vshll.u32 %v13486_v33, 16  ;;  %v17127_v39 = vshll.u32 %v13478_v4, 16  ;;  %17925 = vst [vmem:[#allocation185_spill] sm:$0xff] %v13581_v62 }
 0x2d7   : > { %v3801_v11 = vsel %vm10174_vm8, %v3795_v28, %v3800_v35  ;;  %v3675_v31 = vrot.slane %v3673_v40, 4  ;;  %v17126_v26 = vshrl.u32 %v13478_v4, 16  ;;  %v17128_v17 = vshll.u32 %v13489_v1, 16  ;;  %v13599_v28 = vpop.permute.xlu0 %5993 }
 0x2d8   : > { %v8790_v38 = vcombine.low %v3794_v52, %v3801_v11  ;;  %v3680_v34 = vor.u32 %v3679_v58, %v3678_v29  ;;  %v3674_v25 = vsel %vm10174_vm8, %v3670_v56, %v3673_v40  ;;  %v3802_v11 = vrot.slane %v17135_v15, 5  ;;  %17926 = vst [vmem:[#allocation186_spill] sm:$0xff] %v13599_v28 }
 0x2d9   : > { %v3803_v14 = vrot.slane %v17134_v19, 6  ;;  %v3811_v29 = vshrl.u32 %v13489_v1, 16  ;;  %v3806_v16 = vrot.slane %v17126_v26, 5  ;;  %v3807_v32 = vrot.slane %v17127_v39, 6 }
 0x2da   : > { %6892 = vrot.lane.b32.xlu1 %v8790_v38, %s9462_s5  ;;  %v3681_v6 = vsel %vm10174_vm8, %v3675_v31, %v3680_v34  ;;  %v3814_v40 = vrot.slane %v17128_v17, 6  ;;  %v17132_v52 = vshrl.u32 %v13496_v46, 16  ;;  %v17131_v56 = vshll.u32 %v13496_v46, 16 }
 0x2db   : > { %v8782_v35 = vcombine.low %v3674_v25, %v3681_v6  ;;  %v3804_v21 = vor.u32 %v3803_v14, %v3802_v11  ;;  %v3813_v58 = vrot.slane %v3811_v29, 5  ;;  %v3808_v38 = vor.u32 %v3807_v32, %v3806_v16  ;;  %v13615_v16 = vpop.permute.xlu1 %5999 }
 0x2dc   : > { %v17130_v31 = vshll.u32 %v13499_v30, 16  ;;  %v17129_v34 = vshrl.u32 %v13499_v30, 16  ;;  %v17133_v17 = vshll.u32 %v13505_v61, 16  ;;  %v3682_v25 = vrot.slane %v17132_v52, 5  ;;  %17927 = vst [vmem:[#allocation187_spill] sm:$0xff] %v13615_v16 }
 0x2dd   : > { %6876 = vrot.lane.b32.xlu0 %v8782_v35, %s9462_s5  ;;  %v3805_v26 = vrot.slane %v3804_v21, 4  ;;  %v3815_v39 = vor.u32 %v3814_v40, %v3813_v58  ;;  %v3810_v11 = vrot.slane %v3808_v38, 4  ;;  %v3683_v14 = vrot.slane %v17131_v56, 6 }
 0x2de   : > { %v3686_v29 = vrot.slane %v17129_v34, 5  ;;  %v3687_v6 = vrot.slane %v17130_v31, 6  ;;  %v3691_v40 = vshrl.u32 %v13505_v61, 16  ;;  %v3694_v35 = vrot.slane %v17133_v17, 6 }
 0x2df   : > { %v3809_v32 = vsel %vm10174_vm8, %v3805_v26, %v3808_v38  ;;  %v13625_v21 = vsel %vm6564_vm10, %v13322_v36, %v13402_v22  ;;  %v3816_v58 = vsel %vm10174_vm8, %v3810_v11, %v3815_v39  ;;  %v3684_v34 = vor.u32 %v3683_v14, %v3682_v25  ;;  %v13634_v26 = vpop.permute.xlu0 %5997 }
 0x2e0   : > { %17928 = vst [vmem:[#allocation188_spill] sm:$0xff] %v13625_v21  ;;  %v3688_v31 = vor.u32 %v3687_v6, %v3686_v29  ;;  %v13632_v56 = vsel %vm6564_vm10, %v13329_v8, %v13412_v27  ;;  %17930 = vst [vmem:[#allocation190_spill] sm:$0xff] %v13634_v26  ;;  %v8791_v38 = vcombine.low %v3809_v32, %v3816_v58  ;;  %v3693_v52 = vrot.slane %v3691_v40, 5  ;;  %v13647_v29 = vpop.permute.xlu1 %6003  ;;  %v13658_v58 = vld [vmem:[%s9559_s30 + $0xa8] sm:$0xf] }
 0x2e1   : > { %17929 = vst [vmem:[#allocation189_spill] sm:$0xff] %v13632_v56  ;;  %v8406_v17 = vrot.slane %v13417_v50, 10  ;;  %v3949_v19 = vrot.slane %v13410_v42, 6  ;;  %v3685_v36 = vrot.slane %v3684_v34, 4  ;;  %v3952_v15 = vrot.slane %v13427_v54, 6  ;;  %17931 = vst [vmem:[#allocation191_spill] sm:$0xff] %v13647_v29 }
 0x2e2   : > { %v3690_v22 = vrot.slane %v3688_v31, 4  ;;  %v8398_v39 = vrot.slane %v13434_v0, 10  ;;  %6894 = vrot.lane.b32.xlu1 %v8791_v38, %s9462_s5  ;;  %v3695_v25 = vor.u32 %v3694_v35, %v3693_v52  ;;  %v3893_v11 = vrot.slane %v13420_v5, 6  ;;  %v13684_v21 = vld [vmem:[%s9559_s30 + $0xb4] sm:$0xf] }
 0x2e3   : > { %v3950_v8 = vsel %vm10433_vm11, %v8406_v17, %v3949_v19  ;;  %v3951_v27 = vrot.slane %v3949_v19, 4  ;;  %v3689_v14 = vsel %vm10174_vm8, %v3685_v36, %v3688_v31  ;;  %v3896_v34 = vrot.slane %v13437_v37, 6  ;;  %v13660_v38 = vpop.permute.xlu0 %6001  ;;  %v14029_v42 = vld [vmem:[%s9559_s30 + $0x64] sm:$0xf] }
 0x2e4   : > { %v3696_v6 = vsel %vm10174_vm8, %v3690_v22, %v3695_v25  ;;  %v3894_v17 = vsel %vm10433_vm11, %v8398_v39, %v3893_v11  ;;  %v3895_v19 = vrot.slane %v3893_v11, 4  ;;  %v8407_v31 = vrot.slane %v13486_v33, 10  ;;  %17932 = vst [vmem:[#allocation192_spill] sm:$0xff] %v13660_v38  ;;  %v13668_v25 = vld [vmem:[%s9559_s30 + $0xac] sm:$0xf]  ;;  %17981 = vst [vmem:[#allocation215_spill] sm:$0xff] %v14029_v42 }
 0x2e5   : > { %v3953_v52 = vsel %vm10433_vm11, %v3951_v27, %v3952_v15  ;;  %v8783_v32 = vcombine.low %v3689_v14, %v3696_v6  ;;  %v3956_v35 = vrot.slane %v13478_v4, 6  ;;  %v3959_v36 = vrot.slane %v13489_v1, 6  ;;  %v13679_v6 = vld [vmem:[%s9559_s30 + $0x4c] sm:$0xf] }
 0x2e6   : > { %v8806_v40 = vcombine.low %v3950_v8, %v3953_v52  ;;  %v3897_v15 = vsel %vm10433_vm11, %v3895_v19, %v3896_v34  ;;  %v8399_v22 = vrot.slane %v13496_v46, 10  ;;  %v3900_v39 = vrot.slane %v13499_v30, 6  ;;  %v13676_v34 = vld [vmem:[%s9559_s30 + $0x48] sm:$0xf] }
 0x2e7   : > { %6878 = vrot.lane.b32.xlu0 %v8783_v32, %s9462_s5  ;;  %v8798_v8 = vcombine.low %v3894_v17, %v3897_v15  ;;  %v3957_v27 = vsel %vm10433_vm11, %v8407_v31, %v3956_v35  ;;  %v3958_v11 = vrot.slane %v3956_v35, 4  ;;  %v3903_v14 = vrot.slane %v13505_v61, 6  ;;  %v13687_v32 = vld [vmem:[%s9559_s30 + $0xb8] sm:$0xf] }
 0x2e8   : > { %6972 = vrot.lane.b32.xlu1 %v8806_v40, %s9463_s6  ;;  %v3901_v52 = vsel %vm10433_vm11, %v8399_v22, %v3900_v39  ;;  %v3902_v19 = vrot.slane %v3900_v39, 4  ;;  %v13691_v40 = vpop.permute.xlu1 %6007  ;;  %v8822_v15 = vcombine.low %v13658_v58, %v13668_v25  ;;  %v8814_v22 = vcombine.low %v13676_v34, %v13679_v6  ;;  %v13700_v39 = vld [vmem:[%s9559_s30 + $0xb0] sm:$0x3] }
 0x2e9   : > { %v3960_v17 = vsel %vm10433_vm11, %v3958_v11, %v3959_v36  ;;  %17933 = vst [vmem:[#allocation193_spill] sm:$0xff] %v13691_v40  ;;  %v8823_v36 = vcombine.low %v13684_v21, %v13687_v32  ;;  %v13713_v11 = vsel %vm6564_vm10, %v13469_v63, %v13570_v59  ;;  %v17939_v63 = vshll.u32 %v13700_v39, 16 }
 0x2ea   : > { %v8807_v31 = vcombine.low %v3957_v27, %v3960_v17  ;;  %v3904_v35 = vsel %vm10433_vm11, %v3902_v19, %v3903_v14  ;;  %v13708_v27 = vsel %vm6564_vm10, %v13462_v24, %v13559_v18  ;;  %17935 = vst [vmem:[#allocation195_spill] sm:$0xff] %v13713_v11  ;;  %v13715_v14 = vpop.permute.xlu0 %6005  ;;  %v13724_v18 = vld [vmem:[%s9559_s30 + $0x50] sm:$0x3]  ;;  %v17937_v17 = vshll.u32 %v13668_v25, 16 }
 0x2eb   : > { %6956 = vrot.lane.b32.xlu0 %v8798_v8, %s9463_s6  ;;  %v8799_v56 = vcombine.low %v3901_v52, %v3904_v35  ;;  %17934 = vst [vmem:[#allocation194_spill] sm:$0xff] %v13708_v27  ;;  %17936 = vst [vmem:[#allocation196_spill] sm:$0xff] %v13715_v14  ;;  %v17136_v8 = vshrl.u32 %v13658_v58, 16  ;;  %v17137_v52 = vshll.u32 %v13658_v58, 16  ;;  %v17938_v24 = vshrl.u32 %v13668_v25, 16 }
 0x2ec   : > { %6974 = vrot.lane.b32.xlu1 %v8807_v31, %s9463_s6  ;;  %v4293_v40 = vrot.slane %v17937_v17, 5  ;;  %v4303_v14 = vrot.slane %v17939_v63, 5  ;;  %v17940_v59 = vshrl.u32 %v13676_v34, 16  ;;  %v17941_v11 = vshll.u32 %v13676_v34, 16  ;;  %v13746_v38 = vpop.permute.xlu1 %6808  ;;  %v13750_v17 = vld [vmem:[%s9559_s30 + $0x54] sm:$0xf] }
 0x2ed   : > { %v4284_v35 = vrot.slane %v17136_v8, 4  ;;  %v4287_v19 = vrot.slane %v17137_v52, 5  ;;  %v4297_v27 = vrot.slane %v17938_v24, 4  ;;  %v17942_v29 = vshll.u32 %v13679_v6, 16  ;;  %v13753_v24 = vld [vmem:[%s9559_s30 + $0x58] sm:$0xf] }
 0x2ee   : > { %v4092_v31 = vrot.slane %v17940_v59, 4  ;;  %v4095_v8 = vrot.slane %v17941_v11, 5  ;;  %v17140_v16 = vshrl.u32 %v13679_v6, 16  ;;  %v17141_v59 = vshll.u32 %v13724_v18, 16  ;;  %v13759_v62 = vpop.permute.xlu0 %6792 }
 0x2ef   : > { %6958 = vrot.lane.b32.xlu0 %v8799_v56, %s9463_s6  ;;  %v4101_v52 = vrot.slane %v17942_v29, 5  ;;  %v4288_v56 = vor.u32 %v4287_v19, %v4284_v35  ;;  %v4298_v63 = vor.u32 %v4297_v27, %v4293_v40  ;;  %v17144_v11 = vshrl.u32 %v13684_v21, 16 }
 0x2f0   : > { %7052 = vrot.lane.b32.xlu1 %v8822_v15, %s9464_s7  ;;  %v4096_v26 = vor.u32 %v4095_v8, %v4092_v31  ;;  %v17148_v29 = vshll.u32 %v13684_v21, 16  ;;  %v4105_v48 = vrot.slane %v17140_v16, 4  ;;  %v8815_v27 = vcombine.low %v13750_v17, %v13753_v24  ;;  %v13769_v31 = vld [vmem:[%s9559_s30 + $0xbc] sm:$0x3] }
 0x2f1   : > { %v4289_v28 = vrot.slane %v4288_v56, 4  ;;  %v4299_v15 = vrot.slane %v4298_v63, 4  ;;  %v4111_v8 = vrot.slane %v17141_v59, 5  ;;  %v4308_v35 = vrot.slane %v17144_v11, 4 }
 0x2f2   : > { %v4097_v19 = vrot.slane %v4096_v26, 4  ;;  %v4106_v63 = vor.u32 %v4105_v48, %v4101_v52  ;;  %v4311_v26 = vrot.slane %v17148_v29, 5  ;;  %v17146_v55 = vshll.u32 %v13687_v32, 16 }
 0x2f3   : > { %7036 = vrot.lane.b32.xlu0 %v8814_v22, %s9464_s7  ;;  %v4294_v56 = vsel %vm9604_vm2, %v4289_v28, %v4293_v40  ;;  %v4304_v22 = vsel %vm9604_vm2, %v4299_v15, %v4303_v14  ;;  %v17147_v11 = vshrl.u32 %v13687_v32, 16  ;;  %v17156_v40 = vshll.u32 %v13769_v31, 16  ;;  %v13794_v15 = vld [vmem:[%s9559_s30 + $0x5c] sm:$0x3] }
 0x2f4   : > { %7054 = vrot.lane.b32.xlu1 %v8823_v36, %s9464_s7  ;;  %v8838_v16 = vcombine.low %v4294_v56, %v4304_v22  ;;  %v4102_v59 = vsel %vm9604_vm2, %v4097_v19, %v4101_v52  ;;  %v13784_v36 = vpop.permute.xlu1 %6810  ;;  %v4107_v43 = vrot.slane %v4106_v63, 4  ;;  %v4312_v28 = vor.u32 %v4311_v26, %v4308_v35  ;;  %v13798_v22 = vpop.permute.xlu0 %6794 }
 0x2f5   : > { %v17155_v14 = vshrl.u32 %v13750_v17, 16  ;;  %v4317_v48 = vrot.slane %v17146_v55, 5  ;;  %v4321_v52 = vrot.slane %v17147_v11, 4  ;;  %v17154_v19 = vshll.u32 %v13750_v17, 16 }
 0x2f6   : > { %v17153_v56 = vshll.u32 %v13753_v24, 16  ;;  %v4112_v35 = vsel %vm9604_vm2, %v4107_v43, %v4111_v8  ;;  %v4327_v11 = vrot.slane %v17156_v40, 5  ;;  %v17158_v41 = vshll.u32 %v13794_v15, 16 }
 0x2f7   : > { %7038 = vrot.lane.b32.xlu0 %v8815_v27, %s9464_s7  ;;  %v4313_v27 = vrot.slane %v4312_v28, 4  ;;  %v4116_v63 = vrot.slane %v17155_v14, 4  ;;  %v8830_v26 = vcombine.low %v4102_v59, %v4112_v35  ;;  %v4322_v55 = vor.u32 %v4321_v52, %v4317_v48 }
 0x2f8   : > { %7132 = vrot.lane.b32.xlu1 %v8838_v16, %s9465_s8  ;;  %v4119_v29 = vrot.slane %v17154_v19, 5  ;;  %v4125_v3 = vrot.slane %v17153_v56, 5  ;;  %v17157_v16 = vshrl.u32 %v13753_v24, 16  ;;  %v8470_v28 = vrot.slane %v13658_v58, 9  ;;  %v13817_v52 = vpop.permute.xlu1 %6888 }
 0x2f9   : > { %v4318_v43 = vsel %vm9604_vm2, %v4313_v27, %v4317_v48  ;;  %v4323_v59 = vrot.slane %v4322_v55, 4  ;;  %v4135_v56 = vrot.slane %v17158_v41, 5  ;;  %v4545_v19 = vrot.slane %v13668_v25, 5  ;;  %v13829_v27 = vpop.permute.xlu0 %6872 }
 0x2fa   : > { %v4120_v8 = vor.u32 %v4119_v29, %v4116_v63  ;;  %v4129_v35 = vrot.slane %v17157_v16, 4  ;;  %v4548_v14 = vrot.slane %v13700_v39, 5  ;;  %v8462_v55 = vrot.slane %v13676_v34, 9 }
 0x2fb   : > { %7116 = vrot.lane.b32.xlu0 %v8830_v26, %s9465_s8  ;;  %v4328_v26 = vsel %vm9604_vm2, %v4323_v59, %v4327_v11  ;;  %v4489_v29 = vrot.slane %v13679_v6, 5  ;;  %v4546_v16 = vsel %vm10020_vm5, %v8470_v28, %v4545_v19  ;;  %v4547_v41 = vrot.slane %v4545_v19, 4 }
 0x2fc   : > { %v4121_v48 = vrot.slane %v4120_v8, 4  ;;  %v8839_v63 = vcombine.low %v4318_v43, %v4328_v26  ;;  %v4130_v40 = vor.u32 %v4129_v35, %v4125_v3  ;;  %v4492_v1 = vrot.slane %v13724_v18, 5  ;;  %v13845_v30 = vpop.permute.xlu1 %6890 }
 0x2fd   : > { %v4491_v61 = vrot.slane %v4489_v29, 4  ;;  %v4549_v8 = vsel %vm10020_vm5, %v4547_v41, %v4548_v14  ;;  %v4490_v43 = vsel %vm10020_vm5, %v8462_v55, %v4489_v29  ;;  %v8471_v19 = vrot.slane %v13684_v21, 9 }
 0x2fe   : > { %7134 = vrot.lane.b32.xlu1 %v8839_v63, %s9465_s8  ;;  %v4126_v11 = vsel %vm9604_vm2, %v4121_v48, %v4125_v3  ;;  %v4131_v59 = vrot.slane %v4130_v40, 4  ;;  %v8854_v35 = vcombine.low %v4546_v16, %v4549_v8  ;;  %v4552_v26 = vrot.slane %v13687_v32, 5 }
 0x2ff   : > { %v4493_v28 = vsel %vm10020_vm5, %v4491_v61, %v4492_v1  ;;  %v4555_v40 = vrot.slane %v13769_v31, 5  ;;  %v8463_v41 = vrot.slane %v13750_v17, 9  ;;  %v4496_v1 = vrot.slane %v13753_v24, 5  ;;  %v13854_v61 = vpop.permute.xlu0 %6874 }
 0x300   : > { %v4136_v3 = vsel %vm9604_vm2, %v4131_v59, %v4135_v56  ;;  %v4553_v16 = vsel %vm10020_vm5, %v8471_v19, %v4552_v26  ;;  %v4554_v48 = vrot.slane %v4552_v26, 4  ;;  %v8846_v55 = vcombine.low %v4490_v43, %v4493_v28 }
 0x301   : > { %v8831_v14 = vcombine.low %v4126_v11, %v4136_v3  ;;  %v4499_v29 = vrot.slane %v13794_v15, 5  ;;  %v17943_v56 = vshrl.u32 %v13658_v58, 16  ;;  %v4497_v59 = vsel %vm10020_vm5, %v8463_v41, %v4496_v1 }
 0x302   : > { %7212 = vrot.lane.b32.xlu1 %v8854_v35, %s9466_s9  ;;  %v4556_v11 = vsel %vm10020_vm5, %v4554_v48, %v4555_v40  ;;  %v4498_v8 = vrot.slane %v4496_v1, 4  ;;  %v17944_v19 = vshll.u32 %v13658_v58, 16  ;;  %v17945_v43 = vshrl.u32 %v13668_v25, 16 }
 0x303   : > { %v4735_v63 = vrot.slane %v17943_v56, 5  ;;  %7118 = vrot.lane.b32.xlu0 %v8831_v14, %s9465_s8  ;;  %v8855_v3 = vcombine.low %v4553_v16, %v4556_v11  ;;  %v17946_v28 = vshll.u32 %v13668_v25, 16  ;;  %v4744_v56 = vshrl.u32 %v13700_v39, 16  ;;  %v13889_v33 = vpop.permute.xlu0 %6952 }
 0x304   : > { %v4736_v26 = vrot.slane %v17944_v19, 6  ;;  %v4739_v35 = vrot.slane %v17945_v43, 5  ;;  %v4500_v14 = vsel %vm10020_vm5, %v4498_v8, %v4499_v29  ;;  %v17947_v48 = vshll.u32 %v13700_v39, 16  ;;  %v13878_v19 = vpop.permute.xlu1 %6968 }
 0x305   : > { %v4740_v46 = vrot.slane %v17946_v28, 6  ;;  %v17948_v1 = vshrl.u32 %v13676_v34, 16  ;;  %v8847_v16 = vcombine.low %v4497_v59, %v4500_v14  ;;  %v4746_v43 = vrot.slane %v4744_v56, 5 }
 0x306   : > { %v4737_v40 = vor.u32 %v4736_v26, %v4735_v63  ;;  %v4747_v41 = vrot.slane %v17947_v48, 6  ;;  %7214 = vrot.lane.b32.xlu1 %v8855_v3, %s9466_s9  ;;  %v17949_v28 = vshll.u32 %v13676_v34, 16  ;;  %v17950_v63 = vshrl.u32 %v13679_v6, 16 }
 0x307   : > { %v4615_v37 = vrot.slane %v17948_v1, 5  ;;  %v4741_v11 = vor.u32 %v4740_v46, %v4739_v35  ;;  %7196 = vrot.lane.b32.xlu0 %v8846_v55, %s9466_s9  ;;  %v17951_v26 = vshll.u32 %v13679_v6, 16  ;;  %v4624_v1 = vshrl.u32 %v13724_v18, 16 }
 0x308   : > { %v4616_v4 = vrot.slane %v17949_v28, 6  ;;  %v4738_v29 = vrot.slane %v4737_v40, 4  ;;  %v4619_v8 = vrot.slane %v17950_v63, 5  ;;  %v4748_v59 = vor.u32 %v4747_v41, %v4746_v43  ;;  %v13898_v54 = vpop.permute.xlu1 %6970  ;;  %v13905_v41 = vpop.permute.xlu0 %6954 }
 0x309   : > { %v4620_v48 = vrot.slane %v17951_v26, 6  ;;  %v4743_v3 = vrot.slane %v4741_v11, 4  ;;  %v17952_v35 = vshll.u32 %v13724_v18, 16  ;;  %v4626_v40 = vrot.slane %v4624_v1, 5 }
 0x30a   : > { %v4617_v46 = vor.u32 %v4616_v4, %v4615_v37  ;;  %v4742_v55 = vsel %vm10174_vm8, %v4738_v29, %v4741_v11  ;;  %v17953_v43 = vshrl.u32 %v13684_v21, 16 }
 0x30b   : > { %v4627_v56 = vrot.slane %v17952_v35, 6  ;;  %v4621_v14 = vor.u32 %v4620_v48, %v4619_v8  ;;  %v4749_v28 = vsel %vm10174_vm8, %v4743_v3, %v4748_v59  ;;  %7198 = vrot.lane.b32.xlu0 %v8847_v16, %s9466_s9  ;;  %v17954_v16 = vshll.u32 %v13684_v21, 16 }
 0x30c   : > { %v4618_v63 = vrot.slane %v4617_v46, 4  ;;  %v8870_v26 = vcombine.low %v4742_v55, %v4749_v28  ;;  %v4750_v29 = vrot.slane %v17953_v43, 5  ;;  %v17955_v48 = vshrl.u32 %v13687_v32, 16 }
 0x30d   : > { %v4623_v5 = vrot.slane %v4621_v14, 4  ;;  %v4628_v0 = vor.u32 %v4627_v56, %v4626_v40  ;;  %v4751_v8 = vrot.slane %v17954_v16, 6  ;;  %v17956_v3 = vshll.u32 %v13687_v32, 16 }
 0x30e   : > { %v4622_v37 = vsel %vm10174_vm8, %v4618_v63, %v4621_v14  ;;  %7292 = vrot.lane.b32.xlu1 %v8870_v26, %s9467_s10  ;;  %v4754_v1 = vrot.slane %v17955_v48, 5  ;;  %v17957_v56 = vshll.u32 %v13769_v31, 16  ;;  %v17958_v28 = vshrl.u32 %v13750_v17, 16  ;;  %v13923_v26 = vpop.permute.xlu0 %7032 }
 0x30f   : > { %v4629_v4 = vsel %vm10174_vm8, %v4623_v5, %v4628_v0  ;;  %v4755_v59 = vrot.slane %v17956_v3, 6  ;;  %v4752_v46 = vor.u32 %v4751_v8, %v4750_v29  ;;  %v4759_v5 = vshrl.u32 %v13769_v31, 16  ;;  %v13917_v0 = vpop.permute.xlu1 %7048  ;;  %17959 = vst [vmem:[#allocation197_spill] sm:$0xff] %v13923_v26 }
 0x310   : > { %v8862_v11 = vcombine.low %v4622_v37, %v4629_v4  ;;  %v4762_v55 = vrot.slane %v17957_v56, 6  ;;  %v4630_v63 = vrot.slane %v17958_v28, 5  ;;  %v17960_v4 = vshll.u32 %v13750_v17, 16 }
 0x311   : > { %v4756_v35 = vor.u32 %v4755_v59, %v4754_v1  ;;  %v4753_v14 = vrot.slane %v4752_v46, 4  ;;  %v4761_v40 = vrot.slane %v4759_v5, 5  ;;  %v17961_v16 = vshrl.u32 %v13753_v24, 16 }
 0x312   : > { %7276 = vrot.lane.b32.xlu0 %v8862_v11, %s9467_s10  ;;  %v4631_v11 = vrot.slane %v17960_v4, 6  ;;  %v17962_v1 = vshll.u32 %v13753_v24, 16  ;;  %v4639_v59 = vshrl.u32 %v13794_v15, 16  ;;  %v17963_v46 = vshll.u32 %v13794_v15, 16 }
 0x313   : > { %v4758_v37 = vrot.slane %v4756_v35, 4  ;;  %v4757_v43 = vsel %vm10174_vm8, %v4753_v14, %v4756_v35  ;;  %v4763_v29 = vor.u32 %v4762_v55, %v4761_v40  ;;  %v4634_v8 = vrot.slane %v17961_v16, 5  ;;  %v13938_v28 = vpop.permute.xlu1 %7050  ;;  %v13940_v40 = vpop.permute.xlu0 %7034 }
 0x314   : > { %v4632_v48 = vor.u32 %v4631_v11, %v4630_v63  ;;  %v4635_v3 = vrot.slane %v17962_v1, 6  ;;  %v4642_v5 = vrot.slane %v17963_v46, 6  ;;  %17964 = vst [vmem:[#allocation198_spill] sm:$0xff] %v13938_v28  ;;  %v4641_v14 = vrot.slane %v4639_v59, 5  ;;  %17965 = vst [vmem:[#allocation199_spill] sm:$0xff] %v13940_v40 }
 0x315   : > { %v4764_v56 = vsel %vm10174_vm8, %v4758_v37, %v4763_v29  ;;  %v8486_v29 = vrot.slane %v13658_v58, 10  ;;  %v4900_v1 = vrot.slane %v13700_v39, 6  ;;  %v4841_v59 = vrot.slane %v13679_v6, 6 }
 0x316   : > { %v8871_v4 = vcombine.low %v4757_v43, %v4764_v56  ;;  %v4633_v35 = vrot.slane %v4632_v48, 4  ;;  %v4636_v55 = vor.u32 %v4635_v3, %v4634_v8  ;;  %v4643_v16 = vor.u32 %v4642_v5, %v4641_v14  ;;  %v13980_v14 = vld [vmem:[%s9559_s30 + $0x5c] sm:$0x3] }
 0x317   : > { %v13948_v8 = vpop.permute.xlu1 %7128  ;;  %v4897_v48 = vrot.slane %v13668_v25, 6  ;;  %v8478_v3 = vrot.slane %v13676_v34, 10  ;;  %v4844_v46 = vrot.slane %v13724_v18, 6  ;;  %v13956_v58 = vpop.permute.xlu0 %7112  ;;  %v13964_v25 = vld [vmem:[%s9559_s30 + $0xb8] sm:$0xf]  ;;  %v4843_v34 = vrot.slane %v4841_v59, 4 }
 0x318   : > { %7294 = vrot.lane.b32.xlu1 %v8871_v4, %s9467_s10  ;;  %v4637_v63 = vsel %vm10174_vm8, %v4633_v35, %v4636_v55  ;;  %v4638_v11 = vrot.slane %v4636_v55, 4  ;;  %17966 = vst [vmem:[#allocation200_spill] sm:$0xff] %v13948_v8  ;;  %17967 = vst [vmem:[#allocation201_spill] sm:$0xff] %v13956_v58  ;;  %v13961_v4 = vld [vmem:[%s9559_s30 + $0xb4] sm:$0xf] }
 0x319   : > { %v4898_v5 = vsel %vm10433_vm11, %v8486_v29, %v4897_v48  ;;  %v4899_v56 = vrot.slane %v4897_v48, 4  ;;  %17968 = vst [vmem:[#allocation202_spill] sm:$0xff] %v13961_v4  ;;  %17969 = vst [vmem:[#allocation203_spill] sm:$0xff] %v13964_v25  ;;  %v4842_v39 = vsel %vm10433_vm11, %v8478_v3, %v4841_v59  ;;  %v13969_v35 = vld [vmem:[%s9559_s30 + $0xbc] sm:$0x3]  ;;  %v3558_v59 = vrot.slane %v13980_v14, 5 }
 0x31a   : > { %v4644_v37 = vsel %vm10174_vm8, %v4638_v11, %v4643_v16  ;;  %17970 = vst [vmem:[#allocation204_spill] sm:$0xff] %v13969_v35  ;;  %v13972_v55 = vld [vmem:[%s9559_s30 + $0x54] sm:$0xf]  ;;  %v13977_v18 = vld [vmem:[%s9559_s30 + $0x58] sm:$0xf]  ;;  %17973 = vst [vmem:[#allocation207_spill] sm:$0xff] %v13980_v14  ;;  %v4845_v11 = vsel %vm10433_vm11, %v4843_v34, %v4844_v46 }
 0x31b   : > { %v8863_v43 = vcombine.low %v4637_v63, %v4644_v37  ;;  %17971 = vst [vmem:[#allocation205_spill] sm:$0xff] %v13972_v55  ;;  %v4901_v6 = vsel %vm10433_vm11, %v4899_v56, %v4900_v1  ;;  %17972 = vst [vmem:[#allocation206_spill] sm:$0xff] %v13977_v18  ;;  %v8392_v16 = vrot.slane %v13961_v4, 9  ;;  %v13985_v37 = vpop.permute.xlu1 %7130  ;;  %v8878_v29 = vcombine.low %v4842_v39, %v4845_v11  ;;  %v14019_v58 = vld [vmem:[%s9559_s30 + $0xc8] sm:$0x3] }
 0x31c   : > { %v8886_v63 = vcombine.low %v4898_v5, %v4901_v6  ;;  %17974 = vst [vmem:[#allocation208_spill] sm:$0xff] %v13985_v37  ;;  %v3614_v48 = vrot.slane %v13969_v35, 5  ;;  %v8384_v1 = vrot.slane %v13972_v55, 9  ;;  %v3555_v3 = vrot.slane %v13977_v18, 5  ;;  %v13993_v46 = vpop.permute.xlu0 %7114  ;;  %v14004_v37 = vld [vmem:[%s9559_s30 + $0xc4] sm:$0xf] }
 0x31d   : > { %7278 = vrot.lane.b32.xlu0 %v8863_v43, %s9467_s10  ;;  %v3611_v43 = vrot.slane %v13964_v25, 5  ;;  %17975 = vst [vmem:[#allocation209_spill] sm:$0xff] %v13993_v46  ;;  %v8487_v39 = vrot.slane %v13684_v21, 10  ;;  %v4907_v11 = vrot.slane %v13769_v31, 6  ;;  %17976 = vst [vmem:[#allocation210_spill] sm:$0xff] %v14004_v37  ;;  %v4851_v21 = vrot.slane %v13794_v15, 6 }
 0x31e   : > { %7372 = vrot.lane.b32.xlu1 %v8886_v63, %s9468_s11  ;;  %v3556_v34 = vsel %vm10020_vm5, %v8384_v1, %v3555_v3  ;;  %v3557_v6 = vrot.slane %v3555_v3, 4  ;;  %v4904_v63 = vrot.slane %v13687_v32, 6  ;;  %v14012_v46 = vld [vmem:[%s9559_s30 + $0xc0] sm:$0xf]  ;;  %17978 = vst [vmem:[#allocation212_spill] sm:$0xff] %v14019_v58 }
 0x31f   : > { %v3612_v5 = vsel %vm10020_vm5, %v8392_v16, %v3611_v43  ;;  %v3613_v56 = vrot.slane %v3611_v43, 4  ;;  %v8479_v16 = vrot.slane %v13750_v17, 10  ;;  %v4848_v43 = vrot.slane %v13753_v24, 6  ;;  %17977 = vst [vmem:[#allocation211_spill] sm:$0xff] %v14012_v46  ;;  %v14024_v17 = vpop.permute.xlu1 %7208 }
 0x320   : > { %v3559_v32 = vsel %vm10020_vm5, %v3557_v6, %v3558_v59  ;;  %v4905_v31 = vsel %vm10433_vm11, %v8487_v39, %v4904_v63  ;;  %v4906_v3 = vrot.slane %v4904_v63, 4  ;;  %17980 = vst [vmem:[#allocation214_spill] sm:$0xff] %v14024_v17  ;;  %v3618_v39 = vrot.slane %v14004_v37, 5  ;;  %v14037_v6 = vld [vmem:[%s9559_s30 + $0x68] sm:$0x3]  ;;  %v14039_v63 = vpop.permute.xlu0 %7192 }
 0x321   : > { %7356 = vrot.lane.b32.xlu0 %v8878_v29, %s9468_s11  ;;  %v3615_v29 = vsel %vm10020_vm5, %v3613_v56, %v3614_v48  ;;  %v14022_v48 = vld [vmem:[%s9559_s30 + $0x60] sm:$0xf]  ;;  %v8768_v24 = vcombine.low %v3556_v34, %v3559_v32  ;;  %v4849_v15 = vsel %vm10433_vm11, %v8479_v16, %v4848_v43  ;;  %v4850_v56 = vrot.slane %v4848_v43, 4  ;;  %17982 = vst [vmem:[#allocation216_spill] sm:$0xff] %v14037_v6 }
 0x322   : > { %v8776_v1 = vcombine.low %v3612_v5, %v3615_v29  ;;  %17979 = vst [vmem:[#allocation213_spill] sm:$0xff] %v14022_v48  ;;  %v4908_v59 = vsel %vm10433_vm11, %v4906_v3, %v4907_v11  ;;  %v8393_v5 = vrot.slane %v14012_v46, 9  ;;  %17983 = vst [vmem:[#allocation217_spill] sm:$0xff] %v14039_v63  ;;  %v3621_v16 = vrot.slane %v14019_v58, 5 }
 0x323   : > { %v8887_v34 = vcombine.low %v4905_v31, %v4908_v59  ;;  %v4852_v29 = vsel %vm10433_vm11, %v4850_v56, %v4851_v21  ;;  %v8385_v43 = vrot.slane %v14022_v48, 9  ;;  %v3620_v32 = vrot.slane %v3618_v39, 4  ;;  %v14057_v56 = vpop.permute.xlu1 %7210 }
 0x324   : > { %6816 = vrot.lane.b32.xlu1 %v8776_v1, %s9461_s4  ;;  %v8879_v1 = vcombine.low %v4849_v15, %v4852_v29  ;;  %v3619_v11 = vsel %vm10020_vm5, %v8393_v5, %v3618_v39  ;;  %v3562_v3 = vrot.slane %v14029_v42, 5  ;;  %v3565_v17 = vrot.slane %v14037_v6, 5  ;;  %17984 = vst [vmem:[#allocation218_spill] sm:$0xff] %v14057_v56 }
 0x325   : > { %6800 = vrot.lane.b32.xlu0 %v8768_v24, %s9461_s4  ;;  %v17177_v63 = vshrl.u32 %v13961_v4, 16  ;;  %v3622_v21 = vsel %vm10020_vm5, %v3620_v32, %v3621_v16  ;;  %v17178_v15 = vshll.u32 %v13961_v4, 16  ;;  %v17180_v5 = vshll.u32 %v13964_v25, 16 }
 0x326   : > { %v3563_v31 = vsel %vm10020_vm5, %v8385_v43, %v3562_v3  ;;  %v3564_v24 = vrot.slane %v3562_v3, 4  ;;  %v8777_v59 = vcombine.low %v3619_v11, %v3622_v21  ;;  %v17179_v39 = vshrl.u32 %v13964_v25, 16  ;;  %v14070_v3 = vpop.permute.xlu0 %7194 }
 0x327   : > { %v3817_v16 = vrot.slane %v17177_v63, 5  ;;  %v3818_v43 = vrot.slane %v17178_v15, 6  ;;  %v3826_v32 = vshrl.u32 %v13969_v35, 16  ;;  %17985 = vst [vmem:[#allocation219_spill] sm:$0xff] %v14070_v3  ;;  %v3822_v21 = vrot.slane %v17180_v5, 6 }
 0x328   : > { %7374 = vrot.lane.b32.xlu1 %v8887_v34, %s9468_s11  ;;  %v17185_v34 = vshll.u32 %v13969_v35, 16  ;;  %v3566_v29 = vsel %vm10020_vm5, %v3564_v24, %v3565_v17  ;;  %v3821_v11 = vrot.slane %v17179_v39, 5  ;;  %v17183_v15 = vshrl.u32 %v13972_v55, 16 }
 0x329   : > { %7358 = vrot.lane.b32.xlu0 %v8879_v1, %s9468_s11  ;;  %v8769_v1 = vcombine.low %v3563_v31, %v3566_v29  ;;  %v3819_v24 = vor.u32 %v3818_v43, %v3817_v16  ;;  %v3828_v63 = vrot.slane %v3826_v32, 5  ;;  %v17184_v56 = vshll.u32 %v13972_v55, 16  ;;  %v14089_v43 = vpop.permute.xlu1 %7288 }
 0x32a   : > { %v3829_v17 = vrot.slane %v17185_v34, 6  ;;  %v3823_v31 = vor.u32 %v3822_v21, %v3821_v11  ;;  %v17187_v29 = vshll.u32 %v13977_v18, 16  ;;  %v17186_v39 = vshrl.u32 %v13977_v18, 16  ;;  %17986 = vst [vmem:[#allocation220_spill] sm:$0xff] %v14089_v43 }
 0x32b   : > { %v17196_v5 = vshll.u32 %v13980_v14, 16  ;;  %v3820_v3 = vrot.slane %v3819_v24, 4  ;;  %v3698_v16 = vrot.slane %v17184_v56, 6  ;;  %v3706_v21 = vshrl.u32 %v13980_v14, 16 }
 0x32c   : > { %6818 = vrot.lane.b32.xlu1 %v8777_v59, %s9461_s4  ;;  %v3830_v50 = vor.u32 %v3829_v17, %v3828_v63  ;;  %v3697_v59 = vrot.slane %v17183_v15, 5  ;;  %v3825_v32 = vrot.slane %v3823_v31, 4  ;;  %v3702_v11 = vrot.slane %v17187_v29, 6  ;;  %v14100_v15 = vpop.permute.xlu0 %7272 }
 0x32d   : > { %6802 = vrot.lane.b32.xlu0 %v8769_v1, %s9461_s4  ;;  %v3701_v1 = vrot.slane %v17186_v39, 5  ;;  %v3824_v63 = vsel %vm10174_vm8, %v3820_v3, %v3823_v31  ;;  %v3709_v24 = vrot.slane %v17196_v5, 6  ;;  %17987 = vst [vmem:[#allocation221_spill] sm:$0xff] %v14100_v15  ;;  %v3708_v43 = vrot.slane %v3706_v21, 5 }
 0x32e   : > { %v3699_v17 = vor.u32 %v3698_v16, %v3697_v59  ;;  %v3831_v56 = vsel %vm10174_vm8, %v3825_v32, %v3830_v50  ;;  %v17194_v29 = vshrl.u32 %v14012_v46, 16  ;;  %v17188_v40 = vshll.u32 %v14012_v46, 16 }
 0x32f   : > { %v3703_v34 = vor.u32 %v3702_v11, %v3701_v1  ;;  %v8792_v39 = vcombine.low %v3824_v63, %v3831_v56  ;;  %v3710_v26 = vor.u32 %v3709_v24, %v3708_v43  ;;  %v17190_v3 = vshll.u32 %v14004_v37, 16 }
 0x330   : > { %v3700_v8 = vrot.slane %v3699_v17, 4  ;;  %v17189_v31 = vshrl.u32 %v14004_v37, 16  ;;  %v17191_v50 = vshll.u32 %v14019_v58, 16  ;;  %v3832_v56 = vrot.slane %v17194_v29, 5 }
 0x331   : > { %v3705_v28 = vrot.slane %v3703_v34, 4  ;;  %6896 = vrot.lane.b32.xlu1 %v8792_v39, %s9462_s5  ;;  %v3833_v16 = vrot.slane %v17188_v40, 6  ;;  %v3837_v39 = vrot.slane %v17190_v3, 6  ;;  %v17192_v63 = vshrl.u32 %v14022_v48, 16 }
 0x332   : > { %v3704_v59 = vsel %vm10174_vm8, %v3700_v8, %v3703_v34  ;;  %v14116_v32 = vpop.permute.xlu1 %7290  ;;  %v3836_v1 = vrot.slane %v17189_v31, 5  ;;  %v3841_v8 = vshrl.u32 %v14019_v58, 16  ;;  %v3844_v21 = vrot.slane %v17191_v50, 6 }
 0x333   : > { %17988 = vst [vmem:[#allocation222_spill] sm:$0xff] %v14116_v32  ;;  %v3711_v43 = vsel %vm10174_vm8, %v3705_v28, %v3710_v26  ;;  %v3834_v11 = vor.u32 %v3833_v16, %v3832_v56  ;;  %v17193_v26 = vshll.u32 %v14022_v48, 16  ;;  %v17195_v28 = vshll.u32 %v14029_v42, 16 }
 0x334   : > { %v8784_v34 = vcombine.low %v3704_v59, %v3711_v43  ;;  %v3838_v24 = vor.u32 %v3837_v39, %v3836_v1  ;;  %v3843_v40 = vrot.slane %v3841_v8, 5  ;;  %v17197_v3 = vshrl.u32 %v14029_v42, 16 }
 0x335   : > { %v3835_v31 = vrot.slane %v3834_v11, 4  ;;  %v17198_v59 = vshll.u32 %v14037_v6, 16  ;;  %v3712_v56 = vrot.slane %v17192_v63, 5  ;;  %v3713_v1 = vrot.slane %v17193_v26, 6 }
 0x336   : > { %6880 = vrot.lane.b32.xlu0 %v8784_v34, %s9462_s5  ;;  %v3840_v16 = vrot.slane %v3838_v24, 4  ;;  %v3845_v43 = vor.u32 %v3844_v21, %v3843_v40  ;;  %v3717_v39 = vrot.slane %v17195_v28, 6  ;;  %v3716_v34 = vrot.slane %v17197_v3, 5  ;;  %v14148_v63 = vpop.permute.xlu1 %7368 }
 0x337   : > { %v14128_v17 = vpop.permute.xlu0 %7274  ;;  %v3839_v8 = vsel %vm10174_vm8, %v3835_v31, %v3838_v24  ;;  %v3721_v11 = vshrl.u32 %v14037_v6, 16  ;;  %v3724_v50 = vrot.slane %v17198_v59, 6  ;;  %17990 = vst [vmem:[#allocation224_spill] sm:$0xff] %v14148_v63  ;;  %v3714_v21 = vor.u32 %v3713_v1, %v3712_v56 }
 0x338   : > { %17989 = vst [vmem:[#allocation223_spill] sm:$0xff] %v14128_v17  ;;  %v3846_v40 = vsel %vm10174_vm8, %v3840_v16, %v3845_v43  ;;  %v3718_v29 = vor.u32 %v3717_v39, %v3716_v34  ;;  %v8408_v5 = vrot.slane %v13961_v4, 10  ;;  %v3963_v3 = vrot.slane %v13964_v25, 6 }
 0x339   : > { %v8793_v26 = vcombine.low %v3839_v8, %v3846_v40  ;;  %v3723_v28 = vrot.slane %v3721_v11, 5  ;;  %v3715_v24 = vrot.slane %v3714_v21, 4  ;;  %v3966_v17 = vrot.slane %v13969_v35, 6 }
 0x33a   : > { %v8400_v59 = vrot.slane %v13972_v55, 10  ;;  %v3720_v63 = vrot.slane %v3718_v29, 4  ;;  %v3907_v56 = vrot.slane %v13977_v18, 6  ;;  %v3910_v16 = vrot.slane %v13980_v14, 6 }
 0x33b   : > { %v14153_v31 = vpop.permute.xlu0 %7352  ;;  %6898 = vrot.lane.b32.xlu1 %v8793_v26, %s9462_s5  ;;  %v3725_v32 = vor.u32 %v3724_v50, %v3723_v28  ;;  %v3719_v43 = vsel %vm10174_vm8, %v3715_v24, %v3718_v29  ;;  %v3964_v1 = vsel %vm10433_vm11, %v8408_v5, %v3963_v3  ;;  %v3965_v39 = vrot.slane %v3963_v3, 4  ;;  %v14169_v50 = vpop.permute.xlu1 %6812 }
 0x33c   : > { %17991 = vst [vmem:[#allocation225_spill] sm:$0xff] %v14153_v31  ;;  %v3908_v34 = vsel %vm10433_vm11, %v8400_v59, %v3907_v56  ;;  %v3909_v26 = vrot.slane %v3907_v56, 4  ;;  %17992 = vst [vmem:[#allocation226_spill] sm:$0xff] %v14169_v50  ;;  %v8409_v29 = vrot.slane %v14012_v46, 10  ;;  %v3970_v5 = vrot.slane %v14004_v37, 6 }
 0x33d   : > { %v3726_v8 = vsel %vm10174_vm8, %v3720_v63, %v3725_v32  ;;  %v3967_v11 = vsel %vm10433_vm11, %v3965_v39, %v3966_v17  ;;  %v3973_v63 = vrot.slane %v14019_v58, 6  ;;  %v8401_v59 = vrot.slane %v14022_v48, 10  ;;  %v14194_v39 = vld [vmem:[%s9559_s30 + $0x60] sm:$0xf] }
 0x33e   : > { %v8785_v28 = vcombine.low %v3719_v43, %v3726_v8  ;;  %v8808_v3 = vcombine.low %v3964_v1, %v3967_v11  ;;  %v3911_v32 = vsel %vm10433_vm11, %v3909_v26, %v3910_v16  ;;  %v3971_v21 = vsel %vm10433_vm11, %v8409_v29, %v3970_v5  ;;  %v14186_v43 = vld [vmem:[%s9559_s30 + $0xc0] sm:$0xf]  ;;  %v14189_v16 = vld [vmem:[%s9559_s30 + $0xc4] sm:$0xf]  ;;  %v14204_v29 = vld [vmem:[%s9559_s30 + $0xc8] sm:$0x3] }
 0x33f   : > { %v14179_v40 = vpop.permute.xlu0 %6796  ;;  %v8800_v17 = vcombine.low %v3908_v34, %v3911_v32  ;;  %v3972_v24 = vrot.slane %v3970_v5, 4  ;;  %v3914_v56 = vrot.slane %v14029_v42, 6  ;;  %v3917_v1 = vrot.slane %v14037_v6, 6  ;;  %v14197_v8 = vld [vmem:[%s9559_s30 + $0x64] sm:$0xf]  ;;  %v14206_v5 = vpop.permute.xlu1 %7370 }
 0x340   : > { %17993 = vst [vmem:[#allocation227_spill] sm:$0xff] %v14179_v40  ;;  %6882 = vrot.lane.b32.xlu0 %v8785_v28, %s9462_s5  ;;  %6976 = vrot.lane.b32.xlu1 %v8808_v3, %s9463_s6  ;;  %17994 = vst [vmem:[#allocation228_spill] sm:$0xff] %v14206_v5  ;;  %v8824_v32 = vcombine.low %v14186_v43, %v14189_v16  ;;  %v14233_v42 = vld [vmem:[%s9559_s30 + $0x68] sm:$0x3]  ;;  %v17996_v37 = vshll.u32 %v14189_v16, 16  ;;  %v17221_v6 = vshll.u32 %v14197_v8, 16 }
 0x341   : > { %v3974_v34 = vsel %vm10433_vm11, %v3972_v24, %v3973_v63  ;;  %v3915_v26 = vsel %vm10433_vm11, %v8401_v59, %v3914_v56  ;;  %v3916_v28 = vrot.slane %v3914_v56, 4  ;;  %v8816_v63 = vcombine.low %v14194_v39, %v14197_v8  ;;  %v14216_v59 = vld [vmem:[%s9559_s30 + $0xcc] sm:$0xf] }
 0x342   : > { %v8809_v11 = vcombine.low %v3971_v21, %v3974_v34  ;;  %v14219_v21 = vld [vmem:[%s9559_s30 + $0xd0] sm:$0xf]  ;;  %v14223_v56 = vld [vmem:[%s9559_s30 + $0x6c] sm:$0xf]  ;;  %v4341_v46 = vrot.slane %v17996_v37, 5  ;;  %v17998_v14 = vshrl.u32 %v14194_v39, 16 }
 0x343   : > { %v3918_v3 = vsel %vm10433_vm11, %v3916_v28, %v3917_v1  ;;  %v17215_v1 = vshll.u32 %v14186_v43, 16  ;;  %v14228_v28 = vpop.permute.xlu0 %7354  ;;  %v8825_v58 = vcombine.low %v14216_v59, %v14219_v21  ;;  %v4149_v37 = vrot.slane %v17221_v6, 5  ;;  %v14261_v25 = vpop.permute.xlu1 %6814 }
 0x344   : > { %6960 = vrot.lane.b32.xlu0 %v8800_v17, %s9463_s6  ;;  %6978 = vrot.lane.b32.xlu1 %v8809_v11, %s9463_s6  ;;  %v8801_v24 = vcombine.low %v3915_v26, %v3918_v3  ;;  %v17212_v17 = vshrl.u32 %v14186_v43, 16  ;;  %17995 = vst [vmem:[#allocation229_spill] sm:$0xff] %v14228_v28  ;;  %v14238_v11 = vld [vmem:[%s9559_s30 + $0x70] sm:$0xf]  ;;  %v17997_v26 = vshrl.u32 %v14189_v16, 16  ;;  %v4140_v18 = vrot.slane %v17998_v14, 4 }
 0x345   : > { %v4335_v34 = vrot.slane %v17215_v1, 5  ;;  %v17222_v35 = vshll.u32 %v14233_v42, 16  ;;  %18000 = vst [vmem:[#allocation230_spill] sm:$0xff] %v14261_v25  ;;  %v18001_v4 = vshll.u32 %v14204_v29, 16  ;;  %v17224_v6 = vshrl.u32 %v14216_v59, 16 }
 0x346   : > { %v4332_v3 = vrot.slane %v17212_v17, 4  ;;  %v4345_v48 = vrot.slane %v17997_v26, 4  ;;  %v17999_v17 = vshll.u32 %v14194_v39, 16  ;;  %v8817_v26 = vcombine.low %v14223_v56, %v14238_v11 }
 0x347   : > { %v14272_v5 = vpop.permute.xlu0 %6798  ;;  %v18037_v31 = vshll.u32 %v14219_v21, 16 }
 0x348   : > { %6962 = vrot.lane.b32.xlu0 %v8801_v24, %s9463_s6  ;;  %v4143_v55 = vrot.slane %v17999_v17, 5  ;;  %7056 = vrot.lane.b32.xlu1 %v8824_v32, %s9464_s7  ;;  %v4336_v1 = vor.u32 %v4335_v34, %v4332_v3  ;;  %v17223_v24 = vshrl.u32 %v14197_v8, 16  ;;  %v4346_v14 = vor.u32 %v4345_v48, %v4341_v46  ;;  %18002 = vst [vmem:[#allocation231_spill] sm:$0xff] %v14272_v5  ;;  %v14276_v48 = vld [vmem:[%s9559_s30 + $0xd4] sm:$0x3] }
 0x349   : > { %v4351_v17 = vrot.slane %v18001_v4, 5  ;;  %v4159_v3 = vrot.slane %v17222_v35, 5  ;;  %v17227_v4 = vshll.u32 %v14216_v59, 16  ;;  %v4356_v35 = vrot.slane %v17224_v6, 4 }
 0x34a   : > { %v4144_v28 = vor.u32 %v4143_v55, %v4140_v18  ;;  %v4337_v32 = vrot.slane %v4336_v1, 4  ;;  %v4153_v34 = vrot.slane %v17223_v24, 4  ;;  %v4347_v25 = vrot.slane %v4346_v14, 4 }
 0x34b   : > { %v17225_v55 = vshll.u32 %v14219_v21, 16  ;;  %v4359_v24 = vrot.slane %v17227_v4, 5 }
 0x34c   : > { %7040 = vrot.lane.b32.xlu0 %v8816_v63, %s9464_s7  ;;  %v4145_v40 = vrot.slane %v4144_v28, 4  ;;  %7058 = vrot.lane.b32.xlu1 %v8825_v58, %s9464_s7  ;;  %v4342_v18 = vsel %vm9604_vm2, %v4337_v32, %v4341_v46  ;;  %v4154_v1 = vor.u32 %v4153_v34, %v4149_v37  ;;  %v17226_v63 = vshrl.u32 %v14219_v21, 16  ;;  %v14297_v6 = vpop.permute.xlu1 %6892 }
 0x34d   : > { %v4352_v28 = vsel %vm9604_vm2, %v4347_v25, %v4351_v17  ;;  %v4365_v58 = vrot.slane %v17225_v55, 5  ;;  %v17231_v34 = vshll.u32 %v14276_v48, 16  ;;  %18003 = vst [vmem:[#allocation232_spill] sm:$0xff] %v14297_v6  ;;  %v4360_v25 = vor.u32 %v4359_v24, %v4356_v35  ;;  %v14301_v17 = vld [vmem:[%s9559_s30 + $0x74] sm:$0x3] }
 0x34e   : > { %v4150_v14 = vsel %vm9604_vm2, %v4145_v40, %v4149_v37  ;;  %v8840_v5 = vcombine.low %v4342_v18, %v4352_v28  ;;  %v4155_v46 = vrot.slane %v4154_v1, 4  ;;  %v4369_v32 = vrot.slane %v17226_v63, 4 }
 0x34f   : > { %v17228_v40 = vshrl.u32 %v14223_v56, 16  ;;  %v17229_v37 = vshll.u32 %v14223_v56, 16  ;;  %v4375_v28 = vrot.slane %v17231_v34, 5  ;;  %v14312_v35 = vpop.permute.xlu0 %6876  ;;  %v4361_v63 = vrot.slane %v4360_v25, 4 }
 0x350   : > { %7042 = vrot.lane.b32.xlu0 %v8817_v26, %s9464_s7  ;;  %7136 = vrot.lane.b32.xlu1 %v8840_v5, %s9465_s8  ;;  %v4160_v18 = vsel %vm9604_vm2, %v4155_v46, %v4159_v3  ;;  %v4370_v1 = vor.u32 %v4369_v32, %v4365_v58  ;;  %v17230_v26 = vshrl.u32 %v14238_v11, 16  ;;  %18004 = vst [vmem:[#allocation233_spill] sm:$0xff] %v14312_v35  ;;  %v18005_v6 = vshll.u32 %v14238_v11, 16 }
 0x351   : > { %v8832_v24 = vcombine.low %v4150_v14, %v4160_v18  ;;  %v4164_v4 = vrot.slane %v17228_v40, 4  ;;  %v4167_v55 = vrot.slane %v17229_v37, 5  ;;  %v17232_v32 = vshll.u32 %v14301_v17, 16 }
 0x352   : > { %v4371_v5 = vrot.slane %v4370_v1, 4  ;;  %v4173_v3 = vrot.slane %v18005_v6, 5  ;;  %v4177_v46 = vrot.slane %v17230_v26, 4  ;;  %v4366_v14 = vsel %vm9604_vm2, %v4361_v63, %v4365_v58 }
 0x353   : > { %v4168_v25 = vor.u32 %v4167_v55, %v4164_v4  ;;  %v4183_v1 = vrot.slane %v17232_v32, 5  ;;  %v8472_v6 = vrot.slane %v14186_v43, 9  ;;  %v4559_v35 = vrot.slane %v14189_v16, 5 }
 0x354   : > { %7120 = vrot.lane.b32.xlu0 %v8832_v24, %s9465_s8  ;;  %v4376_v18 = vsel %vm9604_vm2, %v4371_v5, %v4375_v28  ;;  %v4178_v40 = vor.u32 %v4177_v46, %v4173_v3  ;;  %v14331_v37 = vpop.permute.xlu1 %6894  ;;  %v4562_v24 = vrot.slane %v14204_v29, 5  ;;  %v8464_v4 = vrot.slane %v14194_v39, 9 }
 0x355   : > { %18006 = vst [vmem:[#allocation234_spill] sm:$0xff] %v14331_v37  ;;  %v8841_v26 = vcombine.low %v4366_v14, %v4376_v18  ;;  %v4169_v34 = vrot.slane %v4168_v25, 4  ;;  %v4503_v55 = vrot.slane %v14197_v8, 5  ;;  %v4506_v63 = vrot.slane %v14233_v42, 5 }
 0x356   : > { %v4179_v50 = vrot.slane %v4178_v40, 4  ;;  %v18008_v28 = vshrl.u32 %v12874_v9, 16  ;;  %v4560_v14 = vsel %vm10020_vm5, %v8472_v6, %v4559_v35  ;;  %v4561_v40 = vrot.slane %v4559_v35, 4 }
 0x357   : > { %7138 = vrot.lane.b32.xlu1 %v8841_v26, %s9465_s8  ;;  %v4174_v46 = vsel %vm9604_vm2, %v4169_v34, %v4173_v3  ;;  %v18009_v25 = vshll.u32 %v12874_v9, 16  ;;  %v4505_v37 = vrot.slane %v4503_v55, 4  ;;  %v8473_v34 = vrot.slane %v14216_v59, 9 }
 0x358   : > { %v3288_v5 = vrot.slane %v18008_v28, 4  ;;  %v4184_v32 = vsel %vm9604_vm2, %v4179_v50, %v4183_v1  ;;  %v4563_v26 = vsel %vm10020_vm5, %v4561_v40, %v4562_v24  ;;  %v4566_v3 = vrot.slane %v14219_v21, 5 }
 0x359   : > { %v14338_v58 = vpop.permute.xlu0 %6878  ;;  %v3291_v18 = vrot.slane %v18009_v25, 5  ;;  %v8833_v28 = vcombine.low %v4174_v46, %v4184_v32  ;;  %v8856_v6 = vcombine.low %v4560_v14, %v4563_v26  ;;  %v4507_v9 = vsel %vm10020_vm5, %v4505_v37, %v4506_v63 }
 0x35a   : > { %18007 = vst [vmem:[#allocation235_spill] sm:$0xff] %v14338_v58  ;;  %v4504_v58 = vsel %vm10020_vm5, %v8464_v4, %v4503_v55  ;;  %v4569_v35 = vrot.slane %v14276_v48, 5  ;;  %v8465_v50 = vrot.slane %v14223_v56, 9  ;;  %v14361_v1 = vpop.permute.xlu1 %6972  ;;  %v4567_v24 = vsel %vm10020_vm5, %v8473_v34, %v4566_v3 }
 0x35b   : > { %18010 = vst [vmem:[#allocation236_spill] sm:$0xff] %v14361_v1  ;;  %7122 = vrot.lane.b32.xlu0 %v8833_v28, %s9465_s8  ;;  %v8848_v32 = vcombine.low %v4504_v58, %v4507_v9  ;;  %v4568_v4 = vrot.slane %v4566_v3, 4  ;;  %v4510_v55 = vrot.slane %v14238_v11, 5  ;;  %v18011_v46 = vshll.u32 %v12880_v10, 16  ;;  %7216 = vrot.lane.b32.xlu1 %v8856_v6, %s9466_s9 }
 0x35c   : > { %v18012_v37 = vshrl.u32 %v12880_v10, 16  ;;  %v18013_v40 = vshrl.u32 %v12896_v49, 16  ;;  %v4513_v58 = vrot.slane %v14301_v17, 5  ;;  %v18015_v26 = vshll.u32 %v12896_v49, 16 }
 0x35d   : > { %v14369_v14 = vrot.slane %v18011_v46, 5  ;;  %v14377_v28 = vpop.permute.xlu0 %6956  ;;  %v4570_v3 = vsel %vm10020_vm5, %v4568_v4, %v4569_v35  ;;  %v4511_v9 = vsel %vm10020_vm5, %v8465_v50, %v4510_v55  ;;  %v4512_v10 = vrot.slane %v4510_v55, 4 }
 0x35e   : > { %v3301_v63 = vrot.slane %v18012_v37, 4  ;;  %v3096_v25 = vrot.slane %v18013_v40, 4  ;;  %18014 = vst [vmem:[#allocation237_spill] sm:$0xff] %v14377_v28  ;;  %v3099_v34 = vrot.slane %v18015_v26, 5  ;;  %v8857_v46 = vcombine.low %v4567_v24, %v4570_v3  ;;  %v14396_v4 = vpop.permute.xlu1 %6974 }
 0x35f   : > { %v3292_v37 = vor.u32 %v3291_v18, %v3288_v5  ;;  %7200 = vrot.lane.b32.xlu0 %v8848_v32, %s9466_s9  ;;  %v4514_v6 = vsel %vm10020_vm5, %v4512_v10, %v4513_v58  ;;  %v18016_v28 = vshll.u32 %v12883_v2, 16  ;;  %v18017_v26 = vshrl.u32 %v12883_v2, 16  ;;  %18018 = vst [vmem:[#allocation238_spill] sm:$0xff] %v14396_v4 }
 0x360   : > { %v3302_v40 = vor.u32 %v3301_v63, %v14369_v14  ;;  %7218 = vrot.lane.b32.xlu1 %v8857_v46, %s9466_s9  ;;  %v8849_v50 = vcombine.low %v4511_v9, %v4514_v6  ;;  %v3100_v5 = vor.u32 %v3099_v34, %v3096_v25  ;;  %v18019_v18 = vshrl.u32 %v14186_v43, 16 }
 0x361   : > { %v14391_v49 = vrot.slane %v18016_v28, 5  ;;  %v3109_v35 = vrot.slane %v18017_v26, 4  ;;  %v18020_v24 = vshll.u32 %v14186_v43, 16  ;;  %v18021_v63 = vshrl.u32 %v14189_v16, 16  ;;  %v14406_v2 = vpop.permute.xlu0 %6958 }
 0x362   : > { %v4765_v32 = vrot.slane %v18019_v18, 5  ;;  %v18022_v28 = vshll.u32 %v14189_v16, 16  ;;  %18023 = vst [vmem:[#allocation239_spill] sm:$0xff] %v14406_v2  ;;  %v14408_v10 = vrot.slane %v3292_v37, 4  ;;  %v18024_v9 = vshll.u32 %v12893_v51, 16 }
 0x363   : > { %v4766_v55 = vrot.slane %v18020_v24, 6  ;;  %v4769_v58 = vrot.slane %v18021_v63, 5  ;;  %7202 = vrot.lane.b32.xlu0 %v8849_v50, %s9466_s9  ;;  %v4774_v34 = vshrl.u32 %v14204_v29, 16  ;;  %v14416_v6 = vrot.slane %v3302_v40, 4 }
 0x364   : > { %v4770_v3 = vrot.slane %v18022_v28, 6  ;;  %v14412_v46 = vrot.slane %v18024_v9, 5  ;;  %v3110_v26 = vor.u32 %v3109_v35, %v14391_v49  ;;  %v18025_v24 = vshll.u32 %v14204_v29, 16  ;;  %v14431_v35 = vpop.permute.xlu1 %7052 }
 0x365   : > { %v4767_v25 = vor.u32 %v4766_v55, %v4765_v32  ;;  %v14421_v28 = vrot.slane %v3100_v5, 4  ;;  %v4776_v2 = vrot.slane %v4774_v34, 5  ;;  %v18026_v51 = vshrl.u32 %v14194_v39, 16  ;;  %18029 = vst [vmem:[#allocation240_spill] sm:$0xff] %v14431_v35  ;;  %v14446_v1 = vpop.permute.xlu0 %7036 }
 0x366   : > { %v4771_v18 = vor.u32 %v4770_v3, %v4769_v58  ;;  %v4777_v63 = vrot.slane %v18025_v24, 6  ;;  %v18027_v50 = vshll.u32 %v12902_v45, 16  ;;  %v18028_v40 = vshll.u32 %v14194_v39, 16  ;;  %18033 = vst [vmem:[#allocation241_spill] sm:$0xff] %v14446_v1 }
 0x367   : > { %v4768_v37 = vrot.slane %v4767_v25, 4  ;;  %v4645_v9 = vrot.slane %v18026_v51, 5  ;;  %v3298_v5 = vsel %vm9604_vm2, %v14408_v10, %v14369_v14  ;;  %v18030_v25 = vshrl.u32 %v14197_v8, 16 }
 0x368   : > { %v14427_v32 = vrot.slane %v18027_v50, 5  ;;  %v4773_v55 = vrot.slane %v4771_v18, 4  ;;  %v4646_v4 = vrot.slane %v18028_v40, 6  ;;  %v4778_v3 = vor.u32 %v4777_v63, %v4776_v2 }
 0x369   : > { %v4772_v58 = vsel %vm10174_vm8, %v4768_v37, %v4771_v18  ;;  %v4649_v45 = vrot.slane %v18030_v25, 5  ;;  %v18031_v24 = vshll.u32 %v14197_v8, 16  ;;  %v4654_v50 = vshrl.u32 %v14233_v42, 16 }
 0x36a   : > { %v4647_v34 = vor.u32 %v4646_v4, %v4645_v9  ;;  %v18032_v40 = vshll.u32 %v14233_v42, 16  ;;  %v3308_v14 = vsel %vm9604_vm2, %v14416_v6, %v14412_v46  ;;  %v3106_v4 = vsel %vm9604_vm2, %v14421_v28, %v14391_v49 }
 0x36b   : > { %v4650_v51 = vrot.slane %v18031_v24, 6  ;;  %v3111_v2 = vrot.slane %v3110_v26, 4  ;;  %v4779_v10 = vsel %vm10174_vm8, %v4773_v55, %v4778_v3  ;;  %v4656_v9 = vrot.slane %v4654_v50, 5  ;;  %v14470_v3 = vpop.permute.xlu1 %7054 }
 0x36c   : > { %v4657_v35 = vrot.slane %v18032_v40, 6  ;;  %v8872_v18 = vcombine.low %v4772_v58, %v4779_v10  ;;  %v4648_v63 = vrot.slane %v4647_v34, 4  ;;  %v18034_v25 = vshrl.u32 %v14216_v59, 16  ;;  %18038 = vst [vmem:[#allocation242_spill] sm:$0xff] %v14470_v3 }
 0x36d   : > { %v4651_v37 = vor.u32 %v4650_v51, %v4649_v45  ;;  %v18035_v40 = vshll.u32 %v14216_v59, 16  ;;  %v18036_v46 = vshrl.u32 %v14219_v21, 16  ;;  %v4785_v49 = vrot.slane %v18037_v31, 6 }
 0x36e   : > { %v4780_v24 = vrot.slane %v18034_v25, 5  ;;  %7296 = vrot.lane.b32.xlu1 %v8872_v18, %s9467_s10  ;;  %v4658_v55 = vor.u32 %v4657_v35, %v4656_v9  ;;  %v4789_v58 = vshrl.u32 %v14276_v48, 16  ;;  %v18039_v51 = vshll.u32 %v14276_v48, 16 }
 0x36f   : > { %v4781_v1 = vrot.slane %v18035_v40, 6  ;;  %v4784_v6 = vrot.slane %v18036_v46, 5  ;;  %v4652_v26 = vsel %vm10174_vm8, %v4648_v63, %v4651_v37  ;;  %v4653_v28 = vrot.slane %v4651_v37, 4  ;;  %v14482_v40 = vpop.permute.xlu0 %7038 }
 0x370   : > { %v4792_v50 = vrot.slane %v18039_v51, 6  ;;  %v18040_v10 = vshrl.u32 %v14223_v56, 16  ;;  %v4791_v18 = vrot.slane %v4789_v58, 5  ;;  %v18041_v63 = vshll.u32 %v14223_v56, 16 }
 0x371   : > { %v4782_v45 = vor.u32 %v4781_v1, %v4780_v24  ;;  %v4786_v34 = vor.u32 %v4785_v49, %v4784_v6  ;;  %v4659_v31 = vsel %vm10174_vm8, %v4653_v28, %v4658_v55  ;;  %v18042_v35 = vshrl.u32 %v14238_v11, 16 }
 0x372   : > { %v4660_v25 = vrot.slane %v18040_v10, 5  ;;  %v4661_v37 = vrot.slane %v18041_v63, 6  ;;  %v8864_v1 = vcombine.low %v4652_v26, %v4659_v31  ;;  %v18043_v6 = vshll.u32 %v14238_v11, 16 }
 0x373   : > { %v4664_v9 = vrot.slane %v18042_v35, 5  ;;  %v4783_v24 = vrot.slane %v4782_v45, 4  ;;  %v4788_v46 = vrot.slane %v4786_v34, 4  ;;  %v4793_v51 = vor.u32 %v4792_v50, %v4791_v18 }
 0x374   : > { %v4665_v49 = vrot.slane %v18043_v6, 6  ;;  %v4662_v10 = vor.u32 %v4661_v37, %v4660_v25  ;;  %v4669_v3 = vshrl.u32 %v14301_v17, 16  ;;  %v18044_v28 = vshll.u32 %v14301_v17, 16  ;;  %7280 = vrot.lane.b32.xlu0 %v8864_v1, %s9467_s10  ;;  %v14501_v37 = vpop.permute.xlu1 %7132 }
 0x375   : > { %v18045_v58 = vshrl.u32 %v12916_v44, 16  ;;  %v18046_v35 = vshll.u32 %v12916_v44, 16  ;;  %v4787_v26 = vsel %vm10174_vm8, %v4783_v24, %v4786_v34  ;;  %v3116_v50 = vsel %vm9604_vm2, %v3111_v2, %v14427_v32  ;;  %v14505_v34 = vpop.permute.xlu0 %7116 }
 0x376   : > { %v4672_v55 = vrot.slane %v18044_v28, 6  ;;  %v4666_v45 = vor.u32 %v4665_v49, %v4664_v9  ;;  %v4794_v25 = vsel %vm10174_vm8, %v4788_v46, %v4793_v51  ;;  %v4663_v31 = vrot.slane %v4662_v10, 4 }
 0x377   : > { %v3312_v63 = vrot.slane %v18045_v58, 4  ;;  %v3315_v15 = vrot.slane %v18046_v35, 5  ;;  %v4671_v18 = vrot.slane %v4669_v3, 5  ;;  %v8873_v6 = vcombine.low %v4787_v26, %v4794_v25  ;;  %v14550_v25 = vld [vmem:[%s9559_s30 + $0x70] sm:$0xf] }
 0x378   : > { %v4668_v44 = vrot.slane %v4666_v45, 4  ;;  %v8756_v28 = vcombine.low %v3298_v5, %v3308_v14  ;;  %v4667_v1 = vsel %vm10174_vm8, %v4663_v31, %v4666_v45  ;;  %v8748_v9 = vcombine.low %v3106_v4, %v3116_v50  ;;  %v14524_v10 = vpop.permute.xlu1 %7134  ;;  %v14547_v50 = vld [vmem:[%s9559_s30 + $0xcc] sm:$0xf]  ;;  %18053 = vst [vmem:[#allocation245_spill] sm:$0xff] %v14550_v25 }
 0x379   : > { %v4673_v58 = vor.u32 %v4672_v55, %v4671_v18  ;;  %v3316_v24 = vor.u32 %v3315_v15, %v3312_v63  ;;  %7298 = vrot.lane.b32.xlu1 %v8873_v6, %s9467_s10  ;;  %v8488_v2 = vrot.slane %v14186_v43, 10  ;;  %v18047_v3 = vshll.u32 %v12908_v47, 16  ;;  %v14536_v63 = vld [vmem:[%s9559_s30 + $0xd0] sm:$0xf]  ;;  %18052 = vst [vmem:[#allocation244_spill] sm:$0xff] %v14547_v50 }
 0x37a   : > { %v18048_v5 = vshrl.u32 %v12908_v47, 16  ;;  %v14519_v15 = vsel %vm6185_vm12, %v8756_v28, %v13746_v38  ;;  %v4911_v4 = vrot.slane %v14189_v16, 6  ;;  %v4914_v51 = vrot.slane %v14204_v29, 6  ;;  %18049 = vst [vmem:[#allocation243_spill] sm:$0xff] %v14536_v63  ;;  %v14563_v28 = vld [vmem:[%s9559_s30 + $0x6c] sm:$0xf] }
 0x37b   : > { %v4674_v32 = vsel %vm10174_vm8, %v4668_v44, %v4673_v58  ;;  %v14513_v46 = vrot.slane %v18047_v3, 5  ;;  %v8480_v43 = vrot.slane %v14194_v39, 10  ;;  %v14528_v55 = vsel %vm6185_vm12, %v8748_v9, %v13759_v62  ;;  %v14560_v44 = vld [vmem:[%s9559_s30 + $0xd4] sm:$0x3]  ;;  %18056 = vst [vmem:[#allocation247_spill] sm:$0xff] %v14563_v28 }
 0x37c   : > { %v3325_v14 = vrot.slane %v18048_v5, 4  ;;  %v8865_v49 = vcombine.low %v4667_v1, %v4674_v32  ;;  %v14530_v47 = vrot.slane %v3316_v24, 4  ;;  %v4855_v38 = vrot.slane %v14197_v8, 6  ;;  %v14552_v8 = vpop.permute.xlu0 %7118  ;;  %18055 = vst [vmem:[#allocation246_spill] sm:$0xff] %v14560_v44  ;;  %v14580_v3 = vld [vmem:[%s9559_s30 + $0x74] sm:$0x3] }
 0x37d   : > { %v4858_v16 = vrot.slane %v14233_v42, 6  ;;  %v18050_v39 = vshll.u32 %v12927_v20, 16  ;;  %v18051_v35 = vshrl.u32 %v12938_v7, 16  ;;  %v4912_v26 = vsel %vm10433_vm11, %v8488_v2, %v4911_v4  ;;  %18060 = vst [vmem:[#allocation248_spill] sm:$0xff] %v14580_v3 }
 0x37e   : > { %7282 = vrot.lane.b32.xlu0 %v8865_v49, %s9467_s10  ;;  %v4913_v45 = vrot.slane %v4911_v4, 4  ;;  %v3326_v42 = vor.u32 %v3325_v14, %v14513_v46  ;;  %v18054_v20 = vshll.u32 %v12938_v7, 16  ;;  %v4856_v18 = vsel %vm10433_vm11, %v8480_v43, %v4855_v38 }
 0x37f   : > { %v14540_v29 = vrot.slane %v18050_v39, 5  ;;  %v3120_v62 = vrot.slane %v18051_v35, 4  ;;  %v4857_v6 = vrot.slane %v4855_v38, 4  ;;  %v18057_v1 = vshll.u32 %v12930_v12, 16  ;;  %v14592_v38 = vpop.permute.xlu1 %7212 }
 0x380   : > { %v3123_v31 = vrot.slane %v18054_v20, 5  ;;  %v18058_v9 = vshrl.u32 %v12930_v12, 16  ;;  %v18059_v32 = vshll.u32 %v12941_v13, 16  ;;  %v4915_v2 = vsel %vm10433_vm11, %v4913_v45, %v4914_v51 }
 0x381   : > { %v14567_v58 = vrot.slane %v18057_v1, 5  ;;  %v3322_v5 = vsel %vm9604_vm2, %v14530_v47, %v14513_v46  ;;  %v8888_v14 = vcombine.low %v4912_v26, %v4915_v2  ;;  %v4859_v12 = vsel %vm10433_vm11, %v4857_v6, %v4858_v16  ;;  %v14610_v1 = vld [vmem:[%s9559_s30 + $0xdc] sm:$0xf]  ;;  %v14618_v2 = vld [vmem:[%s9559_s30 + $0xd8] sm:$0xf] }
 0x382   : > { %v14571_v24 = vrot.slane %v18058_v9, 4  ;;  %v14575_v7 = vrot.slane %v18059_v32, 5  ;;  %v8394_v49 = vrot.slane %v14547_v50, 9  ;;  %v8880_v4 = vcombine.low %v4856_v18, %v4859_v12  ;;  %18061 = vst [vmem:[#allocation249_spill] sm:$0xff] %v14610_v1  ;;  %18062 = vst [vmem:[#allocation250_spill] sm:$0xff] %v14618_v2 }
 0x383   : > { %v3625_v13 = vrot.slane %v14536_v63, 5  ;;  %v3628_v43 = vrot.slane %v14560_v44, 5  ;;  %v8386_v51 = vrot.slane %v14563_v28, 9  ;;  %v3327_v39 = vrot.slane %v3326_v42, 4  ;;  %7376 = vrot.lane.b32.xlu1 %v8888_v14, %s9468_s11 }
 0x384   : > { %v3124_v35 = vor.u32 %v3123_v31, %v3120_v62  ;;  %v3569_v46 = vrot.slane %v14550_v25, 5  ;;  %v3572_v47 = vrot.slane %v14580_v3, 5  ;;  %v3134_v16 = vor.u32 %v14571_v24, %v14567_v58  ;;  %7360 = vrot.lane.b32.xlu0 %v8880_v4, %s9468_s11  ;;  %v14603_v62 = vpop.permute.xlu0 %7196  ;;  %v14628_v4 = vld [vmem:[%s9559_s30 + $0x78] sm:$0xf] }
 0x385   : > { %v3626_v26 = vsel %vm10020_vm5, %v8394_v49, %v3625_v13  ;;  %v3627_v45 = vrot.slane %v3625_v13, 4  ;;  %v8489_v20 = vrot.slane %v14216_v59, 10  ;;  %v4918_v18 = vrot.slane %v14219_v21, 6  ;;  %v14625_v49 = vld [vmem:[%s9559_s30 + $0xe0] sm:$0x3]  ;;  %18064 = vst [vmem:[#allocation252_spill] sm:$0xff] %v14628_v4 }
 0x386   : > { %v3570_v42 = vsel %vm10020_vm5, %v8386_v51, %v3569_v46  ;;  %v3571_v31 = vrot.slane %v3569_v46, 4  ;;  %v4921_v6 = vrot.slane %v14276_v48, 6  ;;  %v8481_v59 = vrot.slane %v14223_v56, 10  ;;  %18063 = vst [vmem:[#allocation251_spill] sm:$0xff] %v14625_v49  ;;  %v14638_v51 = vpop.permute.xlu1 %7214 }
 0x387   : > { %v3629_v9 = vsel %vm10020_vm5, %v3627_v45, %v3628_v43  ;;  %v4862_v24 = vrot.slane %v14238_v11, 6  ;;  %v4865_v32 = vrot.slane %v14301_v17, 6  ;;  %v4919_v48 = vsel %vm10433_vm11, %v8489_v20, %v4918_v18  ;;  %v14636_v43 = vld [vmem:[%s9559_s30 + $0x7c] sm:$0xf] }
 0x388   : > { %v8778_v14 = vcombine.low %v3626_v26, %v3629_v9  ;;  %v3573_v21 = vsel %vm10020_vm5, %v3571_v31, %v3572_v47  ;;  %v4920_v12 = vrot.slane %v4918_v18, 4  ;;  %v3332_v56 = vsel %vm9604_vm2, %v3327_v39, %v14540_v29  ;;  %18065 = vst [vmem:[#allocation253_spill] sm:$0xff] %v14636_v43  ;;  %v14648_v39 = vld [vmem:[%s9559_s30 + $0x80] sm:$0x3]  ;;  %v14655_v31 = vpop.permute.xlu0 %7198 }
 0x389   : > { %v8770_v11 = vcombine.low %v3570_v42, %v3573_v21  ;;  %v4863_v17 = vsel %vm10433_vm11, %v8481_v59, %v4862_v24  ;;  %v4864_v13 = vrot.slane %v4862_v24, 4  ;;  %v14640_v46 = vrot.slane %v3124_v35, 4  ;;  %18066 = vst [vmem:[#allocation254_spill] sm:$0xff] %v14648_v39 }
 0x38a   : > { %6820 = vrot.lane.b32.xlu1 %v8778_v14, %s9461_s4  ;;  %v4922_v47 = vsel %vm10433_vm11, %v4920_v12, %v4921_v6  ;;  %v8395_v26 = vrot.slane %v14618_v2, 9  ;;  %v3632_v29 = vrot.slane %v14610_v1, 5  ;;  %v3635_v35 = vrot.slane %v14625_v49, 5 }
 0x38b   : > { %6804 = vrot.lane.b32.xlu0 %v8770_v11, %s9461_s4  ;;  %v8889_v45 = vcombine.low %v4919_v48, %v4922_v47  ;;  %v4866_v20 = vsel %vm10433_vm11, %v4864_v13, %v4865_v32  ;;  %v8387_v42 = vrot.slane %v14628_v4, 9  ;;  %v3576_v59 = vrot.slane %v14636_v43, 5  ;;  %v14676_v47 = vpop.permute.xlu1 %7292 }
 0x38c   : > { %v8881_v18 = vcombine.low %v4863_v17, %v4866_v20  ;;  %v3633_v6 = vsel %vm10020_vm5, %v8395_v26, %v3632_v29  ;;  %v3634_v9 = vrot.slane %v3632_v29, 4  ;;  %v14660_v24 = vcombine.low %v3322_v5, %v3332_v56 }
 0x38d   : > { %v14662_v14 = vrot.slane %v3134_v16, 4  ;;  %v3579_v21 = vrot.slane %v14648_v39, 5  ;;  %v17241_v32 = vshrl.u32 %v14547_v50, 16  ;;  %v3577_v12 = vsel %vm10020_vm5, %v8387_v42, %v3576_v59 }
 0x38e   : > { %7378 = vrot.lane.b32.xlu1 %v8889_v45, %s9468_s11  ;;  %v3636_v48 = vsel %vm10020_vm5, %v3634_v9, %v3635_v35  ;;  %v3578_v11 = vrot.slane %v3576_v59, 4  ;;  %v17236_v17 = vshll.u32 %v14547_v50, 16  ;;  %v17234_v16 = vshll.u32 %v14536_v63, 16  ;;  %v14691_v9 = vpop.permute.xlu0 %7276 }
 0x38f   : > { %7362 = vrot.lane.b32.xlu0 %v8881_v18, %s9468_s11  ;;  %v8779_v5 = vcombine.low %v3633_v6, %v3636_v48  ;;  %v17233_v56 = vshrl.u32 %v14536_v63, 16  ;;  %v17235_v13 = vshll.u32 %v14560_v44, 16  ;;  %v3847_v29 = vrot.slane %v17241_v32, 5  ;;  %18067 = vst [vmem:[#allocation255_spill] sm:$0xff] %v14691_v9 }
 0x390   : > { %v3580_v26 = vsel %vm10020_vm5, %v3578_v11, %v3579_v21  ;;  %v3848_v45 = vrot.slane %v17236_v17, 6  ;;  %v3856_v20 = vshrl.u32 %v14560_v44, 16  ;;  %v3852_v18 = vrot.slane %v17234_v16, 6 }
 0x391   : > { %v8771_v35 = vcombine.low %v3577_v12, %v3580_v26  ;;  %v3851_v42 = vrot.slane %v17233_v56, 5  ;;  %v3859_v6 = vrot.slane %v17235_v13, 6  ;;  %v17240_v48 = vshrl.u32 %v14563_v28, 16 }
 0x392   : > { %6822 = vrot.lane.b32.xlu1 %v8779_v5, %s9461_s4  ;;  %v3849_v59 = vor.u32 %v3848_v45, %v3847_v29  ;;  %v3858_v21 = vrot.slane %v3856_v20, 5  ;;  %v17237_v11 = vshll.u32 %v14563_v28, 16  ;;  %v17239_v26 = vshll.u32 %v14550_v25, 16 }
 0x393   : > { %6806 = vrot.lane.b32.xlu0 %v8771_v35, %s9461_s4  ;;  %v3853_v12 = vor.u32 %v3852_v18, %v3851_v42  ;;  %v17238_v56 = vshrl.u32 %v14550_v25, 16  ;;  %v17242_v16 = vshll.u32 %v14580_v3, 16  ;;  %v3727_v5 = vrot.slane %v17240_v48, 5  ;;  %v14709_v18 = vpop.permute.xlu1 %7294 }
 0x394   : > { %v3850_v13 = vrot.slane %v3849_v59, 4  ;;  %v3860_v17 = vor.u32 %v3859_v6, %v3858_v21  ;;  %v3728_v29 = vrot.slane %v17237_v11, 6  ;;  %v3732_v35 = vrot.slane %v17239_v26, 6  ;;  %18068 = vst [vmem:[#allocation256_spill] sm:$0xff] %v14709_v18  ;;  %v14725_v18 = vpop.permute.xlu0 %7278 }
 0x395   : > { %v3855_v45 = vrot.slane %v3853_v12, 4  ;;  %v3731_v20 = vrot.slane %v17238_v56, 5  ;;  %v3736_v42 = vshrl.u32 %v14580_v3, 16  ;;  %v3130_v6 = vsel %vm9604_vm2, %v14640_v46, %v14567_v58 }
 0x396   : > { %v3854_v59 = vsel %vm10174_vm8, %v3850_v13, %v3853_v12  ;;  %v3729_v21 = vor.u32 %v3728_v29, %v3727_v5  ;;  %v3739_v11 = vrot.slane %v17242_v16, 6  ;;  %v3140_v56 = vsel %vm9604_vm2, %v14662_v14, %v14575_v7 }
 0x397   : > { %v3861_v26 = vsel %vm10174_vm8, %v3855_v45, %v3860_v17  ;;  %v3733_v48 = vor.u32 %v3732_v35, %v3731_v20  ;;  %v3738_v32 = vrot.slane %v3736_v42, 5  ;;  %v17250_v13 = vshrl.u32 %v14618_v2, 16 }
 0x398   : > { %v8794_v58 = vcombine.low %v3854_v59, %v3861_v26  ;;  %v3730_v46 = vrot.slane %v3729_v21, 4  ;;  %v17245_v12 = vshll.u32 %v14618_v2, 16  ;;  %v17244_v16 = vshll.u32 %v14610_v1, 16 }
 0x399   : > { %v3735_v5 = vrot.slane %v3733_v48, 4  ;;  %v3740_v29 = vor.u32 %v3739_v11, %v3738_v32  ;;  %v17243_v9 = vshrl.u32 %v14610_v1, 16  ;;  %v17246_v14 = vshll.u32 %v14625_v49, 16 }
 0x39a   : > { %6900 = vrot.lane.b32.xlu1 %v8794_v58, %s9462_s5  ;;  %v3734_v7 = vsel %vm10174_vm8, %v3730_v46, %v3733_v48  ;;  %v3862_v17 = vrot.slane %v17250_v13, 5  ;;  %v3863_v26 = vrot.slane %v17245_v12, 6  ;;  %v3867_v45 = vrot.slane %v17244_v16, 6  ;;  %v14746_v48 = vpop.permute.xlu1 %7372 }
 0x39b   : > { %v3741_v32 = vsel %vm10174_vm8, %v3735_v5, %v3740_v29  ;;  %v3866_v11 = vrot.slane %v17243_v9, 5  ;;  %v3871_v20 = vshrl.u32 %v14625_v49, 16  ;;  %18069 = vst [vmem:[#allocation257_spill] sm:$0xff] %v14746_v48  ;;  %v3874_v59 = vrot.slane %v17246_v14, 6  ;;  %v14753_v9 = vpop.permute.xlu0 %7356 }
 0x39c   : > { %v8786_v35 = vcombine.low %v3734_v7, %v3741_v32  ;;  %v3864_v42 = vor.u32 %v3863_v26, %v3862_v17  ;;  %v17247_v21 = vshrl.u32 %v14628_v4, 16  ;;  %v17249_v5 = vshll.u32 %v14628_v4, 16  ;;  %18070 = vst [vmem:[#allocation258_spill] sm:$0xff] %v14753_v9 }
 0x39d   : > { %v3868_v58 = vor.u32 %v3867_v45, %v3866_v11  ;;  %v3873_v46 = vrot.slane %v3871_v20, 5  ;;  %v17248_v29 = vshll.u32 %v14636_v43, 16  ;;  %v17251_v12 = vshrl.u32 %v14636_v43, 16 }
 0x39e   : > { %6884 = vrot.lane.b32.xlu0 %v8786_v35, %s9462_s5  ;;  %v3865_v16 = vrot.slane %v3864_v42, 4  ;;  %v17252_v7 = vshll.u32 %v14648_v39, 16  ;;  %v3742_v17 = vrot.slane %v17247_v21, 5  ;;  %v3743_v11 = vrot.slane %v17249_v5, 6  ;;  %v14776_v5 = vpop.permute.xlu1 %6816 }
 0x39f   : > { %v3870_v26 = vrot.slane %v3868_v58, 4  ;;  %v3875_v32 = vor.u32 %v3874_v59, %v3873_v46  ;;  %v3747_v45 = vrot.slane %v17248_v29, 6  ;;  %v3746_v35 = vrot.slane %v17251_v12, 5 }
 0x3a0   : > { %v3869_v20 = vsel %vm10174_vm8, %v3865_v16, %v3868_v58  ;;  %v3751_v42 = vshrl.u32 %v14648_v39, 16  ;;  %v3754_v14 = vrot.slane %v17252_v7, 6  ;;  %v8749_v21 = vcombine.low %v3130_v6, %v3140_v56  ;;  %v14782_v7 = vpop.permute.xlu0 %6800 }
 0x3a1   : > { %v7449_v59 = vsel %vm6234_vm13, %v14519_v15, %v13817_v52  ;;  %v3876_v46 = vsel %vm10174_vm8, %v3870_v26, %v3875_v32  ;;  %v3744_v29 = vor.u32 %v3743_v11, %v3742_v17  ;;  %v3748_v58 = vor.u32 %v3747_v45, %v3746_v35 }
 0x3a2   : > { %v8795_v16 = vcombine.low %v3869_v20, %v3876_v46  ;;  %v3753_v13 = vrot.slane %v3751_v42, 5  ;;  %v8410_v12 = vrot.slane %v14547_v50, 10  ;;  %v3977_v48 = vrot.slane %v14536_v63, 6 }
 0x3a3   : > { %v3745_v9 = vrot.slane %v3744_v29, 4  ;;  %v3980_v56 = vrot.slane %v14560_v44, 6  ;;  %v8402_v6 = vrot.slane %v14563_v28, 10  ;;  %v3750_v52 = vrot.slane %v3748_v58, 4 }
 0x3a4   : > { %6902 = vrot.lane.b32.xlu1 %v8795_v16, %s9462_s5  ;;  %v3755_v15 = vor.u32 %v3754_v14, %v3753_v13  ;;  %v3921_v17 = vrot.slane %v14550_v25, 6  ;;  %v3924_v26 = vrot.slane %v14580_v3, 6  ;;  %v7413_v29 = vsel %vm6185_vm12, %v14660_v24, %v13784_v36 }
 0x3a5   : > { %v3749_v32 = vsel %vm10174_vm8, %v3745_v9, %v3748_v58  ;;  %v3978_v11 = vsel %vm10433_vm11, %v8410_v12, %v3977_v48  ;;  %v3979_v45 = vrot.slane %v3977_v48, 4  ;;  %v7389_v20 = vsel %vm6185_vm12, %v8749_v21, %v13798_v22  ;;  %v14804_v48 = vpop.permute.xlu1 %7374 }
 0x3a6   : > { %v3756_v13 = vsel %vm10174_vm8, %v3750_v52, %v3755_v15  ;;  %v3922_v14 = vsel %vm10433_vm11, %v8402_v6, %v3921_v17  ;;  %v3923_v35 = vrot.slane %v3921_v17, 4  ;;  %v8411_v9 = vrot.slane %v14618_v2, 10  ;;  %v14815_v52 = vld [vmem:[%s9559_s30 + $0xd8] sm:$0xf]  ;;  %v14818_v15 = vld [vmem:[%s9559_s30 + $0xdc] sm:$0xf]  ;;  %v14820_v17 = vpop.permute.xlu0 %7358 }
 0x3a7   : > { %v8787_v36 = vcombine.low %v3749_v32, %v3756_v13  ;;  %v3981_v24 = vsel %vm10433_vm11, %v3979_v45, %v3980_v56  ;;  %v3984_v12 = vrot.slane %v14610_v1, 6  ;;  %v3987_v42 = vrot.slane %v14625_v49, 6  ;;  %18071 = vst [vmem:[#allocation259_spill] sm:$0xff] %v14820_v17  ;;  %v14832_v13 = vld [vmem:[%s9559_s30 + $0x78] sm:$0xf] }
 0x3a8   : > { %v8810_v22 = vcombine.low %v3978_v11, %v3981_v24  ;;  %v3925_v21 = vsel %vm10433_vm11, %v3923_v35, %v3924_v26  ;;  %v8403_v46 = vrot.slane %v14628_v4, 10  ;;  %v3928_v6 = vrot.slane %v14636_v43, 6  ;;  %v14870_v24 = vld [vmem:[%s9559_s30 + $0xe4] sm:$0xf]  ;;  %v18146_v17 = vld [vmem:[#allocation224_spill] sm:$0xff] }
 0x3a9   : > { %6886 = vrot.lane.b32.xlu0 %v8787_v36, %s9462_s5  ;;  %v8802_v16 = vcombine.low %v3922_v14, %v3925_v21  ;;  %v3985_v58 = vsel %vm10433_vm11, %v8411_v9, %v3984_v12  ;;  %v3986_v56 = vrot.slane %v3984_v12, 4  ;;  %v7433_v26 = vsel %vm6234_vm13, %v14528_v55, %v13829_v27  ;;  %v14835_v14 = vld [vmem:[%s9559_s30 + $0x7c] sm:$0xf]  ;;  %v14873_v9 = vld [vmem:[%s9559_s30 + $0xe8] sm:$0xf]  ;;  %v14875_v12 = vpop.permute.xlu1 %6818 }
 0x3aa   : > { %v7451_v32 = vsel %vm6234_vm13, %v7413_v29, %v13845_v30  ;;  %v7435_v11 = vsel %vm6234_vm13, %v7389_v20, %v13854_v61  ;;  %6980 = vrot.lane.b32.xlu1 %v8810_v22, %s9463_s6  ;;  %v3931_v45 = vrot.slane %v14648_v39, 6  ;;  %v7481_v35 = vsel %vm6267_vm14, %v7449_v59, %v13878_v19  ;;  %v14856_v59 = vld [vmem:[%s9559_s30 + $0xe0] sm:$0x3]  ;;  %18072 = vst [vmem:[#allocation260_spill] sm:$0xff] %v14875_v12  ;;  %v14879_v22 = vld [vmem:[%s9559_s30 + $0x84] sm:$0xf] }
 0x3ab   : > { %v3988_v27 = vsel %vm10433_vm11, %v3986_v56, %v3987_v42  ;;  %v3929_v30 = vsel %vm10433_vm11, %v8403_v46, %v3928_v6  ;;  %v3930_v61 = vrot.slane %v3928_v6, 4  ;;  %v14845_v55 = vsel %vm6267_vm14, %v7433_v26, %v13889_v33  ;;  %v14887_v56 = vld [vmem:[%s9559_s30 + $0x80] sm:$0x3] }
 0x3ac   : > { %v14849_v29 = vsel %vm6267_vm14, %v7451_v32, %v13898_v54  ;;  %v14853_v20 = vsel %vm6267_vm14, %v7435_v11, %v13905_v41  ;;  %v8811_v19 = vcombine.low %v3985_v58, %v3988_v27  ;;  %v14860_v36 = vsel %vm17293_vm15, %v7481_v35, %v13917_v0  ;;  %v14891_v32 = vpop.permute.xlu0 %6802  ;;  %v14894_v11 = vld [vmem:[%s9559_s30 + $0x88] sm:$0xf] }
 0x3ad   : > { %6964 = vrot.lane.b32.xlu0 %v8802_v16, %s9463_s6  ;;  %v3932_v33 = vsel %vm10433_vm11, %v3930_v61, %v3931_v45  ;;  %v8826_v54 = vcombine.low %v14815_v52, %v14818_v15  ;;  %v8818_v41 = vcombine.low %v14832_v13, %v14835_v14  ;;  %v17253_v21 = vshrl.u32 %v14815_v52, 16  ;;  %18073 = vst [vmem:[#allocation261_spill] sm:$0xff] %v14891_v32 }
 0x3ae   : > { %6982 = vrot.lane.b32.xlu1 %v8811_v19, %s9463_s6  ;;  %v8803_v0 = vcombine.low %v3929_v30, %v3932_v33  ;;  %v17254_v42 = vshll.u32 %v14815_v52, 16  ;;  %v17255_v46 = vshll.u32 %v14818_v15, 16  ;;  %v17256_v16 = vshrl.u32 %v14818_v15, 16 }
 0x3af   : > { %v17258_v6 = vshrl.u32 %v14832_v13, 16  ;;  %v17261_v26 = vshll.u32 %v14832_v13, 16  ;;  %v4380_v45 = vrot.slane %v17253_v21, 4  ;;  %v17262_v30 = vshll.u32 %v14835_v14, 16 }
 0x3b0   : > { %v4383_v35 = vrot.slane %v17254_v42, 5  ;;  %v4389_v27 = vrot.slane %v17255_v46, 5  ;;  %v8827_v61 = vcombine.low %v14870_v24, %v14873_v9  ;;  %v4393_v19 = vrot.slane %v17256_v16, 4 }
 0x3b1   : > { %6966 = vrot.lane.b32.xlu0 %v8803_v0, %s9463_s6  ;;  %v4188_v33 = vrot.slane %v17258_v6, 4  ;;  %v4191_v21 = vrot.slane %v17261_v26, 5  ;;  %v4197_v46 = vrot.slane %v17262_v30, 5  ;;  %v17268_v0 = vshrl.u32 %v14835_v14, 16  ;;  %v14921_v26 = vpop.permute.xlu1 %6896 }
 0x3b2   : > { %7060 = vrot.lane.b32.xlu1 %v8826_v54, %s9464_s7  ;;  %v4384_v42 = vor.u32 %v4383_v35, %v4380_v45  ;;  %v17267_v58 = vshll.u32 %v14887_v56, 16  ;;  %v8819_v16 = vcombine.low %v14879_v22, %v14894_v11  ;;  %v4394_v39 = vor.u32 %v4393_v19, %v4389_v27  ;;  %18075 = vst [vmem:[#allocation262_spill] sm:$0xff] %v14921_v26  ;;  %v14930_v19 = vld [vmem:[%s9559_s30 + $0xec] sm:$0x3] }
 0x3b3   : > { %v18074_v6 = vshll.u32 %v14856_v59, 16  ;;  %v4192_v3 = vor.u32 %v4191_v21, %v4188_v33  ;;  %v4201_v45 = vrot.slane %v17268_v0, 4  ;;  %v17273_v30 = vshrl.u32 %v14870_v24, 16  ;;  %v14934_v33 = vpop.permute.xlu0 %6880 }
 0x3b4   : > { %v4385_v54 = vrot.slane %v4384_v42, 4  ;;  %v4207_v35 = vrot.slane %v17267_v58, 5  ;;  %v4395_v43 = vrot.slane %v4394_v39, 4  ;;  %18076 = vst [vmem:[#allocation263_spill] sm:$0xff] %v14934_v33  ;;  %v18080_v44 = vshll.u32 %v14894_v11, 16 }
 0x3b5   : > { %v4399_v49 = vrot.slane %v18074_v6, 5  ;;  %7044 = vrot.lane.b32.xlu0 %v8818_v41, %s9464_s7  ;;  %v4193_v4 = vrot.slane %v4192_v3, 4  ;;  %v17274_v6 = vshll.u32 %v14870_v24, 16  ;;  %v4202_v58 = vor.u32 %v4201_v45, %v4197_v46 }
 0x3b6   : > { %7062 = vrot.lane.b32.xlu1 %v8827_v61, %s9464_s7  ;;  %v4390_v42 = vsel %vm9604_vm2, %v4385_v54, %v4389_v27  ;;  %v4404_v41 = vrot.slane %v17273_v30, 4  ;;  %v17275_v3 = vshrl.u32 %v14873_v9, 16  ;;  %v18077_v61 = vshll.u32 %v14873_v9, 16 }
 0x3b7   : > { %v4400_v39 = vsel %vm9604_vm2, %v4395_v43, %v4399_v49  ;;  %v4198_v0 = vsel %vm9604_vm2, %v4193_v4, %v4197_v46  ;;  %v4407_v21 = vrot.slane %v17274_v6, 5  ;;  %v4203_v27 = vrot.slane %v4202_v58, 4  ;;  %v14955_v49 = vld [vmem:[%s9559_s30 + $0x8c] sm:$0x3]  ;;  %v14960_v6 = vpop.permute.xlu1 %6898  ;;  %v14972_v46 = vpop.permute.xlu0 %6882 }
 0x3b8   : > { %v4413_v1 = vrot.slane %v18077_v61, 5  ;;  %v8842_v2 = vcombine.low %v4390_v42, %v4400_v39  ;;  %v4417_v54 = vrot.slane %v17275_v3, 4  ;;  %v17277_v45 = vshll.u32 %v14930_v19, 16  ;;  %18078 = vst [vmem:[#allocation264_spill] sm:$0xff] %v14960_v6  ;;  %18079 = vst [vmem:[#allocation265_spill] sm:$0xff] %v14972_v46 }
 0x3b9   : > { %7046 = vrot.lane.b32.xlu0 %v8819_v16, %s9464_s7  ;;  %v4408_v30 = vor.u32 %v4407_v21, %v4404_v41  ;;  %v17280_v4 = vshrl.u32 %v14879_v22, 16  ;;  %v17278_v43 = vshll.u32 %v14879_v22, 16  ;;  %v4208_v58 = vsel %vm9604_vm2, %v4203_v27, %v4207_v35 }
 0x3ba   : > { %7140 = vrot.lane.b32.xlu1 %v8842_v2, %s9465_s8  ;;  %v4418_v42 = vor.u32 %v4417_v54, %v4413_v1  ;;  %v4423_v16 = vrot.slane %v17277_v45, 5  ;;  %v17279_v21 = vshrl.u32 %v14894_v11, 16  ;;  %v8834_v41 = vcombine.low %v4198_v0, %v4208_v58  ;;  %v18081_v45 = vld [vmem:[#allocation197_spill] sm:$0xff]  ;;  %v18082_v0 = vld [vmem:[#allocation198_spill] sm:$0xff] }
 0x3bb   : > { %v4409_v39 = vrot.slane %v4408_v30, 4  ;;  %v4212_v61 = vrot.slane %v17280_v4, 4  ;;  %v4215_v3 = vrot.slane %v17278_v43, 5  ;;  %v4221_v35 = vrot.slane %v18080_v44, 5 }
 0x3bc   : > { %v4419_v2 = vrot.slane %v4418_v42, 4  ;;  %v4225_v27 = vrot.slane %v17279_v21, 4  ;;  %v17285_v54 = vshll.u32 %v14955_v49, 16  ;;  %v7497_v30 = vsel %vm17293_vm15, %v14845_v55, %v18081_v45 }
 0x3bd   : > { %v7515_v58 = vsel %vm17293_vm15, %v14849_v29, %v18082_v0  ;;  %7124 = vrot.lane.b32.xlu0 %v8834_v41, %s9465_s8  ;;  %v4414_v42 = vsel %vm9604_vm2, %v4409_v39, %v4413_v1  ;;  %v4216_v43 = vor.u32 %v4215_v3, %v4212_v61  ;;  %v8474_v25 = vrot.slane %v14815_v52, 9  ;;  %v14995_v41 = vpop.permute.xlu1 %6976  ;;  %v18084_v39 = vld [vmem:[#allocation199_spill] sm:$0xff] }
 0x3be   : > { %v4424_v44 = vsel %vm9604_vm2, %v4419_v2, %v4423_v16  ;;  %v4226_v21 = vor.u32 %v4225_v27, %v4221_v35  ;;  %v4231_v4 = vrot.slane %v17285_v54, 5  ;;  %v4573_v28 = vrot.slane %v14818_v15, 5  ;;  %18083 = vst [vmem:[#allocation197_spill] sm:$0xff] %v14995_v41 }
 0x3bf   : > { %v8843_v55 = vcombine.low %v4414_v42, %v4424_v44  ;;  %v4217_v45 = vrot.slane %v4216_v43, 4  ;;  %v4576_v29 = vrot.slane %v14856_v59, 5  ;;  %v8466_v1 = vrot.slane %v14832_v13, 9  ;;  %v18086_v42 = vld [vmem:[#allocation200_spill] sm:$0xff] }
 0x3c0   : > { %v4227_v0 = vrot.slane %v4226_v21, 4  ;;  %v4517_v3 = vrot.slane %v14835_v14, 5  ;;  %v4520_v16 = vrot.slane %v14887_v56, 5  ;;  %v7499_v61 = vsel %vm17293_vm15, %v14853_v20, %v18084_v39  ;;  %v15008_v21 = vpop.permute.xlu0 %6960 }
 0x3c1   : > { %7142 = vrot.lane.b32.xlu1 %v8843_v55, %s9465_s8  ;;  %v4222_v43 = vsel %vm9604_vm2, %v4217_v45, %v4221_v35  ;;  %v4574_v2 = vsel %vm10020_vm5, %v8474_v25, %v4573_v28  ;;  %v4575_v27 = vrot.slane %v4573_v28, 4  ;;  %18085 = vst [vmem:[#allocation198_spill] sm:$0xff] %v15008_v21  ;;  %v7545_v44 = vsel %vm6333_vm0, %v14860_v36, %v18086_v42  ;;  %v18097_v21 = vld [vmem:[#allocation209_spill] sm:$0xff] }
 0x3c2   : > { %v4232_v54 = vsel %vm9604_vm2, %v4227_v0, %v4231_v4  ;;  %v4518_v20 = vsel %vm10020_vm5, %v8466_v1, %v4517_v3  ;;  %v4519_v55 = vrot.slane %v4517_v3, 4  ;;  %v8475_v25 = vrot.slane %v14870_v24, 9  ;;  %v15029_v3 = vpop.permute.xlu1 %6978 }
 0x3c3   : > { %v8835_v39 = vcombine.low %v4222_v43, %v4232_v54  ;;  %v4577_v35 = vsel %vm10020_vm5, %v4575_v27, %v4576_v29  ;;  %v4580_v28 = vrot.slane %v14873_v9, 5  ;;  %v4583_v36 = vrot.slane %v14930_v19, 5  ;;  %18087 = vst [vmem:[#allocation199_spill] sm:$0xff] %v15029_v3  ;;  %v18088_v43 = vld [vmem:[#allocation168_spill] sm:$0xff] }
 0x3c4   : > { %v8858_v45 = vcombine.low %v4574_v2, %v4577_v35  ;;  %v4521_v63 = vsel %vm10020_vm5, %v4519_v55, %v4520_v16  ;;  %v8467_v4 = vrot.slane %v14879_v22, 9  ;;  %v4524_v29 = vrot.slane %v14894_v11, 5  ;;  %v18091_v55 = vld [vmem:[#allocation167_spill] sm:$0xff]  ;;  %v18096_v3 = vld [vmem:[#allocation208_spill] sm:$0xff] }
 0x3c5   : > { %7126 = vrot.lane.b32.xlu0 %v8835_v39, %s9465_s8  ;;  %v8850_v0 = vcombine.low %v4518_v20, %v4521_v63  ;;  %v4581_v54 = vsel %vm10020_vm5, %v8475_v25, %v4580_v28  ;;  %v4582_v1 = vrot.slane %v4580_v28, 4  ;;  %v18089_v2 = vshrl.u32 %v18088_v43, 16  ;;  %s8921_s8 = sshll.u32 %s9451_s15, 12 }
 0x3c6   : > { %v18090_v16 = vshll.u32 %v18088_v43, 16  ;;  %v18092_v35 = vshll.u32 %v18091_v55, 16  ;;  %7220 = vrot.lane.b32.xlu1 %v8858_v45, %s9466_s9  ;;  %v4527_v63 = vrot.slane %v14955_v49, 5  ;;  %v18093_v20 = vshrl.u32 %v18091_v55, 16  ;;  %v15047_v43 = vpop.permute.xlu0 %6962 }
 0x3c7   : > { %v3336_v27 = vrot.slane %v18089_v2, 4  ;;  %v4584_v25 = vsel %vm10020_vm5, %v4582_v1, %v4583_v36  ;;  %v4525_v28 = vsel %vm10020_vm5, %v8467_v4, %v4524_v29  ;;  %v4526_v2 = vrot.slane %v4524_v29, 4  ;;  %18094 = vst [vmem:[#allocation200_spill] sm:$0xff] %v15047_v43  ;;  %v18099_v36 = vld [vmem:[#allocation217_spill] sm:$0xff]  ;;  %v18100_v4 = vld [vmem:[#allocation218_spill] sm:$0xff] }
 0x3c8   : > { %v3339_v42 = vrot.slane %v18090_v16, 5  ;;  %v15037_v50 = vrot.slane %v18092_v35, 5  ;;  %v3349_v39 = vrot.slane %v18093_v20, 4  ;;  %v18095_v16 = vld [vmem:[#allocation201_spill] sm:$0xff]  ;;  %v7547_v45 = vsel %vm6333_vm0, %v7515_v58, %v18096_v3  ;;  %v18098_v20 = vld [vmem:[#allocation214_spill] sm:$0xff]  ;;  %v18102_v3 = vld [vmem:[#allocation220_spill] sm:$0xff] }
 0x3c9   : > { %v7529_v35 = vsel %vm6333_vm0, %v7497_v30, %v18095_v16  ;;  %v7531_v41 = vsel %vm6333_vm0, %v7499_v61, %v18097_v21  ;;  %v8859_v55 = vcombine.low %v4581_v54, %v4584_v25  ;;  %v7577_v46 = vsel %vm6366_vm1, %v7545_v44, %v18098_v20  ;;  %7204 = vrot.lane.b32.xlu0 %v8850_v0, %s9466_s9  ;;  %v18101_v16 = vld [vmem:[#allocation219_spill] sm:$0xff]  ;;  %v18103_v54 = vld [vmem:[#allocation221_spill] sm:$0xff] }
 0x3ca   : > { %v7561_v1 = vsel %vm6366_vm1, %v7529_v35, %v18099_v36  ;;  %v7579_v29 = vsel %vm6366_vm1, %v7547_v45, %v18100_v4  ;;  %v4528_v30 = vsel %vm10020_vm5, %v4526_v2, %v4527_v63  ;;  %v7563_v58 = vsel %vm6366_vm1, %v7531_v41, %v18101_v16  ;;  %v15080_v35 = vpop.permute.xlu1 %7056  ;;  %v18114_v16 = vld [vmem:[#allocation169_spill] sm:$0xff] }
 0x3cb   : > { %v15068_v61 = vsel %vm17292_vm3, %v7577_v46, %v18102_v3  ;;  %v3340_v21 = vor.u32 %v3339_v42, %v3336_v27  ;;  %7222 = vrot.lane.b32.xlu1 %v8859_v55, %s9466_s9  ;;  %v8851_v44 = vcombine.low %v4525_v28, %v4528_v30  ;;  %v15073_v25 = vsel %vm17292_vm3, %v7561_v1, %v18103_v54  ;;  %v18107_v46 = vld [vmem:[#allocation170_spill] sm:$0xff]  ;;  %v18109_v42 = vld [vmem:[#allocation171_spill] sm:$0xff] }
 0x3cc   : > { %v3350_v0 = vor.u32 %v3349_v39, %v15037_v50  ;;  %v18104_v57 = vshrl.u32 %v14815_v52, 16  ;;  %v18105_v2 = vshll.u32 %v14815_v52, 16  ;;  %18106 = vst [vmem:[#allocation168_spill] sm:$0xff] %v15080_v35  ;;  %v18108_v45 = vshll.u32 %v18107_v46, 16  ;;  %v15104_v46 = vpop.permute.xlu0 %7040 }
 0x3cd   : > { %v18110_v28 = vshrl.u32 %v18109_v42, 16  ;;  %v18111_v20 = vshrl.u32 %v14818_v15, 16  ;;  %v18112_v39 = vshll.u32 %v14818_v15, 16  ;;  %v18113_v4 = vshll.u32 %v18109_v42, 16  ;;  %7206 = vrot.lane.b32.xlu0 %v8851_v44, %s9466_s9  ;;  %18116 = vst [vmem:[#allocation167_spill] sm:$0xff] %v15104_v46 }
 0x3ce   : > { %v4795_v63 = vrot.slane %v18104_v57, 5  ;;  %v4796_v41 = vrot.slane %v18105_v2, 6  ;;  %v15084_v27 = vrot.slane %v18108_v45, 5  ;;  %v18115_v3 = vshll.u32 %v18114_v16, 16 }
 0x3cf   : > { %v15088_v55 = vrot.slane %v18110_v28, 4  ;;  %v4799_v36 = vrot.slane %v18111_v20, 5  ;;  %v4800_v1 = vrot.slane %v18112_v39, 6  ;;  %v15096_v30 = vrot.slane %v18113_v4, 5 }
 0x3d0   : > { %v15100_v54 = vrot.slane %v18115_v3, 5  ;;  %v4797_v57 = vor.u32 %v4796_v41, %v4795_v63  ;;  %v4804_v2 = vshrl.u32 %v14856_v59, 16  ;;  %v15106_v45 = vrot.slane %v3340_v21, 4  ;;  %v18120_v41 = vld [vmem:[#allocation222_spill] sm:$0xff]  ;;  %v18121_v21 = vld [vmem:[#allocation223_spill] sm:$0xff] }
 0x3d1   : > { %v18117_v28 = vshrl.u32 %v18114_v16, 16  ;;  %v4801_v42 = vor.u32 %v4800_v1, %v4799_v36  ;;  %v18118_v39 = vshll.u32 %v14856_v59, 16  ;;  %v15114_v35 = vrot.slane %v3350_v0, 4 }
 0x3d2   : > { %v4798_v3 = vrot.slane %v4797_v57, 4  ;;  %v4806_v43 = vrot.slane %v4804_v2, 5  ;;  %v18119_v44 = vshrl.u32 %v14832_v13, 16  ;;  %v15120_v46 = vsel %vm17292_vm3, %v7579_v29, %v18120_v41  ;;  %v15134_v29 = vpop.permute.xlu1 %7058 }
 0x3d3   : > { %v15110_v20 = vrot.slane %v18117_v28, 4  ;;  %v4807_v4 = vrot.slane %v18118_v39, 6  ;;  %v15124_v16 = vsel %vm17292_vm3, %v7563_v58, %v18121_v21  ;;  %v4803_v28 = vrot.slane %v4801_v42, 4  ;;  %18124 = vst [vmem:[#allocation201_spill] sm:$0xff] %v15134_v29 }
 0x3d4   : > { %v4675_v63 = vrot.slane %v18119_v44, 5  ;;  %v18122_v36 = vshll.u32 %v14832_v13, 16  ;;  %v3148_v0 = vor.u32 %v15096_v30, %v15088_v55  ;;  %v4802_v57 = vsel %vm10174_vm8, %v4798_v3, %v4801_v42 }
 0x3d5   : > { %v4808_v2 = vor.u32 %v4807_v4, %v4806_v43  ;;  %v18123_v39 = vshrl.u32 %v14835_v14, 16  ;;  %v18125_v58 = vshll.u32 %v14835_v14, 16  ;;  %v4684_v6 = vshrl.u32 %v14887_v56, 16  ;;  %v15153_v4 = vpop.permute.xlu0 %7042 }
 0x3d6   : > { %v4676_v1 = vrot.slane %v18122_v36, 6  ;;  %v18126_v36 = vshll.u32 %v14887_v56, 16  ;;  %v3346_v55 = vsel %vm9604_vm2, %v15106_v45, %v15037_v50  ;;  %v3356_v43 = vsel %vm9604_vm2, %v15114_v35, %v15084_v27  ;;  %18127 = vst [vmem:[#allocation208_spill] sm:$0xff] %v15153_v4 }
 0x3d7   : > { %v4679_v44 = vrot.slane %v18123_v39, 5  ;;  %v4680_v21 = vrot.slane %v18125_v58, 6  ;;  %v3158_v30 = vor.u32 %v15110_v20, %v15100_v54  ;;  %v4809_v42 = vsel %vm10174_vm8, %v4803_v28, %v4808_v2 }
 0x3d8   : > { %v4677_v41 = vor.u32 %v4676_v1, %v4675_v63  ;;  %v4687_v33 = vrot.slane %v18126_v36, 6  ;;  %v8874_v3 = vcombine.low %v4802_v57, %v4809_v42  ;;  %v4686_v39 = vrot.slane %v4684_v6, 5 }
 0x3d9   : > { %v4681_v1 = vor.u32 %v4680_v21, %v4679_v44  ;;  %v18128_v58 = vshrl.u32 %v14870_v24, 16  ;;  %v18129_v45 = vshll.u32 %v14870_v24, 16  ;;  %v18130_v35 = vshrl.u32 %v14873_v9, 16  ;;  %v15181_v4 = vpop.permute.xlu0 %7120 }
 0x3da   : > { %v4678_v63 = vrot.slane %v4677_v41, 4  ;;  %v18131_v20 = vshll.u32 %v14873_v9, 16  ;;  %7300 = vrot.lane.b32.xlu1 %v8874_v3, %s9467_s10  ;;  %v4688_v2 = vor.u32 %v4687_v33, %v4686_v39  ;;  %v4819_v6 = vshrl.u32 %v14930_v19, 16  ;;  %18138 = vst [vmem:[#allocation214_spill] sm:$0xff] %v15181_v4 }
 0x3db   : > { %v4810_v50 = vrot.slane %v18128_v58, 5  ;;  %v4811_v36 = vrot.slane %v18129_v45, 6  ;;  %v4814_v27 = vrot.slane %v18130_v35, 5  ;;  %v4683_v57 = vrot.slane %v4681_v1, 4  ;;  %v15171_v35 = vpop.permute.xlu1 %7136 }
 0x3dc   : > { %v4815_v29 = vrot.slane %v18131_v20, 6  ;;  %v4682_v28 = vsel %vm10174_vm8, %v4678_v63, %v4681_v1  ;;  %v18132_v21 = vshll.u32 %v14930_v19, 16  ;;  %v18133_v58 = vshrl.u32 %v14879_v22, 16  ;;  %18134 = vst [vmem:[#allocation209_spill] sm:$0xff] %v15171_v35 }
 0x3dd   : > { %v4812_v44 = vor.u32 %v4811_v36, %v4810_v50  ;;  %v4689_v3 = vsel %vm10174_vm8, %v4683_v57, %v4688_v2  ;;  %v4821_v20 = vrot.slane %v4819_v6, 5  ;;  %v18135_v63 = vshll.u32 %v14879_v22, 16  ;;  %v18140_v6 = vld [vmem:[#allocation176_spill] sm:$0xff] }
 0x3de   : > { %v4816_v41 = vor.u32 %v4815_v29, %v4814_v27  ;;  %v4822_v42 = vrot.slane %v18132_v21, 6  ;;  %v4690_v45 = vrot.slane %v18133_v58, 5  ;;  %v18136_v33 = vshrl.u32 %v14894_v11, 16 }
 0x3df   : > { %v4691_v1 = vrot.slane %v18135_v63, 6  ;;  %v8866_v50 = vcombine.low %v4682_v28, %v4689_v3  ;;  %v4813_v29 = vrot.slane %v4812_v44, 4  ;;  %v18137_v27 = vshll.u32 %v14894_v11, 16 }
 0x3e0   : > { %v4694_v39 = vrot.slane %v18136_v33, 5  ;;  %v4818_v36 = vrot.slane %v4816_v41, 4  ;;  %v4823_v58 = vor.u32 %v4822_v42, %v4821_v20  ;;  %v4699_v32 = vshrl.u32 %v14955_v49, 16 }
 0x3e1   : > { %v4695_v21 = vrot.slane %v18137_v27, 6  ;;  %v4692_v35 = vor.u32 %v4691_v1, %v4690_v45  ;;  %v18139_v57 = vshll.u32 %v14955_v49, 16  ;;  %v18141_v63 = vshrl.u32 %v18140_v6, 16  ;;  %7284 = vrot.lane.b32.xlu0 %v8866_v50, %s9467_s10  ;;  %v18143_v1 = vld [vmem:[#allocation175_spill] sm:$0xff]  ;;  %v15201_v50 = vpop.permute.xlu1 %7138 }
 0x3e2   : > { %v18142_v33 = vshll.u32 %v18140_v6, 16  ;;  %v4817_v44 = vsel %vm10174_vm8, %v4813_v29, %v4816_v41  ;;  %v3149_v27 = vrot.slane %v3148_v0, 4  ;;  %v4824_v42 = vsel %vm10174_vm8, %v4818_v36, %v4823_v58  ;;  %v18147_v41 = vld [vmem:[#allocation225_spill] sm:$0xff] }
 0x3e3   : > { %v4702_v2 = vrot.slane %v18139_v57, 6  ;;  %v3360_v26 = vrot.slane %v18141_v63, 4  ;;  %v4696_v3 = vor.u32 %v4695_v21, %v4694_v39  ;;  %v4693_v45 = vrot.slane %v4692_v35, 4  ;;  %v18148_v21 = vld [vmem:[#allocation172_spill] sm:$0xff] }
 0x3e4   : > { %v3363_v28 = vrot.slane %v18142_v33, 5  ;;  %v4701_v20 = vrot.slane %v4699_v32, 5  ;;  %v18144_v57 = vshll.u32 %v18143_v1, 16  ;;  %v18145_v63 = vshrl.u32 %v18143_v1, 16  ;;  %v15218_v1 = vpop.permute.xlu0 %7122 }
 0x3e5   : > { %v8875_v33 = vcombine.low %v4817_v44, %v4824_v42  ;;  %v4698_v12 = vrot.slane %v4696_v3, 4  ;;  %v15206_v0 = vsel %vm17291_vm4, %v15068_v61, %v18146_v17  ;;  %v15211_v32 = vsel %vm17291_vm4, %v15073_v25, %v18147_v41  ;;  %v18150_v61 = vld [vmem:[#allocation179_spill] sm:$0xff] }
 0x3e6   : > { %v15197_v4 = vrot.slane %v18144_v57, 5  ;;  %v3373_v6 = vrot.slane %v18145_v63, 4  ;;  %v4697_v35 = vsel %vm10174_vm8, %v4693_v45, %v4696_v3  ;;  %v4703_v39 = vor.u32 %v4702_v2, %v4701_v20 }
 0x3e7   : > { %v8758_v29 = vcombine.low %v3346_v55, %v3356_v43  ;;  %v3159_v36 = vrot.slane %v3158_v30, 4  ;;  %v18149_v58 = vshll.u32 %v18148_v21, 16  ;;  %v3364_v42 = vor.u32 %v3363_v28, %v3360_v26  ;;  %7302 = vrot.lane.b32.xlu1 %v8875_v33, %s9467_s10  ;;  %v18153_v28 = vld [vmem:[#allocation180_spill] sm:$0xff]  ;;  %v18157_v21 = vld [vmem:[#allocation177_spill] sm:$0xff] }
 0x3e8   : > { %v3154_v17 = vsel %vm9604_vm2, %v3149_v27, %v15100_v54  ;;  %v18151_v25 = vshrl.u32 %v18150_v61, 16  ;;  %v4704_v2 = vsel %vm10174_vm8, %v4698_v12, %v4703_v39  ;;  %v8490_v55 = vrot.slane %v14815_v52, 10  ;;  %v15247_v39 = vpop.permute.xlu1 %7216 }
 0x3e9   : > { %v3163_v44 = vrot.slane %v18149_v58, 5  ;;  %v3374_v43 = vor.u32 %v3373_v6, %v15197_v4  ;;  %v18152_v26 = vshll.u32 %v18150_v61, 16  ;;  %v18154_v3 = vshll.u32 %v18153_v28, 16 }
 0x3ea   : > { %v3168_v57 = vrot.slane %v18151_v25, 4  ;;  %v8867_v20 = vcombine.low %v4697_v35, %v4704_v2  ;;  %v18155_v54 = vshrl.u32 %v18153_v28, 16  ;;  %v4925_v63 = vrot.slane %v14818_v15, 6  ;;  %v9160_v15 = vld [vmem:[%s16752_s1] sm:$0xff]   ;;  %v15266_v2 = vpop.permute.xlu0 %7200 }
 0x3eb   : > { %v3171_v30 = vrot.slane %v18152_v26, 5  ;;  %v15233_v45 = vrot.slane %v18154_v3, 5  ;;  %v4928_v33 = vrot.slane %v14856_v59, 6  ;;  %v8482_v12 = vrot.slane %v14832_v13, 10  ;;  %v18156_v59 = vld [vmem:[#allocation226_spill] sm:$0xff]  ;;  %8945 = vmatprep.subr.bf16.mxu0 %v9160_v15  ;;  %8991 = vmatprep.subr.bf16.mxu1 %v9160_v15  ;;  %v18159_v28 = vld [vmem:[#allocation181_spill] sm:$0xff] }
 0x3ec   : > { %v3181_v27 = vrot.slane %v18155_v54, 4  ;;  %v3164_v52 = vsel %vm9604_vm2, %v3159_v36, %v3163_v44  ;;  %v15242_v6 = vrot.slane %v3364_v42, 4  ;;  %7286 = vrot.lane.b32.xlu0 %v8867_v20, %s9467_s10  ;;  %v4869_v41 = vrot.slane %v14835_v14, 6  ;;  %8946 = vmatpush3.bf16.msra.mxu0 %v9160_v15 }
 0x3ed   : > { %v4872_v35 = vrot.slane %v14887_v56, 6  ;;  %v15254_v13 = vsel %vm6185_vm12, %v8758_v29, %v18156_v59  ;;  %v18158_v36 = vshll.u32 %v18157_v21, 16  ;;  %v4926_v44 = vsel %vm10433_vm11, %v8490_v55, %v4925_v63  ;;  %8998 = vmatpush3.bf16.msra.mxu1 %v9160_v15  ;;  %v18161_v15 = vld [vmem:[#allocation111_spill] sm:$0xff] }
 0x3ee   : > { %v4927_v14 = vrot.slane %v4925_v63, 4  ;;  %v15262_v42 = vrot.slane %v3374_v43, 4  ;;  %v3172_v56 = vor.u32 %v3171_v30, %v3168_v57  ;;  %v4870_v61 = vsel %vm10433_vm11, %v8482_v12, %v4869_v41 }
 0x3ef   : > { %v15258_v58 = vrot.slane %v18158_v36, 5  ;;  %v4871_v25 = vrot.slane %v4869_v41, 4  ;;  %v15268_v29 = vcombine.low %v3154_v17, %v3164_v52  ;;  %v3182_v26 = vor.u32 %v3181_v27, %v15233_v45 }
 0x3f0   : > { %v18160_v3 = vshll.u32 %v18159_v28, 16  ;;  %v4929_v55 = vsel %vm10433_vm11, %v4927_v14, %v4928_v33  ;;  %v3370_v57 = vsel %vm9604_vm2, %v15242_v6, %v15197_v4  ;;  %v8491_v30 = vrot.slane %v14870_v24, 10  ;;  %v9285_v4 = vld [vmem:[%s9559_s30 + $0x88] sm:$0xf] }
 0x3f1   : > { %v8890_v43 = vcombine.low %v4926_v44, %v4929_v55  ;;  %v4873_v17 = vsel %vm10433_vm11, %v4871_v25, %v4872_v35  ;;  %v4932_v27 = vrot.slane %v14873_v9, 6  ;;  %v4935_v63 = vrot.slane %v14930_v19, 6  ;;  %v15296_v35 = vpop.permute.xlu1 %7218 }
 0x3f2   : > { %v15273_v20 = vrot.slane %v18160_v3, 5  ;;  %v8882_v54 = vcombine.low %v4870_v61, %v4873_v17  ;;  %v8483_v33 = vrot.slane %v14879_v22, 10  ;;  %v3380_v12 = vsel %vm9604_vm2, %v15262_v42, %v15258_v58  ;;  %v9284_v42 = vld [vmem:[%s9559_s30 + $0x84] sm:$0xf] }
 0x3f3   : > { %v15291_v52 = vrot.slane %v3172_v56, 4  ;;  %7380 = vrot.lane.b32.xlu1 %v8890_v43, %s9468_s11  ;;  %v4876_v41 = vrot.slane %v14894_v11, 6  ;;  %v4879_v24 = vrot.slane %v14955_v49, 6  ;;  %v15298_v9 = vrot.slane %v3182_v26, 4  ;;  %v9161_v11 = vld [vmem:[%s16752_s1 + $0x8] sm:$0xff]   ;;  %v18164_v56 = vld [vmem:[#allocation112_spill] sm:$0xff]  ;;  %v15314_v26 = vpop.permute.xlu0 %7202 }
 0x3f4   : > { %7364 = vrot.lane.b32.xlu0 %v8882_v54, %s9468_s11  ;;  %v4933_v22 = vsel %vm10433_vm11, %v8491_v30, %v4932_v27  ;;  %v4934_v19 = vrot.slane %v4932_v27, 4  ;;  %v18162_v59 = vshrl.u32 %v18161_v15, 16  ;;  %v18163_v44 = vshll.u32 %v18161_v15, 16  ;;  %v15321_v43 = vld [vmem:[%s9559_s30 + $0x8c] sm:$0x3]  ;;  %v18167_v30 = vld [vmem:[#allocation141_spill] sm:$0xff]  ;;  %8947 = vmatprep.subr.bf16.mxu0 %v9161_v11 }
 0x3f5   : > { %v4877_v49 = vsel %vm10433_vm11, %v8483_v33, %v4876_v41  ;;  %v4878_v36 = vrot.slane %v4876_v41, 4  ;;  %v18165_v61 = vshrl.u32 %v18164_v56, 16  ;;  %v18166_v3 = vshll.u32 %v18164_v56, 16  ;;  %8992 = vmatprep.subr.bf16.mxu1 %v9161_v11  ;;  %8948 = vmatpush3.bf16.msra.mxu0 %v9161_v11 }
 0x3f6   : > { %v2824_v21 = vrot.slane %v18162_v59, 5  ;;  %v2825_v14 = vrot.slane %v18163_v44, 6  ;;  %v4936_v28 = vsel %vm10433_vm11, %v4934_v19, %v4935_v63  ;;  %v2833_v17 = vshrl.u32 %v15321_v43, 16  ;;  %v18169_v59 = vld [vmem:[#allocation114_spill] sm:$0xff]  ;;  %8999 = vmatpush3.bf16.msra.mxu1 %v9161_v11  ;;  %v9278_v11 = vld [vmem:[%s9559_s30 + $0x80] sm:$0x3] }
 0x3f7   : > { %v2828_v25 = vrot.slane %v18165_v61, 5  ;;  %v2829_v55 = vrot.slane %v18166_v3, 6  ;;  %v18168_v54 = vshll.u32 %v18167_v30, 16  ;;  %v8891_v33 = vcombine.low %v4933_v22, %v4936_v28 }
 0x3f8   : > { %v4880_v41 = vsel %vm10433_vm11, %v4878_v36, %v4879_v24  ;;  %v2826_v15 = vor.u32 %v2825_v14, %v2824_v21  ;;  %v18170_v63 = vshrl.u32 %v18169_v59, 16  ;;  %v2835_v61 = vrot.slane %v2833_v17, 5  ;;  %v18172_v24 = vld [vmem:[#allocation115_spill] sm:$0xff] }
 0x3f9   : > { %v2836_v27 = vrot.slane %v18168_v54, 6  ;;  %v8883_v44 = vcombine.low %v4877_v49, %v4880_v41  ;;  %v2830_v56 = vor.u32 %v2829_v55, %v2828_v25  ;;  %v18171_v3 = vshll.u32 %v18169_v59, 16  ;;  %v9162_v54 = vld [vmem:[%s16752_s1 + $0x10] sm:$0xff]   ;;  %7382 = vrot.lane.b32.xlu1 %v8891_v33, %s9468_s11  ;;  %v15341_v25 = vpop.permute.xlu1 %7296  ;;  %v18175_v59 = vld [vmem:[#allocation144_spill] sm:$0xff] }
 0x3fa   : > { %v2809_v19 = vrot.slane %v18170_v63, 5  ;;  %v2827_v22 = vrot.slane %v2826_v15, 4  ;;  %v18173_v21 = vshrl.u32 %v18172_v24, 16  ;;  %v18174_v14 = vshll.u32 %v18172_v24, 16  ;;  %8949 = vmatprep.subr.bf16.mxu0 %v9162_v54  ;;  %8993 = vmatprep.subr.bf16.mxu1 %v9162_v54 }
 0x3fb   : > { %v2810_v30 = vrot.slane %v18171_v3, 6  ;;  %v2818_v49 = vshrl.u32 %v9278_v11, 16  ;;  %7366 = vrot.lane.b32.xlu0 %v8883_v44, %s9468_s11  ;;  %v2832_v55 = vrot.slane %v2830_v56, 4  ;;  %v2837_v17 = vor.u32 %v2836_v27, %v2835_v61  ;;  %v15352_v44 = vpop.permute.xlu0 %7280  ;;  %8950 = vmatpush3.bf16.msra.mxu0 %v9162_v54  ;;  %v9163_v61 = vld [vmem:[%s16752_s1 + $0x18] sm:$0xff]   ;;  %s16692_s11 = scalar_lea.hbm %s16754_s3, %s8921_s8 }
 0x3fc   : > { %v2813_v36 = vrot.slane %v18173_v21, 5  ;;  %v2814_v28 = vrot.slane %v18174_v14, 6  ;;  %v18176_v63 = vshll.u32 %v18175_v59, 16  ;;  %v3178_v15 = vsel %vm9604_vm2, %v15291_v52, %v15233_v45  ;;  %9000 = vmatpush3.bf16.msra.mxu1 %v9162_v54  ;;  %v9280_v14 = vld [vmem:[%s9559_s30 + $0x7c] sm:$0xf]  ;;  %8951 = vmatprep.subr.bf16.mxu0 %v9163_v61 }
 0x3fd   : > { %v2811_v41 = vor.u32 %v2810_v30, %v2809_v19  ;;  %v2831_v3 = vsel %vm10174_vm8, %v2827_v22, %v2830_v56  ;;  %v2820_v21 = vrot.slane %v2818_v49, 5  ;;  %v3188_v27 = vsel %vm9604_vm2, %v15298_v9, %v15273_v20  ;;  %v9279_v19 = vld [vmem:[%s9559_s30 + $0x78] sm:$0xf]  ;;  %8994 = vmatprep.subr.bf16.mxu1 %v9163_v61 }
 0x3fe   : > { %v2821_v33 = vrot.slane %v18176_v63, 6  ;;  %v2815_v24 = vor.u32 %v2814_v28, %v2813_v36  ;;  %v2838_v45 = vsel %vm10174_vm8, %v2832_v55, %v2837_v17  ;;  %v8324_v56 = vrot.slane %v9279_v19, 10  ;;  %v9281_v49 = vld [vmem:[%s9559_s30 + $0x18] sm:$0xf]  ;;  %v9282_v17 = vld [vmem:[%s9559_s30 + $0x1c] sm:$0xf] }
 0x3ff   : > { %v2812_v52 = vrot.slane %v2811_v41, 4  ;;  %v8709_v30 = vcombine.low %v2831_v3, %v2838_v45  ;;  %v2987_v28 = vrot.slane %v9280_v14, 6  ;;  %v2990_v9 = vrot.slane %v9278_v11, 6  ;;  %v15375_v11 = vpop.permute.xlu1 %7298  ;;  %8952 = vmatpush3.bf16.msra.mxu0 %v9163_v61  ;;  %v9164_v19 = vld [vmem:[%s16752_s1 + $0x20] sm:$0xff]  }
 0x400   : > { %v2817_v22 = vrot.slane %v2815_v24, 4  ;;  %v2822_v36 = vor.u32 %v2821_v33, %v2820_v21  ;;  %v8316_v55 = vrot.slane %v9281_v49, 10  ;;  %v2931_v41 = vrot.slane %v9282_v17, 6  ;;  %v9283_v33 = vld [vmem:[%s9559_s30 + $0x20] sm:$0x3]  ;;  %9001 = vmatpush3.bf16.msra.mxu1 %v9163_v61  ;;  %8953 = vmatprep.subr.bf16.mxu0 %v9164_v19  ;;  %v18177_v49 = vld [vmem:[#allocation227_spill] sm:$0xff] }
 0x401   : > { %v2816_v20 = vsel %vm10174_vm8, %v2812_v52, %v2815_v24  ;;  %6011 = vrot.lane.b32.xlu1 %v8709_v30, %s9473_s26  ;;  %v2988_v59 = vsel %vm10433_vm11, %v8324_v56, %v2987_v28  ;;  %v2989_v63 = vrot.slane %v2987_v28, 4  ;;  %v2934_v3 = vrot.slane %v9283_v33, 6  ;;  %8995 = vmatprep.subr.bf16.mxu1 %v9164_v19  ;;  %v18178_v17 = vld [vmem:[#allocation228_spill] sm:$0xff] }
 0x402   : > { %v2823_v54 = vsel %vm10174_vm8, %v2817_v22, %v2822_v36  ;;  %v8759_v24 = vcombine.low %v3370_v57, %v3380_v12  ;;  %v2932_v45 = vsel %vm10433_vm11, %v8316_v55, %v2931_v41  ;;  %v2933_v52 = vrot.slane %v2931_v41, 4  ;;  %v15396_v57 = vpop.permute.xlu0 %7282  ;;  %v18179_v41 = vld [vmem:[#allocation229_spill] sm:$0xff]  ;;  %v18180_v33 = vld [vmem:[#allocation232_spill] sm:$0xff] }
 0x403   : > { %v8708_v21 = vcombine.low %v2816_v20, %v2823_v54  ;;  %v8751_v56 = vcombine.low %v3178_v15, %v3188_v27  ;;  %v2991_v58 = vsel %vm10433_vm11, %v2989_v63, %v2990_v9  ;;  %v8325_v30 = vrot.slane %v9284_v42, 10  ;;  %v9286_v15 = vld [vmem:[%s9559_s30 + $0x24] sm:$0xf]  ;;  %v9287_v20 = vld [vmem:[%s9559_s30 + $0x28] sm:$0xf]  ;;  %8954 = vmatpush3.bf16.msra.mxu0 %v9164_v19 }
 0x404   : > { %v2994_v6 = vrot.slane %v9285_v4, 6  ;;  %v8724_v12 = vcombine.low %v2988_v59, %v2991_v58  ;;  %v2935_v61 = vsel %vm10433_vm11, %v2933_v52, %v2934_v3  ;;  %v2997_v22 = vrot.slane %v15321_v43, 6  ;;  %v9288_v59 = vld [vmem:[%s9559_s30 + $0x2c] sm:$0x3]  ;;  %9002 = vmatpush3.bf16.msra.mxu1 %v9164_v19  ;;  %v18182_v58 = vld [vmem:[#allocation231_spill] sm:$0xff] }
 0x405   : > { %6009 = vrot.lane.b32.xlu0 %v8708_v21, %s9473_s26  ;;  %v8317_v27 = vrot.slane %v9286_v15, 10  ;;  %v8716_v36 = vcombine.low %v2932_v45, %v2935_v61  ;;  %v2938_v9 = vrot.slane %v9287_v20, 6  ;;  %v7392_v55 = vsel %vm6185_vm12, %v15268_v29, %v18177_v49  ;;  %v9165_v29 = vld [vmem:[%s16752_s1 + $0x28] sm:$0xff]   ;;  %v15431_v45 = vpop.permute.xlu1 %7376  ;;  %v18185_v61 = vld [vmem:[#allocation235_spill] sm:$0xff]  ;;  %v18186_v15 = vld [vmem:[#allocation236_spill] sm:$0xff] }
 0x406   : > { %v2995_v14 = vsel %vm10433_vm11, %v8325_v30, %v2994_v6  ;;  %v2996_v28 = vrot.slane %v2994_v6, 4  ;;  %v15412_v43 = vsel %vm17291_vm4, %v15120_v46, %v18178_v17  ;;  %v15417_v54 = vsel %vm17291_vm4, %v15124_v16, %v18179_v41  ;;  %6089 = vrot.lane.b32.xlu1 %v8724_v12, %s9474_s18  ;;  %v18181_v52 = vld [vmem:[#allocation230_spill] sm:$0xff]  ;;  %v18183_v30 = vld [vmem:[#allocation233_spill] sm:$0xff]  ;;  %8955 = vmatprep.subr.bf16.mxu0 %v9165_v29  ;;  %v15460_v41 = vld [vmem:[%s16752_s1 + $0x30] ss:$0 sps:$4 sm:$0x33]  }
 0x407   : > { %v2941_v63 = vrot.slane %v9288_v59, 6  ;;  %v7453_v46 = vsel %vm6234_vm13, %v15254_v13, %v18180_v33  ;;  %v2939_v16 = vsel %vm10433_vm11, %v8317_v27, %v2938_v9  ;;  %v2940_v21 = vrot.slane %v2938_v9, 4  ;;  %v18184_v6 = vld [vmem:[#allocation234_spill] sm:$0xff]  ;;  %v9289_v49 = vld [vmem:[%s9559_s30 + $0x84] sm:$0xf]  ;;  %18190 = vst [vmem:[#allocation218_spill] sm:$0xff] %v15460_v41  ;;  %8996 = vmatprep.subr.bf16.mxu1 %v9165_v29  ;;  %8956 = vmatpush3.bf16.msra.mxu0 %v9165_v29 }
 0x408   : > { %v2998_v3 = vsel %vm10433_vm11, %v2996_v28, %v2997_v22  ;;  %v7419_v19 = vsel %vm6185_vm12, %v8759_v24, %v18181_v52  ;;  %v7395_v42 = vsel %vm6185_vm12, %v8751_v56, %v18182_v58  ;;  %v7437_v13 = vsel %vm6234_vm13, %v7392_v55, %v18183_v30  ;;  %v15448_v28 = vpop.permute.xlu0 %7360  ;;  %v18188_v56 = vld [vmem:[#allocation237_spill] sm:$0xff]  ;;  %v9290_v55 = vld [vmem:[%s9559_s30 + $0x88] sm:$0xf]  ;;  %v18191_v59 = vld [vmem:[#allocation239_spill] sm:$0xff]  ;;  %9003 = vmatpush3.bf16.msra.mxu1 %v9165_v29 }
 0x409   : > { %6073 = vrot.lane.b32.xlu0 %v8716_v36, %s9474_s18  ;;  %v8725_v4 = vcombine.low %v2995_v14, %v2998_v3  ;;  %v7455_v12 = vsel %vm6234_vm13, %v7419_v19, %v18184_v6  ;;  %v7439_v22 = vsel %vm6234_vm13, %v7395_v42, %v18185_v61  ;;  %v7485_v27 = vsel %vm6267_vm14, %v7453_v46, %v18186_v15  ;;  %v18189_v14 = vld [vmem:[#allocation238_spill] sm:$0xff]  ;;  %v18192_v33 = vld [vmem:[#allocation117_spill] sm:$0xff] }
 0x40a   : > { %v2942_v24 = vsel %vm10433_vm11, %v2940_v21, %v2941_v63  ;;  %18187 = vst [vmem:[#allocation217_spill] sm:$0xff] %v15448_v28  ;;  %v7469_v36 = vsel %vm6267_vm14, %v7437_v13, %v18188_v56  ;;  %v7487_v20 = vsel %vm6267_vm14, %v7455_v12, %v18189_v14  ;;  %v8740_v17 = vcombine.low %v9289_v49, %v9290_v55  ;;  %v18195_v19 = vld [vmem:[#allocation118_spill] sm:$0xff]  ;;  %v9292_v30 = vld [vmem:[%s9559_s30 + $0x24] sm:$0xf]  ;;  %v18200_v56 = vld [vmem:[#allocation240_spill] sm:$0xff] }
 0x40b   : > { %6091 = vrot.lane.b32.xlu1 %v8725_v4, %s9474_s18  ;;  %v8717_v9 = vcombine.low %v2939_v16, %v2942_v24  ;;  %v7471_v63 = vsel %vm6267_vm14, %v7439_v22, %v18191_v59  ;;  %v18193_v46 = vshrl.u32 %v18192_v33, 16  ;;  %v18194_v21 = vshll.u32 %v18192_v33, 16  ;;  %v9291_v42 = vld [vmem:[%s9559_s30 + $0x28] sm:$0xf]  ;;  %v15476_v12 = vld [vmem:[%s9559_s30 + $0xa4] sm:$0x3]  ;;  %9005 = vmatprep.subr.msk.bf16.mxu0 %vm1030_vm9, %v15460_v41 }
 0x40c   : > { %v18196_v16 = vshrl.u32 %v18195_v19, 16  ;;  %v8732_v13 = vcombine.low %v9292_v30, %v9291_v42  ;;  %v18197_v4 = vshll.u32 %v18195_v19, 16  ;;  %v2863_v61 = vshrl.u32 %v15476_v12, 16  ;;  %v18198_v22 = vld [vmem:[#allocation119_spill] sm:$0xff]  ;;  %v18202_v55 = vld [vmem:[#allocation120_spill] sm:$0xff]  ;;  %v15489_v19 = vpop.permute.xlu1 %6820  ;;  %9006 = vmatprep.subr.msk.bf16.mxu1 %vm1030_vm9, %v15460_v41  ;;  %v18206_v29 = vld [vmem:[#allocation241_spill] sm:$0xff] }
 0x40d   : > { %v2854_v3 = vrot.slane %v18193_v46, 5  ;;  %v2855_v52 = vrot.slane %v18194_v21, 6  ;;  %6075 = vrot.lane.b32.xlu0 %v8717_v9, %s9474_s18  ;;  %v18199_v15 = vshrl.u32 %v18198_v22, 16  ;;  %v7517_v14 = vsel %vm17293_vm15, %v7485_v27, %v18200_v56  ;;  %18205 = vst [vmem:[#allocation219_spill] sm:$0xff] %v15489_v19  ;;  %v9295_v42 = vld [vmem:[%s9559_s30 + $0x90] sm:$0xf]  ;;  %v15510_v19 = vpop.permute.xlu0 %6804 }
 0x40e   : > { %v2858_v58 = vrot.slane %v18196_v16, 5  ;;  %v2859_v6 = vrot.slane %v18197_v4, 6  ;;  %v18201_v9 = vshll.u32 %v18198_v22, 16  ;;  %v18203_v59 = vshrl.u32 %v18202_v55, 16  ;;  %v9294_v16 = vld [vmem:[%s9559_s30 + $0x94] sm:$0xf] }
 0x40f   : > { %v2839_v24 = vrot.slane %v18199_v15, 5  ;;  %v18204_v46 = vshll.u32 %v18202_v55, 16  ;;  %v7501_v27 = vsel %vm17293_vm15, %v7469_v36, %v18206_v29  ;;  %6169 = vrot.lane.b32.xlu1 %v8740_v17, %s9475_s28  ;;  %v8741_v30 = vcombine.low %v9295_v42, %v9294_v16  ;;  %v15501_v22 = vld [vmem:[%s9559_s30 + $0x98] sm:$0x3]  ;;  %v18207_v56 = vld [vmem:[#allocation242_spill] sm:$0xff]  ;;  %18210 = vst [vmem:[#allocation220_spill] sm:$0xff] %v15510_v19 }
 0x410   : > { %v2840_v49 = vrot.slane %v18201_v9, 6  ;;  %v2843_v33 = vrot.slane %v18203_v59, 5  ;;  %v2856_v4 = vor.u32 %v2855_v52, %v2854_v3  ;;  %v2848_v15 = vshrl.u32 %v15501_v22, 16  ;;  %v18208_v36 = vld [vmem:[#allocation146_spill] sm:$0xff]  ;;  %v9297_v16 = vld [vmem:[%s9559_s30 + $0x34] sm:$0xf] }
 0x411   : > { %v2844_v21 = vrot.slane %v18204_v46, 6  ;;  %v7519_v9 = vsel %vm17293_vm15, %v7487_v20, %v18207_v56  ;;  %v15506_v55 = vor.u32 %v2859_v6, %v2858_v58  ;;  %v2865_v59 = vrot.slane %v2863_v61, 5  ;;  %v18211_v17 = vld [vmem:[#allocation202_spill] sm:$0xff]  ;;  %6153 = vrot.lane.b32.xlu0 %v8732_v13, %s9475_s28  ;;  %v9298_v42 = vld [vmem:[%s9559_s30 + $0x30] sm:$0xf] }
 0x412   : > { %v18209_v46 = vshll.u32 %v18208_v36, 16  ;;  %v18212_v41 = vshrl.u32 %v18211_v17, 16  ;;  %v18213_v3 = vshll.u32 %v18211_v17, 16  ;;  %v8733_v20 = vcombine.low %v9298_v42, %v9297_v16  ;;  %v18214_v36 = vld [vmem:[#allocation149_spill] sm:$0xff]  ;;  %v18216_v13 = vld [vmem:[#allocation203_spill] sm:$0xff] }
 0x413   : > { %v2841_v58 = vor.u32 %v2840_v49, %v2839_v24  ;;  %v15521_v6 = vsel %vm17293_vm15, %v7471_v63, %v14482_v40  ;;  %v15523_v61 = vor.u32 %v2844_v21, %v2843_v33  ;;  %v2850_v56 = vrot.slane %v2848_v15, 5  ;;  %6171 = vrot.lane.b32.xlu1 %v8741_v30, %s9475_s28  ;;  %v15544_v15 = vpop.permute.xlu1 %7378  ;;  %v18220_v30 = vld [vmem:[#allocation204_spill] sm:$0xff] }
 0x414   : > { %v2866_v29 = vrot.slane %v18209_v46, 6  ;;  %v3384_v28 = vrot.slane %v18212_v41, 4  ;;  %v3387_v52 = vrot.slane %v18213_v3, 5  ;;  %v18215_v46 = vshll.u32 %v18214_v36, 16  ;;  %18219 = vst [vmem:[#allocation221_spill] sm:$0xff] %v15544_v15 }
 0x415   : > { %v15529_v17 = vsel %vm6333_vm0, %v7517_v14, %v14501_v37  ;;  %v18217_v3 = vshll.u32 %v18216_v13, 16  ;;  %v18218_v24 = vshrl.u32 %v18216_v13, 16  ;;  %v2857_v40 = vrot.slane %v2856_v4, 4  ;;  %v9299_v37 = vld [vmem:[%s9559_s30 + $0x94] sm:$0xf]  ;;  %6155 = vrot.lane.b32.xlu0 %v8733_v20, %s9475_s28 }
 0x416   : > { %v2851_v41 = vrot.slane %v18215_v46, 6  ;;  %v15540_v63 = vsel %vm6333_vm0, %v7501_v27, %v14505_v34  ;;  %v2862_v33 = vrot.slane %v15506_v55, 4  ;;  %v2867_v21 = vor.u32 %v2866_v29, %v2865_v59  ;;  %v18222_v27 = vld [vmem:[#allocation205_spill] sm:$0xff] }
 0x417   : > { %v15533_v19 = vrot.slane %v18217_v3, 5  ;;  %v3397_v49 = vrot.slane %v18218_v24, 4  ;;  %v3001_v14 = vrot.slane %v9299_v37, 6  ;;  %v15548_v16 = vsel %vm6333_vm0, %v7519_v9, %v14524_v10  ;;  %v9300_v3 = vld [vmem:[%s9559_s30 + $0x34] sm:$0xf]  ;;  %v15559_v10 = vpop.permute.xlu0 %7362  ;;  %7688 = vrot.lane.b32.xlu1 %v15206_v0, %s9476_s29 }
 0x418   : > { %v3388_v42 = vor.u32 %v3387_v52, %v3384_v28  ;;  %v18221_v36 = vshll.u32 %v18220_v30, 16  ;;  %v2842_v34 = vrot.slane %v2841_v58, 4  ;;  %v18223_v46 = vshrl.u32 %v18222_v27, 16  ;;  %18224 = vst [vmem:[#allocation170_spill] sm:$0xff] %v15559_v10  ;;  %v9301_v58 = vld [vmem:[%s9559_s30 + $0x90] sm:$0xf] }
 0x419   : > { %v2847_v29 = vrot.slane %v15523_v61, 4  ;;  %v2852_v13 = vor.u32 %v2851_v41, %v2850_v56  ;;  %v2945_v24 = vrot.slane %v9300_v3, 6  ;;  %v3398_v28 = vor.u32 %v3397_v49, %v15533_v19  ;;  %v9302_v30 = vld [vmem:[%s9559_s30 + $0xa0] sm:$0xf]  ;;  %7672 = vrot.lane.b32.xlu0 %v15211_v32, %s9476_s29 }
 0x41a   : > { %v15552_v4 = vrot.slane %v18221_v36, 5  ;;  %v3192_v59 = vrot.slane %v18223_v46, 4  ;;  %v18225_v9 = vshll.u32 %v18222_v27, 16  ;;  %v2861_v20 = vsel %vm10174_vm8, %v2857_v40, %v15506_v55  ;;  %v18226_v27 = vld [vmem:[#allocation206_spill] sm:$0xff]  ;;  %v9303_v40 = vld [vmem:[%s9559_s30 + $0x30] sm:$0xf] }
 0x41b   : > { %v8326_v56 = vrot.slane %v9301_v58, 10  ;;  %v2868_v41 = vsel %vm10174_vm8, %v2862_v33, %v2867_v21  ;;  %v3003_v49 = vrot.slane %v3001_v14, 4  ;;  %v3004_v37 = vrot.slane %v15501_v22, 6  ;;  %v9304_v58 = vld [vmem:[%s9559_s30 + $0x38] sm:$0x3]  ;;  %7690 = vrot.lane.b32.xlu1 %v15412_v43, %s9476_s29 }
 0x41c   : > { %v3195_v52 = vrot.slane %v18225_v9, 5  ;;  %v3008_v36 = vrot.slane %v9302_v30, 6  ;;  %v18227_v46 = vshll.u32 %v18226_v27, 16  ;;  %v18228_v0 = vshrl.u32 %v18226_v27, 16  ;;  %v15590_v27 = vpop.permute.xlu1 %6822 }
 0x41d   : > { %v2846_v55 = vsel %vm10174_vm8, %v2842_v34, %v15523_v61  ;;  %v8318_v33 = vrot.slane %v9303_v40, 10  ;;  %v2853_v22 = vsel %vm10174_vm8, %v2847_v29, %v2852_v13  ;;  %v2947_v21 = vrot.slane %v2945_v24, 4  ;;  %v9306_v29 = vld [vmem:[%s9559_s30 + $0x9c] sm:$0xf]  ;;  %7674 = vrot.lane.b32.xlu0 %v15417_v54, %s9476_s29 }
 0x41e   : > { %v15576_v3 = vrot.slane %v18227_v46, 5  ;;  %v3205_v9 = vrot.slane %v18228_v0, 4  ;;  %v2948_v30 = vrot.slane %v9304_v58, 6  ;;  %v9305_v46 = vld [vmem:[%s9559_s30 + $0x40] sm:$0xf]  ;;  %v3389_v0 = vrot.slane %v3388_v42, 4 }
 0x41f   : > { %v2952_v10 = vrot.slane %v9305_v46, 6  ;;  %v3196_v15 = vor.u32 %v3195_v52, %v3192_v59  ;;  %v8711_v32 = vcombine.low %v2861_v20, %v2868_v41  ;;  %v3002_v61 = vsel %vm10433_vm11, %v8326_v56, %v3001_v14  ;;  %v15600_v46 = vpop.permute.xlu0 %6806  ;;  %v9307_v20 = vld [vmem:[%s9559_s30 + $0x3c] sm:$0xf] }
 0x420   : > { %v3005_v34 = vsel %vm10433_vm11, %v3003_v49, %v3004_v37  ;;  %v8327_v13 = vrot.slane %v9306_v29, 10  ;;  %v3010_v40 = vrot.slane %v3008_v36, 4  ;;  %v3011_v58 = vrot.slane %v15476_v12, 6  ;;  %v9308_v49 = vld [vmem:[%s9559_s30 + $0x44] sm:$0x3] }
 0x421   : > { %v3399_v42 = vrot.slane %v3398_v28, 4  ;;  %v3206_v59 = vor.u32 %v3205_v9, %v15576_v3  ;;  %v8710_v43 = vcombine.low %v2846_v55, %v2853_v22  ;;  %v2946_v14 = vsel %vm10433_vm11, %v8318_v33, %v2945_v24  ;;  %6015 = vrot.lane.b32.xlu1 %v8711_v32, %s9473_s26  ;;  %v18229_v55 = vld [vmem:[#allocation207_spill] sm:$0xff] }
 0x422   : > { %v2949_v52 = vsel %vm10433_vm11, %v2947_v21, %v2948_v30  ;;  %v8319_v56 = vrot.slane %v9307_v20, 10  ;;  %v2954_v41 = vrot.slane %v2952_v10, 4  ;;  %v2955_v12 = vrot.slane %v9308_v49, 6 }
 0x423   : > { %v7535_v28 = vsel %vm6333_vm0, %v15521_v6, %v14552_v8  ;;  %v7581_v54 = vsel %vm6366_vm1, %v15529_v17, %v14592_v38  ;;  %v7565_v24 = vsel %vm6366_vm1, %v15540_v63, %v14603_v62  ;;  %v8726_v37 = vcombine.low %v3002_v61, %v3005_v34  ;;  %v15627_v6 = vpop.permute.xlu1 %6900  ;;  %6013 = vrot.lane.b32.xlu0 %v8710_v43, %s9473_s26 }
 0x424   : > { %v3197_v9 = vrot.slane %v3196_v15, 4  ;;  %v18230_v33 = vshll.u32 %v18229_v55, 16  ;;  %v3009_v21 = vsel %vm10433_vm11, %v8327_v13, %v3008_v36  ;;  %v3012_v8 = vsel %vm10433_vm11, %v3010_v40, %v3011_v58  ;;  %v18231_v15 = vld [vmem:[#allocation211_spill] sm:$0xff] }
 0x425   : > { %v3394_v38 = vsel %vm9604_vm2, %v3389_v0, %v15533_v19  ;;  %v3404_v62 = vsel %vm9604_vm2, %v3399_v42, %v15552_v4  ;;  %v3207_v17 = vrot.slane %v3206_v59, 4  ;;  %v8718_v63 = vcombine.low %v2946_v14, %v2949_v52  ;;  %v15644_v0 = vpop.permute.xlu0 %6884  ;;  %6093 = vrot.lane.b32.xlu1 %v8726_v37, %s9474_s18  ;;  %v18234_v58 = vld [vmem:[#allocation255_spill] sm:$0xff]  ;;  %v18235_v42 = vld [vmem:[#allocation256_spill] sm:$0xff] }
 0x426   : > { %v3211_v22 = vrot.slane %v18230_v33, 5  ;;  %v18232_v30 = vshrl.u32 %v18231_v15, 16  ;;  %v18233_v32 = vshll.u32 %v18231_v15, 16  ;;  %v2953_v34 = vsel %vm10433_vm11, %v8319_v56, %v2952_v10  ;;  %v18243_v33 = vld [vmem:[#allocation215_spill] sm:$0xff] }
 0x427   : > { %v2956_v19 = vsel %vm10433_vm11, %v2954_v41, %v2955_v12  ;;  %v7583_v4 = vsel %vm6366_vm1, %v15548_v16, %v14638_v51  ;;  %v7567_v29 = vsel %vm6366_vm1, %v7535_v28, %v14655_v31  ;;  %v7613_v13 = vsel %vm17292_vm3, %v7581_v54, %v14676_v47  ;;  %v18236_v47 = vld [vmem:[#allocation210_spill] sm:$0xff]  ;;  %6077 = vrot.lane.b32.xlu0 %v8718_v63, %s9474_s18  ;;  %v15680_v37 = vpop.permute.xlu1 %6902 }
 0x428   : > { %v3408_v36 = vrot.slane %v18232_v30, 4  ;;  %v3411_v61 = vrot.slane %v18233_v32, 5  ;;  %v8727_v40 = vcombine.low %v3009_v21, %v3012_v8  ;;  %v7597_v10 = vsel %vm17292_vm3, %v7565_v24, %v18234_v58  ;;  %v18246_v63 = vld [vmem:[#allocation258_spill] sm:$0xff]  ;;  %v18247_v32 = vld [vmem:[#allocation121_spill] sm:$0xff] }
 0x429   : > { %v15658_v59 = vsel %vm17292_vm3, %v7583_v4, %v18235_v42  ;;  %v8760_v43 = vcombine.low %v3394_v38, %v3404_v62  ;;  %v3202_v51 = vsel %vm9604_vm2, %v3197_v9, %v15576_v3  ;;  %v3212_v31 = vsel %vm9604_vm2, %v3207_v17, %v3211_v22  ;;  %v18239_v3 = vld [vmem:[#allocation213_spill] sm:$0xff]  ;;  %v9310_v62 = vld [vmem:[%s9559_s30 + $0x9c] sm:$0xf] }
 0x42a   : > { %v18237_v16 = vshll.u32 %v18236_v47, 16  ;;  %v18238_v52 = vshrl.u32 %v18236_v47, 16  ;;  %v8719_v56 = vcombine.low %v2953_v34, %v2956_v19  ;;  %v15674_v41 = vsel %vm17292_vm3, %v7567_v29, %v14725_v18  ;;  %v18242_v9 = vld [vmem:[#allocation257_spill] sm:$0xff]  ;;  %6095 = vrot.lane.b32.xlu1 %v8727_v40, %s9474_s18  ;;  %v15705_v19 = vpop.permute.xlu0 %6886  ;;  %v18249_v29 = vld [vmem:[#allocation212_spill] sm:$0xff]  ;;  %v18252_v47 = vld [vmem:[#allocation122_spill] sm:$0xff] }
 0x42b   : > { %v3412_v49 = vor.u32 %v3411_v61, %v3408_v36  ;;  %v18240_v12 = vshrl.u32 %v18239_v3, 16  ;;  %v18241_v54 = vshll.u32 %v18239_v3, 16  ;;  %v15684_v55 = vsel %vm17291_vm4, %v7613_v13, %v18242_v9  ;;  %v9309_v38 = vld [vmem:[%s9559_s30 + $0xa0] sm:$0xf] }
 0x42c   : > { %v15667_v14 = vrot.slane %v18237_v16, 5  ;;  %v3421_v20 = vrot.slane %v18238_v52, 4  ;;  %v18244_v22 = vshll.u32 %v18243_v33, 16  ;;  %v18245_v18 = vshrl.u32 %v18243_v33, 16  ;;  %6079 = vrot.lane.b32.xlu0 %v8719_v56, %s9474_s18  ;;  %v9311_v58 = vld [vmem:[%s9559_s30 + $0x40] sm:$0xf] }
 0x42d   : > { %v3216_v28 = vrot.slane %v18240_v12, 4  ;;  %v3219_v24 = vrot.slane %v18241_v54, 5  ;;  %v8742_v17 = vcombine.low %v9310_v62, %v9309_v38  ;;  %v15697_v15 = vsel %vm17291_vm4, %v7597_v10, %v18246_v63  ;;  %v9313_v56 = vld [vmem:[%s9559_s30 + $0xac] sm:$0xf]  ;;  %v9314_v54 = vld [vmem:[%s9559_s30 + $0xa8] sm:$0xf] }
 0x42e   : > { %v15688_v21 = vrot.slane %v18244_v22, 5  ;;  %v3229_v8 = vrot.slane %v18245_v18, 4  ;;  %v15701_v30 = vsel %vm6185_vm12, %v8760_v43, %v14776_v5  ;;  %v8752_v36 = vcombine.low %v3202_v51, %v3212_v31  ;;  %v9312_v5 = vld [vmem:[%s9559_s30 + $0x3c] sm:$0xf]  ;;  %v18257_v62 = vld [vmem:[#allocation151_spill] sm:$0xff] }
 0x42f   : > { %v18248_v61 = vshrl.u32 %v18247_v32, 16  ;;  %v3422_v4 = vor.u32 %v3421_v20, %v15667_v14  ;;  %v18250_v13 = vshll.u32 %v18249_v29, 16  ;;  %v8734_v10 = vcombine.low %v9312_v5, %v9311_v58  ;;  %6173 = vrot.lane.b32.xlu1 %v8742_v17, %s9475_s28  ;;  %v15728_v22 = vld [vmem:[%s9559_s30 + $0xbc] sm:$0x3]  ;;  %v15741_v29 = vpop.permute.xlu1 %6980  ;;  %v9317_v58 = vld [vmem:[%s9559_s30 + $0x4c] sm:$0xf] }
 0x430   : > { %v18251_v42 = vshll.u32 %v18247_v32, 16  ;;  %v15717_v51 = vrot.slane %v3412_v49, 4  ;;  %v3220_v31 = vor.u32 %v3219_v24, %v3216_v28  ;;  %v18253_v16 = vshrl.u32 %v18252_v47, 16  ;;  %v18255_v28 = vld [vmem:[#allocation216_spill] sm:$0xff] }
 0x431   : > { %v2884_v34 = vrot.slane %v18248_v61, 5  ;;  %v15710_v40 = vrot.slane %v18250_v13, 5  ;;  %v18254_v20 = vshll.u32 %v18252_v47, 16  ;;  %v3230_v12 = vor.u32 %v3229_v8, %v15688_v21  ;;  %v18259_v32 = vld [vmem:[#allocation124_spill] sm:$0xff]  ;;  %6157 = vrot.lane.b32.xlu0 %v8734_v10, %s9475_s28  ;;  %v9316_v13 = vld [vmem:[%s9559_s30 + $0x48] sm:$0xf] }
 0x432   : > { %v2885_v43 = vrot.slane %v18251_v42, 6  ;;  %v2888_v52 = vrot.slane %v18253_v16, 5  ;;  %v8743_v9 = vcombine.low %v9314_v54, %v9313_v56  ;;  %v2893_v49 = vshrl.u32 %v15728_v22, 16  ;;  %v15748_v16 = vpop.permute.xlu0 %6964 }
 0x433   : > { %v2889_v3 = vrot.slane %v18254_v20, 6  ;;  %v18256_v24 = vshll.u32 %v18255_v28, 16  ;;  %v18258_v8 = vshll.u32 %v18257_v62, 16  ;;  %v18260_v17 = vshrl.u32 %v18259_v32, 16  ;;  %v18262_v20 = vld [vmem:[#allocation125_spill] sm:$0xff] }
 0x434   : > { %v2886_v33 = vor.u32 %v2885_v43, %v2884_v34  ;;  %v3423_v34 = vrot.slane %v3422_v4, 4  ;;  %v8735_v5 = vcombine.low %v9316_v13, %v9317_v58  ;;  %v2895_v42 = vrot.slane %v2893_v49, 5  ;;  %6175 = vrot.lane.b32.xlu1 %v8743_v9, %s9475_s28  ;;  %v18265_v13 = vld [vmem:[#allocation153_spill] sm:$0xff] }
 0x435   : > { %v15733_v18 = vrot.slane %v18256_v24, 5  ;;  %v15735_v38 = vor.u32 %v2889_v3, %v2888_v52  ;;  %v2896_v63 = vrot.slane %v18258_v8, 6  ;;  %v2869_v61 = vrot.slane %v18260_v17, 5  ;;  %v9318_v24 = vld [vmem:[%s9559_s30 + $0xb0] sm:$0x3] }
 0x436   : > { %v18261_v43 = vshll.u32 %v18259_v32, 16  ;;  %v3221_v52 = vrot.slane %v3220_v31, 4  ;;  %v18263_v3 = vshrl.u32 %v18262_v20, 16  ;;  %v18264_v54 = vshll.u32 %v18262_v20, 16  ;;  %6159 = vrot.lane.b32.xlu0 %v8735_v5, %s9475_s28  ;;  %v9321_v5 = vld [vmem:[%s9559_s30 + $0x4c] sm:$0xf] }
 0x437   : > { %v2878_v4 = vshrl.u32 %v9318_v24, 16  ;;  %v3231_v62 = vrot.slane %v3230_v12, 4  ;;  %v2887_v10 = vrot.slane %v2886_v33, 4  ;;  %v2892_v49 = vrot.slane %v15735_v38, 4 }
 0x438   : > { %v2870_v47 = vrot.slane %v18261_v43, 6  ;;  %v2873_v56 = vrot.slane %v18263_v3, 5  ;;  %v2874_v28 = vrot.slane %v18264_v54, 6  ;;  %v2897_v32 = vor.u32 %v2896_v63, %v2895_v42  ;;  %7692 = vrot.lane.b32.xlu1 %v15684_v55, %s9476_s29 }
 0x439   : > { %v2880_v31 = vrot.slane %v2878_v4, 5  ;;  %v18266_v58 = vshll.u32 %v18265_v13, 16  ;;  %v7398_v20 = vsel %vm6185_vm12, %v8752_v36, %v14782_v7  ;;  %v7647_v12 = vsel %vm17291_vm4, %v15658_v59, %v14804_v48  ;;  %v9319_v7 = vld [vmem:[%s9559_s30 + $0xac] sm:$0xf]  ;;  %v9320_v59 = vld [vmem:[%s9559_s30 + $0xa8] sm:$0xf] }
 0x43a   : > { %v2871_v8 = vor.u32 %v2870_v47, %v2869_v61  ;;  %v2875_v17 = vor.u32 %v2874_v28, %v2873_v56  ;;  %v3418_v9 = vsel %vm9604_vm2, %v15717_v51, %v15667_v14  ;;  %v3428_v63 = vsel %vm9604_vm2, %v3423_v34, %v15710_v40  ;;  %v15773_v47 = vpop.permute.xlu1 %6982  ;;  %v15782_v34 = vpop.permute.xlu0 %6966  ;;  %v18267_v56 = vld [vmem:[#allocation259_spill] sm:$0xff]  ;;  %7676 = vrot.lane.b32.xlu0 %v15697_v15, %s9476_s29 }
 0x43b   : > { %v2881_v43 = vrot.slane %v18266_v58, 6  ;;  %v3015_v36 = vrot.slane %v9319_v7, 6  ;;  %v3226_v48 = vsel %vm9604_vm2, %v3221_v52, %v15688_v21  ;;  %v8328_v14 = vrot.slane %v9320_v59, 10  ;;  %v9325_v13 = vld [vmem:[%s9559_s30 + $0xb4] sm:$0xf]  ;;  %v18269_v7 = vld [vmem:[#allocation262_spill] sm:$0xff] }
 0x43c   : > { %v2872_v33 = vrot.slane %v2871_v8, 4  ;;  %v2877_v61 = vrot.slane %v2875_v17, 4  ;;  %v3018_v51 = vrot.slane %v9318_v24, 6  ;;  %v2959_v40 = vrot.slane %v9321_v5, 6  ;;  %v9322_v24 = vld [vmem:[%s9559_s30 + $0x48] sm:$0xf]  ;;  %7694 = vrot.lane.b32.xlu1 %v7647_v12, %s9476_s29 }
 0x43d   : > { %v2882_v42 = vor.u32 %v2881_v43, %v2880_v31  ;;  %v3236_v3 = vsel %vm9604_vm2, %v3231_v62, %v15733_v18  ;;  %v2891_v21 = vsel %vm10174_vm8, %v2887_v10, %v15735_v38  ;;  %v2898_v55 = vsel %vm10174_vm8, %v2892_v49, %v2897_v32  ;;  %v9323_v10 = vld [vmem:[%s9559_s30 + $0x50] sm:$0x3]  ;;  %v9324_v8 = vld [vmem:[%s9559_s30 + $0xb8] sm:$0xf] }
 0x43e   : > { %v3017_v52 = vrot.slane %v3015_v36, 4  ;;  %v7631_v54 = vsel %vm17291_vm4, %v15674_v41, %v18267_v56  ;;  %v8761_v28 = vcombine.low %v3418_v9, %v3428_v63  ;;  %v2876_v18 = vsel %vm10174_vm8, %v2872_v33, %v2875_v17  ;;  %v9326_v33 = vld [vmem:[%s9559_s30 + $0x58] sm:$0xf] }
 0x43f   : > { %v8320_v4 = vrot.slane %v9322_v24, 10  ;;  %v2883_v38 = vsel %vm10174_vm8, %v2877_v61, %v2882_v42  ;;  %v2961_v62 = vrot.slane %v2959_v40, 4  ;;  %v2962_v49 = vrot.slane %v9323_v10, 6  ;;  %v15812_v61 = vpop.permute.xlu1 %7060  ;;  %v18268_v42 = vld [vmem:[#allocation260_spill] sm:$0xff]  ;;  %7678 = vrot.lane.b32.xlu0 %v7631_v54, %s9476_s29  ;;  %v18273_v24 = vld [vmem:[#allocation265_spill] sm:$0xff] }
 0x440   : > { %v3022_v32 = vrot.slane %v9324_v8, 6  ;;  %v8753_v41 = vcombine.low %v3226_v48, %v3236_v3  ;;  %v8713_v31 = vcombine.low %v2891_v21, %v2898_v55  ;;  %v3016_v15 = vsel %vm10433_vm11, %v8328_v14, %v3015_v36  ;;  %v15822_v14 = vpop.permute.xlu0 %7044  ;;  %v9328_v21 = vld [vmem:[%s9559_s30 + $0x5c] sm:$0x3]  ;;  %v18275_v8 = vld [vmem:[#allocation198_spill] sm:$0xff] }
 0x441   : > { %v3019_v17 = vsel %vm10433_vm11, %v3017_v52, %v3018_v51  ;;  %v8329_v58 = vrot.slane %v9325_v13, 10  ;;  %v3025_v9 = vrot.slane %v15728_v22, 6  ;;  %v2966_v63 = vrot.slane %v9326_v33, 6  ;;  %v9327_v51 = vld [vmem:[%s9559_s30 + $0x54] sm:$0xf]  ;;  %v18270_v52 = vld [vmem:[#allocation261_spill] sm:$0xff] }
 0x442   : > { %v3024_v43 = vrot.slane %v3022_v32, 4  ;;  %v7425_v12 = vsel %vm6185_vm12, %v8761_v28, %v18268_v42  ;;  %v7457_v36 = vsel %vm6234_vm13, %v15701_v30, %v18269_v7  ;;  %v8712_v48 = vcombine.low %v2876_v18, %v2883_v38  ;;  %v18271_v30 = vld [vmem:[#allocation263_spill] sm:$0xff]  ;;  %v18272_v28 = vld [vmem:[#allocation264_spill] sm:$0xff]  ;;  %6019 = vrot.lane.b32.xlu1 %v8713_v31, %s9473_s26  ;;  %v18274_v38 = vld [vmem:[#allocation197_spill] sm:$0xff] }
 0x443   : > { %v2960_v59 = vsel %vm10433_vm11, %v8320_v4, %v2959_v40  ;;  %v2963_v22 = vsel %vm10433_vm11, %v2961_v62, %v2962_v49  ;;  %v8321_v5 = vrot.slane %v9327_v51, 10  ;;  %v2968_v3 = vrot.slane %v2966_v63, 4  ;;  %v18277_v31 = vld [vmem:[#allocation200_spill] sm:$0xff]  ;;  %v18280_v7 = vld [vmem:[#allocation201_spill] sm:$0xff] }
 0x444   : > { %v2969_v55 = vrot.slane %v9328_v21, 6  ;;  %v7401_v56 = vsel %vm6185_vm12, %v8753_v41, %v18270_v52  ;;  %v7441_v54 = vsel %vm6234_vm13, %v7398_v20, %v18271_v30  ;;  %v7459_v18 = vsel %vm6234_vm13, %v7425_v12, %v18272_v28  ;;  %v18276_v41 = vld [vmem:[#allocation199_spill] sm:$0xff]  ;;  %6017 = vrot.lane.b32.xlu0 %v8712_v48, %s9473_s26  ;;  %v18278_v33 = vld [vmem:[#allocation168_spill] sm:$0xff] }
 0x445   : > { %v8728_v40 = vcombine.low %v3016_v15, %v3019_v17  ;;  %v7443_v4 = vsel %vm6234_vm13, %v7401_v56, %v18273_v24  ;;  %v7489_v62 = vsel %vm6267_vm14, %v7457_v36, %v18274_v38  ;;  %v3023_v10 = vsel %vm10433_vm11, %v8329_v58, %v3022_v32  ;;  %v18279_v12 = vld [vmem:[#allocation167_spill] sm:$0xff]  ;;  %v18281_v51 = vld [vmem:[#allocation208_spill] sm:$0xff] }
 0x446   : > { %v3026_v49 = vsel %vm10433_vm11, %v3024_v43, %v3025_v9  ;;  %v7473_v20 = vsel %vm6267_vm14, %v7441_v54, %v18275_v8  ;;  %v7491_v13 = vsel %vm6267_vm14, %v7459_v18, %v18276_v41  ;;  %v7475_v15 = vsel %vm6267_vm14, %v7443_v4, %v18277_v31  ;;  %v15858_v9 = vpop.permute.xlu1 %7062 }
 0x447   : > { %v8720_v17 = vcombine.low %v2960_v59, %v2963_v22  ;;  %v7521_v42 = vsel %vm17293_vm15, %v7489_v62, %v18278_v33  ;;  %v7505_v32 = vsel %vm17293_vm15, %v7473_v20, %v18279_v12  ;;  %v2967_v58 = vsel %vm10433_vm11, %v8321_v5, %v2966_v63  ;;  %v18282_v59 = vld [vmem:[#allocation209_spill] sm:$0xff]  ;;  %6097 = vrot.lane.b32.xlu1 %v8728_v40, %s9474_s18  ;;  %v15867_v63 = vpop.permute.xlu0 %7046  ;;  %v18283_v5 = vld [vmem:[#allocation214_spill] sm:$0xff]  ;;  %v9330_v40 = vld [vmem:[%s9559_s30 + $0xb8] sm:$0xf] }
 0x448   : > { %v2970_v43 = vsel %vm10433_vm11, %v2968_v3, %v2969_v55  ;;  %v7523_v36 = vsel %vm17293_vm15, %v7491_v13, %v18280_v7  ;;  %v7507_v48 = vsel %vm17293_vm15, %v7475_v15, %v18281_v51  ;;  %v7553_v22 = vsel %vm6333_vm0, %v7521_v42, %v18282_v59  ;;  %v18287_v62 = vld [vmem:[#allocation128_spill] sm:$0xff]  ;;  %v18290_v15 = vld [vmem:[#allocation217_spill] sm:$0xff] }
 0x449   : > { %v8729_v21 = vcombine.low %v3023_v10, %v3026_v49  ;;  %v7537_v3 = vsel %vm6333_vm0, %v7505_v32, %v18283_v5  ;;  %v7555_v55 = vsel %vm6333_vm0, %v7523_v36, %v15201_v50  ;;  %v7539_v52 = vsel %vm6333_vm0, %v7507_v48, %v15218_v1  ;;  %6081 = vrot.lane.b32.xlu0 %v8720_v17, %s9474_s18  ;;  %v18291_v42 = vld [vmem:[#allocation244_spill] sm:$0xff]  ;;  %v18293_v7 = vld [vmem:[#allocation129_spill] sm:$0xff]  ;;  %v18296_v5 = vld [vmem:[#allocation130_spill] sm:$0xff] }
 0x44a   : > { %v7585_v56 = vsel %vm6366_vm1, %v7553_v22, %v15247_v39  ;;  %v7569_v30 = vsel %vm6366_vm1, %v7537_v3, %v15266_v2  ;;  %v7587_v54 = vsel %vm6366_vm1, %v7555_v55, %v15296_v35  ;;  %v7571_v28 = vsel %vm6366_vm1, %v7539_v52, %v15314_v26  ;;  %v9329_v39 = vld [vmem:[%s9559_s30 + $0xb4] sm:$0xf]  ;;  %v15913_v33 = vpop.permute.xlu1 %7140  ;;  %v9334_v59 = vld [vmem:[%s9559_s30 + $0xc4] sm:$0xf]  ;;  %v9335_v22 = vld [vmem:[%s9559_s30 + $0xc0] sm:$0xf] }
 0x44b   : > { %v8721_v18 = vcombine.low %v2967_v58, %v2970_v43  ;;  %v7617_v50 = vsel %vm17292_vm3, %v7585_v56, %v15341_v25  ;;  %v7601_v1 = vsel %vm17292_vm3, %v7569_v30, %v15352_v44  ;;  %v8744_v24 = vcombine.low %v9329_v39, %v9330_v40  ;;  %v18284_v2 = vld [vmem:[#allocation127_spill] sm:$0xff]  ;;  %6099 = vrot.lane.b32.xlu1 %v8729_v21, %s9474_s18  ;;  %v9333_v58 = vld [vmem:[%s9559_s30 + $0x58] sm:$0xf]  ;;  %v15935_v30 = vld [vmem:[%s9559_s30 + $0xc8] sm:$0x3] }
 0x44c   : > { %v18285_v4 = vshrl.u32 %v18284_v2, 16  ;;  %v18286_v26 = vshll.u32 %v18284_v2, 16  ;;  %v18288_v10 = vshrl.u32 %v18287_v62, 16  ;;  %v18289_v25 = vshll.u32 %v18287_v62, 16  ;;  %v15900_v44 = vld [vmem:[%s9559_s30 + $0xd4] sm:$0x3] }
 0x44d   : > { %v2923_v20 = vshrl.u32 %v15900_v44, 16  ;;  %v7619_v41 = vsel %vm17292_vm3, %v7587_v54, %v15375_v11  ;;  %v7603_v13 = vsel %vm17292_vm3, %v7571_v28, %v15396_v57  ;;  %v7649_v31 = vsel %vm17291_vm4, %v7617_v50, %v15431_v45  ;;  %6083 = vrot.lane.b32.xlu0 %v8721_v18, %s9474_s18  ;;  %v9332_v11 = vld [vmem:[%s9559_s30 + $0x54] sm:$0xf]  ;;  %v15922_v57 = vpop.permute.xlu0 %7124 }
 0x44e   : > { %v2914_v35 = vrot.slane %v18285_v4, 5  ;;  %v2915_v38 = vrot.slane %v18286_v26, 6  ;;  %v2918_v49 = vrot.slane %v18288_v10, 5  ;;  %v2919_v8 = vrot.slane %v18289_v25, 6  ;;  %v18302_v26 = vld [vmem:[#allocation243_spill] sm:$0xff] }
 0x44f   : > { %v15911_v17 = vsel %vm17291_vm4, %v7601_v1, %v18290_v15  ;;  %v18292_v12 = vshrl.u32 %v18291_v42, 16  ;;  %v8736_v43 = vcombine.low %v9332_v11, %v9333_v58  ;;  %v18294_v45 = vshrl.u32 %v18293_v7, 16  ;;  %6177 = vrot.lane.b32.xlu1 %v8744_v24, %s9475_s28  ;;  %v18299_v1 = vld [vmem:[#allocation7_spill] sm:$0xff]  ;;  %v9337_v11 = vld [vmem:[%s9559_s30 + $0x60] sm:$0xf] }
 0x450   : > { %v18295_v51 = vshll.u32 %v18293_v7, 16  ;;  %v8745_v21 = vcombine.low %v9335_v22, %v9334_v59  ;;  %v18297_v3 = vshrl.u32 %v18296_v5, 16  ;;  %v18298_v52 = vshll.u32 %v18296_v5, 16  ;;  %v18305_v24 = vld [vmem:[#allocation247_spill] sm:$0xff]  ;;  %v9338_v58 = vld [vmem:[%s9559_s30 + $0x64] sm:$0xf] }
 0x451   : > { %v15917_v32 = vrot.slane %v18292_v12, 4  ;;  %v2899_v36 = vrot.slane %v18294_v45, 5  ;;  %v2908_v54 = vshrl.u32 %v15935_v30, 16  ;;  %v2916_v28 = vor.u32 %v2915_v38, %v2914_v35  ;;  %6161 = vrot.lane.b32.xlu0 %v8736_v43, %s9475_s28 }
 0x452   : > { %v2900_v48 = vrot.slane %v18295_v51, 6  ;;  %v2903_v55 = vrot.slane %v18297_v3, 5  ;;  %v2904_v56 = vrot.slane %v18298_v52, 6  ;;  %v15939_v18 = vor.u32 %v2919_v8, %v2918_v49  ;;  %v18311_v3 = vld [vmem:[#allocation157_spill] sm:$0xff] }
 0x453   : > { %v2925_v50 = vrot.slane %v2923_v20, 5  ;;  %v18300_v39 = vshll.u32 %v18299_v1, 16  ;;  %v18301_v2 = vshll.u32 %v18291_v42, 16  ;;  %v18303_v62 = vshll.u32 %v18302_v26, 16  ;;  %v18308_v20 = vld [vmem:[#allocation245_spill] sm:$0xff]  ;;  %6179 = vrot.lane.b32.xlu1 %v8745_v21, %s9475_s28 }
 0x454   : > { %v18304_v25 = vshrl.u32 %v18302_v26, 16  ;;  %v18306_v35 = vshrl.u32 %v18305_v24, 16  ;;  %v18307_v49 = vshll.u32 %v18305_v24, 16  ;;  %v18309_v42 = vshll.u32 %v18308_v20, 16 }
 0x455   : > { %v2926_v40 = vrot.slane %v18300_v39, 6  ;;  %v15945_v4 = vrot.slane %v18301_v2, 5  ;;  %v15949_v10 = vrot.slane %v18303_v62, 5  ;;  %v8737_v7 = vcombine.low %v9337_v11, %v9338_v58  ;;  %v15978_v39 = vpop.permute.xlu1 %7142  ;;  %v18314_v2 = vld [vmem:[#allocation246_spill] sm:$0xff] }
 0x456   : > { %v15953_v15 = vrot.slane %v18304_v25, 4  ;;  %v15957_v38 = vrot.slane %v18306_v35, 4  ;;  %v15961_v8 = vrot.slane %v18307_v49, 5  ;;  %v15965_v12 = vrot.slane %v18309_v42, 5  ;;  %18313 = vst [vmem:[#allocation171_spill] sm:$0xff] %v15978_v39  ;;  %v15986_v25 = vpop.permute.xlu0 %7126 }
 0x457   : > { %v2901_v45 = vor.u32 %v2900_v48, %v2899_v36  ;;  %v18310_v51 = vshrl.u32 %v18308_v20, 16  ;;  %v15974_v22 = vor.u32 %v2904_v56, %v2903_v55  ;;  %v2910_v5 = vrot.slane %v2908_v54, 5  ;;  %18316 = vst [vmem:[#allocation169_spill] sm:$0xff] %v15986_v25  ;;  %v18317_v54 = vld [vmem:[#allocation221_spill] sm:$0xff]  ;;  %6163 = vrot.lane.b32.xlu0 %v8737_v7, %s9475_s28  ;;  %7696 = vrot.lane.b32.xlu1 %v7649_v31, %s9476_s29 }
 0x458   : > { %v18312_v52 = vshll.u32 %v18311_v3, 16  ;;  %v18315_v26 = vshll.u32 %v18314_v2, 16  ;;  %v2917_v62 = vrot.slane %v2916_v28, 4  ;;  %v2922_v36 = vrot.slane %v15939_v18, 4  ;;  %v9339_v35 = vld [vmem:[%s9559_s30 + $0xc4] sm:$0xf] }
 0x459   : > { %v15972_v59 = vrot.slane %v18310_v51, 4  ;;  %v2927_v48 = vor.u32 %v2926_v40, %v2925_v50  ;;  %v7651_v24 = vsel %vm17291_vm4, %v7619_v41, %v18317_v54  ;;  %v3029_v49 = vrot.slane %v9339_v35, 6  ;;  %v18318_v28 = vld [vmem:[#allocation170_spill] sm:$0xff]  ;;  %v9340_v3 = vld [vmem:[%s9559_s30 + $0x64] sm:$0xf] }
 0x45a   : > { %v2911_v1 = vrot.slane %v18312_v52, 6  ;;  %v15982_v43 = vrot.slane %v18315_v26, 5  ;;  %v7635_v50 = vsel %vm17291_vm4, %v7603_v13, %v18318_v28  ;;  %v18319_v40 = vld [vmem:[#allocation250_spill] sm:$0xff]  ;;  %v2902_v11 = vrot.slane %v2901_v45, 4  ;;  %v9341_v45 = vld [vmem:[%s9559_s30 + $0xc0] sm:$0xf] }
 0x45b   : > { %v18320_v20 = vshrl.u32 %v18319_v40, 16  ;;  %v3254_v41 = vor.u32 %v15972_v59, %v15965_v12  ;;  %v2907_v58 = vrot.slane %v15974_v22, 4  ;;  %v2973_v52 = vrot.slane %v9340_v3, 6  ;;  %v9342_v35 = vld [vmem:[%s9559_s30 + $0xd0] sm:$0xf]  ;;  %7680 = vrot.lane.b32.xlu0 %v15911_v17, %s9476_s29  ;;  %v18326_v17 = vld [vmem:[#allocation252_spill] sm:$0xff]  ;;  %7698 = vrot.lane.b32.xlu1 %v7651_v24, %s9476_s29 }
 0x45c   : > { %v2912_v51 = vor.u32 %v2911_v1, %v2910_v5  ;;  %v18321_v2 = vshll.u32 %v18319_v40, 16  ;;  %v2921_v13 = vsel %vm10174_vm8, %v2917_v62, %v15939_v18  ;;  %v2928_v7 = vsel %vm10174_vm8, %v2922_v36, %v2927_v48  ;;  %v16020_v1 = vpop.permute.xlu1 %7220  ;;  %v18322_v40 = vld [vmem:[#allocation218_spill] sm:$0xff]  ;;  %v9343_v48 = vld [vmem:[%s9559_s30 + $0x60] sm:$0xf] }
 0x45d   : > { %v16001_v42 = vrot.slane %v18320_v20, 4  ;;  %v8330_v59 = vrot.slane %v9341_v45, 10  ;;  %v3031_v54 = vrot.slane %v3029_v49, 4  ;;  %v3032_v5 = vrot.slane %v15935_v30, 6  ;;  %v18323_v20 = vld [vmem:[#allocation249_spill] sm:$0xff]  ;;  %v16037_v45 = vpop.permute.xlu0 %7204 }
 0x45e   : > { %v16010_v26 = vrot.slane %v18321_v2, 5  ;;  %v3036_v28 = vrot.slane %v9342_v35, 6  ;;  %v7831_v31 = vsel %vm1030_vm9, %v18322_v40, 0  ;;  %v18324_v3 = vshll.u32 %v18323_v20, 16 }
 0x45f   : > { %v18325_v62 = vshrl.u32 %v18323_v20, 16  ;;  %v2906_v30 = vsel %vm10174_vm8, %v2902_v11, %v15974_v22  ;;  %v8322_v2 = vrot.slane %v9343_v48, 10  ;;  %8958 = vmatpush3.bf16.msra.mxu0 %v7831_v31  ;;  %v2913_v35 = vsel %vm10174_vm8, %v2907_v58, %v2912_v51  ;;  %9004 = vmatpush3.bf16.msra.mxu1 %v7831_v31  ;;  %v9346_v51 = vld [vmem:[%s9559_s30 + $0xcc] sm:$0xf] }
 0x460   : > { %v16027_v18 = vrot.slane %v18324_v3, 5  ;;  %v2975_v40 = vrot.slane %v2973_v52, 4  ;;  %v9344_v3 = vld [vmem:[%s9559_s30 + $0x68] sm:$0x3]  ;;  %v18327_v56 = vshrl.u32 %v18326_v17, 16  ;;  %v18328_v22 = vshll.u32 %v18326_v17, 16  ;;  %7682 = vrot.lane.b32.xlu0 %v7635_v50, %s9476_s29  ;;  %v16067_v39 = vpop.permute.xlu1 %7222 }
 0x461   : > { %v3469_v36 = vrot.slane %v18325_v62, 4  ;;  %v2976_v20 = vrot.slane %v9344_v3, 6  ;;  %v9345_v62 = vld [vmem:[%s9559_s30 + $0x70] sm:$0xf]  ;;  %v8715_v48 = vcombine.low %v2921_v13, %v2928_v7  ;;  %v3030_v53 = vsel %vm10433_vm11, %v8330_v59, %v3029_v49  ;;  %v9347_v59 = vld [vmem:[%s9559_s30 + $0x6c] sm:$0xf] }
 0x462   : > { %v2980_v21 = vrot.slane %v9345_v62, 6  ;;  %v3264_v55 = vrot.slane %v18327_v56, 4  ;;  %v3267_v11 = vrot.slane %v18328_v22, 5  ;;  %v3033_v58 = vsel %vm10433_vm11, %v3031_v54, %v3032_v5  ;;  %v18329_v56 = vld [vmem:[#allocation253_spill] sm:$0xff] }
 0x463   : > { %v8331_v3 = vrot.slane %v9346_v51, 10  ;;  %v3038_v31 = vrot.slane %v3036_v28, 4  ;;  %v3039_v62 = vrot.slane %v15900_v44, 6  ;;  %v18330_v25 = vshll.u32 %v18329_v56, 16  ;;  %v9348_v44 = vld [vmem:[%s9559_s30 + $0x74] sm:$0x3]  ;;  %6023 = vrot.lane.b32.xlu1 %v8715_v48, %s9473_s26 }
 0x464   : > { %v18331_v22 = vshrl.u32 %v18329_v56, 16  ;;  %v8714_v13 = vcombine.low %v2906_v30, %v2913_v35  ;;  %v2974_v49 = vsel %vm10433_vm11, %v8322_v2, %v2973_v52  ;;  %v2977_v7 = vsel %vm10433_vm11, %v2975_v40, %v2976_v20  ;;  %v18334_v35 = vld [vmem:[#allocation248_spill] sm:$0xff]  ;;  %v16078_v20 = vpop.permute.xlu0 %7206 }
 0x465   : > { %v16056_v17 = vrot.slane %v18330_v25, 5  ;;  %v8323_v54 = vrot.slane %v9347_v59, 10  ;;  %v2982_v5 = vrot.slane %v2980_v21, 4  ;;  %v2983_v51 = vrot.slane %v9348_v44, 6 }
 0x466   : > { %v3277_v24 = vrot.slane %v18331_v22, 4  ;;  %v18332_v25 = vor.u32 %v15945_v4, %v15917_v32  ;;  %v18333_v50 = vor.u32 %v15953_v15, %v15949_v10  ;;  %v18335_v52 = vshll.u32 %v18334_v35, 16  ;;  %6021 = vrot.lane.b32.xlu0 %v8714_v13, %s9473_s26  ;;  %v9351_v35 = vld [vmem:[%s9559_s30 + $0x70] sm:$0xf] }
 0x467   : > { %v8730_v40 = vcombine.low %v3030_v53, %v3033_v58  ;;  %v18336_v22 = vor.u32 %v15961_v8, %v15957_v38  ;;  %v3255_v44 = vrot.slane %v3254_v41, 4  ;;  %v3037_v32 = vsel %vm10433_vm11, %v8331_v3, %v3036_v28 }
 0x468   : > { %v3437_v56 = vrot.slane %v18332_v25, 4  ;;  %v3447_v30 = vrot.slane %v18333_v50, 4  ;;  %v3259_v2 = vrot.slane %v18335_v52, 5  ;;  %v3040_v4 = vsel %vm10433_vm11, %v3038_v31, %v3039_v62  ;;  %v7285_v31 = vpop.permute.xlu0 %7284  ;;  %v9352_v52 = vld [vmem:[%s9559_s30 + $0x6c] sm:$0xf] }
 0x469   : > { %v3245_v59 = vrot.slane %v18336_v22, 4  ;;  %v3460_v15 = vor.u32 %v16010_v26, %v16001_v42  ;;  %v3470_v25 = vor.u32 %v3469_v36, %v16027_v18  ;;  %v8722_v48 = vcombine.low %v2974_v49, %v2977_v7  ;;  %6101 = vrot.lane.b32.xlu1 %v8730_v40, %s9474_s18  ;;  %v18341_v40 = vld [vmem:[#allocation219_spill] sm:$0xff] }
 0x46a   : > { %v3268_v53 = vor.u32 %v3267_v11, %v3264_v55  ;;  %v3278_v58 = vor.u32 %v3277_v24, %v16056_v17  ;;  %v2981_v38 = vsel %vm10433_vm11, %v8323_v54, %v2980_v21  ;;  %v2984_v8 = vsel %vm10433_vm11, %v2982_v5, %v2983_v51  ;;  %v7301_v21 = vpop.permute.xlu1 %7300  ;;  %v9349_v5 = vld [vmem:[%s9559_s30 + $0xd0] sm:$0xf]  ;;  %v9350_v51 = vld [vmem:[%s9559_s30 + $0xcc] sm:$0xf] }
 0x46b   : > { %v3442_v41 = vsel %vm9604_vm2, %v3437_v56, %v15949_v10  ;;  %v3452_v42 = vsel %vm9604_vm2, %v3447_v30, %v15982_v43  ;;  %v8731_v26 = vcombine.low %v3037_v32, %v3040_v4  ;;  %v3250_v55 = vsel %vm9604_vm2, %v3245_v59, %v15965_v12  ;;  %v18337_v10 = vld [vmem:[#allocation251_spill] sm:$0xff]  ;;  %6085 = vrot.lane.b32.xlu0 %v8722_v48, %s9474_s18  ;;  %v18339_v12 = vld [vmem:[#allocation254_spill] sm:$0xff]  ;;  %v18342_v32 = vld [vmem:[#allocation220_spill] sm:$0xff] }
 0x46c   : > { %v3260_v60 = vsel %vm9604_vm2, %v3255_v44, %v3259_v2  ;;  %v3461_v28 = vrot.slane %v3460_v15, 4  ;;  %v3471_v36 = vrot.slane %v3470_v25, 4  ;;  %v18338_v11 = vshll.u32 %v18337_v10, 16  ;;  %v9353_v25 = vld [vmem:[%s9559_s30 + $0xdc] sm:$0xf] }
 0x46d   : > { %v8723_v43 = vcombine.low %v2981_v38, %v2984_v8  ;;  %v8762_v62 = vcombine.low %v3442_v41, %v3452_v42  ;;  %v3269_v24 = vrot.slane %v3268_v53, 4  ;;  %v3279_v13 = vrot.slane %v3278_v58, 4  ;;  %6103 = vrot.lane.b32.xlu1 %v8731_v26, %s9474_s18  ;;  %v9354_v48 = vld [vmem:[%s9559_s30 + $0xd8] sm:$0xf]  ;;  %v7287_v58 = vpop.permute.xlu0 %7286  ;;  %v9356_v26 = vld [vmem:[%s9559_s30 + $0x7c] sm:$0xf] }
 0x46e   : > { %v3475_v3 = vrot.slane %v18338_v11, 5  ;;  %v18340_v49 = vshll.u32 %v18339_v12, 16  ;;  %v8754_v54 = vcombine.low %v3250_v55, %v3260_v60  ;;  %v8746_v56 = vcombine.low %v9350_v51, %v9349_v5  ;;  %v9355_v42 = vld [vmem:[%s9559_s30 + $0x78] sm:$0xf]  ;;  %v9359_v51 = vld [vmem:[%s9559_s30] sm:$0xf] }
 0x46f   : > { %v3466_v50 = vsel %vm9604_vm2, %v3461_v28, %v16027_v18  ;;  %6087 = vrot.lane.b32.xlu0 %v8723_v43, %s9474_s18  ;;  %v8738_v2 = vcombine.low %v9352_v52, %v9351_v35  ;;  %v7428_v22 = vsel %vm6185_vm12, %v8762_v62, %v18341_v40  ;;  %v3274_v59 = vsel %vm9604_vm2, %v3269_v24, %v16056_v17  ;;  %v7303_v18 = vpop.permute.xlu1 %7302  ;;  %v18343_v43 = vld [vmem:[#allocation171_spill] sm:$0xff]  ;;  %v9363_v40 = vld [vmem:[%s9559_s30 + $0x6c] sm:$0xf] }
 0x470   : > { %v3283_v7 = vrot.slane %v18340_v49, 5  ;;  %v3476_v30 = vsel %vm9604_vm2, %v3471_v36, %v3475_v3  ;;  %v7404_v4 = vsel %vm6185_vm12, %v8754_v54, %v18342_v32  ;;  %v7461_v15 = vsel %vm6234_vm13, %v7428_v22, %v15627_v6  ;;  %v9362_v35 = vld [vmem:[%s9559_s30 + $0x10] sm:$0xf] }
 0x471   : > { %6181 = vrot.lane.b32.xlu1 %v8746_v56, %s9475_s28  ;;  %v8747_v53 = vcombine.low %v9354_v48, %v9353_v25  ;;  %v8763_v38 = vcombine.low %v3466_v50, %v3476_v30  ;;  %v7445_v23 = vsel %vm6234_vm13, %v7404_v4, %v15644_v0  ;;  %v7493_v17 = vsel %vm6267_vm14, %v7461_v15, %v15741_v29  ;;  %v7365_v11 = vpop.permute.xlu0 %7364  ;;  %v9360_v56 = vld [vmem:[%s9559_s30 + $0x4] sm:$0xf]  ;;  %v9361_v30 = vld [vmem:[%s9559_s30 + $0xc] sm:$0xf]  ;;  %v9364_v22 = vld [vmem:[%s9559_s30 + $0x70] sm:$0xf] }
 0x472   : > { %v3284_v44 = vsel %vm9604_vm2, %v3279_v13, %v3283_v7  ;;  %v7477_v41 = vsel %vm6267_vm14, %v7445_v23, %v15748_v16  ;;  %v7525_v6 = vsel %vm17293_vm15, %v7493_v17, %v15812_v61  ;;  %v8739_v55 = vcombine.low %v9355_v42, %v9356_v26  ;;  %v9358_v7 = vld [vmem:[%s9559_s30 + $0x64] sm:$0xf]  ;;  %v18346_v4 = vld [vmem:[#allocation52_spill] sm:$0xff] }
 0x473   : > { %v8755_v8 = vcombine.low %v3274_v59, %v3284_v44  ;;  %6165 = vrot.lane.b32.xlu0 %v8738_v2, %s9475_s28  ;;  %v7509_v60 = vsel %vm17293_vm15, %v7477_v41, %v15822_v14  ;;  %v7557_v0 = vsel %vm6333_vm0, %v7525_v6, %v15913_v33  ;;  %v7431_v61 = vsel %vm6185_vm12, %v8763_v38, %v15590_v27  ;;  %v7381_v14 = vpop.permute.xlu1 %7380  ;;  %v18345_v44 = vld [vmem:[#allocation13_spill] sm:$0xff]  ;;  %v18347_v25 = vld [vmem:[#allocation16_spill] sm:$0xff]  ;;  %v18351_v6 = vld [vmem:[#allocation26_spill] sm:$0xff] }
 0x474   : > { %v7541_v29 = vsel %vm6333_vm0, %v7509_v60, %v15922_v57  ;;  %v7589_v16 = vsel %vm6366_vm1, %v7557_v0, %v16020_v1  ;;  %v7463_v57 = vsel %vm6234_vm13, %v7431_v61, %v15680_v37  ;;  %v8492_v50 = vcombine.low %v9359_v51, %v9360_v56  ;;  %v18349_v38 = vld [vmem:[#allocation73_spill] sm:$0xff]  ;;  %v18352_v26 = vld [vmem:[#allocation28_spill] sm:$0xff]  ;;  %v18369_v51 = vld [vmem:[#allocation155_spill] sm:$0xff] }
 0x475   : > { %6183 = vrot.lane.b32.xlu1 %v8747_v53, %s9475_s28  ;;  %v7573_v28 = vsel %vm6366_vm1, %v7541_v29, %v16037_v45  ;;  %v7621_v36 = vsel %vm17292_vm3, %v7589_v16, %v7301_v21  ;;  %v7407_v33 = vsel %vm6185_vm12, %v8755_v8, %v15600_v46  ;;  %v7495_v45 = vsel %vm6267_vm14, %v7463_v57, %v15773_v47  ;;  %v7367_v12 = vpop.permute.xlu0 %7366  ;;  %v18348_v53 = vld [vmem:[#allocation11_spill] sm:$0xff]  ;;  %v18350_v8 = vld [vmem:[#allocation12_spill] sm:$0xff]  ;;  %v18353_v60 = vld [vmem:[#allocation89_spill] sm:$0xff] }
 0x476   : > { %v7605_v10 = vsel %vm17292_vm3, %v7573_v28, %v7285_v31  ;;  %v7653_v1 = vsel %vm17291_vm4, %v7621_v36, %v7381_v14  ;;  %v7447_v27 = vsel %vm6234_vm13, %v7407_v33, %v15705_v19  ;;  %v7527_v37 = vsel %vm17293_vm15, %v7495_v45, %v15858_v9  ;;  %v18344_v31 = vld [vmem:[#allocation169_spill] sm:$0xff]  ;;  %v18356_v36 = vld [vmem:[#allocation62_spill] sm:$0xff]  ;;  %v18357_v33 = vld [vmem:[#allocation67_spill] sm:$0xff] }
 0x477   : > { %6167 = vrot.lane.b32.xlu0 %v8739_v55, %s9475_s28  ;;  %v7637_v21 = vsel %vm17291_vm4, %v7605_v10, %v7365_v11  ;;  %v7479_v46 = vsel %vm6267_vm14, %v7447_v27, %v15782_v34  ;;  %v7559_v19 = vsel %vm6333_vm0, %v7527_v37, %v18343_v43  ;;  %v8493_v52 = vcombine.low %v9361_v30, %v9362_v35  ;;  %v18354_v29 = vld [vmem:[#allocation49_spill] sm:$0xff]  ;;  %v18359_v27 = vld [vmem:[#allocation82_spill] sm:$0xff]  ;;  %v18362_v43 = vld [vmem:[#allocation88_spill] sm:$0xff] }
 0x478   : > { %v7511_v3 = vsel %vm17293_vm15, %v7479_v46, %v15867_v63  ;;  %v7591_v62 = vsel %vm6366_vm1, %v7559_v19, %v16067_v39  ;;  %v7383_v63 = vpop.permute.xlu1 %7382  ;;  %v8501_v59 = vcombine.low %v9363_v40, %v9364_v22  ;;  %v6188_v48 = vsel %vm6185_vm12, %v8492_v50, %v18347_v25  ;;  %v18355_v61 = vld [vmem:[#allocation61_spill] sm:$0xff]  ;;  %v18361_v37 = vld [vmem:[#allocation98_spill] sm:$0xff]  ;;  %v18370_v50 = vld [vmem:[#allocation79_spill] sm:$0xff] }
 0x479   : > { %7700 = vrot.lane.b32.xlu1 %v7653_v1, %s9476_s29  ;;  %v7543_v47 = vsel %vm6333_vm0, %v7511_v3, %v18344_v31  ;;  %v7623_v9 = vsel %vm17292_vm3, %v7591_v62, %v7303_v18  ;;  %v6010_v5 = vpop.permute.xlu0 %6009  ;;  %v6236_v55 = vsel %vm6234_vm13, %v6188_v48, %v18352_v26  ;;  %v18358_v1 = vld [vmem:[#allocation71_spill] sm:$0xff]  ;;  %v18363_v31 = vld [vmem:[#allocation93_spill] sm:$0xff]  ;;  %v18364_v62 = vld [vmem:[#allocation94_spill] sm:$0xff]  ;;  %vm18381_vm2 = vcmask 359424  }
 0x47a   : > { %v7575_v34 = vsel %vm6366_vm1, %v7543_v47, %v16078_v20  ;;  %v7655_v13 = vsel %vm17291_vm4, %v7623_v9, %v7383_v63  ;;  %v9357_v20 = vld [vmem:[%s9559_s30 + $0x60] sm:$0xf]  ;;  %v6215_v41 = vsel %vm6185_vm12, %v8501_v59, %v18350_v8  ;;  %v6269_v14 = vsel %vm6267_vm14, %v6236_v55, %v18356_v36  ;;  %v18372_v40 = vld [vmem:[#allocation107_spill] sm:$0xff]  ;;  %v18373_v59 = vld [vmem:[#allocation70_spill] sm:$0xff] }
 0x47b   : > { %7684 = vrot.lane.b32.xlu0 %v7637_v21, %s9476_s29  ;;  %v7607_v24 = vsel %vm17292_vm3, %v7575_v34, %v7287_v58  ;;  %v8500_v54 = vcombine.low %v9357_v20, %v9358_v7  ;;  %v6191_v58 = vsel %vm6185_vm12, %v8493_v52, %v18348_v53  ;;  %v6254_v16 = vsel %vm6234_vm13, %v6215_v41, %v18354_v29  ;;  %v18360_v21 = vld [vmem:[#allocation83_spill] sm:$0xff]  ;;  %v18365_v9 = vld [vmem:[#allocation133_spill] sm:$0xff]  ;;  %v18375_v25 = vld [vmem:[#allocation142_spill] sm:$0xff] }
 0x47c   : > { %v7639_v39 = vsel %vm17291_vm4, %v7607_v24, %v7367_v12  ;;  %v16197_v49 = vpop.permute.xlu1 %6011  ;;  %v6238_v42 = vsel %vm6234_vm13, %v6191_v58, %v18351_v6  ;;  %v6287_v11 = vsel %vm6267_vm14, %v6254_v16, %v18358_v1  ;;  %v6302_v46 = vsel %vm17293_vm15, %v6269_v14, %v18360_v21  ;;  %v18368_v7 = vld [vmem:[#allocation43_spill] sm:$0xff]  ;;  %v18371_v35 = vld [vmem:[#allocation105_spill] sm:$0xff]  ;;  %v18378_v8 = vld [vmem:[#allocation154_spill] sm:$0xff] }
 0x47d   : > { %7702 = vrot.lane.b32.xlu1 %v7655_v13, %s9476_s29  ;;  %v6212_v18 = vsel %vm6185_vm12, %v8500_v54, %v18345_v44  ;;  %v16209_v32 = vpop.permute.xlu0 %6073  ;;  %v6271_v28 = vsel %vm6267_vm14, %v6238_v42, %v18355_v61  ;;  %v6320_v19 = vsel %vm17293_vm15, %v6287_v11, %v18362_v43  ;;  %v6335_v34 = vsel %vm6333_vm0, %v6302_v46, %v18364_v62  ;;  %v18366_v13 = vld [vmem:[#allocation33_spill] sm:$0xff]  ;;  %v18376_v53 = vld [vmem:[#allocation143_spill] sm:$0xff]  ;;  %v18383_v16 = vld [vmem:[#allocation174_spill] sm:$0xff] }
 0x47e   : > { %v6252_v15 = vsel %vm6234_vm13, %v6212_v18, %v18346_v4  ;;  %v6304_v45 = vsel %vm17293_vm15, %v6271_v28, %v18359_v27  ;;  %v6353_v12 = vsel %vm6333_vm0, %v6320_v19, %v18366_v13  ;;  %v6368_v54 = vsel %vm6366_vm1, %v6335_v34, %v18368_v7  ;;  %v18374_v4 = vld [vmem:[#allocation132_spill] sm:$0xff]  ;;  %v18379_v6 = vld [vmem:[#allocation109_spill] sm:$0xff]  ;;  %v18380_v26 = vld [vmem:[#allocation103_spill] sm:$0xff] }
 0x47f   : > { %7686 = vrot.lane.b32.xlu0 %v7639_v39, %s9476_s29  ;;  %v6285_v23 = vsel %vm6267_vm14, %v6252_v15, %v18349_v38  ;;  %v6337_v47 = vsel %vm6333_vm0, %v6304_v45, %v18363_v31  ;;  %v18367_v39 = vld [vmem:[#allocation42_spill] sm:$0xff]  ;;  %v6386_v30 = vsel %vm6366_vm1, %v6353_v12, %v18370_v50  ;;  %v6401_v22 = vsel %vm17292_vm3, %v6368_v54, %v18372_v40  ;;  %v18377_v38 = vld [vmem:[#allocation72_spill] sm:$0xff]  ;;  %vm18386_vm11 = vmmov %vm18381_vm2 }
 0x480   : > { %v6090_v2 = vpop.permute.xlu1 %6089  ;;  %v6318_v0 = vsel %vm17293_vm15, %v6285_v23, %v18353_v60  ;;  %v6370_v20 = vsel %vm6366_vm1, %v6337_v47, %v18367_v39  ;;  %v6419_v15 = vsel %vm17292_vm3, %v6386_v30, %v18374_v4  ;;  %v6434_v58 = vsel %vm17291_vm4, %v6401_v22, %v18376_v53  ;;  %v18384_v28 = vld [vmem:[#allocation68_spill] sm:$0xff]  ;;  %v18385_v14 = vld [vmem:[#allocation6_spill] sm:$0xff]  ;;  %v18390_v43 = vld [vmem:[#allocation5_spill] sm:$0xff] }
 0x481   : > { %v6351_v57 = vsel %vm6333_vm0, %v6318_v0, %v18357_v33  ;;  %v16237_v10 = vpop.permute.xlu0 %6075  ;;  %v6403_v52 = vsel %vm17292_vm3, %v6370_v20, %v18371_v35  ;;  %v6452_v41 = vsel %vm17291_vm4, %v6419_v15, %v18378_v8  ;;  %v6467_v42 = vsel %vm6465_vm6, %v6434_v58, %v18379_v6  ;;  %v18382_v0 = vld [vmem:[#allocation51_spill] sm:$0xff]  ;;  %v18387_v11 = vld [vmem:[#allocation40_spill] sm:$0xff]  ;;  %v18392_v31 = vld [vmem:[#allocation186_spill] sm:$0xff] }
 0x482   : > { %v6384_v3 = vsel %vm6366_vm1, %v6351_v57, %v18361_v37  ;;  %v6436_v48 = vsel %vm17291_vm4, %v6403_v52, %v18375_v25  ;;  %vm6630_vm5 = vcmask 457728   ;;  %v6500_v29 = vsel %vm6498_vm7, %v6467_v42, %v18382_v0  ;;  %v18388_v45 = vld [vmem:[#allocation8_spill] sm:$0xff]  ;;  %v18389_v37 = vld [vmem:[#allocation45_spill] sm:$0xff]  ;;  %v18395_v39 = vld [vmem:[#allocation131_spill] sm:$0xff] }
 0x483   : > { %v6417_v63 = vsel %vm17292_vm3, %v6384_v3, %v18365_v9  ;;  %vm6597_vm8 = vcmask 424960   ;;  %vm6663_vm9 = vcmask 490496   ;;  %v6485_v36 = vsel %vm6465_vm6, %v6452_v41, %v18384_v28  ;;  %vm18391_vm3 = vmmov %vm18386_vm11  ;;  %v18393_v34 = vld [vmem:[#allocation48_spill] sm:$0xff]  ;;  %v18398_v30 = vld [vmem:[#allocation185_spill] sm:$0xff] }
 0x484   : > { %v16219_v17 = vpop.permute.xlu1 %6091  ;;  %v6450_v56 = vsel %vm17291_vm4, %v6417_v63, %v18369_v51  ;;  %v6533_v33 = vsel %vm18386_vm11, %v6500_v29, %v18385_v14  ;;  %v6518_v27 = vsel %vm6498_vm7, %v6485_v36, %v18387_v11  ;;  %vm7796_vm4 = vcmask 818176   ;;  %v18394_v63 = vld [vmem:[#allocation173_spill] sm:$0xff]  ;;  %vm18396_vm11 = vmmov %vm18391_vm3  ;;  %v9365_v4 = vld [vmem:[%s9559_s30 + $0x78] sm:$0xf] }
 0x485   : > { %v6483_v44 = vsel %vm6465_vm6, %v6450_v56, %v18373_v59  ;;  %v6154_v18 = vpop.permute.xlu0 %6153  ;;  %v6566_v21 = vsel %vm6564_vm10, %v6533_v33, %v18388_v45  ;;  %v6469_v3 = vsel %vm6465_vm6, %v6436_v48, %v18389_v37  ;;  %v6551_v19 = vsel %vm18391_vm3, %v6518_v27, %v18390_v43  ;;  %v18397_v51 = vld [vmem:[#allocation41_spill] sm:$0xff]  ;;  %v9366_v15 = vld [vmem:[%s9559_s30 + $0x7c] sm:$0xf]  ;;  %v9367_v48 = vld [vmem:[%s9559_s30 + $0x18] sm:$0xf] }
 0x486   : > { %v6516_v23 = vsel %vm6498_vm7, %v6483_v44, %v18377_v38  ;;  %v6502_v9 = vsel %vm6498_vm7, %v6469_v3, %v18393_v34  ;;  %v6584_v13 = vsel %vm6564_vm10, %v6551_v19, %v18394_v63  ;;  %v9368_v53 = vld [vmem:[%s9559_s30 + $0x1c] sm:$0xf]  ;;  %v9370_v8 = vld [vmem:[%s9559_s30 + $0x88] sm:$0xf]  ;;  %v18399_v6 = vld [vmem:[#allocation19_spill] sm:$0xff]  ;;  %vm18415_vm3 = vcmask 228352  }
 0x487   : > { %v6549_v55 = vsel %vm18381_vm2, %v6516_v23, %v18380_v26  ;;  %vm7704_vm2 = vcmask 523264   ;;  %v6535_v20 = vsel %vm18396_vm11, %v6502_v9, %v18395_v39  ;;  %v6617_v7 = vsel %vm6597_vm8, %v6584_v13, %v16197_v49  ;;  %v9369_v23 = vld [vmem:[%s9559_s30 + $0x84] sm:$0xf]  ;;  %v18401_v0 = vld [vmem:[#allocation15_spill] sm:$0xff]  ;;  %v18405_v45 = vld [vmem:[#allocation18_spill] sm:$0xff] }
 0x488   : > { %v6170_v24 = vpop.permute.xlu1 %6169  ;;  %v6582_v61 = vsel %vm6564_vm10, %v6549_v55, %v18383_v16  ;;  %v6568_v56 = vsel %vm6564_vm10, %v6535_v20, %v18397_v51  ;;  %v8494_v58 = vcombine.low %v9367_v48, %v9368_v53  ;;  %v8503_v41 = vcombine.low %v9369_v23, %v9370_v8  ;;  %v18400_v55 = vld [vmem:[#allocation56_spill] sm:$0xff]  ;;  %v9371_v16 = vld [vmem:[%s9559_s30 + $0x24] sm:$0xf]  ;;  %v18402_v36 = vld [vmem:[#allocation75_spill] sm:$0xff] }
 0x489   : > { %v6615_v57 = vsel %vm6597_vm8, %v6582_v61, %v6010_v5  ;;  %v6156_v1 = vpop.permute.xlu0 %6155  ;;  %v6599_v5 = vsel %vm6597_vm8, %v6566_v21, %v18392_v31  ;;  %v6601_v35 = vsel %vm6597_vm8, %v6568_v56, %v18398_v30  ;;  %v9372_v61 = vld [vmem:[%s9559_s30 + $0x28] sm:$0xf]  ;;  %v18404_v11 = vld [vmem:[#allocation91_spill] sm:$0xff]  ;;  %v18407_v3 = vld [vmem:[#allocation37_spill] sm:$0xff]  ;;  %vm18420_vm11 = vcmask 261120  }
 0x48a   : > { %v6648_v46 = vsel %vm6630_vm5, %v6615_v57, %v6090_v2  ;;  %v6632_v2 = vsel %vm6630_vm5, %v6599_v5, %v16209_v32  ;;  %v6650_v32 = vsel %vm6630_vm5, %v6617_v7, %v16219_v17  ;;  %v6634_v40 = vsel %vm6630_vm5, %v6601_v35, %v16237_v10  ;;  %v18403_v57 = vld [vmem:[#allocation34_spill] sm:$0xff]  ;;  %v18408_v31 = vld [vmem:[#allocation55_spill] sm:$0xff]  ;;  %v18410_v34 = vld [vmem:[#allocation100_spill] sm:$0xff] }
 0x48b   : > { %v6681_v47 = vsel %vm6663_vm9, %v6648_v46, %v6170_v24  ;;  %v6665_v24 = vsel %vm6663_vm9, %v6632_v2, %v6154_v18  ;;  %v6667_v17 = vsel %vm6663_vm9, %v6634_v40, %v6156_v1  ;;  %v8502_v10 = vcombine.low %v9365_v4, %v9366_v15  ;;  %v18406_v46 = vld [vmem:[#allocation64_spill] sm:$0xff]  ;;  %v18411_v63 = vld [vmem:[#allocation17_spill] sm:$0xff]  ;;  %v18412_v2 = vld [vmem:[#allocation74_spill] sm:$0xff] }
 0x48c   : > { %v6172_v60 = vpop.permute.xlu1 %6171  ;;  %v6194_v29 = vsel %vm6185_vm12, %v8494_v58, %v18401_v0  ;;  %v8495_v28 = vcombine.low %v9371_v16, %v9372_v61  ;;  %v6221_v21 = vsel %vm6185_vm12, %v8503_v41, %v18405_v45  ;;  %v18413_v39 = vld [vmem:[#allocation85_spill] sm:$0xff]  ;;  %v18414_v7 = vld [vmem:[#allocation135_spill] sm:$0xff]  ;;  %v18425_v53 = vld [vmem:[#allocation84_spill] sm:$0xff] }
 0x48d   : > { %v7673_v54 = vpop.permute.xlu0 %7672  ;;  %v6683_v49 = vsel %vm6663_vm9, %v6650_v32, %v6172_v60  ;;  %v6218_v42 = vsel %vm6185_vm12, %v8502_v10, %v18399_v6  ;;  %v6240_v1 = vsel %vm6234_vm13, %v6194_v29, %v18403_v57  ;;  %v6258_v5 = vsel %vm6234_vm13, %v6221_v21, %v18408_v31  ;;  %v18416_v51 = vld [vmem:[#allocation31_spill] sm:$0xff]  ;;  %v18417_v32 = vld [vmem:[#allocation90_spill] sm:$0xff]  ;;  %v18424_v15 = vld [vmem:[#allocation81_spill] sm:$0xff] }
 0x48e   : > { %v7706_v50 = vsel %vm7704_vm2, %v6665_v24, %v7673_v54  ;;  %v6256_v60 = vsel %vm6234_vm13, %v6218_v42, %v18400_v55  ;;  %v6273_v37 = vsel %vm6267_vm14, %v6240_v1, %v18406_v46  ;;  %v6197_v13 = vsel %vm6185_vm12, %v8495_v28, %v18411_v63  ;;  %v18418_v30 = vld [vmem:[#allocation47_spill] sm:$0xff]  ;;  %v18428_v42 = vld [vmem:[#allocation53_spill] sm:$0xff]  ;;  %v18430_v29 = vld [vmem:[#allocation134_spill] sm:$0xff] }
 0x48f   : > { %8959 = vmatprep.mubr.msk.bf16.mxu0 %vm7796_vm4, %v7706_v50  ;;  %v6289_v14 = vsel %vm6267_vm14, %v6256_v60, %v18402_v36  ;;  %v6242_v56 = vsel %vm6234_vm13, %v6197_v13, %v18416_v51  ;;  %v18421_v40 = vld [vmem:[#allocation63_spill] sm:$0xff]  ;;  %v18429_v60 = vld [vmem:[#allocation25_spill] sm:$0xff]  ;;  %v18431_v61 = vld [vmem:[#allocation60_spill] sm:$0xff] }
 0x490   : > { %v7689_v62 = vpop.permute.xlu1 %7688  ;;  %v6322_v27 = vsel %vm17293_vm15, %v6289_v14, %v18404_v11  ;;  %v18426_v23 = vld [vmem:[#allocation99_spill] sm:$0xff]  ;;  %v18434_v1 = vld [vmem:[#allocation44_spill] sm:$0xff]  ;;  %v18436_v21 = vld [vmem:[#allocation97_spill] sm:$0xff] }
 0x491   : > { %v7722_v12 = vsel %vm7704_vm2, %v6681_v47, %v7689_v62  ;;  %v7675_v59 = vpop.permute.xlu0 %7674  ;;  %v6355_v43 = vsel %vm6333_vm0, %v6322_v27, %v18407_v3  ;;  %v18409_v47 = vld [vmem:[#allocation27_spill] sm:$0xff]  ;;  %v18435_v27 = vld [vmem:[#allocation156_spill] sm:$0xff]  ;;  %v18441_v13 = vld [vmem:[#allocation145_spill] sm:$0xff] }
 0x492   : > { %8975 = vmatprep.mubr.msk.bf16.mxu1 %vm7796_vm4, %v7722_v12  ;;  %v7708_v44 = vsel %vm7704_vm2, %v6667_v17, %v7675_v59  ;;  %v6306_v62 = vsel %vm17293_vm15, %v6273_v37, %v18409_v47  ;;  %v6388_v9 = vsel %vm6366_vm1, %v6355_v43, %v18410_v34  ;;  %v6291_v12 = vsel %vm6267_vm14, %v6258_v5, %v18412_v2  ;;  %v18422_v17 = vld [vmem:[#allocation35_spill] sm:$0xff]  ;;  %v18437_v37 = vld [vmem:[#allocation182_spill] sm:$0xff]  ;;  %v18438_v43 = vld [vmem:[#allocation108_spill] sm:$0xff] }
 0x493   : > { %8960 = vmatmul.mubr.msk.bf16.vlgmr.msra.gmra.mrb[0].mxu0 %vm7796_vm4, %v7708_v44  ;;  %v6339_v20 = vsel %vm6333_vm0, %v6306_v62, %v18413_v39  ;;  %v6421_v24 = vsel %vm18415_vm3, %v6388_v9, %v18414_v7  ;;  %v6324_v50 = vsel %vm17293_vm15, %v6291_v12, %v18417_v32  ;;  %v18423_v44 = vld [vmem:[#allocation113_spill] sm:$0xff]  ;;  %v18427_v41 = vld [vmem:[#allocation147_spill] sm:$0xff]  ;;  %v18439_v5 = vld [vmem:[#allocation80_spill] sm:$0xff] }
 0x494   : > { %v7691_v52 = vpop.permute.xlu1 %7690  ;;  %v6372_v35 = vsel %vm6366_vm1, %v6339_v20, %v18418_v30  ;;  %v6357_v59 = vsel %vm6333_vm0, %v6324_v50, %v18422_v17  ;;  %v18432_v36 = vld [vmem:[#allocation139_spill] sm:$0xff]  ;;  %v18440_v62 = vld [vmem:[#allocation160_spill] sm:$0xff]  ;;  %v18442_v12 = vld [vmem:[#allocation50_spill] sm:$0xff] }
 0x495   : > { %v7724_v22 = vsel %vm7704_vm2, %v6683_v49, %v7691_v52  ;;  %v6014_v25 = vpop.permute.xlu0 %6013  ;;  %v18419_v49 = vld [vmem:[#allocation158_spill] sm:$0xff]  ;;  %v6405_v4 = vsel %vm18415_vm3, %v6372_v35, %v18423_v44  ;;  %v6390_v8 = vsel %vm6366_vm1, %v6357_v59, %v18426_v23  ;;  %v18443_v20 = vld [vmem:[#allocation164_spill] sm:$0xff]  ;;  %v18444_v51 = vld [vmem:[#allocation59_spill] sm:$0xff] }
 0x496   : > { %8976 = vmatmul.mubr.msk.bf16.vlgmr.msra.gmra.mrb[0].mxu1 %vm7796_vm4, %v7724_v22  ;;  %v6454_v52 = vsel %vm18420_vm11, %v6421_v24, %v18419_v49  ;;  %v6275_v22 = vsel %vm6267_vm14, %v6242_v56, %v18421_v40  ;;  %v6438_v6 = vsel %vm18420_vm11, %v6405_v4, %v18427_v41  ;;  %v6423_v16 = vsel %vm18415_vm3, %v6390_v8, %v18430_v29  ;;  %v18445_v32 = vld [vmem:[#allocation104_spill] sm:$0xff]  ;;  %v18447_v30 = vld [vmem:[#allocation190_spill] sm:$0xff]  ;;  %v18453_v8 = vld [vmem:[#allocation187_spill] sm:$0xff] }
 0x497   : > { %v6487_v10 = vsel %vm6465_vm6, %v6454_v52, %v18424_v15  ;;  %v6308_v58 = vsel %vm17293_vm15, %v6275_v22, %v18425_v53  ;;  %v6471_v28 = vsel %vm6465_vm6, %v6438_v6, %v18431_v61  ;;  %vm18433_vm15 = vcmask 359424   ;;  %v18448_v52 = vld [vmem:[#allocation106_spill] sm:$0xff]  ;;  %v18450_v44 = vld [vmem:[#allocation152_spill] sm:$0xff]  ;;  %v18452_v53 = vld [vmem:[#allocation163_spill] sm:$0xff] }
 0x498   : > { %v16335_v18 = vpop.permute.xlu1 %6015  ;;  %v6520_v55 = vsel %vm6498_vm7, %v6487_v10, %v18428_v42  ;;  %v6341_v0 = vsel %vm6333_vm0, %v6308_v58, %v18429_v60  ;;  %v6456_v45 = vsel %vm18420_vm11, %v6423_v16, %v18435_v27  ;;  %v6504_v46 = vsel %vm6498_vm7, %v6471_v28, %v18436_v21  ;;  %v18449_v22 = vld [vmem:[#allocation178_spill] sm:$0xff]  ;;  %v9373_v29 = vld [vmem:[%s9559_s30 + $0x90] sm:$0xf]  ;;  %v9374_v16 = vld [vmem:[%s9559_s30 + $0x94] sm:$0xf] }
 0x499   : > { %v6078_v26 = vpop.permute.xlu0 %6077  ;;  %v6553_v14 = vsel %vm18433_vm15, %v6520_v55, %v18432_v36  ;;  %v6374_v11 = vsel %vm6366_vm1, %v6341_v0, %v18434_v1  ;;  %v6489_v47 = vsel %vm6465_vm6, %v6456_v45, %v18439_v5  ;;  %v6537_v34 = vsel %vm18433_vm15, %v6504_v46, %v18440_v62  ;;  %v9375_v28 = vld [vmem:[%s9559_s30 + $0x30] sm:$0xf]  ;;  %v9376_v36 = vld [vmem:[%s9559_s30 + $0x34] sm:$0xf]  ;;  %v9377_v1 = vld [vmem:[%s9559_s30 + $0x9c] sm:$0xf] }
 0x49a   : > { %v6586_v3 = vsel %vm6564_vm10, %v6553_v14, %v18437_v37  ;;  %v6407_v31 = vsel %vm18415_vm3, %v6374_v11, %v18438_v43  ;;  %v6522_v39 = vsel %vm6498_vm7, %v6489_v47, %v18442_v12  ;;  %v6570_v7 = vsel %vm6564_vm10, %v6537_v34, %v18443_v20  ;;  %vm18446_vm3 = vmmov %vm18433_vm15  ;;  %v9378_v11 = vld [vmem:[%s9559_s30 + $0xa0] sm:$0xf]  ;;  %v18454_v45 = vld [vmem:[#allocation22_spill] sm:$0xff] }
 0x49b   : > { %v6619_v9 = vsel %vm6597_vm8, %v6586_v3, %v6014_v25  ;;  %v6440_v2 = vsel %vm18420_vm11, %v6407_v31, %v18441_v13  ;;  %v6555_v50 = vsel %vm18446_vm3, %v6522_v39, %v18445_v32  ;;  %v6603_v25 = vsel %vm6597_vm8, %v6570_v7, %v18447_v30  ;;  %vm18451_vm15 = vmmov %vm18446_vm3  ;;  %v18455_v37 = vld [vmem:[#allocation58_spill] sm:$0xff]  ;;  %v9379_v43 = vld [vmem:[%s9559_s30 + $0x3c] sm:$0xf] }
 0x49c   : > { %v6094_v38 = vpop.permute.xlu1 %6093  ;;  %v6473_v56 = vsel %vm6465_vm6, %v6440_v2, %v18444_v51  ;;  %v6588_v17 = vsel %vm6564_vm10, %v6555_v50, %v18449_v22  ;;  %v8496_v14 = vcombine.low %v9375_v28, %v9376_v36  ;;  %v8505_v27 = vcombine.low %v9377_v1, %v9378_v11  ;;  %v9380_v31 = vld [vmem:[%s9559_s30 + $0x40] sm:$0xf]  ;;  %v18456_v47 = vld [vmem:[#allocation10_spill] sm:$0xff]  ;;  %v18458_v13 = vld [vmem:[#allocation39_spill] sm:$0xff]  ;;  %s175_s30 = sand.u32 1, %s9443_s13  }
 0x49d   : > { %v6652_v24 = vsel %vm6630_vm5, %v6619_v9, %v6094_v38  ;;  %v6506_v40 = vsel %vm6498_vm7, %v6473_v56, %v18448_v52  ;;  %v6636_v38 = vsel %vm6630_vm5, %v6603_v25, %v6078_v26  ;;  %v6621_v15 = vsel %vm6597_vm8, %v6588_v17, %v16335_v18  ;;  %v18457_v34 = vld [vmem:[#allocation78_spill] sm:$0xff]  ;;  %v18461_v20 = vld [vmem:[#allocation20_spill] sm:$0xff]  ;;  %v18464_v30 = vld [vmem:[#allocation57_spill] sm:$0xff]  ;;  %s8138_s26 = sshll.u32 %s175_s30, 8  ;;  %s16704_s18 = scalar_lea.sflag [#allocation3], %s175_s30 }
 0x49e   : > { %v6080_v19 = vpop.permute.xlu0 %6079  ;;  %v6539_v4 = vsel %vm18451_vm15, %v6506_v40, %v18450_v44  ;;  %v8497_v5 = vcombine.low %v9379_v43, %v9380_v31  ;;  %v6200_v62 = vsel %vm6185_vm12, %v8496_v14, %v18456_v47  ;;  %v18459_v12 = vld [vmem:[#allocation46_spill] sm:$0xff]  ;;  %vm18460_vm11 = vcmask 130048   ;;  %v18468_v22 = vld [vmem:[#allocation9_spill] sm:$0xff]  ;;  %v18470_v44 = vld [vmem:[#allocation96_spill] sm:$0xff]  ;;  %s16630_s7 = scalar_lea.vmem [#allocation2], %s8138_s26 }
 0x49f   : > { %v6572_v58 = vsel %vm6564_vm10, %v6539_v4, %v18452_v53  ;;  %v6244_v2 = vsel %vm6234_vm13, %v6200_v62, %v18458_v13  ;;  %v6227_v7 = vsel %vm6185_vm12, %v8505_v27, %v18461_v20  ;;  %v18463_v56 = vld [vmem:[#allocation38_spill] sm:$0xff]  ;;  %vm18466_vm3 = vmmov %vm18460_vm11  ;;  %vm18472_vm15 = vcmask 228352   ;;  %v18473_v53 = vld [vmem:[#allocation36_spill] sm:$0xff]  ;;  %s8042_s9 = sshll.u32 %s16630_s7, 4  ;;  %s16697_s9 = int_to_ptr.vmem [resolvable:$true] %s8042_s9 }
 0x4a0   : > { %v6096_v33 = vpop.permute.xlu1 %6095  ;;  %v6605_v41 = vsel %vm6597_vm8, %v6572_v58, %v18453_v8  ;;  %v6262_v25 = vsel %vm6234_vm13, %v6227_v7, %v18464_v30  ;;  %v18467_v52 = vld [vmem:[#allocation102_spill] sm:$0xff]  ;;  %v6203_v17 = vsel %vm6185_vm12, %v8497_v5, %v18468_v22  ;;  %v18484_v36 = vld [vmem:[#allocation29_spill] sm:$0xff]  ;;  %v18491_v31 = vld [vmem:[#allocation136_spill] sm:$0xff]  ;;  %s9381_s19 = scalar_lea.vmem %s16697_s9, 4096  ;;  %p9388_p1 = scmp.lt.s32.totalorder %s16697_s9, %s9386_s23 }
 0x4a1   : > { %v6654_v26 = vsel %vm6630_vm5, %v6621_v15, %v6096_v33  ;;  %v6638_v6 = vsel %vm6630_vm5, %v6605_v41, %v6080_v19  ;;  %v8504_v19 = vcombine.low %v9373_v29, %v9374_v16  ;;  %v18471_v15 = vld [vmem:[#allocation137_spill] sm:$0xff]  ;;  %v6246_v58 = vsel %vm6234_vm13, %v6203_v17, %v18473_v53  ;;  %v18476_v8 = vld [vmem:[#allocation54_spill] sm:$0xff]  ;;  %v18483_v16 = vld [vmem:[#allocation87_spill] sm:$0xff]  ;;  %p9382_p12 = scmp.ne.s32.totalorder %s16697_s9, %s9381_s19  ;;  %p9389_p2 = scmp.lt.s32.totalorder %s9387_s27, %s9381_s19 }
 0x4a2   : > { %v18486_v1 = vld [vmem:[#allocation101_spill] sm:$0xff]  ;;  %v18487_v27 = vld [vmem:[#allocation150_spill] sm:$0xff]  ;;  %v18498_v7 = vld [vmem:[#allocation32_spill] sm:$0xff] }
 0x4a3   : > { %v6158_v48 = vpop.permute.xlu0 %6157  ;;  %v6224_v21 = vsel %vm6185_vm12, %v8504_v19, %v18454_v45  ;;  %vm18478_vm12 = vcmask 261120   ;;  %v18493_v47 = vld [vmem:[#allocation110_spill] sm:$0xff]  ;;  %v18505_v17 = vld [vmem:[#allocation148_spill] sm:$0xff]  ;;  %p9383_p13 = pnand %p9382_p12, %p9539_p4  ;;  %p9390_p3 = por %p9389_p2, %p9388_p1 }
 0x4a4   : > { %v6174_v54 = vpop.permute.xlu1 %6173  ;;  %v6669_v10 = vsel %vm6663_vm9, %v6636_v38, %v6158_v48  ;;  %v6260_v3 = vsel %vm6234_vm13, %v6224_v21, %v18455_v37  ;;  %v18469_v38 = vld [vmem:[#allocation77_spill] sm:$0xff]  ;;  %v18489_v21 = vld [vmem:[#allocation126_spill] sm:$0xff] }
 0x4a5   : > { %v6685_v35 = vsel %vm6663_vm9, %v6652_v24, %v6174_v54  ;;  %v6293_v9 = vsel %vm6267_vm14, %v6260_v3, %v18457_v34  ;;  %v18462_v24 = vld [vmem:[#allocation66_spill] sm:$0xff]  ;;  %v18490_v3 = vld [vmem:[#allocation95_spill] sm:$0xff]  ;;  %v18494_v34 = vld [vmem:[#allocation24_spill] sm:$0xff]  ;;  %p9384_p0 = pneg %p9383_p13 }
 0x4a6   : > { %v6326_v39 = vsel %vm18460_vm11, %v6293_v9, %v18459_v12  ;;  %v6277_v51 = vsel %vm6267_vm14, %v6244_v2, %v18462_v24  ;;  %vm18475_vm11 = vmmov %vm18466_vm3  ;;  %v18496_v2 = vld [vmem:[#allocation76_spill] sm:$0xff]  ;;  %v18509_v53 = vld [vmem:[#allocation138_spill] sm:$0xff] }
 0x4a7   : > { %v6359_v32 = vsel %vm6333_vm0, %v6326_v39, %v18463_v56  ;;  %vm18485_vm13 = vmmov %vm18475_vm11  ;;  %v18497_v39 = vld [vmem:[#allocation23_spill] sm:$0xff]  ;;  %p9391_p5 = pnand %p9390_p3, %p9384_p0 }
 0x4a8   : > { %v6176_v57 = vpop.permute.xlu1 %6175  ;;  %v6160_v63 = vpop.permute.xlu0 %6159  ;;  %v6392_v40 = vsel %vm6366_vm1, %v6359_v32, %v18467_v52  ;;  %v18500_v32 = vld [vmem:[#allocation116_spill] sm:$0xff] }
 0x4a9   : > { %v6687_v18 = vsel %vm6663_vm9, %v6654_v26, %v6176_v57  ;;  %v6671_v33 = vsel %vm6663_vm9, %v6638_v6, %v6160_v63  ;;  %v18474_v26 = vld [vmem:[#allocation92_spill] sm:$0xff]  ;;  %v18479_v6 = vld [vmem:[#allocation65_spill] sm:$0xff] }
 0x4ac   : > { %v7693_v49 = vpop.permute.xlu1 %7692  ;;  %v7677_v54 = vpop.permute.xlu0 %7676 }
 0x4ad   : > { %v7726_v59 = vsel %vm7704_vm2, %v6685_v35, %v7693_v49  ;;  %v7710_v23 = vsel %vm7704_vm2, %v6669_v10, %v7677_v54  ;;  %v18465_v35 = vld [vmem:[#allocation30_spill] sm:$0xff]  ;;  %v6425_v10 = vsel %vm18472_vm15, %v6392_v40, %v18471_v15 }
 0x4ae   : > { %8979 = vmatprep.mubr.msk.bf16.mxu1 %vm7796_vm4, %v7726_v59  ;;  %8963 = vmatprep.mubr.msk.bf16.mxu0 %vm7796_vm4, %v7710_v23  ;;  %v6310_v49 = vsel %vm18466_vm3, %v6277_v51, %v18465_v35  ;;  %v6295_v59 = vsel %vm6267_vm14, %v6262_v25, %v18469_v38  ;;  %vm18482_vm3 = vmmov %vm18472_vm15  ;;  %v18499_v51 = vld [vmem:[#allocation184_spill] sm:$0xff]  ;;  %v18502_v25 = vld [vmem:[#allocation86_spill] sm:$0xff] }
 0x4af   : > { %v6343_v4 = vsel %vm6333_vm0, %v6310_v49, %v18470_v44  ;;  %v6328_v23 = vsel %vm18475_vm11, %v6295_v59, %v18474_v26  ;;  %vm18488_vm15 = vmmov %vm18478_vm12  ;;  %vm18495_vm11 = vcmask 359424   ;;  %v18503_v49 = vld [vmem:[#allocation162_spill] sm:$0xff]  ;;  %v18507_v59 = vld [vmem:[#allocation159_spill] sm:$0xff] }
 0x4b0   : > { %v7695_v48 = vpop.permute.xlu1 %7694  ;;  %v6376_v41 = vsel %vm6366_vm1, %v6343_v4, %v18476_v8  ;;  %v18508_v4 = vld [vmem:[#allocation166_spill] sm:$0xff]  ;;  %v18510_v26 = vld [vmem:[#allocation140_spill] sm:$0xff] }
 0x4b1   : > { %v7728_v42 = vsel %vm7704_vm2, %v6687_v18, %v7695_v48  ;;  %v7679_v55 = vpop.permute.xlu0 %7678  ;;  %v18477_v18 = vld [vmem:[#allocation21_spill] sm:$0xff]  ;;  %v18512_v8 = vld [vmem:[#allocation192_spill] sm:$0xff] }
 0x4b2   : > { %8980 = vmatmul.mubr.msk.bf16.gmra.mrb[4].mxu1 %vm7796_vm4, %v7728_v42  ;;  %v7712_v60 = vsel %vm7704_vm2, %v6671_v33, %v7679_v55  ;;  %v6458_v48 = vsel %vm18478_vm12, %v6425_v10, %v18477_v18  ;;  %v6279_v42 = vsel %vm6267_vm14, %v6246_v58, %v18479_v6  ;;  %v18480_v33 = vld [vmem:[#allocation69_spill] sm:$0xff]  ;;  %vm18492_vm14 = vmmov %vm18482_vm3 }
 0x4b3   : > { %8964 = vmatmul.mubr.msk.bf16.gmra.mrb[4].mxu0 %vm7796_vm4, %v7712_v60  ;;  %v6361_v55 = vsel %vm6333_vm0, %v6328_v23, %v18480_v33  ;;  %v18481_v60 = vld [vmem:[#allocation123_spill] sm:$0xff]  ;;  %v6491_v19 = vsel %vm6465_vm6, %v6458_v48, %v18483_v16  ;;  %v6312_v14 = vsel %vm18485_vm13, %v6279_v42, %v18484_v36  ;;  %v18513_v48 = vld [vmem:[#allocation14_spill] sm:$0xff]  ;;  %v18517_v36 = vld [vmem:[#allocation165_spill] sm:$0xff] }
 0x4b4   : > { %v16464_v0 = vpop.permute.xlu1 %6019  ;;  %v6409_v29 = vsel %vm18482_vm3, %v6376_v41, %v18481_v60  ;;  %v6394_v11 = vsel %vm6366_vm1, %v6361_v55, %v18486_v1  ;;  %v6524_v37 = vsel %vm6498_vm7, %v6491_v19, %v18489_v21  ;;  %v6345_v43 = vsel %vm6333_vm0, %v6312_v14, %v18490_v3  ;;  %vm18501_vm0 = vmmov %vm18482_vm3  ;;  %v18514_v42 = vld [vmem:[#allocation183_spill] sm:$0xff]  ;;  %v18515_v60 = vld [vmem:[#allocation161_spill] sm:$0xff] }
 0x4b5   : > { %v6442_v45 = vsel %vm18488_vm15, %v6409_v29, %v18487_v27  ;;  %v6427_v5 = vsel %vm18492_vm14, %v6394_v11, %v18491_v31  ;;  %v6557_v9 = vsel %vm18495_vm11, %v6524_v37, %v18494_v34  ;;  %v6378_v12 = vsel %vm6366_vm1, %v6345_v43, %v18496_v2  ;;  %vm18504_vm3 = vmmov %vm18495_vm11  ;;  %v18518_v11 = vld [vmem:[#allocation191_spill] sm:$0xff] }
 0x4b6   : > { %v6018_v61 = vpop.permute.xlu0 %6017  ;;  %v6475_v62 = vsel %vm6465_vm6, %v6442_v45, %v18493_v47  ;;  %v6460_v20 = vsel %vm18478_vm12, %v6427_v5, %v18497_v39  ;;  %v6590_v56 = vsel %vm6564_vm10, %v6557_v9, %v18499_v51  ;;  %v6411_v30 = vsel %vm18501_vm0, %v6378_v12, %v18500_v32  ;;  %vm18506_vm1 = vmmov %vm18478_vm12  ;;  %v18519_v2 = vld [vmem:[#allocation195_spill] sm:$0xff] }
 0x4b7   : > { %v6508_v24 = vsel %vm6498_vm7, %v6475_v62, %v18498_v7  ;;  %v6493_v35 = vsel %vm6465_vm6, %v6460_v20, %v18502_v25  ;;  %v6623_v40 = vsel %vm6597_vm8, %v6590_v56, %v6018_v61  ;;  %v6444_v38 = vsel %vm18506_vm1, %v6411_v30, %v18505_v17  ;;  %vm18511_vm13 = vmmov %vm18504_vm3  ;;  %v18520_v7 = vld [vmem:[#allocation196_spill] sm:$0xff]  ;;  %v18523_v17 = vld [vmem:[#allocation193_spill] sm:$0xff] }
 0x4b8   : > { %v6541_v52 = vsel %vm18504_vm3, %v6508_v24, %v18503_v49  ;;  %v6526_v44 = vsel %vm6498_vm7, %v6493_v35, %v18507_v59  ;;  %v6477_v58 = vsel %vm6465_vm6, %v6444_v38, %v18509_v53  ;;  %vm18516_vm6 = vmmov %vm18504_vm3  ;;  %v18521_v24 = vld [vmem:[#allocation189_spill] sm:$0xff]  ;;  %v18524_v38 = vld [vmem:[#allocation188_spill] sm:$0xff] }
 0x4b9   : > { %v6098_v57 = vpop.permute.xlu1 %6097  ;;  %v6574_v15 = vsel %vm6564_vm10, %v6541_v52, %v18508_v4  ;;  %v6559_v23 = vsel %vm18511_vm13, %v6526_v44, %v18510_v26  ;;  %v6510_v6 = vsel %vm6498_vm7, %v6477_v58, %v18513_v48  ;;  %v6611_v51 = vsel %vm6597_vm8, %v18521_v24, %v18520_v7  ;;  %v18522_v52 = vld [vmem:[#allocation194_spill] sm:$0xff] }
 0x4ba   : > { %v6656_v10 = vsel %vm6630_vm5, %v6623_v40, %v6098_v57  ;;  %v6607_v61 = vsel %vm6597_vm8, %v6574_v15, %v18512_v8  ;;  %v6592_v33 = vsel %vm6564_vm10, %v6559_v23, %v18514_v42  ;;  %v6543_v29 = vsel %vm18516_vm6, %v6510_v6, %v18515_v60  ;;  %v16625_v8 = vld [vmem:[%s16753_s2] ss:$0 sm:$0xff] }
 0x4bb   : > { %v6082_v46 = vpop.permute.xlu0 %6081  ;;  %v6625_v16 = vsel %vm6597_vm8, %v6592_v33, %v16464_v0  ;;  %v6576_v14 = vsel %vm6564_vm10, %v6543_v29, %v18517_v36  ;;  %v6613_v59 = vsel %vm6597_vm8, %v18524_v38, %v18523_v17 }
 0x4bc   : > { %v6640_v57 = vsel %vm6630_vm5, %v6607_v61, %v6082_v46  ;;  %v6609_v27 = vsel %vm6597_vm8, %v6576_v14, %v18518_v11 }
 0x4bd   : > { %v6100_v63 = vpop.permute.xlu1 %6099 }
 0x4be   : > { %v6658_v1 = vsel %vm6630_vm5, %v6625_v16, %v6100_v63 }
 0x4bf   : > { %v6084_v50 = vpop.permute.xlu0 %6083 }
 0x4c1   : > { %v6178_v54 = vpop.permute.xlu1 %6177 }
 0x4c2   : > { %v6689_v41 = vsel %vm6663_vm9, %v6656_v10, %v6178_v54 }
 0x4c3   : > { %v6162_v28 = vpop.permute.xlu0 %6161 }
 0x4c4   : > { %v6673_v19 = vsel %vm6663_vm9, %v6640_v57, %v6162_v28  ;;  %v6642_v28 = vsel %vm6630_vm5, %v6609_v27, %v6084_v50 }
 0x4c5   : > { %v6180_v13 = vpop.permute.xlu1 %6179 }
 0x4c6   : > { %v6691_v45 = vsel %vm6663_vm9, %v6658_v1, %v6180_v13 }
 0x4c9   : > { %v6164_v22 = vpop.permute.xlu0 %6163  ;;  %v7697_v18 = vpop.permute.xlu1 %7696 }
 0x4ca   : > { %v7730_v55 = vsel %vm7704_vm2, %v6689_v41, %v7697_v18  ;;  %v6675_v37 = vsel %vm6663_vm9, %v6642_v28, %v6164_v22 }
 0x4cb   : > { %8983 = vmatprep.mubr.msk.bf16.mxu1 %vm7796_vm4, %v7730_v55 }
 0x4cd   : > { %v7681_v54 = vpop.permute.xlu0 %7680  ;;  %v7699_v0 = vpop.permute.xlu1 %7698 }
 0x4ce   : > { %v7714_v46 = vsel %vm7704_vm2, %v6673_v19, %v7681_v54  ;;  %v7732_v21 = vsel %vm7704_vm2, %v6691_v45, %v7699_v0 }
 0x4cf   : > { %8967 = vmatprep.mubr.msk.bf16.mxu0 %vm7796_vm4, %v7714_v46  ;;  %8984 = vmatmul.mubr.msk.bf16.gmra.mrb[8].mxu1 %vm7796_vm4, %v7732_v21 }
 0x4d2   : > { %v7683_v3 = vpop.permute.xlu0 %7682 }
 0x4d3   : > { %v7716_v63 = vsel %vm7704_vm2, %v6675_v37, %v7683_v3 }
 0x4d4   : > { %8968 = vmatmul.mubr.msk.bf16.gmra.mrb[8].mxu0 %vm7796_vm4, %v7716_v63 }
 0x4d5   : > { %v6024_v43 = vpop.permute.xlu1 %6023 }
 0x4d6   : > { %v6629_v40 = vsel %vm6597_vm8, %v18522_v52, %v6024_v43 }
 0x4d8   : > { %v6022_v31 = vpop.permute.xlu0 %6021 }
 0x4d9   : > { %v6627_v12 = vsel %vm6597_vm8, %v18519_v2, %v6022_v31 }
 0x4db   : > { %v6102_v5 = vpop.permute.xlu1 %6101 }
 0x4dc   : > { %v6660_v20 = vsel %vm6630_vm5, %v6627_v12, %v6102_v5 }
 0x4dd   : > { %v6086_v47 = vpop.permute.xlu0 %6085 }
 0x4de   : > { %v6644_v30 = vsel %vm6630_vm5, %v6611_v51, %v6086_v47 }
 0x4df   : > { %v6104_v62 = vpop.permute.xlu1 %6103 }
 0x4e0   : > { %v6662_v44 = vsel %vm6630_vm5, %v6629_v40, %v6104_v62 }
 0x4e1   : > { %v6088_v34 = vpop.permute.xlu0 %6087 }
 0x4e2   : > { %v6646_v4 = vsel %vm6630_vm5, %v6613_v59, %v6088_v34 }
 0x4e3   : > { %v6182_v9 = vpop.permute.xlu1 %6181 }
 0x4e4   : > { %v6693_v56 = vsel %vm6663_vm9, %v6660_v20, %v6182_v9 }
 0x4e5   : > { %v6166_v13 = vpop.permute.xlu0 %6165 }
 0x4e6   : > { %v6677_v35 = vsel %vm6663_vm9, %v6644_v30, %v6166_v13 }
 0x4e7   : > { %v6184_v50 = vpop.permute.xlu1 %6183 }
 0x4e8   : > { %v6695_v15 = vsel %vm6663_vm9, %v6662_v44, %v6184_v50 }
 0x4e9   : > { %v6168_v39 = vpop.permute.xlu0 %6167 }
 0x4ea   : > { %v6679_v53 = vsel %vm6663_vm9, %v6646_v4, %v6168_v39 }
 0x4eb   : > { %v7701_v32 = vpop.permute.xlu1 %7700 }
 0x4ec   : > { %v7734_v25 = vsel %vm7704_vm2, %v6693_v56, %v7701_v32 }
 0x4ed   : > { %v7685_v49 = vpop.permute.xlu0 %7684  ;;  %8987 = vmatprep.mubr.msk.bf16.mxu1 %vm7796_vm4, %v7734_v25 }
 0x4ee   : > { %v7718_v22 = vsel %vm7704_vm2, %v6677_v35, %v7685_v49 }
 0x4ef   : > { %8971 = vmatprep.mubr.msk.bf16.mxu0 %vm7796_vm4, %v7718_v22  ;;  %v7703_v10 = vpop.permute.xlu1 %7702 }
 0x4f0   : > { %v7736_v58 = vsel %vm7704_vm2, %v6695_v15, %v7703_v10 }
 0x4f1   : > { %v7687_v26 = vpop.permute.xlu0 %7686  ;;  %8988 = vmatmul.mubr.msk.bf16.gmra.mrb[12].mxu1 %vm7796_vm4, %v7736_v58 }
 0x4f2   : > { %v7720_v23 = vsel %vm7704_vm2, %v6679_v53, %v7687_v26 }
 0x4f3   : > { %8972 = vmatmul.mubr.msk.bf16.gmra.mrb[12].mxu0 %vm7796_vm4, %v7720_v23 }
 0x566   : > { %v8961_v48 = vpop.f32.mrb[0].mxu0 }
 0x567   : > { %v7876_v33 = vadd.f32 %v8961_v48, %v16625_v8  ;;  %v7867_v57 = vpop.f32.mrb[1].mxu0 }
 0x568   : > { %v7868_v29 = vadd.f32 %v16625_v8, %v7867_v57  ;;  %v8962_v16 = vpop.f32.mrb[2].mxu0 }
 0x569   : > { %v8977_v61 = vpop.f32.mrb[0].mxu1  ;;  %7996 = vst [vmem:[%s16630_s7 + $0x10] sm:$0xff] %v7876_v33  ;;  %v7879_v54 = vadd.f32 %v8962_v16, %v16625_v8  ;;  %v7870_v36 = vpop.f32.mrb[3].mxu0 }
 0x56a   : > { %v7940_v41 = vadd.f32 %v8977_v61, %v16625_v8  ;;  %v7931_v18 = vpop.f32.mrb[1].mxu1  ;;  %7994 = vst [vmem:[%s16630_s7] sm:$0xff] %v7868_v29  ;;  %v7871_v14 = vadd.f32 %v16625_v8, %v7870_v36 }
 0x56b   : > { %v7932_v6 = vadd.f32 %v16625_v8, %v7931_v18  ;;  %v8978_v42 = vpop.f32.mrb[2].mxu1  ;;  %7997 = vst [vmem:[%s16630_s7 + $0x18] sm:$0xff] %v7879_v54 }
 0x56c   : > { %8012 = vst [vmem:[%s16630_s7 + $0x90] sm:$0xff] %v7940_v41  ;;  %v7943_v55 = vadd.f32 %v8978_v42, %v16625_v8  ;;  %v7934_v60 = vpop.f32.mrb[3].mxu1  ;;  %7995 = vst [vmem:[%s16630_s7 + $0x8] sm:$0xff] %v7871_v14 }
 0x56d   : > { %8010 = vst [vmem:[%s16630_s7 + $0x80] sm:$0xff] %v7932_v6  ;;  %v7935_v19 = vadd.f32 %v16625_v8, %v7934_v60 }
 0x56e   : > { %8013 = vst [vmem:[%s16630_s7 + $0x98] sm:$0xff] %v7943_v55 }
 0x56f   : > { %8011 = vst [vmem:[%s16630_s7 + $0x88] sm:$0xff] %v7935_v19 }
 0x585   : > { %v8981_v1 = vpop.f32.mrb[4].mxu1 }
 0x586   : > { %v7956_v46 = vadd.f32 %v8981_v1, %v16625_v8  ;;  %v7947_v11 = vpop.f32.mrb[5].mxu1  ;;  %v8965_v27 = vpop.f32.mrb[4].mxu0 }
 0x587   : > { %v7948_v45 = vadd.f32 %v16625_v8, %v7947_v11  ;;  %v8982_v0 = vpop.f32.mrb[6].mxu1  ;;  %v7892_v28 = vadd.f32 %v8965_v27, %v16625_v8  ;;  %v7883_v21 = vpop.f32.mrb[5].mxu0 }
 0x588   : > { %8016 = vst [vmem:[%s16630_s7 + $0xb0] sm:$0xff] %v7956_v46  ;;  %v7959_v37 = vadd.f32 %v8982_v0, %v16625_v8  ;;  %v7950_v3 = vpop.f32.mrb[7].mxu1  ;;  %v7884_v63 = vadd.f32 %v16625_v8, %v7883_v21  ;;  %v8966_v43 = vpop.f32.mrb[6].mxu0 }
 0x589   : > { %8014 = vst [vmem:[%s16630_s7 + $0xa0] sm:$0xff] %v7948_v45  ;;  %v7951_v31 = vadd.f32 %v16625_v8, %v7950_v3  ;;  %8000 = vst [vmem:[%s16630_s7 + $0x30] sm:$0xff] %v7892_v28  ;;  %v7895_v5 = vadd.f32 %v8966_v43, %v16625_v8  ;;  %v7886_v47 = vpop.f32.mrb[7].mxu0 }
 0x58a   : > { %8017 = vst [vmem:[%s16630_s7 + $0xb8] sm:$0xff] %v7959_v37  ;;  %7998 = vst [vmem:[%s16630_s7 + $0x20] sm:$0xff] %v7884_v63  ;;  %v7887_v62 = vadd.f32 %v16625_v8, %v7886_v47 }
 0x58b   : > { %8015 = vst [vmem:[%s16630_s7 + $0xa8] sm:$0xff] %v7951_v31  ;;  %8001 = vst [vmem:[%s16630_s7 + $0x38] sm:$0xff] %v7895_v5 }
 0x58c   : > { %7999 = vst [vmem:[%s16630_s7 + $0x28] sm:$0xff] %v7887_v62 }
 0x5a2   : > { %v8985_v34 = vpop.f32.mrb[8].mxu1 }
 0x5a3   : > { %v7972_v9 = vadd.f32 %v8985_v34, %v16625_v8  ;;  %v7963_v13 = vpop.f32.mrb[9].mxu1 }
 0x5a4   : > { %v7964_v2 = vadd.f32 %v16625_v8, %v7963_v13  ;;  %v8986_v12 = vpop.f32.mrb[10].mxu1 }
 0x5a5   : > { %8020 = vst [vmem:[%s16630_s7 + $0xd0] sm:$0xff] %v7972_v9  ;;  %v7975_v7 = vadd.f32 %v8986_v12, %v16625_v8  ;;  %v7966_v24 = vpop.f32.mrb[11].mxu1 }
 0x5a6   : > { %8018 = vst [vmem:[%s16630_s7 + $0xc0] sm:$0xff] %v7964_v2  ;;  %v7967_v32 = vadd.f32 %v16625_v8, %v7966_v24 }
 0x5a7   : > { %v8969_v50 = vpop.f32.mrb[8].mxu0  ;;  %8021 = vst [vmem:[%s16630_s7 + $0xd8] sm:$0xff] %v7975_v7 }
 0x5a8   : > { %v7908_v39 = vadd.f32 %v8969_v50, %v16625_v8  ;;  %v7899_v20 = vpop.f32.mrb[9].mxu0  ;;  %8019 = vst [vmem:[%s16630_s7 + $0xc8] sm:$0xff] %v7967_v32 }
 0x5a9   : > { %v7900_v51 = vadd.f32 %v16625_v8, %v7899_v20  ;;  %v8970_v56 = vpop.f32.mrb[10].mxu0 }
 0x5aa   : > { %8004 = vst [vmem:[%s16630_s7 + $0x50] sm:$0xff] %v7908_v39  ;;  %v7911_v30 = vadd.f32 %v8970_v56, %v16625_v8  ;;  %v7902_v25 = vpop.f32.mrb[11].mxu0 }
 0x5ab   : > { %8002 = vst [vmem:[%s16630_s7 + $0x40] sm:$0xff] %v7900_v51  ;;  %v7903_v35 = vadd.f32 %v16625_v8, %v7902_v25 }
 0x5ac   : > { %8005 = vst [vmem:[%s16630_s7 + $0x58] sm:$0xff] %v7911_v30 }
 0x5ad   : > { %8003 = vst [vmem:[%s16630_s7 + $0x48] sm:$0xff] %v7903_v35 }
 0x5c4   : > { %v8989_v49 = vpop.f32.mrb[12].mxu1 }
 0x5c5   : > { %v7988_v40 = vadd.f32 %v8989_v49, %v16625_v8  ;;  %v7979_v22 = vpop.f32.mrb[13].mxu1 }
 0x5c6   : > { %v8973_v52 = vpop.f32.mrb[12].mxu0  ;;  %v7980_v59 = vadd.f32 %v16625_v8, %v7979_v22  ;;  %v8990_v44 = vpop.f32.mrb[14].mxu1 }
 0x5c7   : > { %v7924_v17 = vadd.f32 %v8973_v52, %v16625_v8  ;;  %v7915_v38 = vpop.f32.mrb[13].mxu0  ;;  %8024 = vst [vmem:[%s16630_s7 + $0xf0] sm:$0xff] %v7988_v40  ;;  %v7991_v10 = vadd.f32 %v8990_v44, %v16625_v8  ;;  %v7982_v53 = vpop.f32.mrb[15].mxu1 }
 0x5c8   : > { %v7916_v4 = vadd.f32 %v16625_v8, %v7915_v38  ;;  %v8974_v15 = vpop.f32.mrb[14].mxu0  ;;  %8022 = vst [vmem:[%s16630_s7 + $0xe0] sm:$0xff] %v7980_v59  ;;  %v7983_v23 = vadd.f32 %v16625_v8, %v7982_v53 }
 0x5c9   : > { %8008 = vst [vmem:[%s16630_s7 + $0x70] sm:$0xff] %v7924_v17  ;;  %v7927_v58 = vadd.f32 %v8974_v15, %v16625_v8  ;;  %v7918_v26 = vpop.f32.mrb[15].mxu0  ;;  %8025 = vst [vmem:[%s16630_s7 + $0xf8] sm:$0xff] %v7991_v10 }
 0x5ca   : > { %8006 = vst [vmem:[%s16630_s7 + $0x60] sm:$0xff] %v7916_v4  ;;  %v7919_v61 = vadd.f32 %v16625_v8, %v7918_v26  ;;  %8023 = vst [vmem:[%s16630_s7 + $0xe8] sm:$0xff] %v7983_v23 }
 0x5cb   : > { %8009 = vst [vmem:[%s16630_s7 + $0x78] sm:$0xff] %v7927_v58 }
 0x5cc   : > { %8007 = vst [vmem:[%s16630_s7 + $0x68] sm:$0xff] %v7919_v61 }
 0x5cd   : > { %9394 = shalt.err (!%p9391_p5)
}
 0x5ce   : > { %s9395_s28 = scalar_lea.hbm %s16692_s11, 4096  ;;  %s9399_s26 = scalar_lea.hbm %s16754_s3, 8192 }
 0x5cf   : > { %p9396_p6 = scmp.ne.s32.totalorder %s16692_s11, %s9395_s28  ;;  %p9400_p10 = scmp.lt.u32.totalorder %s16692_s11, %s16754_s3 }
 0x5d0   : > { %p9401_p11 = scmp.lt.u32.totalorder %s9399_s26, %s9395_s28  ;;  %p9403_p13 = scmp.lt.u32.totalorder %s9395_s28, %s16692_s11 }
 0x5d1   : > { %p9397_p7 = pnand %p9396_p6, %p9539_p4 }
 0x5d2   : > { %p9402_p12 = por %p9401_p11, %p9400_p10 }
 0x5d3   : > { %p9398_p9 = pneg %p9397_p7 }
 0x5d4   : > { %p9404_p0 = por %p9403_p13, %p9402_p12 }
 0x5d6   : > { %p9405_p1 = pnand %p9404_p0, %p9398_p9 }
 0x5d8   : > { %9408 = shalt.err (!%p9405_p1)
}
 0x5d9   : > { %s9478_s7 = smov 128  }
 0x5da   : > { %9008 = dma.vmem_to_hbm [thread:$0]  (%p9539_p4), %s16697_s9, 4096, %s16692_s11, %s16704_s18, %s9478_s7, %s9478_s7, %s9462_s5  }
 0x5db PF: > { %p9014_p2 = scmp.ge.s32.totalorder %s9459_s17, 2  ;;  %s8057_s8 = sand.u32 1, %s9439_s12  }
 0x5dc   : > { %s8058_s15 = scalar_lea.sflag [#allocation3], %s8057_s8 }
 0x5dd   : > { %p9011_p3 = pnand %p9014_p2, %p9546_p8 }
 0x5df   : > { %9434 = dma.done.wait (!%p9011_p3), %s8058_s15, 4096  }
 0x5e0   : > { %9436 = vsyncadd (!%p9011_p3), %s8058_s15, 4294963200  ;;  %s16_s17 = sadd.s32 1, %s9459_s17   ;;  %s18525_s12 = smov %s9443_s13 }
 0x5e1   : > { %p13_p5 = scmp.ge.s32.totalorder %s16_s17, 4   ;;  %s18526_s13 = smov %s9447_s14 }
 0x5e2   : > { %s18527_s14 = smov %s9552_s25  ;;  %s18528_s15 = smov %s9455_s16 }
 0x5e3   : > { %s18529_s16 = smov %s18531_s20  ;;  %15 = sbr.rel (!%p13_p5) target bundleno = 4 (0x4), region = 72 }
 0x5ea   :  { %8063 = vsyncpa [#allocation3], 1 }
 0x5eb   :  { %8065 = vsyncpa [#allocation3 + $0x1], 1 }

</bundles_post_ra>
